<compile_context>
chip_gen: v6e
topology: v6e:2x2x1
jax: 0.10.0
libtpu: 0.0.40
codegen_flags: <defaults>
</compile_context>

<pallas_src>
import functools

import jax
import jax.numpy as jnp
from jax.experimental import pallas as pl
from jax.experimental.pallas import tpu as pltpu


# ----------------------------------------------------------------------------
# Mask helpers.
# ----------------------------------------------------------------------------
def _mask_taps(k, mask_type):
    c = k // 2
    taps = []
    for i in range(k):
        for j in range(k):
            keep = (i < c) or (i == c and (j < c if mask_type == "A" else j <= c))
            if keep:
                taps.append((i, j))
    return taps


# ----------------------------------------------------------------------------
# Fused PixelCNN kernel (one grid step = one batch tile of Nb images).
# ----------------------------------------------------------------------------
def _pixelcnn_kernel(patchA_ref, wA_ref, abA_ref,
                     w1s_ref, ab1s_ref, w2s_ref, ab2s_ref, w3s_ref, ab3s_ref,
                     wh1_ref, abh1_ref, wh2_ref, bh2_ref,
                     o_ref,
                     pad_ref, hmid_ref,
                     *, W, HW, offs_b, k_chunk):
    M = o_ref.shape[0]                      # Nb * HW rows
    Ch = w1s_ref.shape[-1]                  # hidden channels of the mask-B blocks
    L = w1s_ref.shape[0]                    # number of residual blocks
    S = pad_ref.shape[0] - M                # sublane-aligned top halo rows

    # ---- masked-A 7x7 conv (im2col precomputed in the wrapper) + folded BN + ReLU ----
    x = jnp.dot(patchA_ref[...], wA_ref[...], preferred_element_type=jnp.float32)
    x = jnp.maximum(x * abA_ref[0:1, :] + abA_ref[1:2, :], 0.0)       # (M, C) f32

    # ---- per-tap validity masks for the 3x3 mask-B conv (shared by all blocks) ----
    # A tap (di, dj) at pixel (r, c) reads (r+di, c+dj); invalid (zero-padded) positions
    # are r+di < 0 or c+dj outside [0, W).  In the flat stacked layout r+di < 0 would
    # read the previous image's rows, so it is masked explicitly.
    row = jax.lax.broadcasted_iota(jnp.int32, (M, 1), 0)
    f_img = row % HW                       # flat index within the image
    col = row % W                          # column within the image
    tap_masks = []
    for (di, dj) in offs_b:
        if di == 0 and dj == 0:
            tap_masks.append(None)
        else:
            m = (f_img >= (-di) * W) & (col + dj >= 0) & (col + dj < W)
            tap_masks.append(m)

    # Zero the halo rows unconditionally (scratch is per-core; never gate on program_id).
    pad_ref[0:S, :] = jnp.zeros((S, Ch), jnp.float32)

    # ---- residual ConvMaskB blocks:
    #      1x1 -> BN -> ReLU -> masked 3x3 -> BN -> ReLU -> 1x1 -> BN -> ReLU -> +x ----
    for l in range(L):
        ab1 = ab1s_ref[l]
        ab2 = ab2s_ref[l]
        ab3 = ab3s_ref[l]
        w2l = w2s_ref[l]                                             # (T, Ch, Ch) bf16

        h = jnp.dot(x.astype(jnp.bfloat16), w1s_ref[l],
                    preferred_element_type=jnp.float32)
        h = jnp.maximum(h * ab1[0:1, :] + ab1[1:2, :], 0.0)          # (M, Ch)

        # Masked 3x3 conv = sum over causal taps of (row-shifted h) @ W_tap.
        pad_ref[S:S + M, :] = h                                      # aligned store
        acc2 = None
        for t, (di, dj) in enumerate(offs_b):
            if di == 0 and dj == 0:
                piece = h                                            # center tap
            else:
                s = di * W + dj                                      # non-positive shift
                piece = pad_ref[S + s:S + s + M, :]                  # halo reads -> 0
                piece = jnp.where(tap_masks[t], piece, 0.0)
            contrib = jnp.dot(piece.astype(jnp.bfloat16), w2l[t],
                              preferred_element_type=jnp.float32)
            acc2 = contrib if acc2 is None else acc2 + contrib
        h = jnp.maximum(acc2 * ab2[0:1, :] + ab2[1:2, :], 0.0)       # (M, Ch)

        h = jnp.dot(h.astype(jnp.bfloat16), w3s_ref[l],
                    preferred_element_type=jnp.float32)
        h = jnp.maximum(h * ab3[0:1, :] + ab3[1:2, :], 0.0)          # (M, C)
        x = x + h                                                    # residual, f32

    # ---- output head: ReLU -> 1x1(Cmid) -> BN -> ReLU -> 1x1(Cout) ----
    xb = jnp.maximum(x, 0.0).astype(jnp.bfloat16)
    Cmid = wh1_ref.shape[1]
    Cout = o_ref.shape[-1]

    # Pass 1: produce the Cmid-wide intermediate in k_chunk slices into VMEM (bf16).
    for k0 in range(0, Cmid, k_chunk):
        hk = jnp.dot(xb, wh1_ref[:, k0:k0 + k_chunk],
                     preferred_element_type=jnp.float32)
        hk = jnp.maximum(hk * abh1_ref[0:1, k0:k0 + k_chunk]
                         + abh1_ref[1:2, k0:k0 + k_chunk], 0.0)
        hmid_ref[:, k0:k0 + k_chunk] = hk.astype(jnp.bfloat16)       # 128-lane aligned

    # Pass 2: 128-wide output chunks, accumulating over the Cmid slices.
    for j0 in range(0, Cout, k_chunk):
        jw = min(k_chunk, Cout - j0)
        acc = jnp.zeros((M, jw), jnp.float32)
        for k0 in range(0, Cmid, k_chunk):
            acc = acc + jnp.dot(hmid_ref[:, k0:k0 + k_chunk],
                                wh2_ref[k0:k0 + k_chunk, j0:j0 + jw],
                                preferred_element_type=jnp.float32)
        o_ref[:, j0:j0 + jw] = (acc + bh2_ref[0:1, j0:j0 + jw]).astype(o_ref.dtype)


# ----------------------------------------------------------------------------
# Wrapper.
# ----------------------------------------------------------------------------
def _build_patch_a(x_nhwc, offs_a, pad):
    """Wrapper-side im2col for the masked-A 7x7 conv: (N,H,W,Cin) -> (N*HW, T*Cin)."""
    N, H, W, Cin = x_nhwc.shape
    xp = jnp.pad(x_nhwc, ((0, 0), (pad, pad), (pad, pad), (0, 0)))
    pieces = [xp[:, pad + di:pad + di + H, pad + dj:pad + dj + W, :]
              for (di, dj) in offs_a]
    patch = jnp.concatenate(pieces, axis=-1)                 # (N, H, W, T*Cin)
    return patch.reshape(N * H * W, len(offs_a) * Cin)


def _pick_nb(N, HW, target_rows=256, max_rows=4096):
    """Largest divisor of N such that Nb*HW stays VMEM-friendly, aiming for >=256 rows."""
    best = 1
    for nb in range(1, N + 1):
        if N % nb:
            continue
        if nb * HW > max_rows:
            break
        best = nb
        if nb * HW >= target_rows:
            break
    return best


def pixelcnn_forward(x_nchw, params):
    N, Cin, H, W = x_nchw.shape
    HW = H * W

    pA, pB, pO = params["A"], params["B"], params["out"]
    C = pA["w"].shape[-1]
    TA = pA["w"].shape[0]
    L, TB, Ch = pB["w2"].shape[0], pB["w2"].shape[1], pB["w2"].shape[-1]
    Cmid = pO["w1"].shape[1]
    Cout = pO["w2"].shape[1]
    offs_b = pB["offs"]

    # Wrapper-side im2col for the mask-A layer (lane-dense bf16 matmul operand).
    x_nhwc = jnp.transpose(x_nchw, (0, 2, 3, 1))
    patch_a = _build_patch_a(x_nhwc, pA["offs"], pad=3).astype(jnp.bfloat16)

    # Batch tiling: raise matmul M while keeping per-step VMEM bounded.
    Nb = _pick_nb(N, HW)
    if (Nb * HW) % 8 != 0:
        Nb = N                                    # full-array block is always legal
    M = Nb * HW
    G = N // Nb

    S = ((max(-(di * W + dj) for (di, dj) in offs_b) + 7) // 8) * 8  # aligned top halo
    k_chunk = min(128, Cmid)
    assert Cmid % k_chunk == 0

    kernel = functools.partial(_pixelcnn_kernel, W=W, HW=HW, offs_b=offs_b,
                               k_chunk=k_chunk)

    flops = 2 * N * HW * (TA * C
                          + L * (C * Ch + TB * Ch * Ch + Ch * C)
                          + C * Cmid + Cmid * Cout)
    w_bytes = 2 * (TA * C + L * (C * Ch + TB * Ch * Ch + Ch * C) + C * Cmid + Cmid * Cout)
    bytes_acc = patch_a.size * 2 + N * HW * Cout * 4 + w_bytes + 4 * (2 * C + 2 * Cmid + Cout)

    inv = lambda rank: (lambda n: (0,) * rank)
    out_flat = pl.pallas_call(
        kernel,
        out_shape=jax.ShapeDtypeStruct((N * HW, Cout), jnp.float32),
        grid=(G,),
        in_specs=[
            pl.BlockSpec((M, TA), lambda n: (n, 0)),        # mask-A patch matrix
            pl.BlockSpec(pA["w"].shape, inv(2)),
            pl.BlockSpec(pA["ab"].shape, inv(2)),
            pl.BlockSpec(pB["w1"].shape, inv(3)),
            pl.BlockSpec(pB["ab1"].shape, inv(3)),
            pl.BlockSpec(pB["w2"].shape, inv(4)),
            pl.BlockSpec(pB["ab2"].shape, inv(3)),
            pl.BlockSpec(pB["w3"].shape, inv(3)),
            pl.BlockSpec(pB["ab3"].shape, inv(3)),
            pl.BlockSpec(pO["w1"].shape, inv(2)),
            pl.BlockSpec(pO["ab1"].shape, inv(2)),
            pl.BlockSpec(pO["w2"].shape, inv(2)),
            pl.BlockSpec(pO["b2"].shape, inv(2)),
        ],
        out_specs=pl.BlockSpec((M, Cout), lambda n: (n, 0)),
        scratch_shapes=[
            pltpu.VMEM((S + M, Ch), jnp.float32),           # zero-halo buffer (mask-B)
            pltpu.VMEM((M, Cmid), jnp.bfloat16),            # head intermediate
        ],
        compiler_params=pltpu.CompilerParams(dimension_semantics=("parallel",)),
        cost_estimate=pl.CostEstimate(flops=flops, transcendentals=0,
                                      bytes_accessed=bytes_acc),
    )(patch_a, pA["w"], pA["ab"],
      pB["w1"], pB["ab1"], pB["w2"], pB["ab2"], pB["w3"], pB["ab3"],
      pO["w1"], pO["ab1"], pO["w2"], pO["b2"])

    # (N*HW, Cin*256) -> (N, Cin, H, W, 256)  (== view(N,C,256,H,W).permute(0,1,3,4,2))
    out = out_flat.reshape(N, H, W, Cin, 256)
    return jnp.transpose(out, (0, 3, 1, 2, 4))


# ----------------------------------------------------------------------------
# Parameter construction (deterministic, in-script).
# ----------------------------------------------------------------------------
def _make_conv(key, kh, kw, cin, cout):
    wkey, bkey = jax.random.split(key)
    fan_in = kh * kw * cin
    bound = 1.0 / float(fan_in) ** 0.5
    w = jax.random.uniform(wkey, (kh, kw, cin, cout), jnp.float32, -bound, bound)
    b = jax.random.uniform(bkey, (cout,), jnp.float32, -bound, bound)
    return w, b


def _make_bn(key, c):
    gkey, bkey = jax.random.split(key)
    gamma = 1.0 + 0.1 * jax.random.normal(gkey, (c,), jnp.float32)
    beta = 0.1 * jax.random.normal(bkey, (c,), jnp.float32)
    mean = jnp.zeros((c,), jnp.float32)
    var = jnp.ones((c,), jnp.float32)
    return gamma, beta, mean, var


def _fold(bias, bn=None, eps=1e-5):
    """Fold conv bias + eval-mode BatchNorm into per-channel (scale, shift)."""
    if bn is None:
        return jnp.ones_like(bias), bias
    gamma, beta, mean, var = bn
    s = gamma / jnp.sqrt(var + eps)
    return s, (bias - mean) * s + beta


def build_params(key, input_c, num_channels, num_levels):
    keys = jax.random.split(key, 8 + 6 * num_levels)
    ki = iter(range(len(keys)))
    nxt = lambda: keys[next(ki)]

    # ConvMaskABlock: masked-A 7x7 conv (pad 3) -> BN -> ReLU
    w, b = _make_conv(nxt(), 7, 7, input_c, num_channels)
    taps_a = _mask_taps(7, "A")
    wA = jnp.concatenate([w[i, j] for (i, j) in taps_a], axis=0).astype(jnp.bfloat16)
    s, sh = _fold(b, _make_bn(nxt(), num_channels))
    A = {"w": wA, "offs": tuple((i - 3, j - 3) for (i, j) in taps_a),
         "ab": jnp.stack([s, sh], 0)}

    # Residual ConvMaskBBlocks (weights stacked over levels).
    h = num_channels // 2
    taps_b = _mask_taps(3, "B")
    w1s, ab1s, w2s, ab2s, w3s, ab3s = [], [], [], [], [], []
    for _ in range(num_levels):
        w1, b1 = _make_conv(nxt(), 1, 1, num_channels, h)
        s1, sh1 = _fold(b1, _make_bn(nxt(), h))
        w2, b2 = _make_conv(nxt(), 3, 3, h, h)
        w2p = jnp.stack([w2[i, j] for (i, j) in taps_b], 0)          # (T, Ch, Ch)
        s2, sh2 = _fold(b2, _make_bn(nxt(), h))
        w3, b3 = _make_conv(nxt(), 1, 1, h, num_channels)
        s3, sh3 = _fold(b3, _make_bn(nxt(), num_channels))
        w1s.append(w1[0, 0]); ab1s.append(jnp.stack([s1, sh1], 0))
        w2s.append(w2p);      ab2s.append(jnp.stack([s2, sh2], 0))
        w3s.append(w3[0, 0]); ab3s.append(jnp.stack([s3, sh3], 0))
    B = {"w1": jnp.stack(w1s, 0).astype(jnp.bfloat16), "ab1": jnp.stack(ab1s, 0),
         "w2": jnp.stack(w2s, 0).astype(jnp.bfloat16), "ab2": jnp.stack(ab2s, 0),
         "w3": jnp.stack(w3s, 0).astype(jnp.bfloat16), "ab3": jnp.stack(ab3s, 0),
         "offs": tuple((i - 1, j - 1) for (i, j) in taps_b)}

    # Output head: ReLU -> 1x1 (num_channels -> 1024) -> BN -> ReLU -> 1x1 (-> input_c*256)
    w1, b1 = _make_conv(nxt(), 1, 1, num_channels, 1024)
    s1, sh1 = _fold(b1, _make_bn(nxt(), 1024))
    w2, b2 = _make_conv(nxt(), 1, 1, 1024, input_c * 256)
    out = {"w1": w1[0, 0].astype(jnp.bfloat16), "ab1": jnp.stack([s1, sh1], 0),
           "w2": w2[0, 0].astype(jnp.bfloat16), "b2": b2.reshape(1, -1)}
    return {"A": A, "B": B, "out": out}


if __name__ == "__main__":
    # Small config: args.input_c=1, args.num_channels=32, args.num_levels=2
    input_c, num_channels, num_levels = 1, 32, 2
    N, H, W = 2, 8, 8

    key = jax.random.PRNGKey(0)
    pkey, xkey = jax.random.split(key)
    params = build_params(pkey, input_c, num_channels, num_levels)
    x = jax.random.uniform(xkey, (N, input_c, H, W), jnp.float32)   # NCHW like PyTorch

    out = pixelcnn_forward(x, params)
    out = jax.block_until_ready(out)
    assert out.shape == (N, input_c, H, W, 256), out.shape
    assert bool(jnp.isfinite(out).all())
    print("KERNEL_OK")
</pallas_src>

<mosaic_0001>
module attributes {stable_mosaic.version = 11 : i64} {
  func.func @_pixelcnn_kernel(%arg0: i32, %arg1: memref<128x24xbf16, #tpu.memory_space<vmem>>, %arg2: memref<24x32xbf16, #tpu.memory_space<vmem>>, %arg3: memref<2x32xf32, #tpu.memory_space<vmem>>, %arg4: memref<2x32x16xbf16, #tpu.memory_space<vmem>>, %arg5: memref<2x2x16xf32, #tpu.memory_space<vmem>>, %arg6: memref<2x5x16x16xbf16, #tpu.memory_space<vmem>>, %arg7: memref<2x2x16xf32, #tpu.memory_space<vmem>>, %arg8: memref<2x16x32xbf16, #tpu.memory_space<vmem>>, %arg9: memref<2x2x32xf32, #tpu.memory_space<vmem>>, %arg10: memref<32x1024xbf16, #tpu.memory_space<vmem>>, %arg11: memref<2x1024xf32, #tpu.memory_space<vmem>>, %arg12: memref<1024x256xbf16, #tpu.memory_space<vmem>>, %arg13: memref<1x256xf32, #tpu.memory_space<vmem>>, %arg14: memref<128x256xf32, #tpu.memory_space<vmem>>, %arg15: memref<144x16xf32, #tpu.memory_space<vmem>>, %arg16: memref<128x1024xbf16, #tpu.memory_space<vmem>>) attributes {dimension_semantics = [#tpu.dimension_semantics<parallel>], iteration_bounds = array<i64: 1>, scalar_prefetch = 0 : i64, scratch_operands = 2 : i64, tpu.core_type = #tpu.core_type<tc>, window_params = [{transform_indices = @transform_0, window_bounds = array<i64: 128, 24>}, {pipeline_mode = #tpu.pipeline_mode<synchronous>, transform_indices = @transform_1, window_bounds = array<i64: 24, 32>}, {pipeline_mode = #tpu.pipeline_mode<synchronous>, transform_indices = @transform_2, window_bounds = array<i64: 2, 32>}, {pipeline_mode = #tpu.pipeline_mode<synchronous>, transform_indices = @transform_3, window_bounds = array<i64: 2, 32, 16>}, {pipeline_mode = #tpu.pipeline_mode<synchronous>, transform_indices = @transform_4, window_bounds = array<i64: 2, 2, 16>}, {pipeline_mode = #tpu.pipeline_mode<synchronous>, transform_indices = @transform_5, window_bounds = array<i64: 2, 5, 16, 16>}, {pipeline_mode = #tpu.pipeline_mode<synchronous>, transform_indices = @transform_6, window_bounds = array<i64: 2, 2, 16>}, {pipeline_mode = #tpu.pipeline_mode<synchronous>, transform_indices = @transform_7, window_bounds = array<i64: 2, 16, 32>}, {pipeline_mode = #tpu.pipeline_mode<synchronous>, transform_indices = @transform_8, window_bounds = array<i64: 2, 2, 32>}, {pipeline_mode = #tpu.pipeline_mode<synchronous>, transform_indices = @transform_9, window_bounds = array<i64: 32, 1024>}, {pipeline_mode = #tpu.pipeline_mode<synchronous>, transform_indices = @transform_10, window_bounds = array<i64: 2, 1024>}, {pipeline_mode = #tpu.pipeline_mode<synchronous>, transform_indices = @transform_11, window_bounds = array<i64: 1024, 256>}, {pipeline_mode = #tpu.pipeline_mode<synchronous>, transform_indices = @transform_12, window_bounds = array<i64: 1, 256>}, {transform_indices = @transform_13, window_bounds = array<i64: 128, 256>}]} {
    %c0 = arith.constant 0 : index
    %c0_0 = arith.constant 0 : index
    %0 = vector.load %arg1[%c0, %c0_0] : memref<128x24xbf16, #tpu.memory_space<vmem>>, vector<128x24xbf16>
    %c0_1 = arith.constant 0 : index
    %c0_2 = arith.constant 0 : index
    %1 = vector.load %arg2[%c0_1, %c0_2] : memref<24x32xbf16, #tpu.memory_space<vmem>>, vector<24x32xbf16>
    %cst = arith.constant dense<0.000000e+00> : vector<128x32xf32>
    %2 = tpu.matmul %0, %1, %cst {dimension_numbers = #tpu.dot_dimension_numbers<[1], [0], [0], [1], [0, 0, 1, 1], [], []>} : vector<128x24xbf16>, vector<24x32xbf16>, vector<128x32xf32> -> vector<128x32xf32>
    %c0_3 = arith.constant 0 : index
    %c0_4 = arith.constant 0 : index
    %3 = vector.load %arg3[%c0_3, %c0_4] : memref<2x32xf32, #tpu.memory_space<vmem>>, vector<1x32xf32>
    %4 = vector.broadcast %3 : vector<1x32xf32> to vector<128x32xf32>
    %5 = arith.mulf %2, %4 : vector<128x32xf32>
    %c1 = arith.constant 1 : index
    %c0_5 = arith.constant 0 : index
    %6 = vector.load %arg3[%c1, %c0_5] : memref<2x32xf32, #tpu.memory_space<vmem>>, vector<1x32xf32>
    %7 = vector.broadcast %6 : vector<1x32xf32> to vector<128x32xf32>
    %8 = arith.addf %5, %7 : vector<128x32xf32>
    %cst_6 = arith.constant 0.000000e+00 : f32
    %9 = vector.broadcast %cst_6 : f32 to vector<128x32xf32>
    %10 = arith.maximumf %8, %9 : vector<128x32xf32>
    %11 = tpu.iota {dimensions = array<i32: 0>} : vector<128x1xi32>
    %c64_i32 = arith.constant 64 : i32
    %c0_i32 = arith.constant 0 : i32
    %12 = arith.cmpi eq, %c64_i32, %c0_i32 : i32
    %c1_i32 = arith.constant 1 : i32
    %13 = arith.select %12, %c1_i32, %c64_i32 : i32
    %14 = vector.broadcast %13 : i32 to vector<128x1xi32>
    %15 = arith.remsi %11, %14 : vector<128x1xi32>
    %c0_i32_7 = arith.constant 0 : i32
    %16 = vector.broadcast %c0_i32_7 : i32 to vector<128x1xi32>
    %17 = arith.cmpi ne, %15, %16 : vector<128x1xi32>
    %c0_i32_8 = arith.constant 0 : i32
    %18 = vector.broadcast %c0_i32_8 : i32 to vector<128x1xi32>
    %19 = arith.cmpi slt, %15, %18 : vector<128x1xi32>
    %c0_i32_9 = arith.constant 0 : i32
    %20 = arith.cmpi slt, %13, %c0_i32_9 : i32
    %21 = vector.broadcast %20 : i1 to vector<128x1xi1>
    %22 = vector.broadcast %21 : vector<128x1xi1> to vector<128x1xi1>
    %23 = arith.xori %19, %22 : vector<128x1xi1>
    %24 = arith.andi %23, %17 : vector<128x1xi1>
    %25 = vector.broadcast %13 : i32 to vector<128x1xi32>
    %26 = arith.addi %15, %25 : vector<128x1xi32>
    %27 = arith.select %24, %26, %15 : vector<128x1xi1>, vector<128x1xi32>
    %c8_i32 = arith.constant 8 : i32
    %c0_i32_10 = arith.constant 0 : i32
    %28 = arith.cmpi eq, %c8_i32, %c0_i32_10 : i32
    %c1_i32_11 = arith.constant 1 : i32
    %29 = arith.select %28, %c1_i32_11, %c8_i32 : i32
    %30 = vector.broadcast %29 : i32 to vector<128x1xi32>
    %31 = arith.remsi %11, %30 : vector<128x1xi32>
    %c0_i32_12 = arith.constant 0 : i32
    %32 = vector.broadcast %c0_i32_12 : i32 to vector<128x1xi32>
    %33 = arith.cmpi ne, %31, %32 : vector<128x1xi32>
    %c0_i32_13 = arith.constant 0 : i32
    %34 = vector.broadcast %c0_i32_13 : i32 to vector<128x1xi32>
    %35 = arith.cmpi slt, %31, %34 : vector<128x1xi32>
    %c0_i32_14 = arith.constant 0 : i32
    %36 = arith.cmpi slt, %29, %c0_i32_14 : i32
    %37 = vector.broadcast %36 : i1 to vector<128x1xi1>
    %38 = vector.broadcast %37 : vector<128x1xi1> to vector<128x1xi1>
    %39 = arith.xori %35, %38 : vector<128x1xi1>
    %40 = arith.andi %39, %33 : vector<128x1xi1>
    %41 = vector.broadcast %29 : i32 to vector<128x1xi32>
    %42 = arith.addi %31, %41 : vector<128x1xi32>
    %43 = arith.select %40, %42, %31 : vector<128x1xi1>, vector<128x1xi32>
    %c8_i32_15 = arith.constant 8 : i32
    %44 = vector.broadcast %c8_i32_15 : i32 to vector<128x1xi32>
    %45 = arith.cmpi sge, %27, %44 : vector<128x1xi32>
    %c-1_i32 = arith.constant -1 : i32
    %46 = vector.broadcast %c-1_i32 : i32 to vector<128x1xi32>
    %47 = arith.addi %43, %46 : vector<128x1xi32>
    %c0_i32_16 = arith.constant 0 : i32
    %48 = vector.broadcast %c0_i32_16 : i32 to vector<128x1xi32>
    %49 = arith.cmpi sge, %47, %48 : vector<128x1xi32>
    %50 = arith.andi %45, %49 : vector<128x1xi1>
    %c-1_i32_17 = arith.constant -1 : i32
    %51 = vector.broadcast %c-1_i32_17 : i32 to vector<128x1xi32>
    %52 = arith.addi %43, %51 : vector<128x1xi32>
    %c8_i32_18 = arith.constant 8 : i32
    %53 = vector.broadcast %c8_i32_18 : i32 to vector<128x1xi32>
    %54 = arith.cmpi slt, %52, %53 : vector<128x1xi32>
    %55 = arith.andi %50, %54 : vector<128x1xi1>
    %c8_i32_19 = arith.constant 8 : i32
    %56 = vector.broadcast %c8_i32_19 : i32 to vector<128x1xi32>
    %57 = arith.cmpi sge, %27, %56 : vector<128x1xi32>
    %c0_i32_20 = arith.constant 0 : i32
    %58 = vector.broadcast %c0_i32_20 : i32 to vector<128x1xi32>
    %59 = arith.addi %43, %58 : vector<128x1xi32>
    %c0_i32_21 = arith.constant 0 : i32
    %60 = vector.broadcast %c0_i32_21 : i32 to vector<128x1xi32>
    %61 = arith.cmpi sge, %59, %60 : vector<128x1xi32>
    %62 = arith.andi %57, %61 : vector<128x1xi1>
    %c0_i32_22 = arith.constant 0 : i32
    %63 = vector.broadcast %c0_i32_22 : i32 to vector<128x1xi32>
    %64 = arith.addi %43, %63 : vector<128x1xi32>
    %c8_i32_23 = arith.constant 8 : i32
    %65 = vector.broadcast %c8_i32_23 : i32 to vector<128x1xi32>
    %66 = arith.cmpi slt, %64, %65 : vector<128x1xi32>
    %67 = arith.andi %62, %66 : vector<128x1xi1>
    %c8_i32_24 = arith.constant 8 : i32
    %68 = vector.broadcast %c8_i32_24 : i32 to vector<128x1xi32>
    %69 = arith.cmpi sge, %27, %68 : vector<128x1xi32>
    %c1_i32_25 = arith.constant 1 : i32
    %70 = vector.broadcast %c1_i32_25 : i32 to vector<128x1xi32>
    %71 = arith.addi %43, %70 : vector<128x1xi32>
    %c0_i32_26 = arith.constant 0 : i32
    %72 = vector.broadcast %c0_i32_26 : i32 to vector<128x1xi32>
    %73 = arith.cmpi sge, %71, %72 : vector<128x1xi32>
    %74 = arith.andi %69, %73 : vector<128x1xi1>
    %c1_i32_27 = arith.constant 1 : i32
    %75 = vector.broadcast %c1_i32_27 : i32 to vector<128x1xi32>
    %76 = arith.addi %43, %75 : vector<128x1xi32>
    %c8_i32_28 = arith.constant 8 : i32
    %77 = vector.broadcast %c8_i32_28 : i32 to vector<128x1xi32>
    %78 = arith.cmpi slt, %76, %77 : vector<128x1xi32>
    %79 = arith.andi %74, %78 : vector<128x1xi1>
    %c0_i32_29 = arith.constant 0 : i32
    %80 = vector.broadcast %c0_i32_29 : i32 to vector<128x1xi32>
    %81 = arith.cmpi sge, %27, %80 : vector<128x1xi32>
    %c-1_i32_30 = arith.constant -1 : i32
    %82 = vector.broadcast %c-1_i32_30 : i32 to vector<128x1xi32>
    %83 = arith.addi %43, %82 : vector<128x1xi32>
    %c0_i32_31 = arith.constant 0 : i32
    %84 = vector.broadcast %c0_i32_31 : i32 to vector<128x1xi32>
    %85 = arith.cmpi sge, %83, %84 : vector<128x1xi32>
    %86 = arith.andi %81, %85 : vector<128x1xi1>
    %c-1_i32_32 = arith.constant -1 : i32
    %87 = vector.broadcast %c-1_i32_32 : i32 to vector<128x1xi32>
    %88 = arith.addi %43, %87 : vector<128x1xi32>
    %c8_i32_33 = arith.constant 8 : i32
    %89 = vector.broadcast %c8_i32_33 : i32 to vector<128x1xi32>
    %90 = arith.cmpi slt, %88, %89 : vector<128x1xi32>
    %91 = arith.andi %86, %90 : vector<128x1xi1>
    %cst_34 = arith.constant 0.000000e+00 : f32
    %92 = vector.broadcast %cst_34 : f32 to vector<16x16xf32>
    %c0_35 = arith.constant 0 : index
    %c0_36 = arith.constant 0 : index
    %93 = vector.load %arg15[%c0_35, %c0_36] : memref<144x16xf32, #tpu.memory_space<vmem>>, vector<16x16xf32>
    tpu.vector_store %arg15[%c0_35, %c0_36], %92 {strides = array<i32>} : memref<144x16xf32, #tpu.memory_space<vmem>>, vector<16x16xf32>,
    %c0_37 = arith.constant 0 : index
    %c0_38 = arith.constant 0 : index
    %c0_39 = arith.constant 0 : index
    %94 = vector.load %arg5[%c0_37, %c0_38, %c0_39] : memref<2x2x16xf32, #tpu.memory_space<vmem>>, vector<1x2x16xf32>
    %95 = vector.shape_cast %94 : vector<1x2x16xf32> to vector<2x16xf32>
    %c0_40 = arith.constant 0 : index
    %c0_41 = arith.constant 0 : index
    %c0_42 = arith.constant 0 : index
    %96 = vector.load %arg7[%c0_40, %c0_41, %c0_42] : memref<2x2x16xf32, #tpu.memory_space<vmem>>, vector<1x2x16xf32>
    %97 = vector.shape_cast %96 : vector<1x2x16xf32> to vector<2x16xf32>
    %c0_43 = arith.constant 0 : index
    %c0_44 = arith.constant 0 : index
    %c0_45 = arith.constant 0 : index
    %98 = vector.load %arg9[%c0_43, %c0_44, %c0_45] : memref<2x2x32xf32, #tpu.memory_space<vmem>>, vector<1x2x32xf32>
    %99 = vector.shape_cast %98 : vector<1x2x32xf32> to vector<2x32xf32>
    %c0_46 = arith.constant 0 : index
    %c0_47 = arith.constant 0 : index
    %c0_48 = arith.constant 0 : index
    %c0_49 = arith.constant 0 : index
    %100 = vector.load %arg6[%c0_46, %c0_47, %c0_48, %c0_49] : memref<2x5x16x16xbf16, #tpu.memory_space<vmem>>, vector<1x5x16x16xbf16>
    %101 = vector.shape_cast %100 : vector<1x5x16x16xbf16> to vector<5x16x16xbf16>
    %102 = arith.truncf %10 : vector<128x32xf32> to vector<128x32xbf16>
    %c0_50 = arith.constant 0 : index
    %c0_51 = arith.constant 0 : index
    %c0_52 = arith.constant 0 : index
    %103 = vector.load %arg4[%c0_50, %c0_51, %c0_52] : memref<2x32x16xbf16, #tpu.memory_space<vmem>>, vector<1x32x16xbf16>
    %104 = vector.shape_cast %103 : vector<1x32x16xbf16> to vector<32x16xbf16>
    %cst_53 = arith.constant dense<0.000000e+00> : vector<128x16xf32>
    %105 = tpu.matmul %102, %104, %cst_53 {dimension_numbers = #tpu.dot_dimension_numbers<[1], [0], [0], [1], [0, 0, 1, 1], [], []>} : vector<128x32xbf16>, vector<32x16xbf16>, vector<128x16xf32> -> vector<128x16xf32>
    %106 = vector.extract_strided_slice %95 {offsets = [0, 0], sizes = [1, 16], strides = [1, 1]} : vector<2x16xf32> to vector<1x16xf32>
    %107 = vector.broadcast %106 : vector<1x16xf32> to vector<128x16xf32>
    %108 = arith.mulf %105, %107 : vector<128x16xf32>
    %109 = vector.extract_strided_slice %95 {offsets = [1, 0], sizes = [1, 16], strides = [1, 1]} : vector<2x16xf32> to vector<1x16xf32>
    %110 = vector.broadcast %109 : vector<1x16xf32> to vector<128x16xf32>
    %111 = arith.addf %108, %110 : vector<128x16xf32>
    %cst_54 = arith.constant 0.000000e+00 : f32
    %112 = vector.broadcast %cst_54 : f32 to vector<128x16xf32>
    %113 = arith.maximumf %111, %112 : vector<128x16xf32>
    %c16 = arith.constant 16 : index
    %c0_55 = arith.constant 0 : index
    %114 = vector.load %arg15[%c16, %c0_55] : memref<144x16xf32, #tpu.memory_space<vmem>>, vector<128x16xf32>
    tpu.vector_store %arg15[%c16, %c0_55], %113 {strides = array<i32>} : memref<144x16xf32, #tpu.memory_space<vmem>>, vector<128x16xf32>,
    %c7 = arith.constant 7 : index
    %c0_56 = arith.constant 0 : index
    %115 = vector.load %arg15[%c7, %c0_56] : memref<144x16xf32, #tpu.memory_space<vmem>>, vector<128x16xf32>
    %cst_57 = arith.constant 0.000000e+00 : f32
    %116 = vector.shape_cast %55 : vector<128x1xi1> to vector<128x1xi1>
    %117 = vector.broadcast %116 : vector<128x1xi1> to vector<128x16xi1>
    %118 = vector.broadcast %cst_57 : f32 to vector<128x16xf32>
    %119 = arith.select %117, %115, %118 : vector<128x16xi1>, vector<128x16xf32>
    %120 = arith.truncf %119 : vector<128x16xf32> to vector<128x16xbf16>
    %121 = vector.extract_strided_slice %101 {offsets = [0, 0, 0], sizes = [1, 16, 16], strides = [1, 1, 1]} : vector<5x16x16xbf16> to vector<1x16x16xbf16>
    %122 = vector.shape_cast %121 : vector<1x16x16xbf16> to vector<16x16xbf16>
    %cst_58 = arith.constant dense<0.000000e+00> : vector<128x16xf32>
    %123 = tpu.matmul %120, %122, %cst_58 {dimension_numbers = #tpu.dot_dimension_numbers<[1], [0], [0], [1], [0, 0, 1, 1], [], []>} : vector<128x16xbf16>, vector<16x16xbf16>, vector<128x16xf32> -> vector<128x16xf32>
    %c8 = arith.constant 8 : index
    %c0_59 = arith.constant 0 : index
    %124 = vector.load %arg15[%c8, %c0_59] : memref<144x16xf32, #tpu.memory_space<vmem>>, vector<128x16xf32>
    %cst_60 = arith.constant 0.000000e+00 : f32
    %125 = vector.shape_cast %67 : vector<128x1xi1> to vector<128x1xi1>
    %126 = vector.broadcast %125 : vector<128x1xi1> to vector<128x16xi1>
    %127 = vector.broadcast %cst_60 : f32 to vector<128x16xf32>
    %128 = arith.select %126, %124, %127 : vector<128x16xi1>, vector<128x16xf32>
    %129 = arith.truncf %128 : vector<128x16xf32> to vector<128x16xbf16>
    %130 = vector.extract_strided_slice %101 {offsets = [1, 0, 0], sizes = [1, 16, 16], strides = [1, 1, 1]} : vector<5x16x16xbf16> to vector<1x16x16xbf16>
    %131 = vector.shape_cast %130 : vector<1x16x16xbf16> to vector<16x16xbf16>
    %cst_61 = arith.constant dense<0.000000e+00> : vector<128x16xf32>
    %132 = tpu.matmul %129, %131, %cst_61 {dimension_numbers = #tpu.dot_dimension_numbers<[1], [0], [0], [1], [0, 0, 1, 1], [], []>} : vector<128x16xbf16>, vector<16x16xbf16>, vector<128x16xf32> -> vector<128x16xf32>
    %133 = arith.addf %123, %132 : vector<128x16xf32>
    %c9 = arith.constant 9 : index
    %c0_62 = arith.constant 0 : index
    %134 = vector.load %arg15[%c9, %c0_62] : memref<144x16xf32, #tpu.memory_space<vmem>>, vector<128x16xf32>
    %cst_63 = arith.constant 0.000000e+00 : f32
    %135 = vector.shape_cast %79 : vector<128x1xi1> to vector<128x1xi1>
    %136 = vector.broadcast %135 : vector<128x1xi1> to vector<128x16xi1>
    %137 = vector.broadcast %cst_63 : f32 to vector<128x16xf32>
    %138 = arith.select %136, %134, %137 : vector<128x16xi1>, vector<128x16xf32>
    %139 = arith.truncf %138 : vector<128x16xf32> to vector<128x16xbf16>
    %140 = vector.extract_strided_slice %101 {offsets = [2, 0, 0], sizes = [1, 16, 16], strides = [1, 1, 1]} : vector<5x16x16xbf16> to vector<1x16x16xbf16>
    %141 = vector.shape_cast %140 : vector<1x16x16xbf16> to vector<16x16xbf16>
    %cst_64 = arith.constant dense<0.000000e+00> : vector<128x16xf32>
    %142 = tpu.matmul %139, %141, %cst_64 {dimension_numbers = #tpu.dot_dimension_numbers<[1], [0], [0], [1], [0, 0, 1, 1], [], []>} : vector<128x16xbf16>, vector<16x16xbf16>, vector<128x16xf32> -> vector<128x16xf32>
    %143 = arith.addf %133, %142 : vector<128x16xf32>
    %c15 = arith.constant 15 : index
    %c0_65 = arith.constant 0 : index
    %144 = vector.load %arg15[%c15, %c0_65] : memref<144x16xf32, #tpu.memory_space<vmem>>, vector<128x16xf32>
    %cst_66 = arith.constant 0.000000e+00 : f32
    %145 = vector.shape_cast %91 : vector<128x1xi1> to vector<128x1xi1>
    %146 = vector.broadcast %145 : vector<128x1xi1> to vector<128x16xi1>
    %147 = vector.broadcast %cst_66 : f32 to vector<128x16xf32>
    %148 = arith.select %146, %144, %147 : vector<128x16xi1>, vector<128x16xf32>
    %149 = arith.truncf %148 : vector<128x16xf32> to vector<128x16xbf16>
    %150 = vector.extract_strided_slice %101 {offsets = [3, 0, 0], sizes = [1, 16, 16], strides = [1, 1, 1]} : vector<5x16x16xbf16> to vector<1x16x16xbf16>
    %151 = vector.shape_cast %150 : vector<1x16x16xbf16> to vector<16x16xbf16>
    %cst_67 = arith.constant dense<0.000000e+00> : vector<128x16xf32>
    %152 = tpu.matmul %149, %151, %cst_67 {dimension_numbers = #tpu.dot_dimension_numbers<[1], [0], [0], [1], [0, 0, 1, 1], [], []>} : vector<128x16xbf16>, vector<16x16xbf16>, vector<128x16xf32> -> vector<128x16xf32>
    %153 = arith.addf %143, %152 : vector<128x16xf32>
    %154 = arith.truncf %113 : vector<128x16xf32> to vector<128x16xbf16>
    %155 = vector.extract_strided_slice %101 {offsets = [4, 0, 0], sizes = [1, 16, 16], strides = [1, 1, 1]} : vector<5x16x16xbf16> to vector<1x16x16xbf16>
    %156 = vector.shape_cast %155 : vector<1x16x16xbf16> to vector<16x16xbf16>
    %cst_68 = arith.constant dense<0.000000e+00> : vector<128x16xf32>
    %157 = tpu.matmul %154, %156, %cst_68 {dimension_numbers = #tpu.dot_dimension_numbers<[1], [0], [0], [1], [0, 0, 1, 1], [], []>} : vector<128x16xbf16>, vector<16x16xbf16>, vector<128x16xf32> -> vector<128x16xf32>
    %158 = arith.addf %153, %157 : vector<128x16xf32>
    %159 = vector.extract_strided_slice %97 {offsets = [0, 0], sizes = [1, 16], strides = [1, 1]} : vector<2x16xf32> to vector<1x16xf32>
    %160 = vector.broadcast %159 : vector<1x16xf32> to vector<128x16xf32>
    %161 = arith.mulf %158, %160 : vector<128x16xf32>
    %162 = vector.extract_strided_slice %97 {offsets = [1, 0], sizes = [1, 16], strides = [1, 1]} : vector<2x16xf32> to vector<1x16xf32>
    %163 = vector.broadcast %162 : vector<1x16xf32> to vector<128x16xf32>
    %164 = arith.addf %161, %163 : vector<128x16xf32>
    %cst_69 = arith.constant 0.000000e+00 : f32
    %165 = vector.broadcast %cst_69 : f32 to vector<128x16xf32>
    %166 = arith.maximumf %164, %165 : vector<128x16xf32>
    %167 = arith.truncf %166 : vector<128x16xf32> to vector<128x16xbf16>
    %c0_70 = arith.constant 0 : index
    %c0_71 = arith.constant 0 : index
    %c0_72 = arith.constant 0 : index
    %168 = vector.load %arg8[%c0_70, %c0_71, %c0_72] : memref<2x16x32xbf16, #tpu.memory_space<vmem>>, vector<1x16x32xbf16>
    %169 = vector.shape_cast %168 : vector<1x16x32xbf16> to vector<16x32xbf16>
    %cst_73 = arith.constant dense<0.000000e+00> : vector<128x32xf32>
    %170 = tpu.matmul %167, %169, %cst_73 {dimension_numbers = #tpu.dot_dimension_numbers<[1], [0], [0], [1], [0, 0, 1, 1], [], []>} : vector<128x16xbf16>, vector<16x32xbf16>, vector<128x32xf32> -> vector<128x32xf32>
    %171 = vector.extract_strided_slice %99 {offsets = [0, 0], sizes = [1, 32], strides = [1, 1]} : vector<2x32xf32> to vector<1x32xf32>
    %172 = vector.broadcast %171 : vector<1x32xf32> to vector<128x32xf32>
    %173 = arith.mulf %170, %172 : vector<128x32xf32>
    %174 = vector.extract_strided_slice %99 {offsets = [1, 0], sizes = [1, 32], strides = [1, 1]} : vector<2x32xf32> to vector<1x32xf32>
    %175 = vector.broadcast %174 : vector<1x32xf32> to vector<128x32xf32>
    %176 = arith.addf %173, %175 : vector<128x32xf32>
    %cst_74 = arith.constant 0.000000e+00 : f32
    %177 = vector.broadcast %cst_74 : f32 to vector<128x32xf32>
    %178 = arith.maximumf %176, %177 : vector<128x32xf32>
    %179 = arith.addf %10, %178 : vector<128x32xf32>
    %c1_75 = arith.constant 1 : index
    %c0_76 = arith.constant 0 : index
    %c0_77 = arith.constant 0 : index
    %180 = vector.load %arg5[%c1_75, %c0_76, %c0_77] : memref<2x2x16xf32, #tpu.memory_space<vmem>>, vector<1x2x16xf32>
    %181 = vector.shape_cast %180 : vector<1x2x16xf32> to vector<2x16xf32>
    %c1_78 = arith.constant 1 : index
    %c0_79 = arith.constant 0 : index
    %c0_80 = arith.constant 0 : index
    %182 = vector.load %arg7[%c1_78, %c0_79, %c0_80] : memref<2x2x16xf32, #tpu.memory_space<vmem>>, vector<1x2x16xf32>
    %183 = vector.shape_cast %182 : vector<1x2x16xf32> to vector<2x16xf32>
    %c1_81 = arith.constant 1 : index
    %c0_82 = arith.constant 0 : index
    %c0_83 = arith.constant 0 : index
    %184 = vector.load %arg9[%c1_81, %c0_82, %c0_83] : memref<2x2x32xf32, #tpu.memory_space<vmem>>, vector<1x2x32xf32>
    %185 = vector.shape_cast %184 : vector<1x2x32xf32> to vector<2x32xf32>
    %c1_84 = arith.constant 1 : index
    %c0_85 = arith.constant 0 : index
    %c0_86 = arith.constant 0 : index
    %c0_87 = arith.constant 0 : index
    %186 = vector.load %arg6[%c1_84, %c0_85, %c0_86, %c0_87] : memref<2x5x16x16xbf16, #tpu.memory_space<vmem>>, vector<1x5x16x16xbf16>
    %187 = vector.shape_cast %186 : vector<1x5x16x16xbf16> to vector<5x16x16xbf16>
    %188 = arith.truncf %179 : vector<128x32xf32> to vector<128x32xbf16>
    %c1_88 = arith.constant 1 : index
    %c0_89 = arith.constant 0 : index
    %c0_90 = arith.constant 0 : index
    %189 = vector.load %arg4[%c1_88, %c0_89, %c0_90] : memref<2x32x16xbf16, #tpu.memory_space<vmem>>, vector<1x32x16xbf16>
    %190 = vector.shape_cast %189 : vector<1x32x16xbf16> to vector<32x16xbf16>
    %cst_91 = arith.constant dense<0.000000e+00> : vector<128x16xf32>
    %191 = tpu.matmul %188, %190, %cst_91 {dimension_numbers = #tpu.dot_dimension_numbers<[1], [0], [0], [1], [0, 0, 1, 1], [], []>} : vector<128x32xbf16>, vector<32x16xbf16>, vector<128x16xf32> -> vector<128x16xf32>
    %192 = vector.extract_strided_slice %181 {offsets = [0, 0], sizes = [1, 16], strides = [1, 1]} : vector<2x16xf32> to vector<1x16xf32>
    %193 = vector.broadcast %192 : vector<1x16xf32> to vector<128x16xf32>
    %194 = arith.mulf %191, %193 : vector<128x16xf32>
    %195 = vector.extract_strided_slice %181 {offsets = [1, 0], sizes = [1, 16], strides = [1, 1]} : vector<2x16xf32> to vector<1x16xf32>
    %196 = vector.broadcast %195 : vector<1x16xf32> to vector<128x16xf32>
    %197 = arith.addf %194, %196 : vector<128x16xf32>
    %cst_92 = arith.constant 0.000000e+00 : f32
    %198 = vector.broadcast %cst_92 : f32 to vector<128x16xf32>
    %199 = arith.maximumf %197, %198 : vector<128x16xf32>
    %c16_93 = arith.constant 16 : index
    %c0_94 = arith.constant 0 : index
    %200 = vector.load %arg15[%c16_93, %c0_94] : memref<144x16xf32, #tpu.memory_space<vmem>>, vector<128x16xf32>
    tpu.vector_store %arg15[%c16_93, %c0_94], %199 {strides = array<i32>} : memref<144x16xf32, #tpu.memory_space<vmem>>, vector<128x16xf32>,
    %c7_95 = arith.constant 7 : index
    %c0_96 = arith.constant 0 : index
    %201 = vector.load %arg15[%c7_95, %c0_96] : memref<144x16xf32, #tpu.memory_space<vmem>>, vector<128x16xf32>
    %cst_97 = arith.constant 0.000000e+00 : f32
    %202 = vector.shape_cast %55 : vector<128x1xi1> to vector<128x1xi1>
    %203 = vector.broadcast %202 : vector<128x1xi1> to vector<128x16xi1>
    %204 = vector.broadcast %cst_97 : f32 to vector<128x16xf32>
    %205 = arith.select %203, %201, %204 : vector<128x16xi1>, vector<128x16xf32>
    %206 = arith.truncf %205 : vector<128x16xf32> to vector<128x16xbf16>
    %207 = vector.extract_strided_slice %187 {offsets = [0, 0, 0], sizes = [1, 16, 16], strides = [1, 1, 1]} : vector<5x16x16xbf16> to vector<1x16x16xbf16>
    %208 = vector.shape_cast %207 : vector<1x16x16xbf16> to vector<16x16xbf16>
    %cst_98 = arith.constant dense<0.000000e+00> : vector<128x16xf32>
    %209 = tpu.matmul %206, %208, %cst_98 {dimension_numbers = #tpu.dot_dimension_numbers<[1], [0], [0], [1], [0, 0, 1, 1], [], []>} : vector<128x16xbf16>, vector<16x16xbf16>, vector<128x16xf32> -> vector<128x16xf32>
    %c8_99 = arith.constant 8 : index
    %c0_100 = arith.constant 0 : index
    %210 = vector.load %arg15[%c8_99, %c0_100] : memref<144x16xf32, #tpu.memory_space<vmem>>, vector<128x16xf32>
    %cst_101 = arith.constant 0.000000e+00 : f32
    %211 = vector.shape_cast %67 : vector<128x1xi1> to vector<128x1xi1>
    %212 = vector.broadcast %211 : vector<128x1xi1> to vector<128x16xi1>
    %213 = vector.broadcast %cst_101 : f32 to vector<128x16xf32>
    %214 = arith.select %212, %210, %213 : vector<128x16xi1>, vector<128x16xf32>
    %215 = arith.truncf %214 : vector<128x16xf32> to vector<128x16xbf16>
    %216 = vector.extract_strided_slice %187 {offsets = [1, 0, 0], sizes = [1, 16, 16], strides = [1, 1, 1]} : vector<5x16x16xbf16> to vector<1x16x16xbf16>
    %217 = vector.shape_cast %216 : vector<1x16x16xbf16> to vector<16x16xbf16>
    %cst_102 = arith.constant dense<0.000000e+00> : vector<128x16xf32>
    %218 = tpu.matmul %215, %217, %cst_102 {dimension_numbers = #tpu.dot_dimension_numbers<[1], [0], [0], [1], [0, 0, 1, 1], [], []>} : vector<128x16xbf16>, vector<16x16xbf16>, vector<128x16xf32> -> vector<128x16xf32>
    %219 = arith.addf %209, %218 : vector<128x16xf32>
    %c9_103 = arith.constant 9 : index
    %c0_104 = arith.constant 0 : index
    %220 = vector.load %arg15[%c9_103, %c0_104] : memref<144x16xf32, #tpu.memory_space<vmem>>, vector<128x16xf32>
    %cst_105 = arith.constant 0.000000e+00 : f32
    %221 = vector.shape_cast %79 : vector<128x1xi1> to vector<128x1xi1>
    %222 = vector.broadcast %221 : vector<128x1xi1> to vector<128x16xi1>
    %223 = vector.broadcast %cst_105 : f32 to vector<128x16xf32>
    %224 = arith.select %222, %220, %223 : vector<128x16xi1>, vector<128x16xf32>
    %225 = arith.truncf %224 : vector<128x16xf32> to vector<128x16xbf16>
    %226 = vector.extract_strided_slice %187 {offsets = [2, 0, 0], sizes = [1, 16, 16], strides = [1, 1, 1]} : vector<5x16x16xbf16> to vector<1x16x16xbf16>
    %227 = vector.shape_cast %226 : vector<1x16x16xbf16> to vector<16x16xbf16>
    %cst_106 = arith.constant dense<0.000000e+00> : vector<128x16xf32>
    %228 = tpu.matmul %225, %227, %cst_106 {dimension_numbers = #tpu.dot_dimension_numbers<[1], [0], [0], [1], [0, 0, 1, 1], [], []>} : vector<128x16xbf16>, vector<16x16xbf16>, vector<128x16xf32> -> vector<128x16xf32>
    %229 = arith.addf %219, %228 : vector<128x16xf32>
    %c15_107 = arith.constant 15 : index
    %c0_108 = arith.constant 0 : index
    %230 = vector.load %arg15[%c15_107, %c0_108] : memref<144x16xf32, #tpu.memory_space<vmem>>, vector<128x16xf32>
    %cst_109 = arith.constant 0.000000e+00 : f32
    %231 = vector.shape_cast %91 : vector<128x1xi1> to vector<128x1xi1>
    %232 = vector.broadcast %231 : vector<128x1xi1> to vector<128x16xi1>
    %233 = vector.broadcast %cst_109 : f32 to vector<128x16xf32>
    %234 = arith.select %232, %230, %233 : vector<128x16xi1>, vector<128x16xf32>
    %235 = arith.truncf %234 : vector<128x16xf32> to vector<128x16xbf16>
    %236 = vector.extract_strided_slice %187 {offsets = [3, 0, 0], sizes = [1, 16, 16], strides = [1, 1, 1]} : vector<5x16x16xbf16> to vector<1x16x16xbf16>
    %237 = vector.shape_cast %236 : vector<1x16x16xbf16> to vector<16x16xbf16>
    %cst_110 = arith.constant dense<0.000000e+00> : vector<128x16xf32>
    %238 = tpu.matmul %235, %237, %cst_110 {dimension_numbers = #tpu.dot_dimension_numbers<[1], [0], [0], [1], [0, 0, 1, 1], [], []>} : vector<128x16xbf16>, vector<16x16xbf16>, vector<128x16xf32> -> vector<128x16xf32>
    %239 = arith.addf %229, %238 : vector<128x16xf32>
    %240 = arith.truncf %199 : vector<128x16xf32> to vector<128x16xbf16>
    %241 = vector.extract_strided_slice %187 {offsets = [4, 0, 0], sizes = [1, 16, 16], strides = [1, 1, 1]} : vector<5x16x16xbf16> to vector<1x16x16xbf16>
    %242 = vector.shape_cast %241 : vector<1x16x16xbf16> to vector<16x16xbf16>
    %cst_111 = arith.constant dense<0.000000e+00> : vector<128x16xf32>
    %243 = tpu.matmul %240, %242, %cst_111 {dimension_numbers = #tpu.dot_dimension_numbers<[1], [0], [0], [1], [0, 0, 1, 1], [], []>} : vector<128x16xbf16>, vector<16x16xbf16>, vector<128x16xf32> -> vector<128x16xf32>
    %244 = arith.addf %239, %243 : vector<128x16xf32>
    %245 = vector.extract_strided_slice %183 {offsets = [0, 0], sizes = [1, 16], strides = [1, 1]} : vector<2x16xf32> to vector<1x16xf32>
    %246 = vector.broadcast %245 : vector<1x16xf32> to vector<128x16xf32>
    %247 = arith.mulf %244, %246 : vector<128x16xf32>
    %248 = vector.extract_strided_slice %183 {offsets = [1, 0], sizes = [1, 16], strides = [1, 1]} : vector<2x16xf32> to vector<1x16xf32>
    %249 = vector.broadcast %248 : vector<1x16xf32> to vector<128x16xf32>
    %250 = arith.addf %247, %249 : vector<128x16xf32>
    %cst_112 = arith.constant 0.000000e+00 : f32
    %251 = vector.broadcast %cst_112 : f32 to vector<128x16xf32>
    %252 = arith.maximumf %250, %251 : vector<128x16xf32>
    %253 = arith.truncf %252 : vector<128x16xf32> to vector<128x16xbf16>
    %c1_113 = arith.constant 1 : index
    %c0_114 = arith.constant 0 : index
    %c0_115 = arith.constant 0 : index
    %254 = vector.load %arg8[%c1_113, %c0_114, %c0_115] : memref<2x16x32xbf16, #tpu.memory_space<vmem>>, vector<1x16x32xbf16>
    %255 = vector.shape_cast %254 : vector<1x16x32xbf16> to vector<16x32xbf16>
    %cst_116 = arith.constant dense<0.000000e+00> : vector<128x32xf32>
    %256 = tpu.matmul %253, %255, %cst_116 {dimension_numbers = #tpu.dot_dimension_numbers<[1], [0], [0], [1], [0, 0, 1, 1], [], []>} : vector<128x16xbf16>, vector<16x32xbf16>, vector<128x32xf32> -> vector<128x32xf32>
    %257 = vector.extract_strided_slice %185 {offsets = [0, 0], sizes = [1, 32], strides = [1, 1]} : vector<2x32xf32> to vector<1x32xf32>
    %258 = vector.broadcast %257 : vector<1x32xf32> to vector<128x32xf32>
    %259 = arith.mulf %256, %258 : vector<128x32xf32>
    %260 = vector.extract_strided_slice %185 {offsets = [1, 0], sizes = [1, 32], strides = [1, 1]} : vector<2x32xf32> to vector<1x32xf32>
    %261 = vector.broadcast %260 : vector<1x32xf32> to vector<128x32xf32>
    %262 = arith.addf %259, %261 : vector<128x32xf32>
    %cst_117 = arith.constant 0.000000e+00 : f32
    %263 = vector.broadcast %cst_117 : f32 to vector<128x32xf32>
    %264 = arith.maximumf %262, %263 : vector<128x32xf32>
    %265 = arith.addf %179, %264 : vector<128x32xf32>
    %cst_118 = arith.constant 0.000000e+00 : f32
    %266 = vector.broadcast %cst_118 : f32 to vector<128x32xf32>
    %267 = arith.maximumf %265, %266 : vector<128x32xf32>
    %268 = arith.truncf %267 : vector<128x32xf32> to vector<128x32xbf16>
    %c0_119 = arith.constant 0 : index
    %c0_120 = arith.constant 0 : index
    %269 = vector.load %arg10[%c0_119, %c0_120] : memref<32x1024xbf16, #tpu.memory_space<vmem>>, vector<32x128xbf16>
    %cst_121 = arith.constant dense<0.000000e+00> : vector<128x128xf32>
    %270 = tpu.matmul %268, %269, %cst_121 {dimension_numbers = #tpu.dot_dimension_numbers<[1], [0], [0], [1], [0, 0, 1, 1], [], []>} : vector<128x32xbf16>, vector<32x128xbf16>, vector<128x128xf32> -> vector<128x128xf32>
    %c0_122 = arith.constant 0 : index
    %c0_123 = arith.constant 0 : index
    %271 = vector.load %arg11[%c0_122, %c0_123] : memref<2x1024xf32, #tpu.memory_space<vmem>>, vector<1x128xf32>
    %272 = vector.broadcast %271 : vector<1x128xf32> to vector<128x128xf32>
    %273 = arith.mulf %270, %272 : vector<128x128xf32>
    %c1_124 = arith.constant 1 : index
    %c0_125 = arith.constant 0 : index
    %274 = vector.load %arg11[%c1_124, %c0_125] : memref<2x1024xf32, #tpu.memory_space<vmem>>, vector<1x128xf32>
    %275 = vector.broadcast %274 : vector<1x128xf32> to vector<128x128xf32>
    %276 = arith.addf %273, %275 : vector<128x128xf32>
    %cst_126 = arith.constant 0.000000e+00 : f32
    %277 = vector.broadcast %cst_126 : f32 to vector<128x128xf32>
    %278 = arith.maximumf %276, %277 : vector<128x128xf32>
    %279 = arith.truncf %278 : vector<128x128xf32> to vector<128x128xbf16>
    %c0_127 = arith.constant 0 : index
    %c0_128 = arith.constant 0 : index
    %280 = vector.load %arg16[%c0_127, %c0_128] : memref<128x1024xbf16, #tpu.memory_space<vmem>>, vector<128x128xbf16>
    tpu.vector_store %arg16[%c0_127, %c0_128], %279 {strides = array<i32>} : memref<128x1024xbf16, #tpu.memory_space<vmem>>, vector<128x128xbf16>,
    %c0_129 = arith.constant 0 : index
    %c128 = arith.constant 128 : index
    %281 = vector.load %arg10[%c0_129, %c128] : memref<32x1024xbf16, #tpu.memory_space<vmem>>, vector<32x128xbf16>
    %cst_130 = arith.constant dense<0.000000e+00> : vector<128x128xf32>
    %282 = tpu.matmul %268, %281, %cst_130 {dimension_numbers = #tpu.dot_dimension_numbers<[1], [0], [0], [1], [0, 0, 1, 1], [], []>} : vector<128x32xbf16>, vector<32x128xbf16>, vector<128x128xf32> -> vector<128x128xf32>
    %c0_131 = arith.constant 0 : index
    %c128_132 = arith.constant 128 : index
    %283 = vector.load %arg11[%c0_131, %c128_132] : memref<2x1024xf32, #tpu.memory_space<vmem>>, vector<1x128xf32>
    %284 = vector.broadcast %283 : vector<1x128xf32> to vector<128x128xf32>
    %285 = arith.mulf %282, %284 : vector<128x128xf32>
    %c1_133 = arith.constant 1 : index
    %c128_134 = arith.constant 128 : index
    %286 = vector.load %arg11[%c1_133, %c128_134] : memref<2x1024xf32, #tpu.memory_space<vmem>>, vector<1x128xf32>
    %287 = vector.broadcast %286 : vector<1x128xf32> to vector<128x128xf32>
    %288 = arith.addf %285, %287 : vector<128x128xf32>
    %cst_135 = arith.constant 0.000000e+00 : f32
    %289 = vector.broadcast %cst_135 : f32 to vector<128x128xf32>
    %290 = arith.maximumf %288, %289 : vector<128x128xf32>
    %291 = arith.truncf %290 : vector<128x128xf32> to vector<128x128xbf16>
    %c0_136 = arith.constant 0 : index
    %c128_137 = arith.constant 128 : index
    %292 = vector.load %arg16[%c0_136, %c128_137] : memref<128x1024xbf16, #tpu.memory_space<vmem>>, vector<128x128xbf16>
    tpu.vector_store %arg16[%c0_136, %c128_137], %291 {strides = array<i32>} : memref<128x1024xbf16, #tpu.memory_space<vmem>>, vector<128x128xbf16>,
    %c0_138 = arith.constant 0 : index
    %c256 = arith.constant 256 : index
    %293 = vector.load %arg10[%c0_138, %c256] : memref<32x1024xbf16, #tpu.memory_space<vmem>>, vector<32x128xbf16>
    %cst_139 = arith.constant dense<0.000000e+00> : vector<128x128xf32>
    %294 = tpu.matmul %268, %293, %cst_139 {dimension_numbers = #tpu.dot_dimension_numbers<[1], [0], [0], [1], [0, 0, 1, 1], [], []>} : vector<128x32xbf16>, vector<32x128xbf16>, vector<128x128xf32> -> vector<128x128xf32>
    %c0_140 = arith.constant 0 : index
    %c256_141 = arith.constant 256 : index
    %295 = vector.load %arg11[%c0_140, %c256_141] : memref<2x1024xf32, #tpu.memory_space<vmem>>, vector<1x128xf32>
    %296 = vector.broadcast %295 : vector<1x128xf32> to vector<128x128xf32>
    %297 = arith.mulf %294, %296 : vector<128x128xf32>
    %c1_142 = arith.constant 1 : index
    %c256_143 = arith.constant 256 : index
    %298 = vector.load %arg11[%c1_142, %c256_143] : memref<2x1024xf32, #tpu.memory_space<vmem>>, vector<1x128xf32>
    %299 = vector.broadcast %298 : vector<1x128xf32> to vector<128x128xf32>
    %300 = arith.addf %297, %299 : vector<128x128xf32>
    %cst_144 = arith.constant 0.000000e+00 : f32
    %301 = vector.broadcast %cst_144 : f32 to vector<128x128xf32>
    %302 = arith.maximumf %300, %301 : vector<128x128xf32>
    %303 = arith.truncf %302 : vector<128x128xf32> to vector<128x128xbf16>
    %c0_145 = arith.constant 0 : index
    %c256_146 = arith.constant 256 : index
    %304 = vector.load %arg16[%c0_145, %c256_146] : memref<128x1024xbf16, #tpu.memory_space<vmem>>, vector<128x128xbf16>
    tpu.vector_store %arg16[%c0_145, %c256_146], %303 {strides = array<i32>} : memref<128x1024xbf16, #tpu.memory_space<vmem>>, vector<128x128xbf16>,
    %c0_147 = arith.constant 0 : index
    %c384 = arith.constant 384 : index
    %305 = vector.load %arg10[%c0_147, %c384] : memref<32x1024xbf16, #tpu.memory_space<vmem>>, vector<32x128xbf16>
    %cst_148 = arith.constant dense<0.000000e+00> : vector<128x128xf32>
    %306 = tpu.matmul %268, %305, %cst_148 {dimension_numbers = #tpu.dot_dimension_numbers<[1], [0], [0], [1], [0, 0, 1, 1], [], []>} : vector<128x32xbf16>, vector<32x128xbf16>, vector<128x128xf32> -> vector<128x128xf32>
    %c0_149 = arith.constant 0 : index
    %c384_150 = arith.constant 384 : index
    %307 = vector.load %arg11[%c0_149, %c384_150] : memref<2x1024xf32, #tpu.memory_space<vmem>>, vector<1x128xf32>
    %308 = vector.broadcast %307 : vector<1x128xf32> to vector<128x128xf32>
    %309 = arith.mulf %306, %308 : vector<128x128xf32>
    %c1_151 = arith.constant 1 : index
    %c384_152 = arith.constant 384 : index
    %310 = vector.load %arg11[%c1_151, %c384_152] : memref<2x1024xf32, #tpu.memory_space<vmem>>, vector<1x128xf32>
    %311 = vector.broadcast %310 : vector<1x128xf32> to vector<128x128xf32>
    %312 = arith.addf %309, %311 : vector<128x128xf32>
    %cst_153 = arith.constant 0.000000e+00 : f32
    %313 = vector.broadcast %cst_153 : f32 to vector<128x128xf32>
    %314 = arith.maximumf %312, %313 : vector<128x128xf32>
    %315 = arith.truncf %314 : vector<128x128xf32> to vector<128x128xbf16>
    %c0_154 = arith.constant 0 : index
    %c384_155 = arith.constant 384 : index
    %316 = vector.load %arg16[%c0_154, %c384_155] : memref<128x1024xbf16, #tpu.memory_space<vmem>>, vector<128x128xbf16>
    tpu.vector_store %arg16[%c0_154, %c384_155], %315 {strides = array<i32>} : memref<128x1024xbf16, #tpu.memory_space<vmem>>, vector<128x128xbf16>,
    %c0_156 = arith.constant 0 : index
    %c512 = arith.constant 512 : index
    %317 = vector.load %arg10[%c0_156, %c512] : memref<32x1024xbf16, #tpu.memory_space<vmem>>, vector<32x128xbf16>
    %cst_157 = arith.constant dense<0.000000e+00> : vector<128x128xf32>
    %318 = tpu.matmul %268, %317, %cst_157 {dimension_numbers = #tpu.dot_dimension_numbers<[1], [0], [0], [1], [0, 0, 1, 1], [], []>} : vector<128x32xbf16>, vector<32x128xbf16>, vector<128x128xf32> -> vector<128x128xf32>
    %c0_158 = arith.constant 0 : index
    %c512_159 = arith.constant 512 : index
    %319 = vector.load %arg11[%c0_158, %c512_159] : memref<2x1024xf32, #tpu.memory_space<vmem>>, vector<1x128xf32>
    %320 = vector.broadcast %319 : vector<1x128xf32> to vector<128x128xf32>
    %321 = arith.mulf %318, %320 : vector<128x128xf32>
    %c1_160 = arith.constant 1 : index
    %c512_161 = arith.constant 512 : index
    %322 = vector.load %arg11[%c1_160, %c512_161] : memref<2x1024xf32, #tpu.memory_space<vmem>>, vector<1x128xf32>
    %323 = vector.broadcast %322 : vector<1x128xf32> to vector<128x128xf32>
    %324 = arith.addf %321, %323 : vector<128x128xf32>
    %cst_162 = arith.constant 0.000000e+00 : f32
    %325 = vector.broadcast %cst_162 : f32 to vector<128x128xf32>
    %326 = arith.maximumf %324, %325 : vector<128x128xf32>
    %327 = arith.truncf %326 : vector<128x128xf32> to vector<128x128xbf16>
    %c0_163 = arith.constant 0 : index
    %c512_164 = arith.constant 512 : index
    %328 = vector.load %arg16[%c0_163, %c512_164] : memref<128x1024xbf16, #tpu.memory_space<vmem>>, vector<128x128xbf16>
    tpu.vector_store %arg16[%c0_163, %c512_164], %327 {strides = array<i32>} : memref<128x1024xbf16, #tpu.memory_space<vmem>>, vector<128x128xbf16>,
    %c0_165 = arith.constant 0 : index
    %c640 = arith.constant 640 : index
    %329 = vector.load %arg10[%c0_165, %c640] : memref<32x1024xbf16, #tpu.memory_space<vmem>>, vector<32x128xbf16>
    %cst_166 = arith.constant dense<0.000000e+00> : vector<128x128xf32>
    %330 = tpu.matmul %268, %329, %cst_166 {dimension_numbers = #tpu.dot_dimension_numbers<[1], [0], [0], [1], [0, 0, 1, 1], [], []>} : vector<128x32xbf16>, vector<32x128xbf16>, vector<128x128xf32> -> vector<128x128xf32>
    %c0_167 = arith.constant 0 : index
    %c640_168 = arith.constant 640 : index
    %331 = vector.load %arg11[%c0_167, %c640_168] : memref<2x1024xf32, #tpu.memory_space<vmem>>, vector<1x128xf32>
    %332 = vector.broadcast %331 : vector<1x128xf32> to vector<128x128xf32>
    %333 = arith.mulf %330, %332 : vector<128x128xf32>
    %c1_169 = arith.constant 1 : index
    %c640_170 = arith.constant 640 : index
    %334 = vector.load %arg11[%c1_169, %c640_170] : memref<2x1024xf32, #tpu.memory_space<vmem>>, vector<1x128xf32>
    %335 = vector.broadcast %334 : vector<1x128xf32> to vector<128x128xf32>
    %336 = arith.addf %333, %335 : vector<128x128xf32>
    %cst_171 = arith.constant 0.000000e+00 : f32
    %337 = vector.broadcast %cst_171 : f32 to vector<128x128xf32>
    %338 = arith.maximumf %336, %337 : vector<128x128xf32>
    %339 = arith.truncf %338 : vector<128x128xf32> to vector<128x128xbf16>
    %c0_172 = arith.constant 0 : index
    %c640_173 = arith.constant 640 : index
    %340 = vector.load %arg16[%c0_172, %c640_173] : memref<128x1024xbf16, #tpu.memory_space<vmem>>, vector<128x128xbf16>
    tpu.vector_store %arg16[%c0_172, %c640_173], %339 {strides = array<i32>} : memref<128x1024xbf16, #tpu.memory_space<vmem>>, vector<128x128xbf16>,
    %c0_174 = arith.constant 0 : index
    %c768 = arith.constant 768 : index
    %341 = vector.load %arg10[%c0_174, %c768] : memref<32x1024xbf16, #tpu.memory_space<vmem>>, vector<32x128xbf16>
    %cst_175 = arith.constant dense<0.000000e+00> : vector<128x128xf32>
    %342 = tpu.matmul %268, %341, %cst_175 {dimension_numbers = #tpu.dot_dimension_numbers<[1], [0], [0], [1], [0, 0, 1, 1], [], []>} : vector<128x32xbf16>, vector<32x128xbf16>, vector<128x128xf32> -> vector<128x128xf32>
    %c0_176 = arith.constant 0 : index
    %c768_177 = arith.constant 768 : index
    %343 = vector.load %arg11[%c0_176, %c768_177] : memref<2x1024xf32, #tpu.memory_space<vmem>>, vector<1x128xf32>
    %344 = vector.broadcast %343 : vector<1x128xf32> to vector<128x128xf32>
    %345 = arith.mulf %342, %344 : vector<128x128xf32>
    %c1_178 = arith.constant 1 : index
    %c768_179 = arith.constant 768 : index
    %346 = vector.load %arg11[%c1_178, %c768_179] : memref<2x1024xf32, #tpu.memory_space<vmem>>, vector<1x128xf32>
    %347 = vector.broadcast %346 : vector<1x128xf32> to vector<128x128xf32>
    %348 = arith.addf %345, %347 : vector<128x128xf32>
    %cst_180 = arith.constant 0.000000e+00 : f32
    %349 = vector.broadcast %cst_180 : f32 to vector<128x128xf32>
    %350 = arith.maximumf %348, %349 : vector<128x128xf32>
    %351 = arith.truncf %350 : vector<128x128xf32> to vector<128x128xbf16>
    %c0_181 = arith.constant 0 : index
    %c768_182 = arith.constant 768 : index
    %352 = vector.load %arg16[%c0_181, %c768_182] : memref<128x1024xbf16, #tpu.memory_space<vmem>>, vector<128x128xbf16>
    tpu.vector_store %arg16[%c0_181, %c768_182], %351 {strides = array<i32>} : memref<128x1024xbf16, #tpu.memory_space<vmem>>, vector<128x128xbf16>,
    %c0_183 = arith.constant 0 : index
    %c896 = arith.constant 896 : index
    %353 = vector.load %arg10[%c0_183, %c896] : memref<32x1024xbf16, #tpu.memory_space<vmem>>, vector<32x128xbf16>
    %cst_184 = arith.constant dense<0.000000e+00> : vector<128x128xf32>
    %354 = tpu.matmul %268, %353, %cst_184 {dimension_numbers = #tpu.dot_dimension_numbers<[1], [0], [0], [1], [0, 0, 1, 1], [], []>} : vector<128x32xbf16>, vector<32x128xbf16>, vector<128x128xf32> -> vector<128x128xf32>
    %c0_185 = arith.constant 0 : index
    %c896_186 = arith.constant 896 : index
    %355 = vector.load %arg11[%c0_185, %c896_186] : memref<2x1024xf32, #tpu.memory_space<vmem>>, vector<1x128xf32>
    %356 = vector.broadcast %355 : vector<1x128xf32> to vector<128x128xf32>
    %357 = arith.mulf %354, %356 : vector<128x128xf32>
    %c1_187 = arith.constant 1 : index
    %c896_188 = arith.constant 896 : index
    %358 = vector.load %arg11[%c1_187, %c896_188] : memref<2x1024xf32, #tpu.memory_space<vmem>>, vector<1x128xf32>
    %359 = vector.broadcast %358 : vector<1x128xf32> to vector<128x128xf32>
    %360 = arith.addf %357, %359 : vector<128x128xf32>
    %cst_189 = arith.constant 0.000000e+00 : f32
    %361 = vector.broadcast %cst_189 : f32 to vector<128x128xf32>
    %362 = arith.maximumf %360, %361 : vector<128x128xf32>
    %363 = arith.truncf %362 : vector<128x128xf32> to vector<128x128xbf16>
    %c0_190 = arith.constant 0 : index
    %c896_191 = arith.constant 896 : index
    %364 = vector.load %arg16[%c0_190, %c896_191] : memref<128x1024xbf16, #tpu.memory_space<vmem>>, vector<128x128xbf16>
    tpu.vector_store %arg16[%c0_190, %c896_191], %363 {strides = array<i32>} : memref<128x1024xbf16, #tpu.memory_space<vmem>>, vector<128x128xbf16>,
    %cst_192 = arith.constant 0.000000e+00 : f32
    %365 = vector.broadcast %cst_192 : f32 to vector<128x128xf32>
    %c0_193 = arith.constant 0 : index
    %c0_194 = arith.constant 0 : index
    %366 = vector.load %arg16[%c0_193, %c0_194] : memref<128x1024xbf16, #tpu.memory_space<vmem>>, vector<128x128xbf16>
    %c0_195 = arith.constant 0 : index
    %c0_196 = arith.constant 0 : index
    %367 = vector.load %arg12[%c0_195, %c0_196] : memref<1024x256xbf16, #tpu.memory_space<vmem>>, vector<128x128xbf16>
    %cst_197 = arith.constant dense<0.000000e+00> : vector<128x128xf32>
    %368 = tpu.matmul %366, %367, %cst_197 {dimension_numbers = #tpu.dot_dimension_numbers<[1], [0], [0], [1], [0, 0, 1, 1], [], []>} : vector<128x128xbf16>, vector<128x128xbf16>, vector<128x128xf32> -> vector<128x128xf32>
    %369 = arith.addf %365, %368 : vector<128x128xf32>
    %c0_198 = arith.constant 0 : index
    %c128_199 = arith.constant 128 : index
    %370 = vector.load %arg16[%c0_198, %c128_199] : memref<128x1024xbf16, #tpu.memory_space<vmem>>, vector<128x128xbf16>
    %c128_200 = arith.constant 128 : index
    %c0_201 = arith.constant 0 : index
    %371 = vector.load %arg12[%c128_200, %c0_201] : memref<1024x256xbf16, #tpu.memory_space<vmem>>, vector<128x128xbf16>
    %cst_202 = arith.constant dense<0.000000e+00> : vector<128x128xf32>
    %372 = tpu.matmul %370, %371, %cst_202 {dimension_numbers = #tpu.dot_dimension_numbers<[1], [0], [0], [1], [0, 0, 1, 1], [], []>} : vector<128x128xbf16>, vector<128x128xbf16>, vector<128x128xf32> -> vector<128x128xf32>
    %373 = arith.addf %369, %372 : vector<128x128xf32>
    %c0_203 = arith.constant 0 : index
    %c256_204 = arith.constant 256 : index
    %374 = vector.load %arg16[%c0_203, %c256_204] : memref<128x1024xbf16, #tpu.memory_space<vmem>>, vector<128x128xbf16>
    %c256_205 = arith.constant 256 : index
    %c0_206 = arith.constant 0 : index
    %375 = vector.load %arg12[%c256_205, %c0_206] : memref<1024x256xbf16, #tpu.memory_space<vmem>>, vector<128x128xbf16>
    %cst_207 = arith.constant dense<0.000000e+00> : vector<128x128xf32>
    %376 = tpu.matmul %374, %375, %cst_207 {dimension_numbers = #tpu.dot_dimension_numbers<[1], [0], [0], [1], [0, 0, 1, 1], [], []>} : vector<128x128xbf16>, vector<128x128xbf16>, vector<128x128xf32> -> vector<128x128xf32>
    %377 = arith.addf %373, %376 : vector<128x128xf32>
    %c0_208 = arith.constant 0 : index
    %c384_209 = arith.constant 384 : index
    %378 = vector.load %arg16[%c0_208, %c384_209] : memref<128x1024xbf16, #tpu.memory_space<vmem>>, vector<128x128xbf16>
    %c384_210 = arith.constant 384 : index
    %c0_211 = arith.constant 0 : index
    %379 = vector.load %arg12[%c384_210, %c0_211] : memref<1024x256xbf16, #tpu.memory_space<vmem>>, vector<128x128xbf16>
    %cst_212 = arith.constant dense<0.000000e+00> : vector<128x128xf32>
    %380 = tpu.matmul %378, %379, %cst_212 {dimension_numbers = #tpu.dot_dimension_numbers<[1], [0], [0], [1], [0, 0, 1, 1], [], []>} : vector<128x128xbf16>, vector<128x128xbf16>, vector<128x128xf32> -> vector<128x128xf32>
    %381 = arith.addf %377, %380 : vector<128x128xf32>
    %c0_213 = arith.constant 0 : index
    %c512_214 = arith.constant 512 : index
    %382 = vector.load %arg16[%c0_213, %c512_214] : memref<128x1024xbf16, #tpu.memory_space<vmem>>, vector<128x128xbf16>
    %c512_215 = arith.constant 512 : index
    %c0_216 = arith.constant 0 : index
    %383 = vector.load %arg12[%c512_215, %c0_216] : memref<1024x256xbf16, #tpu.memory_space<vmem>>, vector<128x128xbf16>
    %cst_217 = arith.constant dense<0.000000e+00> : vector<128x128xf32>
    %384 = tpu.matmul %382, %383, %cst_217 {dimension_numbers = #tpu.dot_dimension_numbers<[1], [0], [0], [1], [0, 0, 1, 1], [], []>} : vector<128x128xbf16>, vector<128x128xbf16>, vector<128x128xf32> -> vector<128x128xf32>
    %385 = arith.addf %381, %384 : vector<128x128xf32>
    %c0_218 = arith.constant 0 : index
    %c640_219 = arith.constant 640 : index
    %386 = vector.load %arg16[%c0_218, %c640_219] : memref<128x1024xbf16, #tpu.memory_space<vmem>>, vector<128x128xbf16>
    %c640_220 = arith.constant 640 : index
    %c0_221 = arith.constant 0 : index
    %387 = vector.load %arg12[%c640_220, %c0_221] : memref<1024x256xbf16, #tpu.memory_space<vmem>>, vector<128x128xbf16>
    %cst_222 = arith.constant dense<0.000000e+00> : vector<128x128xf32>
    %388 = tpu.matmul %386, %387, %cst_222 {dimension_numbers = #tpu.dot_dimension_numbers<[1], [0], [0], [1], [0, 0, 1, 1], [], []>} : vector<128x128xbf16>, vector<128x128xbf16>, vector<128x128xf32> -> vector<128x128xf32>
    %389 = arith.addf %385, %388 : vector<128x128xf32>
    %c0_223 = arith.constant 0 : index
    %c768_224 = arith.constant 768 : index
    %390 = vector.load %arg16[%c0_223, %c768_224] : memref<128x1024xbf16, #tpu.memory_space<vmem>>, vector<128x128xbf16>
    %c768_225 = arith.constant 768 : index
    %c0_226 = arith.constant 0 : index
    %391 = vector.load %arg12[%c768_225, %c0_226] : memref<1024x256xbf16, #tpu.memory_space<vmem>>, vector<128x128xbf16>
    %cst_227 = arith.constant dense<0.000000e+00> : vector<128x128xf32>
    %392 = tpu.matmul %390, %391, %cst_227 {dimension_numbers = #tpu.dot_dimension_numbers<[1], [0], [0], [1], [0, 0, 1, 1], [], []>} : vector<128x128xbf16>, vector<128x128xbf16>, vector<128x128xf32> -> vector<128x128xf32>
    %393 = arith.addf %389, %392 : vector<128x128xf32>
    %c0_228 = arith.constant 0 : index
    %c896_229 = arith.constant 896 : index
    %394 = vector.load %arg16[%c0_228, %c896_229] : memref<128x1024xbf16, #tpu.memory_space<vmem>>, vector<128x128xbf16>
    %c896_230 = arith.constant 896 : index
    %c0_231 = arith.constant 0 : index
    %395 = vector.load %arg12[%c896_230, %c0_231] : memref<1024x256xbf16, #tpu.memory_space<vmem>>, vector<128x128xbf16>
    %cst_232 = arith.constant dense<0.000000e+00> : vector<128x128xf32>
    %396 = tpu.matmul %394, %395, %cst_232 {dimension_numbers = #tpu.dot_dimension_numbers<[1], [0], [0], [1], [0, 0, 1, 1], [], []>} : vector<128x128xbf16>, vector<128x128xbf16>, vector<128x128xf32> -> vector<128x128xf32>
    %397 = arith.addf %393, %396 : vector<128x128xf32>
    %c0_233 = arith.constant 0 : index
    %c0_234 = arith.constant 0 : index
    %398 = vector.load %arg13[%c0_233, %c0_234] : memref<1x256xf32, #tpu.memory_space<vmem>>, vector<1x128xf32>
    %399 = vector.broadcast %398 : vector<1x128xf32> to vector<128x128xf32>
    %400 = arith.addf %397, %399 : vector<128x128xf32>
    %c0_235 = arith.constant 0 : index
    %c0_236 = arith.constant 0 : index
    %401 = vector.load %arg14[%c0_235, %c0_236] : memref<128x256xf32, #tpu.memory_space<vmem>>, vector<128x128xf32>
    tpu.vector_store %arg14[%c0_235, %c0_236], %400 {strides = array<i32>} : memref<128x256xf32, #tpu.memory_space<vmem>>, vector<128x128xf32>,
    %cst_237 = arith.constant 0.000000e+00 : f32
    %402 = vector.broadcast %cst_237 : f32 to vector<128x128xf32>
    %c0_238 = arith.constant 0 : index
    %c0_239 = arith.constant 0 : index
    %403 = vector.load %arg16[%c0_238, %c0_239] : memref<128x1024xbf16, #tpu.memory_space<vmem>>, vector<128x128xbf16>
    %c0_240 = arith.constant 0 : index
    %c128_241 = arith.constant 128 : index
    %404 = vector.load %arg12[%c0_240, %c128_241] : memref<1024x256xbf16, #tpu.memory_space<vmem>>, vector<128x128xbf16>
    %cst_242 = arith.constant dense<0.000000e+00> : vector<128x128xf32>
    %405 = tpu.matmul %403, %404, %cst_242 {dimension_numbers = #tpu.dot_dimension_numbers<[1], [0], [0], [1], [0, 0, 1, 1], [], []>} : vector<128x128xbf16>, vector<128x128xbf16>, vector<128x128xf32> -> vector<128x128xf32>
    %406 = arith.addf %402, %405 : vector<128x128xf32>
    %c0_243 = arith.constant 0 : index
    %c128_244 = arith.constant 128 : index
    %407 = vector.load %arg16[%c0_243, %c128_244] : memref<128x1024xbf16, #tpu.memory_space<vmem>>, vector<128x128xbf16>
    %c128_245 = arith.constant 128 : index
    %c128_246 = arith.constant 128 : index
    %408 = vector.load %arg12[%c128_245, %c128_246] : memref<1024x256xbf16, #tpu.memory_space<vmem>>, vector<128x128xbf16>
    %cst_247 = arith.constant dense<0.000000e+00> : vector<128x128xf32>
    %409 = tpu.matmul %407, %408, %cst_247 {dimension_numbers = #tpu.dot_dimension_numbers<[1], [0], [0], [1], [0, 0, 1, 1], [], []>} : vector<128x128xbf16>, vector<128x128xbf16>, vector<128x128xf32> -> vector<128x128xf32>
    %410 = arith.addf %406, %409 : vector<128x128xf32>
    %c0_248 = arith.constant 0 : index
    %c256_249 = arith.constant 256 : index
    %411 = vector.load %arg16[%c0_248, %c256_249] : memref<128x1024xbf16, #tpu.memory_space<vmem>>, vector<128x128xbf16>
    %c256_250 = arith.constant 256 : index
    %c128_251 = arith.constant 128 : index
    %412 = vector.load %arg12[%c256_250, %c128_251] : memref<1024x256xbf16, #tpu.memory_space<vmem>>, vector<128x128xbf16>
    %cst_252 = arith.constant dense<0.000000e+00> : vector<128x128xf32>
    %413 = tpu.matmul %411, %412, %cst_252 {dimension_numbers = #tpu.dot_dimension_numbers<[1], [0], [0], [1], [0, 0, 1, 1], [], []>} : vector<128x128xbf16>, vector<128x128xbf16>, vector<128x128xf32> -> vector<128x128xf32>
    %414 = arith.addf %410, %413 : vector<128x128xf32>
    %c0_253 = arith.constant 0 : index
    %c384_254 = arith.constant 384 : index
    %415 = vector.load %arg16[%c0_253, %c384_254] : memref<128x1024xbf16, #tpu.memory_space<vmem>>, vector<128x128xbf16>
    %c384_255 = arith.constant 384 : index
    %c128_256 = arith.constant 128 : index
    %416 = vector.load %arg12[%c384_255, %c128_256] : memref<1024x256xbf16, #tpu.memory_space<vmem>>, vector<128x128xbf16>
    %cst_257 = arith.constant dense<0.000000e+00> : vector<128x128xf32>
    %417 = tpu.matmul %415, %416, %cst_257 {dimension_numbers = #tpu.dot_dimension_numbers<[1], [0], [0], [1], [0, 0, 1, 1], [], []>} : vector<128x128xbf16>, vector<128x128xbf16>, vector<128x128xf32> -> vector<128x128xf32>
    %418 = arith.addf %414, %417 : vector<128x128xf32>
    %c0_258 = arith.constant 0 : index
    %c512_259 = arith.constant 512 : index
    %419 = vector.load %arg16[%c0_258, %c512_259] : memref<128x1024xbf16, #tpu.memory_space<vmem>>, vector<128x128xbf16>
    %c512_260 = arith.constant 512 : index
    %c128_261 = arith.constant 128 : index
    %420 = vector.load %arg12[%c512_260, %c128_261] : memref<1024x256xbf16, #tpu.memory_space<vmem>>, vector<128x128xbf16>
    %cst_262 = arith.constant dense<0.000000e+00> : vector<128x128xf32>
    %421 = tpu.matmul %419, %420, %cst_262 {dimension_numbers = #tpu.dot_dimension_numbers<[1], [0], [0], [1], [0, 0, 1, 1], [], []>} : vector<128x128xbf16>, vector<128x128xbf16>, vector<128x128xf32> -> vector<128x128xf32>
    %422 = arith.addf %418, %421 : vector<128x128xf32>
    %c0_263 = arith.constant 0 : index
    %c640_264 = arith.constant 640 : index
    %423 = vector.load %arg16[%c0_263, %c640_264] : memref<128x1024xbf16, #tpu.memory_space<vmem>>, vector<128x128xbf16>
    %c640_265 = arith.constant 640 : index
    %c128_266 = arith.constant 128 : index
    %424 = vector.load %arg12[%c640_265, %c128_266] : memref<1024x256xbf16, #tpu.memory_space<vmem>>, vector<128x128xbf16>
    %cst_267 = arith.constant dense<0.000000e+00> : vector<128x128xf32>
    %425 = tpu.matmul %423, %424, %cst_267 {dimension_numbers = #tpu.dot_dimension_numbers<[1], [0], [0], [1], [0, 0, 1, 1], [], []>} : vector<128x128xbf16>, vector<128x128xbf16>, vector<128x128xf32> -> vector<128x128xf32>
    %426 = arith.addf %422, %425 : vector<128x128xf32>
    %c0_268 = arith.constant 0 : index
    %c768_269 = arith.constant 768 : index
    %427 = vector.load %arg16[%c0_268, %c768_269] : memref<128x1024xbf16, #tpu.memory_space<vmem>>, vector<128x128xbf16>
    %c768_270 = arith.constant 768 : index
    %c128_271 = arith.constant 128 : index
    %428 = vector.load %arg12[%c768_270, %c128_271] : memref<1024x256xbf16, #tpu.memory_space<vmem>>, vector<128x128xbf16>
    %cst_272 = arith.constant dense<0.000000e+00> : vector<128x128xf32>
    %429 = tpu.matmul %427, %428, %cst_272 {dimension_numbers = #tpu.dot_dimension_numbers<[1], [0], [0], [1], [0, 0, 1, 1], [], []>} : vector<128x128xbf16>, vector<128x128xbf16>, vector<128x128xf32> -> vector<128x128xf32>
    %430 = arith.addf %426, %429 : vector<128x128xf32>
    %c0_273 = arith.constant 0 : index
    %c896_274 = arith.constant 896 : index
    %431 = vector.load %arg16[%c0_273, %c896_274] : memref<128x1024xbf16, #tpu.memory_space<vmem>>, vector<128x128xbf16>
    %c896_275 = arith.constant 896 : index
    %c128_276 = arith.constant 128 : index
    %432 = vector.load %arg12[%c896_275, %c128_276] : memref<1024x256xbf16, #tpu.memory_space<vmem>>, vector<128x128xbf16>
    %cst_277 = arith.constant dense<0.000000e+00> : vector<128x128xf32>
    %433 = tpu.matmul %431, %432, %cst_277 {dimension_numbers = #tpu.dot_dimension_numbers<[1], [0], [0], [1], [0, 0, 1, 1], [], []>} : vector<128x128xbf16>, vector<128x128xbf16>, vector<128x128xf32> -> vector<128x128xf32>
    %434 = arith.addf %430, %433 : vector<128x128xf32>
    %c0_278 = arith.constant 0 : index
    %c128_279 = arith.constant 128 : index
    %435 = vector.load %arg13[%c0_278, %c128_279] : memref<1x256xf32, #tpu.memory_space<vmem>>, vector<1x128xf32>
    %436 = vector.broadcast %435 : vector<1x128xf32> to vector<128x128xf32>
    %437 = arith.addf %434, %436 : vector<128x128xf32>
    %c0_280 = arith.constant 0 : index
    %c128_281 = arith.constant 128 : index
    %438 = vector.load %arg14[%c0_280, %c128_281] : memref<128x256xf32, #tpu.memory_space<vmem>>, vector<128x128xf32>
    tpu.vector_store %arg14[%c0_280, %c128_281], %437 {strides = array<i32>} : memref<128x256xf32, #tpu.memory_space<vmem>>, vector<128x128xf32>,
    return
  }
  func.func @transform_0(%arg0: i32) -> (i32, i32) {
    %c0_i32 = arith.constant 0 : i32
    %c0_i32_0 = arith.constant 0 : i32
    return %arg0, %c0_i32 : i32, i32
  }
  func.func @transform_1(%arg0: i32) -> (i32, i32) {
    %c0_i32 = arith.constant 0 : i32
    %c0_i32_0 = arith.constant 0 : i32
    %c0_i32_1 = arith.constant 0 : i32
    return %c0_i32, %c0_i32_0 : i32, i32
  }
  func.func @transform_2(%arg0: i32) -> (i32, i32) {
    %c0_i32 = arith.constant 0 : i32
    %c0_i32_0 = arith.constant 0 : i32
    %c0_i32_1 = arith.constant 0 : i32
    return %c0_i32, %c0_i32_0 : i32, i32
  }
  func.func @transform_3(%arg0: i32) -> (i32, i32, i32) {
    %c0_i32 = arith.constant 0 : i32
    %c0_i32_0 = arith.constant 0 : i32
    %c0_i32_1 = arith.constant 0 : i32
    %c0_i32_2 = arith.constant 0 : i32
    return %c0_i32, %c0_i32_0, %c0_i32_1 : i32, i32, i32
  }
  func.func @transform_4(%arg0: i32) -> (i32, i32, i32) {
    %c0_i32 = arith.constant 0 : i32
    %c0_i32_0 = arith.constant 0 : i32
    %c0_i32_1 = arith.constant 0 : i32
    %c0_i32_2 = arith.constant 0 : i32
    return %c0_i32, %c0_i32_0, %c0_i32_1 : i32, i32, i32
  }
  func.func @transform_5(%arg0: i32) -> (i32, i32, i32, i32) {
    %c0_i32 = arith.constant 0 : i32
    %c0_i32_0 = arith.constant 0 : i32
    %c0_i32_1 = arith.constant 0 : i32
    %c0_i32_2 = arith.constant 0 : i32
    %c0_i32_3 = arith.constant 0 : i32
    return %c0_i32, %c0_i32_0, %c0_i32_1, %c0_i32_2 : i32, i32, i32, i32
  }
  func.func @transform_6(%arg0: i32) -> (i32, i32, i32) {
    %c0_i32 = arith.constant 0 : i32
    %c0_i32_0 = arith.constant 0 : i32
    %c0_i32_1 = arith.constant 0 : i32
    %c0_i32_2 = arith.constant 0 : i32
    return %c0_i32, %c0_i32_0, %c0_i32_1 : i32, i32, i32
  }
  func.func @transform_7(%arg0: i32) -> (i32, i32, i32) {
    %c0_i32 = arith.constant 0 : i32
    %c0_i32_0 = arith.constant 0 : i32
    %c0_i32_1 = arith.constant 0 : i32
    %c0_i32_2 = arith.constant 0 : i32
    return %c0_i32, %c0_i32_0, %c0_i32_1 : i32, i32, i32
  }
  func.func @transform_8(%arg0: i32) -> (i32, i32, i32) {
    %c0_i32 = arith.constant 0 : i32
    %c0_i32_0 = arith.constant 0 : i32
    %c0_i32_1 = arith.constant 0 : i32
    %c0_i32_2 = arith.constant 0 : i32
    return %c0_i32, %c0_i32_0, %c0_i32_1 : i32, i32, i32
  }
  func.func @transform_9(%arg0: i32) -> (i32, i32) {
    %c0_i32 = arith.constant 0 : i32
    %c0_i32_0 = arith.constant 0 : i32
    %c0_i32_1 = arith.constant 0 : i32
    return %c0_i32, %c0_i32_0 : i32, i32
  }
  func.func @transform_10(%arg0: i32) -> (i32, i32) {
    %c0_i32 = arith.constant 0 : i32
    %c0_i32_0 = arith.constant 0 : i32
    %c0_i32_1 = arith.constant 0 : i32
    return %c0_i32, %c0_i32_0 : i32, i32
  }
  func.func @transform_11(%arg0: i32) -> (i32, i32) {
    %c0_i32 = arith.constant 0 : i32
    %c0_i32_0 = arith.constant 0 : i32
    %c0_i32_1 = arith.constant 0 : i32
    return %c0_i32, %c0_i32_0 : i32, i32
  }
  func.func @transform_12(%arg0: i32) -> (i32, i32) {
    %c0_i32 = arith.constant 0 : i32
    %c0_i32_0 = arith.constant 0 : i32
    %c0_i32_1 = arith.constant 0 : i32
    return %c0_i32, %c0_i32_0 : i32, i32
  }
  func.func @transform_13(%arg0: i32) -> (i32, i32) {
    %c0_i32 = arith.constant 0 : i32
    %c0_i32_0 = arith.constant 0 : i32
    return %arg0, %c0_i32 : i32, i32
  }
}

</mosaic_0001>

<bundles_post_ra>
// kernel: tpu_custom_call.1
= control target key start
LH: loop header
LB: loop body
LE: loop exit
PB: predicated region body
PF: predicated region fallthrough
CT: control target
= control target key end

     0   :  { %18 = vsyncpa [#allocation5], 0  ;;  %s15161_s0 = inlined_call_operand.vmem [shape: bf16[128,24], index: 0, kind: input, shape index: {}]   ;;  %s15162_s1 = inlined_call_operand.vmem [shape: bf16[24,32], index: 1, kind: input, shape index: {}]   ;;  %s15163_s2 = inlined_call_operand.hbm [shape: f32[2,32], index: 2, kind: input, shape index: {}]   ;;  %s15164_s3 = inlined_call_operand.vmem [shape: bf16[2,32,16], index: 3, kind: input, shape index: {}]   ;;  %s15165_s4 = inlined_call_operand.hbm [shape: f32[2,2,16], index: 4, kind: input, shape index: {}]   ;;  %s15166_s5 = inlined_call_operand.hbm [shape: bf16[2,5,16,16], index: 5, kind: input, shape index: {}]   ;;  %s15167_s6 = inlined_call_operand.hbm [shape: f32[2,2,16], index: 6, kind: input, shape index: {}]   ;;  %s15168_s7 = inlined_call_operand.hbm [shape: bf16[2,16,32], index: 7, kind: input, shape index: {}]   ;;  %s15169_s8 = inlined_call_operand.hbm [shape: f32[2,2,32], index: 8, kind: input, shape index: {}]   ;;  %s15170_s9 = inlined_call_operand.vmem [shape: bf16[32,1024], index: 9, kind: input, shape index: {}]   ;;  %s15171_s10 = inlined_call_operand.hbm [shape: f32[2,1024], index: 10, kind: input, shape index: {}]   ;;  %s15172_s11 = inlined_call_operand.hbm [shape: bf16[1024,256], index: 11, kind: input, shape index: {}]   ;;  %s15173_s12 = inlined_call_operand.vmem [shape: f32[1,256], index: 12, kind: input, shape index: {}]   ;;  %s15174_s13 = inlined_call_operand.hbm [shape: f32[128,256], index: 13, kind: output, shape index: {}]  }
   0x1   :  { %19 = vsyncpa [#allocation8], 0 }
   0x2   :  { %20 = vsyncpa [#allocation11], 0 }
   0x3   :  { %21 = vsyncpa [#allocation14], 0 }
   0x4   :  { %22 = vsyncpa [#allocation17], 0 }
   0x5   :  { %23 = vsyncpa [#allocation6], 0  ;;  %s12423_s25 = smov [#allocation7]  }
   0x6   :  { %s45_s26 = sshll.u32 %s12423_s25, 4  ;;  %s46_s26 = int_to_ptr.vmem [resolvable:$true] %s45_s26 }
   0x7   :  { %s12239_s27 = scalar_lea.vmem %s46_s26, 64  ;;  %p12244_p1 = scmp.lt.s32.totalorder %s46_s26, %s46_s26 }
   0x8   :  { %p12240_p0 = scmp.ne.s32.totalorder %s46_s26, %s12239_s27  ;;  %p12245_p2 = scmp.lt.s32.totalorder %s12239_s27, %s12239_s27 }
   0xa   :  { %p12246_p3 = por %p12245_p2, %p12244_p1 }
   0xc   :  { %p12247_p4 = pnand %p12246_p3, %p12240_p0 }
   0xe   :  { %12250 = shalt.err (!%p12247_p4)
}
   0xf   :  { %s12424_s28 = smov 32   ;;  %s12425_s29 = smov 2  }
  0x10   :  { %51 = dma.hbm_to_vmem [thread:$0]  %s15165_s4, 64, %s46_s26, [#allocation8], %s12424_s28, %s12424_s28, %s12425_s29  }
  0x11   :  { %s12426_s15 = smov [#allocation10]   ;;  %s12427_s17 = smov [#allocation13]  }
  0x12   :  { %s69_s16 = sshll.u32 %s12426_s15, 4  ;;  %s93_s18 = sshll.u32 %s12427_s17, 4  ;;  %s70_s16 = int_to_ptr.vmem [resolvable:$true] %s69_s16  ;;  %s94_s18 = int_to_ptr.vmem [resolvable:$true] %s93_s18 }
  0x13   :  { %s12259_s19 = scalar_lea.vmem %s70_s16, 64  ;;  %p12264_p6 = scmp.lt.s32.totalorder %s70_s16, %s70_s16 }
  0x14   :  { %p12260_p5 = scmp.ne.s32.totalorder %s70_s16, %s12259_s19  ;;  %p12265_p7 = scmp.lt.s32.totalorder %s12259_s19, %s12259_s19 }
  0x16   :  { %p12266_p8 = por %p12265_p7, %p12264_p6 }
  0x18   :  { %p12267_p9 = pnand %p12266_p8, %p12260_p5 }
  0x1a   :  { %12270 = shalt.err (!%p12267_p9)
}
  0x1b   :  { %75 = dma.hbm_to_vmem [thread:$0]  %s15167_s6, 64, %s70_s16, [#allocation11], %s12424_s28, %s12424_s28, %s12425_s29  }
  0x1c   :  { %s12279_s22 = scalar_lea.vmem %s94_s18, 64  ;;  %p12284_p11 = scmp.lt.s32.totalorder %s94_s18, %s94_s18 }
  0x1d   :  { %p12280_p10 = scmp.ne.s32.totalorder %s94_s18, %s12279_s22  ;;  %p12285_p12 = scmp.lt.s32.totalorder %s12279_s22, %s12279_s22 }
  0x1f   :  { %p12286_p13 = por %p12285_p12, %p12284_p11 }
  0x21   :  { %p12287_p0 = pnand %p12286_p13, %p12280_p10 }
  0x23   :  { %12290 = shalt.err (!%p12287_p0)
}
  0x24   :  { %99 = dma.hbm_to_vmem [thread:$0]  %s15169_s8, 64, %s94_s18, [#allocation14], %s12424_s28, %s12424_s28, %s12425_s29  }
  0x25   :  { %s12428_s24 = smov [#allocation4]   ;;  %s12429_s26 = smov [#allocation9]  }
  0x26   :  { %s34_s25 = sshll.u32 %s12428_s24, 4  ;;  %s57_s27 = sshll.u32 %s12429_s26, 4  ;;  %s35_s25 = int_to_ptr.vmem [resolvable:$true] %s34_s25  ;;  %s58_s27 = int_to_ptr.vmem [resolvable:$true] %s57_s27 }
  0x27   :  { %s12299_s30 = scalar_lea.vmem %s35_s25, 32  ;;  %p12304_p2 = scmp.lt.s32.totalorder %s35_s25, %s35_s25 }
  0x28   :  { %p12300_p1 = scmp.ne.s32.totalorder %s35_s25, %s12299_s30  ;;  %p12305_p3 = scmp.lt.s32.totalorder %s12299_s30, %s12299_s30 }
  0x2a   :  { %p12306_p4 = por %p12305_p3, %p12304_p2 }
  0x2c   :  { %p12307_p5 = pnand %p12306_p4, %p12300_p1 }
  0x2e   :  { %12310 = shalt.err (!%p12307_p5)
}
  0x2f   :  { %37 = dma.hbm_to_vmem [thread:$0]  %s15163_s2, 32, %s35_s25, [#allocation5]  }
  0x30   :  { %s12319_s15 = scalar_lea.vmem %s58_s27, 1280  ;;  %p12324_p7 = scmp.lt.s32.totalorder %s58_s27, %s58_s27 }
  0x31   :  { %p12320_p6 = scmp.ne.s32.totalorder %s58_s27, %s12319_s15  ;;  %p12325_p8 = scmp.lt.s32.totalorder %s12319_s15, %s12319_s15 }
  0x33   :  { %p12326_p9 = por %p12325_p8, %p12324_p7 }
  0x35   :  { %p12327_p10 = pnand %p12326_p9, %p12320_p6 }
  0x37   :  { %12330 = shalt.err (!%p12327_p10)
}
  0x38   :  { %s12430_s8 = smov 64   ;;  %s12431_s28 = smov 4  }
  0x39   :  { %63 = dma.hbm_to_vmem [thread:$0]  %s15166_s5, 1280, %s58_s27, [#allocation8], %s12430_s8, %s12430_s8, %s12431_s28  }
  0x3a   :  { %s12432_s17 = smov [#allocation12]   ;;  %s12433_s19 = smov [#allocation15]  }
  0x3b   :  { %s81_s18 = sshll.u32 %s12432_s17, 4  ;;  %s108_s20 = sshll.u32 %s12433_s19, 4  ;;  %s82_s18 = int_to_ptr.vmem [resolvable:$true] %s81_s18  ;;  %s109_s20 = int_to_ptr.vmem [resolvable:$true] %s108_s20 }
  0x3c   :  { %s12339_s2 = scalar_lea.vmem %s82_s18, 256  ;;  %p12344_p12 = scmp.lt.s32.totalorder %s82_s18, %s82_s18 }
  0x3d   :  { %p12340_p11 = scmp.ne.s32.totalorder %s82_s18, %s12339_s2  ;;  %p12345_p13 = scmp.lt.s32.totalorder %s12339_s2, %s12339_s2 }
  0x3f   :  { %p12346_p0 = por %p12345_p13, %p12344_p12 }
  0x41   :  { %p12347_p1 = pnand %p12346_p0, %p12340_p11 }
  0x43   :  { %12350 = shalt.err (!%p12347_p1)
}
  0x44   :  { %87 = dma.hbm_to_vmem [thread:$0]  %s15168_s7, 256, %s82_s18, [#allocation11], %s12430_s8, %s12430_s8, %s12431_s28  }
  0x45   :  { %s12359_s4 = scalar_lea.vmem %s109_s20, 256  ;;  %p12364_p3 = scmp.lt.s32.totalorder %s109_s20, %s109_s20 }
  0x46   :  { %p12360_p2 = scmp.ne.s32.totalorder %s109_s20, %s12359_s4  ;;  %p12365_p4 = scmp.lt.s32.totalorder %s12359_s4, %s12359_s4 }
  0x48   :  { %p12366_p5 = por %p12365_p4, %p12364_p3 }
  0x4a   :  { %p12367_p6 = pnand %p12366_p5, %p12360_p2 }
  0x4c   :  { %12370 = shalt.err (!%p12367_p6)
}
  0x4d   :  { %111 = dma.hbm_to_vmem [thread:$0]  %s15171_s10, 256, %s109_s20, [#allocation14]  }
  0x4e   :  { %s12434_s24 = smov [#allocation16]  }
  0x4f   :  { %s117_s25 = sshll.u32 %s12434_s24, 4  ;;  %s118_s25 = int_to_ptr.vmem [resolvable:$true] %s117_s25 }
  0x50   :  { %s12379_s26 = scalar_lea.vmem %s118_s25, 16384  ;;  %p12384_p8 = scmp.lt.s32.totalorder %s118_s25, %s118_s25 }
  0x51   :  { %p12380_p7 = scmp.ne.s32.totalorder %s118_s25, %s12379_s26  ;;  %p12385_p9 = scmp.lt.s32.totalorder %s12379_s26, %s12379_s26 }
  0x53   :  { %p12386_p10 = por %p12385_p9, %p12384_p8 }
  0x55   :  { %p12387_p11 = pnand %p12386_p10, %p12380_p7 }
  0x57   :  { %12390 = shalt.err (!%p12387_p11)
}
  0x58   :  { %s12435_s7 = smov 128   ;;  %s12436_s27 = smov 8  }
  0x59   :  { %123 = dma.hbm_to_vmem [thread:$0]  %s15172_s11, 16384, %s118_s25, [#allocation17], %s12435_s7, %s12435_s7, %s12436_s27  }
  0x5a   :  { %12411 = dma.done.wait [#allocation5], 32  }
  0x5b   :  { %12412 = vsyncadd [#allocation5], 4294967264 }
  0x5c   :  { %12413 = dma.done.wait [#allocation8], 1344  }
  0x5d   :  { %12414 = vsyncadd [#allocation8], 4294965952 }
  0x5e   :  { %12415 = dma.done.wait [#allocation11], 320  }
  0x5f   :  { %12416 = vsyncadd [#allocation11], 4294966976 }
  0x60   :  { %12417 = dma.done.wait [#allocation14], 320  }
  0x61   :  { %12418 = vsyncadd [#allocation14], 4294966976 }
  0x62   :  { %12419 = dma.done.wait [#allocation17], 16384  }
  0x63   :  { %12420 = vsyncadd [#allocation17], 4294950912  ;;  %vm244_vm0 = vcmask 1043456   ;;  %v12077_v0 = vld [vmem:[%s15162_s1 + $0x8] ss:$0 sps:$4 sm:$0xff]   ;;  %v12078_v1 = vld [vmem:[%s15162_s1] sm:$0xff]  }
  0x64   :  { %vm219_vm1 = vcmask 195584   ;;  %12057 = vmatprep.subr.msk.bf16.mxu0 %vm244_vm0, %v12077_v0  ;;  %v246_v2 = vsel %vm244_vm0, %v12077_v0, 0  ;;  %v12079_v3 = vld [vmem:[%s15161_s0] sm:$0xff]   ;;  %12058 = vmatprep.subr.msk.bf16.mxu1 %vm244_vm0, %v12077_v0  ;;  %v12080_v4 = vld [vmem:[%s15161_s0 + $0x8] sm:$0xff]   ;;  %v12081_v5 = vld [vmem:[%s15161_s0 + $0x10] sm:$0xff]   ;;  %vm15215_vm2 = vcmask 261120  }
  0x65   :  { %11106 = vmatpush3.bf16.msra.mxu0 %v246_v2  ;;  %12055 = vmatpush3.bf16.msra.mxu1 %v246_v2  ;;  %v12083_v6 = vld [vmem:[%s15161_s0 + $0x20] sm:$0xff]   ;;  %v12084_v7 = vld [vmem:[%s15161_s0 + $0x28] sm:$0xff]   ;;  %v12085_v8 = vld [vmem:[%s15161_s0 + $0x30] sm:$0xff]   ;;  %vm1092_vm3 = vcmask 130048  }
  0x66   :  { %11107 = vmatprep.subr.bf16.mxu0 %v12078_v1  ;;  %11109 = vmatprep.mubr.msk.bf16.mxu0 %vm219_vm1, %v12079_v3  ;;  %v12087_v9 = vld [vmem:[%s15164_s3 + $0x8] sm:$0xff]   ;;  %v12082_v10 = vld [vmem:[%s15161_s0 + $0x18] sm:$0xff]   ;;  %v12088_v12 = vld [vmem:[%s15164_s3] sm:$0xff]  }
  0x67   :  { %12054 = vmatprep.subr.bf16.mxu1 %v12078_v1  ;;  %11117 = vmatprep.mubr.msk.bf16.mxu1 %vm219_vm1, %v12083_v6  ;;  %v12086_v11 = vld [vmem:[%s15161_s0 + $0x38] sm:$0xff]   ;;  %v12579_v15 = vld [vmem:[#allocation4] ss:$0 sm:$0xff]  ;;  %v12583_v22 = vld [vmem:[#allocation4 + $0x1] ss:$0 sm:$0xff] }
  0x69   :  { %11108 = vmatpush3.bf16.msra.mxu0 %v12078_v1  ;;  %12056 = vmatpush3.bf16.msra.mxu1 %v12078_v1 }
  0x6a   :  { %11125 = vmatprep.subr.bf16.mxu1 %v12087_v9 }
  0x6c   :  { %11110 = vmatmul.mubr.msk.bf16.vlgmr.msra.gmra.mxu0 %vm219_vm1, %v12080_v4  ;;  %11118 = vmatmul.mubr.msk.bf16.vlgmr.msra.gmra.mxu1 %vm219_vm1, %v12084_v7 }
  0x6d   :  { %11113 = vmatprep.mubr.msk.bf16.mxu0 %vm219_vm1, %v12081_v5  ;;  %11121 = vmatprep.mubr.msk.bf16.mxu1 %vm219_vm1, %v12085_v8 }
  0x6e   :  { %11126 = vmatpush3.bf16.msra.mxu1 %v12087_v9 }
  0x6f   :  { %11127 = vmatprep.subr.bf16.mxu1 %v12088_v12 }
  0x72   :  { %11128 = vmatpush3.bf16.msra.mxu1 %v12088_v12 }
  0x74   :  { %11114 = vmatmul.mubr.msk.bf16.gmra.mxu0 %vm219_vm1, %v12082_v10  ;;  %11122 = vmatmul.mubr.msk.bf16.gmra.mxu1 %vm219_vm1, %v12086_v11 }
 0x12c   :  { %v11111_v13 = vpop.f32.mrf.mxu0  ;;  %v11119_v14 = vpop.f32.mrf.mxu1 }
 0x12d   :  { %v352_v19 = vmul.f32 %v11111_v13, %v12579_v15  ;;  %v360_v61 = vmul.f32 %v11119_v14, %v12579_v15 }
 0x12e   :  { %v282_v16 = vpop.f32.mrf.mxu0  ;;  %v314_v17 = vpop.f32.mrf.mxu1 }
 0x12f   :  { %v350_v18 = vmul.f32 %v12579_v15, %v282_v16  ;;  %v12594_v29 = vadd.f32 %v12583_v22, %v352_v19  ;;  %v358_v31 = vmul.f32 %v12579_v15, %v314_v17  ;;  %v12662_v7 = vadd.f32 %v12583_v22, %v360_v61 }
 0x130   :  { %v11112_v20 = vpop.f32.mrf.mxu0  ;;  %v11120_v21 = vpop.f32.mrf.mxu1 }
 0x131   :  { %v353_v23 = vmul.f32 %v11112_v20, %v12579_v15  ;;  %v12587_v26 = vadd.f32 %v12583_v22, %v350_v18  ;;  %15304 = vst [vmem:[#allocation27_spill] sm:$0xff] %v12594_v29  ;;  %v15187_v41 = vmax.f32 %v12594_v29, 0.0  ;;  %v12608_v44 = vadd.f32 %v12583_v22, %v358_v31  ;;  %15314 = vst [vmem:[#allocation37_spill] sm:$0xff] %v12662_v7 }
 0x132   :  { %v285_v24 = vpop.f32.mrf.mxu0  ;;  %v317_v25 = vpop.f32.mrf.mxu1  ;;  %v361_v63 = vmul.f32 %v11120_v21, %v12579_v15  ;;  %v15179_v12 = vmax.f32 %v12662_v7, 0.0  ;;  %v403_v31 = vlaneseq }
 0x133   :  { %15302 = vst [vmem:[#allocation25_spill] sm:$0xff] %v12587_v26  ;;  %v12590_v27 = vadd.f32 %v12583_v22, %v353_v23  ;;  %v351_v28 = vmul.f32 %v12579_v15, %v285_v24  ;;  %v359_v34 = vmul.f32 %v12579_v15, %v317_v25  ;;  %v15189_v38 = vmax.f32 %v12587_v26, 0.0  ;;  %15306 = vst [vmem:[#allocation29_spill] sm:$0xff] %v12608_v44  ;;  %v12090_v25 = vld [vmem:[#allocation9] sm:$0xff]  }
 0x134   :  { %v11115_v30 = vpop.f32.mrf.mxu0  ;;  %v11123_v32 = vpop.f32.mrf.mxu1  ;;  %v15180_v56 = vmax.f32 %v12608_v44, 0.0  ;;  %v12669_v9 = vadd.f32 %v12583_v22, %v361_v63  ;;  %v15198_v24 = vmov 0.0   ;;  %11163 = vmatprep.subr.bf16.mxu1 %v12090_v25 }
 0x135   :  { %15303 = vst [vmem:[#allocation26_spill] sm:$0xff] %v12590_v27  ;;  %v12598_v33 = vadd.f32 %v12583_v22, %v351_v28  ;;  %v15190_v35 = vmax.f32 %v12590_v27, 0.0  ;;  %v356_v42 = vmul.f32 %v11115_v30, %v12579_v15  ;;  %v12616_v48 = vadd.f32 %v12583_v22, %v359_v34  ;;  %1094 = vst.msk [vmem:[#allocation2 + $0x8] sm:$0xff] %vm1092_vm3, %v15198_v24  ;;  %v12705_v28 = vld [vmem:[#allocation9 + $0x10] sm:$0xff]   ;;  %v12708_v30 = vld [vmem:[#allocation9 + $0x18] sm:$0xff]  }
 0x136   :  { %v298_v36 = vpop.f32.mrf.mxu0  ;;  %v330_v37 = vpop.f32.mrf.mxu1  ;;  %15315 = vst [vmem:[#allocation38_spill] sm:$0xff] %v12669_v9  ;;  %v15182_v13 = vmax.f32 %v12669_v9, 0.0  ;;  %v364_v14 = vmul.f32 %v11123_v32, %v12579_v15  ;;  %v12711_v32 = vshrl.u32 %v403_v31, 7 }
 0x137   :  { %15305 = vst [vmem:[#allocation28_spill] sm:$0xff] %v12598_v33  ;;  %v15188_v39 = vmax.f32 %v12598_v33, 0.0  ;;  %v354_v40 = vmul.f32 %v12579_v15, %v298_v36  ;;  %15307 = vst [vmem:[#allocation30_spill] sm:$0xff] %v12616_v48  ;;  %v1109_v49 = vpack.c.bf16 %v15190_v35, %v15187_v41  ;;  %v12631_v55 = vadd.f32 %v12583_v22, %v356_v42  ;;  %v1095_v36 = vld [vmem:[#allocation7] sm:$0x3] }
 0x138   :  { %v11116_v43 = vpop.f32.mrf.mxu0  ;;  %v11124_v45 = vpop.f32.mrf.mxu1  ;;  %v15181_v58 = vmax.f32 %v12616_v48, 0.0  ;;  %v362_v59 = vmul.f32 %v12579_v15, %v330_v37  ;;  %v1113_v18 = vpack.c.bf16 %v15182_v13, %v15179_v12  ;;  %v12689_v19 = vadd.f32 %v12583_v22, %v364_v14 }
 0x139   :  { %v1108_v46 = vpack.c.bf16 %v15188_v39, %v15189_v38  ;;  %v357_v47 = vmul.f32 %v11116_v43, %v12579_v15  ;;  %v12623_v52 = vadd.f32 %v12583_v22, %v354_v40  ;;  %15310 = vst [vmem:[#allocation33_spill] sm:$0xff] %v12631_v55  ;;  %v15183_v2 = vmax.f32 %v12631_v55, 0.0 }
 0x13a   :  { %v301_v50 = vpop.f32.mrf.mxu0  ;;  %v333_v51 = vpop.f32.mrf.mxu1  ;;  %v1112_v4 = vpack.c.bf16 %v15181_v58, %v15180_v56  ;;  %v12656_v5 = vadd.f32 %v12583_v22, %v362_v59  ;;  %v365_v16 = vmul.f32 %v11124_v45, %v12579_v15  ;;  %15316 = vst [vmem:[#allocation39_spill] sm:$0xff] %v12689_v19  ;;  %v12714_v34 = vsub.s32 0, %v12711_v32 }
 0x13b   :  { %15308 = vst [vmem:[#allocation31_spill] sm:$0xff] %v12623_v52  ;;  %v12626_v53 = vadd.f32 %v12583_v22, %v357_v47  ;;  %v355_v54 = vmul.f32 %v12579_v15, %v301_v50  ;;  %11129 = vmatprep.mubr.msk.bf16.mxu1 %vm15215_vm2, %v1108_v46  ;;  %v363_v60 = vmul.f32 %v12579_v15, %v333_v51  ;;  %v15185_v0 = vmax.f32 %v12623_v52, 0.0 }
 0x13c   :  { %11130 = vmatmul.mubr.msk.bf16.vlgmr.msra.gmra.mxu1 %vm15215_vm2, %v1109_v49  ;;  %15312 = vst [vmem:[#allocation35_spill] sm:$0xff] %v12656_v5  ;;  %v15178_v10 = vmax.f32 %v12656_v5, 0.0  ;;  %v12692_v20 = vadd.f32 %v12583_v22, %v365_v16  ;;  %v15175_v15 = vmax.f32 %v12689_v19, 0.0  ;;  %15318 = vst [vmem:[#allocation41_spill] sm:$0xff] %v12714_v34  ;;  %v12717_v37 = vsub.s32 1, %v12711_v32 }
 0x13d   :  { %15309 = vst [vmem:[#allocation32_spill] sm:$0xff] %v12626_v53  ;;  %v12636_v57 = vadd.f32 %v12583_v22, %v355_v54  ;;  %v15186_v62 = vmax.f32 %v12626_v53, 0.0  ;;  %v12659_v6 = vadd.f32 %v12583_v22, %v363_v60  ;;  %v12089_v22 = vld [vmem:[#allocation9 + $0x8] sm:$0xff]   ;;  %11164 = vmatpush3.bf16.msra.mxu1 %v12090_v25  ;;  %v12720_v40 = vrot.slane %v1095_v36, %v12714_v34 }
 0x13e   :  { %15317 = vst [vmem:[#allocation40_spill] sm:$0xff] %v12692_v20  ;;  %v15177_v21 = vmax.f32 %v12692_v20, 0.0  ;;  %11145 = vmatprep.subr.bf16.mxu0 %v12089_v22  ;;  %11199 = vmatprep.subr.bf16.mxu1 %v12708_v30  ;;  %15319 = vst [vmem:[#allocation42_spill] sm:$0xff] %v12717_v37  ;;  %v12723_v42 = vrot.slane %v1095_v36, %v12717_v37  ;;  %v12727_v46 = vadd.s32 8, %v12711_v32  ;;  %v12732_v54 = vadd.s32 24, %v12711_v32 }
 0x13f   :  { %15311 = vst [vmem:[#allocation34_spill] sm:$0xff] %v12636_v57  ;;  %v15184_v1 = vmax.f32 %v12636_v57, 0.0  ;;  %15313 = vst [vmem:[#allocation36_spill] sm:$0xff] %v12659_v6  ;;  %v1111_v8 = vpack.c.bf16 %v15186_v62, %v15183_v2  ;;  %v15176_v11 = vmax.f32 %v12659_v6, 0.0  ;;  %11146 = vmatpush3.bf16.msra.mxu0 %v12089_v22  ;;  %v12744_v14 = vadd.s32 40, %v12711_v32 }
 0x140   :  { %v1115_v23 = vpack.c.bf16 %v15177_v21, %v15175_v15  ;;  %11181 = vmatprep.subr.bf16.mxu0 %v12705_v28  ;;  %v15197_v63 = vand.u32 7, %v12727_v46  ;;  %v12747_v16 = vadd.s32 48, %v12711_v32  ;;  %v15194_v25 = vand.u32 7, %v12732_v54 }
 0x141   :  { %v1110_v3 = vpack.c.bf16 %v15184_v1, %v15185_v0  ;;  %v1114_v17 = vpack.c.bf16 %v15176_v11, %v15178_v10  ;;  %v12754_v31 = vadd.s32 56, %v12711_v32 }
 0x142   :  { %v12774_v11 = vadd.s32 4294967295, %v15194_v25 }
 0x143   :  { %11133 = vmatprep.mubr.msk.bf16.mxu1 %vm15215_vm2, %v1110_v3  ;;  %v15191_v21 = vand.u32 7, %v12754_v31 }
 0x144   :  { %11134 = vmatmul.mubr.msk.bf16.gmra.mxu1 %vm15215_vm2, %v1111_v8  ;;  %v12741_v8 = vadd.s32 32, %v12711_v32  ;;  %15321 = vst [vmem:[#allocation44_spill] sm:$0xff] %v12774_v11  ;;  %vm839_vm5 = vcmp.ge.s32.totalorder %v12774_v11, 0 }
 0x145   :  { %11137 = vmatprep.mubr.msk.bf16.mxu1 %vm15215_vm2, %v1112_v4  ;;  %v12738_v4 = vadd.s32 16, %v12711_v32  ;;  %v12807_v2 = vadd.s32 4294967295, %v15191_v21 }
 0x147   :  { %15326 = vst [vmem:[#allocation49_spill] sm:$0xff] %v12807_v2  ;;  %vm843_vm10 = vcmp.ge.s32.totalorder %v12807_v2, 0 }
 0x14c   :  { %11138 = vmatmul.mubr.msk.bf16.gmra.mxu1 %vm15215_vm2, %v1113_v18 }
 0x14d   :  { %11141 = vmatprep.mubr.msk.bf16.mxu1 %vm15215_vm2, %v1114_v17 }
 0x154   :  { %11142 = vmatmul.mubr.msk.bf16.gmra.mxu1 %vm15215_vm2, %v1115_v23 }
 0x1fc   :  { %v11131_v43 = vpop.f32.mrf.mxu1 }
 0x1fd   :  { %v1260_v45 = vmul.f32 %v11131_v43, %v12720_v40 }
 0x1fe   :  { %v1191_v47 = vpop.f32.mrf.mxu1 }
 0x1ff   :  { %v1280_v49 = vadd.f32 %v12723_v42, %v1260_v45  ;;  %v1258_v50 = vmul.f32 %v12720_v40, %v1191_v47  ;;  %v12761_v47 = vadd.s32 4294967295, %v15197_v63 }
 0x200   :  { %v11132_v51 = vpop.f32.mrf.mxu1 }
 0x201   :  { %v1296_v59 = vmax.f32 %v1280_v49, 0.0  ;;  %v1278_v60 = vadd.f32 %v12723_v42, %v1258_v50  ;;  %v1261_v61 = vmul.f32 %v11132_v51, %v12720_v40  ;;  %15320 = vst [vmem:[#allocation43_spill] sm:$0xff] %v12761_v47  ;;  %v15196_v50 = vand.u32 7, %v12738_v4 }
 0x202   :  { %v1194_v3 = vpop.f32.mrf.mxu1  ;;  %v15193_v51 = vand.u32 7, %v12741_v8  ;;  %vm15224_vm4 = vcmp.ge.s32.totalorder %v12761_v47, 0 }
 0x203   :  { %1312 = vst.msk [vmem:[#allocation2 + $0x20] sm:$0xff] %vm1092_vm3, %v1296_v59  ;;  %v1294_v17 = vmax.f32 %v1278_v60, 0.0  ;;  %v1281_v18 = vadd.f32 %v12723_v42, %v1261_v61  ;;  %v1259_v23 = vmul.f32 %v12720_v40, %v1194_v3  ;;  %v15195_v60 = vand.u32 7, %v12744_v14 }
 0x204   :  { %v11135_v22 = vpop.f32.mrf.mxu1  ;;  %v15192_v61 = vand.u32 7, %v12747_v16 }
 0x205   :  { %1310 = vst.msk [vmem:[#allocation2 + $0x10] sm:$0xff] %vm1092_vm3, %v1294_v17  ;;  %v1297_v36 = vmax.f32 %v1281_v18, 0.0  ;;  %v1279_v43 = vadd.f32 %v12723_v42, %v1259_v23  ;;  %v1264_v45 = vmul.f32 %v11135_v22, %v12720_v40 }
 0x206   :  { %v1207_v49 = vpop.f32.mrf.mxu1 }
 0x207   :  { %1313 = vst.msk [vmem:[#allocation2 + $0x28] sm:$0xff] %vm1092_vm3, %v1297_v36  ;;  %v12768_v3 = vpack.c.bf16 %v1297_v36, %v1296_v59  ;;  %v1295_v18 = vmax.f32 %v1279_v43, 0.0  ;;  %v1284_v23 = vadd.f32 %v12723_v42, %v1264_v45  ;;  %v1262_v22 = vmul.f32 %v12720_v40, %v1207_v49 }
 0x208   :  { %v11136_v15 = vpop.f32.mrf.mxu1  ;;  %v12785_v45 = vadd.s32 4294967295, %v15196_v50  ;;  %v12789_v49 = vadd.s32 4294967295, %v15193_v51 }
 0x209   :  { %1311 = vst.msk [vmem:[#allocation2 + $0x18] sm:$0xff] %vm1092_vm3, %v1295_v18  ;;  %v12778_v10 = vpack.c.bf16 %v1295_v18, %v1294_v17  ;;  %v1300_v12 = vmax.f32 %v1284_v23, 0.0  ;;  %v1282_v59 = vadd.f32 %v12723_v42, %v1262_v22  ;;  %v1265_v36 = vmul.f32 %v11136_v15, %v12720_v40 }
 0x20a   :  { %v1210_v43 = vpop.f32.mrf.mxu1  ;;  %15322 = vst [vmem:[#allocation45_spill] sm:$0xff] %v12785_v45  ;;  %15323 = vst [vmem:[#allocation46_spill] sm:$0xff] %v12789_v49  ;;  %v12793_v17 = vadd.s32 4294967295, %v15195_v60  ;;  %v12800_v22 = vadd.s32 4294967295, %v15192_v61  ;;  %vm838_vm6 = vcmp.ge.s32.totalorder %v12785_v45, 0  ;;  %vm840_vm7 = vcmp.ge.s32.totalorder %v12789_v49, 0 }
 0x20b   :  { %1316 = vst.msk [vmem:[#allocation2 + $0x40] sm:$0xff] %vm1092_vm3, %v1300_v12  ;;  %v1298_v18 = vmax.f32 %v1282_v59, 0.0  ;;  %v1285_v15 = vadd.f32 %v12723_v42, %v1265_v36  ;;  %v1263_v23 = vmul.f32 %v12720_v40, %v1210_v43  ;;  %v12810_v59 = vadd.s32 72, %v12711_v32  ;;  %v1401_v51 = vld [vmem:[#allocation2 + $0x20] sm:$0xff] }
 0x20c   :  { %15324 = vst [vmem:[#allocation47_spill] sm:$0xff] %v12793_v17  ;;  %15325 = vst [vmem:[#allocation48_spill] sm:$0xff] %v12800_v22  ;;  %v11139_v56 = vpop.f32.mrf.mxu1  ;;  %v1399_v58 = vld [vmem:[#allocation2 + $0x10] sm:$0xff]  ;;  %vm841_vm8 = vcmp.ge.s32.totalorder %v12793_v17, 0  ;;  %vm842_vm9 = vcmp.ge.s32.totalorder %v12800_v22, 0 }
 0x20d   :  { %v12802_v13 = vld [vmem:[#allocation2 + $0xf] sm:$0xff]  ;;  %1314 = vst.msk [vmem:[#allocation2 + $0x30] sm:$0xff] %vm1092_vm3, %v1298_v18  ;;  %v1301_v36 = vmax.f32 %v1285_v15, 0.0  ;;  %v1283_v43 = vadd.f32 %v12723_v42, %v1263_v23  ;;  %v1268_v1 = vmul.f32 %v11139_v56, %v12720_v40  ;;  %v1462_v0 = vpack.c.bf16 %v1399_v58, %v15198_v24 }
 0x20e   :  { %v1223_v62 = vpop.f32.mrf.mxu1  ;;  %v1375_v41 = vsel %vm15224_vm4, %v12802_v13, 0.0  ;;  %v15327_v6 = vand.u32 7, %v12810_v59 }
 0x20f   :  { %1317 = vst.msk [vmem:[#allocation2 + $0x48] sm:$0xff] %vm1092_vm3, %v1301_v36  ;;  %v12823_v15 = vpack.c.bf16 %v1301_v36, %v1300_v12  ;;  %v1299_v23 = vmax.f32 %v1283_v43, 0.0  ;;  %v1288_v56 = vadd.f32 %v12723_v42, %v1268_v1  ;;  %v1266_v58 = vmul.f32 %v12720_v40, %v1223_v62  ;;  %11147 = vmatprep.mubr.msk.bf16.mxu0 %vm1092_vm3, %v1462_v0 }
 0x210   :  { %v11140_v39 = vpop.f32.mrf.mxu1  ;;  %v1390_v38 = vpack.c.bf16 %v1375_v41, %v15198_v24  ;;  %v1400_v35 = vld [vmem:[#allocation2 + $0x18] sm:$0xff]  ;;  %v12836_v36 = vadd.s32 80, %v12711_v32  ;;  %v12839_v1 = vadd.s32 88, %v12711_v32  ;;  %v1402_v24 = vld [vmem:[#allocation2 + $0x28] sm:$0xff]  ;;  %v12869_v20 = vadd.s32 4294967295, %v15327_v6 }
 0x211   :  { %v12830_v21 = vld [vmem:[#allocation2 + $0x17] sm:$0xff]  ;;  %v12832_v61 = vld [vmem:[#allocation2 + $0x1f] sm:$0xff]  ;;  %1315 = vst.msk [vmem:[#allocation2 + $0x38] sm:$0xff] %vm1092_vm3, %v1299_v23  ;;  %v12842_v62 = vpack.c.bf16 %v1299_v23, %v1298_v18  ;;  %v1304_v0 = vmax.f32 %v1288_v56, 0.0  ;;  %v1286_v41 = vadd.f32 %v12723_v42, %v1266_v58  ;;  %v1269_v43 = vmul.f32 %v11140_v39, %v12720_v40  ;;  %v12862_v58 = vld [vmem:[#allocation2 + $0x27] sm:$0xff] }
 0x212   :  { %11165 = vmatprep.mubr.msk.bf16.mxu1 %vm1092_vm3, %v1390_v38  ;;  %v1226_v25 = vpop.f32.mrf.mxu1  ;;  %v1463_v60 = vpack.c.bf16 %v1401_v51, %v1400_v35  ;;  %v1376_v50 = vsel %vm838_vm6, %v12830_v21, 0.0  ;;  %v1377_v18 = vsel %vm839_vm5, %v12832_v61, 0.0  ;;  %v12855_v23 = vadd.s32 96, %v12711_v32  ;;  %v12857_v56 = vld [vmem:[#allocation9 + $0x20] sm:$0xff]   ;;  %15328 = vst [vmem:[#allocation50_spill] sm:$0xff] %v12869_v20 }
 0x213   :  { %1320 = vst.msk [vmem:[#allocation2 + $0x60] sm:$0xff] %vm1092_vm3, %v1304_v0  ;;  %v1302_v39 = vmax.f32 %v1286_v41, 0.0  ;;  %v1289_v38 = vadd.f32 %v12723_v42, %v1269_v43  ;;  %v1267_v35 = vmul.f32 %v12720_v40, %v1226_v25  ;;  %v1391_v51 = vpack.c.bf16 %v1377_v18, %v1376_v50 }
 0x214   :  { %11148 = vmatmul.mubr.msk.bf16.vlgmr.msra.gmra.mxu0 %vm1092_vm3, %v1463_v60  ;;  %v11143_v63 = vpop.f32.mrf.mxu1  ;;  %v1403_v12 = vld [vmem:[#allocation2 + $0x30] sm:$0xff]  ;;  %v12873_v43 = vadd.s32 104, %v12711_v32  ;;  %v1378_v6 = vsel %vm840_vm7, %v12862_v58, 0.0  ;;  %vm845_vm11 = vcmp.ge.s32.totalorder %v12869_v20, 0  ;;  %v15333_v55 = vand.u32 7, %v12855_v23 }
 0x215   :  { %v12865_v19 = vld [vmem:[#allocation2 + $0x2f] sm:$0xff]  ;;  %1318 = vst.msk [vmem:[#allocation2 + $0x50] sm:$0xff] %vm1092_vm3, %v1302_v39  ;;  %v1305_v25 = vmax.f32 %v1289_v38, 0.0  ;;  %v1287_v50 = vadd.f32 %v12723_v42, %v1267_v35  ;;  %11182 = vmatpush3.bf16.msra.mxu0 %v12705_v28  ;;  %v1272_v60 = vmul.f32 %v11143_v63, %v12720_v40  ;;  %11166 = vmatmul.mubr.msk.bf16.vlgmr.msra.gmra.mxu1 %vm1092_vm3, %v1391_v51 }
 0x216   :  { %v1464_v18 = vpack.c.bf16 %v1403_v12, %v1402_v24  ;;  %v1239_v5 = vpop.f32.mrf.mxu1  ;;  %v1379_v41 = vsel %vm841_vm8, %v12865_v19, 0.0  ;;  %11200 = vmatpush3.bf16.msra.mxu1 %v12708_v30  ;;  %11217 = vmatprep.subr.bf16.mxu0 %v12857_v56  ;;  %v15329_v30 = vand.u32 7, %v12836_v36  ;;  %v12933_v57 = vadd.s32 4294967295, %v15333_v55 }
 0x217   :  { %1321 = vst.msk [vmem:[#allocation2 + $0x68] sm:$0xff] %vm1092_vm3, %v1305_v25  ;;  %v12891_v24 = vpack.c.bf16 %v1305_v25, %v1304_v0  ;;  %v1303_v28 = vmax.f32 %v1287_v50, 0.0  ;;  %v1292_v63 = vadd.f32 %v12723_v42, %v1272_v60  ;;  %v1270_v12 = vmul.f32 %v12720_v40, %v1239_v5 }
 0x218   :  { %11151 = vmatprep.mubr.msk.bf16.mxu0 %vm1092_vm3, %v1464_v18  ;;  %v11144_v51 = vpop.f32.mrf.mxu1  ;;  %v1392_v7 = vpack.c.bf16 %v1379_v41, %v1378_v6  ;;  %v1404_v38 = vld [vmem:[#allocation2 + $0x38] sm:$0xff]  ;;  %v12903_v0 = vadd.s32 4294967295, %v15329_v30  ;;  %v1405_v18 = vld [vmem:[#allocation2 + $0x40] sm:$0xff]  ;;  %15334 = vst [vmem:[#allocation53_spill] sm:$0xff] %v12933_v57  ;;  %v15336_v55 = vand.u32 7, %v12873_v43  ;;  %vm15216_vm14 = vcmp.ge.s32.totalorder %v12933_v57, 0 }
 0x219   :  { %v12896_v44 = vld [vmem:[#allocation2 + $0x37] sm:$0xff]  ;;  %v12898_v35 = vld [vmem:[#allocation2 + $0x3f] sm:$0xff]  ;;  %1319 = vst.msk [vmem:[#allocation2 + $0x58] sm:$0xff] %vm1092_vm3, %v1303_v28  ;;  %v12907_v5 = vpack.c.bf16 %v1303_v28, %v1302_v39  ;;  %v1308_v50 = vmax.f32 %v1292_v63, 0.0  ;;  %v1290_v41 = vadd.f32 %v12723_v42, %v1270_v12  ;;  %v1273_v60 = vmul.f32 %v11144_v51, %v12720_v40 }
 0x21a   :  { %15330 = vst [vmem:[#allocation51_spill] sm:$0xff] %v12903_v0  ;;  %11169 = vmatprep.mubr.msk.bf16.mxu1 %vm1092_vm3, %v1392_v7  ;;  %v1242_v6 = vpop.f32.mrf.mxu1  ;;  %v1465_v48 = vpack.c.bf16 %v1405_v18, %v1404_v38  ;;  %v1380_v30 = vsel %vm842_vm9, %v12896_v44, 0.0  ;;  %v1381_v25 = vsel %vm843_vm10, %v12898_v35, 0.0  ;;  %v12919_v39 = vadd.s32 112, %v12711_v32 }
 0x21b   :  { %1324 = vst.msk [vmem:[#allocation2 + $0x80] sm:$0xff] %vm1092_vm3, %v1308_v50  ;;  %v1306_v28 = vmax.f32 %v1290_v41, 0.0  ;;  %v1293_v63 = vadd.f32 %v12723_v42, %v1273_v60  ;;  %v1271_v7 = vmul.f32 %v12720_v40, %v1242_v6  ;;  %v1393_v12 = vpack.c.bf16 %v1381_v25, %v1380_v30 }
 0x21c   :  { %11152 = vmatmul.mubr.msk.bf16.gmra.mxu0 %vm1092_vm3, %v1465_v48  ;;  %v1407_v38 = vld [vmem:[#allocation2 + $0x50] sm:$0xff]  ;;  %v15331_v18 = vand.u32 7, %v12839_v1  ;;  %v12936_v41 = vadd.s32 120, %v12711_v32  ;;  %v15335_v48 = vmov 0.0   ;;  %vm846_vm12 = vcmp.ge.s32.totalorder %v12903_v0, 0 }
 0x21d   :  { %v12925_v51 = vld [vmem:[#allocation2 + $0x4f] sm:$0xff]  ;;  %1322 = vst.msk [vmem:[#allocation2 + $0x70] sm:$0xff] %vm1092_vm3, %v1306_v28  ;;  %v1309_v40 = vmax.f32 %v1293_v63, 0.0  ;;  %v1291_v25 = vadd.f32 %v12723_v42, %v1271_v7  ;;  %11170 = vmatmul.mubr.msk.bf16.gmra.mxu1 %vm1092_vm3, %v1393_v12  ;;  %v1466_v60 = vpack.c.bf16 %v1407_v38, %v15335_v48  ;;  %v1409_v12 = vld [vmem:[#allocation2 + $0x60] sm:$0xff]  ;;  %v616_v38 = vand.u32 7, %v12711_v32 }
 0x21e   :  { %v12929_v9 = vadd.s32 4294967295, %v15331_v18  ;;  %v1383_v6 = vsel %vm845_vm11, %v12925_v51, 0.0  ;;  %v12949_v18 = vadd.s32 4294967295, %v15336_v55 }
 0x21f   :  { %v1394_v30 = vpack.c.bf16 %v1383_v6, %v15335_v48  ;;  %1325 = vst.msk [vmem:[#allocation2 + $0x88] sm:$0xff] %vm1092_vm3, %v1309_v40  ;;  %v12953_v42 = vpack.c.bf16 %v1309_v40, %v1308_v50  ;;  %v1307_v7 = vmax.f32 %v1291_v25, 0.0  ;;  %11155 = vmatprep.mubr.msk.bf16.mxu0 %vm1092_vm3, %v1466_v60  ;;  %v15339_v50 = vand.u32 7, %v12727_v46  ;;  %v12979_v46 = vld [vmem:[#allocation2 + $0x67] sm:$0xff] }
 0x220   :  { %15332 = vst [vmem:[#allocation52_spill] sm:$0xff] %v12929_v9  ;;  %15337 = vst [vmem:[#allocation54_spill] sm:$0xff] %v12949_v18  ;;  %v1408_v6 = vld [vmem:[#allocation2 + $0x58] sm:$0xff]  ;;  %vm847_vm13 = vcmp.ge.s32.totalorder %v12929_v9, 0  ;;  %vm849_vm15 = vcmp.ge.s32.totalorder %v12949_v18, 0 }
 0x221   :  { %15338 = vst [vmem:[#allocation55_spill] sm:$0xff] %v12953_v42  ;;  %11173 = vmatprep.mubr.msk.bf16.mxu1 %vm1092_vm3, %v1394_v30  ;;  %v12959_v52 = vld [vmem:[#allocation2 + $0x57] sm:$0xff]  ;;  %v12961_v55 = vld [vmem:[#allocation2 + $0x5f] sm:$0xff]  ;;  %v12966_v40 = vadd.s32 1, %v15339_v50  ;;  %1323 = vst.msk [vmem:[#allocation2 + $0x78] sm:$0xff] %vm1092_vm3, %v1307_v7  ;;  %v12969_v25 = vpack.c.bf16 %v1307_v7, %v1306_v28  ;;  %v1467_v60 = vpack.c.bf16 %v1409_v12, %v1408_v6  ;;  %v15342_v50 = vand.u32 7, %v12919_v39 }
 0x222   :  { %v1384_v30 = vsel %vm846_vm12, %v12959_v52, 0.0  ;;  %v1385_v53 = vsel %vm847_vm13, %v12961_v55, 0.0  ;;  %v12985_v7 = vadd.s32 4294967295, %v616_v38  ;;  %v1410_v12 = vld [vmem:[#allocation2 + $0x68] sm:$0xff] }
 0x223   :  { %15340 = vst [vmem:[#allocation56_spill] sm:$0xff] %v12966_v40  ;;  %15341 = vst [vmem:[#allocation57_spill] sm:$0xff] %v12969_v25  ;;  %v1395_v29 = vpack.c.bf16 %v1385_v53, %v1384_v30  ;;  %v12983_v28 = vadd.s32 4294967295, %v15342_v50  ;;  %v15345_v53 = vand.u32 7, %v12936_v41  ;;  %v1386_v50 = vsel %vm15216_vm14, %v12979_v46, 0.0 }
 0x224   :  { %15344 = vst [vmem:[#allocation59_spill] sm:$0xff] %v12985_v7  ;;  %11156 = vmatmul.mubr.msk.bf16.gmra.mxu0 %vm1092_vm3, %v1467_v60  ;;  %v1411_v6 = vld [vmem:[#allocation2 + $0x70] sm:$0xff]  ;;  %vm15223_vm0 = vcmp.lt.s32.totalorder %v12966_v40, 8  ;;  %vm15225_vm2 = vcmp.ge.s32.totalorder %v12985_v7, 0 }
 0x225   :  { %15343 = vst [vmem:[#allocation58_spill] sm:$0xff] %v12983_v28  ;;  %v12988_v63 = vld [vmem:[#allocation2 + $0x6f] sm:$0xff]  ;;  %v12992_v30 = vadd.s32 4294967295, %v15345_v53  ;;  %11174 = vmatmul.mubr.msk.bf16.gmra.mxu1 %vm1092_vm3, %v1395_v29  ;;  %v1468_v33 = vpack.c.bf16 %v1411_v6, %v1410_v12  ;;  %vm15288_vm1 = vcmp.ge.s32.totalorder %v12983_v28, 0  ;;  %v1413_v53 = vld [vmem:[#allocation2 + $0x80] sm:$0xff]  ;;  %v15347_v29 = vand.u32 7, %v12738_v4 }
 0x226   :  { %v1387_v38 = vsel %vm849_vm15, %v12988_v63, 0.0  ;;  %v1725_v60 = vld [vmem:[#allocation2 + $0x11] sm:$0xff] }
 0x227   :  { %15346 = vst [vmem:[#allocation60_spill] sm:$0xff] %v12992_v30  ;;  %v1396_v26 = vpack.c.bf16 %v1387_v38, %v1386_v50  ;;  %11159 = vmatprep.mubr.msk.bf16.mxu0 %vm1092_vm3, %v1468_v33  ;;  %v13007_v12 = vadd.s32 1, %v15347_v29  ;;  %vm15226_vm14 = vcmp.ge.s32.totalorder %v12992_v30, 0  ;;  %v1773_v50 = vsel %vm15223_vm0, %v1725_v60, 0.0 }
 0x228   :  { %v1412_v6 = vld [vmem:[#allocation2 + $0x78] sm:$0xff]  ;;  %v15349_v33 = vand.u32 7, %v12744_v14  ;;  %v1988_v29 = vsel %vm15224_vm4, %v12830_v21, 0.0  ;;  %v15351_v60 = vand.u32 7, %v12732_v54  ;;  %v1788_v14 = vpack.c.bf16 %v1773_v50, %v15335_v48 }
 0x229   :  { %15348 = vst [vmem:[#allocation61_spill] sm:$0xff] %v13007_v12  ;;  %11177 = vmatprep.mubr.msk.bf16.mxu1 %vm1092_vm3, %v1396_v26  ;;  %v13011_v27 = vld [vmem:[#allocation2 + $0x77] sm:$0xff]  ;;  %v13013_v37 = vld [vmem:[#allocation2 + $0x7f] sm:$0xff]  ;;  %v1469_v34 = vpack.c.bf16 %v1413_v53, %v1412_v6  ;;  %v1987_v53 = vsel %vm15225_vm2, %v12802_v13, 0.0  ;;  %v15353_v6 = vand.u32 7, %v12741_v8  ;;  %vm15230_vm0 = vcmp.lt.s32.totalorder %v13007_v12, 8 }
 0x22a   :  { %v13019_v38 = vadd.s32 1, %v15349_v33  ;;  %v1388_v4 = vsel %vm15288_vm1, %v13011_v27, 0.0  ;;  %v1389_v26 = vsel %vm15226_vm14, %v13013_v37, 0.0  ;;  %v13032_v40 = vadd.s32 1, %v15351_v60  ;;  %v1726_v21 = vld [vmem:[#allocation2 + $0x19] sm:$0xff]  ;;  %v1729_v54 = vld [vmem:[#allocation2 + $0x31] sm:$0xff] }
 0x22b   :  { %v1397_v42 = vpack.c.bf16 %v1389_v26, %v1388_v4  ;;  %v13040_v33 = vadd.s32 1, %v15353_v6  ;;  %v2003_v25 = vpack.c.bf16 %v1988_v29, %v1987_v53  ;;  %v412_v50 = vadd.s32 64, %v12711_v32  ;;  %v1727_v13 = vld [vmem:[#allocation2 + $0x21] sm:$0xff]  ;;  %v1728_v8 = vld [vmem:[#allocation2 + $0x29] sm:$0xff] }
 0x22c   :  { %15350 = vst [vmem:[#allocation62_spill] sm:$0xff] %v13019_v38  ;;  %15352 = vst [vmem:[#allocation63_spill] sm:$0xff] %v13032_v40  ;;  %11160 = vmatmul.mubr.msk.bf16.gmra.mxu0 %vm1092_vm3, %v1469_v34  ;;  %vm15229_vm4 = vcmp.lt.s32.totalorder %v13019_v38, 8  ;;  %vm15228_vm2 = vcmp.lt.s32.totalorder %v13032_v40, 8  ;;  %v1774_v34 = vsel %vm15230_vm0, %v1726_v21, 0.0  ;;  %v15355_v4 = vand.u32 7, %v12747_v16 }
 0x22d   :  { %15354 = vst [vmem:[#allocation64_spill] sm:$0xff] %v13040_v33  ;;  %11178 = vmatmul.mubr.msk.bf16.gmra.mxu1 %vm1092_vm3, %v1397_v42  ;;  %11183 = vmatprep.mubr.msk.bf16.mxu0 %vm1092_vm3, %v1788_v14  ;;  %vm15227_vm14 = vcmp.lt.s32.totalorder %v13040_v33, 8  ;;  %v1777_v42 = vsel %vm15229_vm4, %v1729_v54, 0.0  ;;  %v1775_v32 = vsel %vm15228_vm2, %v1727_v13, 0.0  ;;  %v15357_v29 = vand.u32 7, %v12810_v59 }
 0x22e   :  { %11201 = vmatprep.mubr.msk.bf16.mxu1 %vm1092_vm3, %v2003_v25  ;;  %v13057_v26 = vadd.s32 1, %v15355_v4  ;;  %v1989_v25 = vsel %vm838_vm6, %v12832_v61, 0.0  ;;  %v672_v14 = vand.u32 7, %v412_v50  ;;  %v1789_v53 = vpack.c.bf16 %v1775_v32, %v1774_v34  ;;  %v1730_v34 = vld [vmem:[#allocation2 + $0x39] sm:$0xff] }
 0x22f   :  { %v13066_v60 = vadd.s32 1, %v15357_v29  ;;  %v1776_v6 = vsel %vm15227_vm14, %v1728_v8, 0.0  ;;  %v1992_v16 = vsel %vm841_vm8, %v12896_v44, 0.0  ;;  %v15359_v21 = vand.u32 7, %v12754_v31  ;;  %v1733_v31 = vld [vmem:[#allocation2 + $0x51] sm:$0xff] }
 0x230   :  { %15356 = vst [vmem:[#allocation65_spill] sm:$0xff] %v13057_v26  ;;  %v1790_v13 = vpack.c.bf16 %v1777_v42, %v1776_v6  ;;  %v1990_v61 = vsel %vm839_vm5, %v12862_v58, 0.0  ;;  %v1991_v50 = vsel %vm840_vm7, %v12865_v19, 0.0  ;;  %vm15233_vm14 = vcmp.lt.s32.totalorder %v13057_v26, 8  ;;  %v1731_v58 = vld [vmem:[#allocation2 + $0x41] sm:$0xff] }
 0x231   :  { %15358 = vst [vmem:[#allocation66_spill] sm:$0xff] %v13066_v60  ;;  %v13075_v54 = vadd.s32 1, %v15359_v21  ;;  %v2004_v59 = vpack.c.bf16 %v1990_v61, %v1989_v25  ;;  %v2005_v44 = vpack.c.bf16 %v1992_v16, %v1991_v50  ;;  %vm15232_vm2 = vcmp.lt.s32.totalorder %v13066_v60, 8  ;;  %v1946_v42 = vld [vmem:[#allocation2 + $0x47] sm:$0xff] }
 0x232   :  { %v13088_v8 = vadd.s32 4294967295, %v672_v14  ;;  %v1778_v19 = vsel %vm15233_vm14, %v1730_v34, 0.0  ;;  %v15362_v4 = vand.u32 7, %v12836_v36  ;;  %v1993_v29 = vsel %vm842_vm9, %v12898_v35, 0.0  ;;  %v1737_v34 = vld [vmem:[#allocation2 + $0x71] sm:$0xff] }
 0x233   :  { %15360 = vst [vmem:[#allocation67_spill] sm:$0xff] %v13075_v54  ;;  %vm15231_vm4 = vcmp.lt.s32.totalorder %v13075_v54, 8  ;;  %v15364_v14 = vand.u32 7, %v12873_v43  ;;  %v1996_v36 = vsel %vm845_vm11, %v12959_v52, 0.0  ;;  %v15366_v16 = vand.u32 7, %v12839_v1  ;;  %v1734_v1 = vld [vmem:[#allocation2 + $0x59] sm:$0xff] }
 0x234   :  { %11184 = vmatmul.mubr.msk.bf16.vlgmr.msra.gmra.mxu0 %vm1092_vm3, %v1789_v53  ;;  %15361 = vst [vmem:[#allocation68_spill] sm:$0xff] %v13088_v8  ;;  %v13099_v32 = vadd.s32 1, %v15362_v4  ;;  %v1779_v25 = vsel %vm15231_vm4, %v1731_v58, 0.0  ;;  %vm15234_vm0 = vcmp.ge.s32.totalorder %v13088_v8, 0  ;;  %v1994_v35 = vsel %vm843_vm10, %v1946_v42, 0.0 }
 0x235   :  { %11218 = vmatpush3.bf16.msra.mxu0 %v12857_v56  ;;  %11187 = vmatprep.mubr.msk.bf16.mxu0 %vm1092_vm3, %v1790_v13  ;;  %v1781_v56 = vsel %vm15232_vm2, %v1733_v31, 0.0  ;;  %v13109_v53 = vadd.s32 1, %v15364_v14  ;;  %v1791_v6 = vpack.c.bf16 %v1779_v25, %v1778_v19  ;;  %v13116_v21 = vadd.s32 1, %v15366_v16 }
 0x236   :  { %11202 = vmatmul.mubr.msk.bf16.vlgmr.msra.gmra.mxu1 %vm1092_vm3, %v2004_v59  ;;  %15363 = vst [vmem:[#allocation69_spill] sm:$0xff] %v13099_v32  ;;  %v1792_v13 = vpack.c.bf16 %v1781_v56, %v15335_v48  ;;  %v15368_v61 = vand.u32 7, %v12855_v23  ;;  %v2006_v43 = vpack.c.bf16 %v1994_v35, %v1993_v29  ;;  %v1995_v52 = vsel %vm15234_vm0, %v12925_v51, 0.0  ;;  %v1735_v23 = vld [vmem:[#allocation2 + $0x61] sm:$0xff]  ;;  %v1736_v51 = vld [vmem:[#allocation2 + $0x69] sm:$0xff] }
 0x237   :  { %11205 = vmatprep.mubr.msk.bf16.mxu1 %vm1092_vm3, %v2005_v44  ;;  %15365 = vst [vmem:[#allocation70_spill] sm:$0xff] %v13109_v53  ;;  %15367 = vst [vmem:[#allocation71_spill] sm:$0xff] %v13116_v21  ;;  %vm1022_vm4 = vcmp.lt.s32.totalorder %v13099_v32, 8  ;;  %v2007_v50 = vpack.c.bf16 %v1996_v36, %v1995_v52  ;;  %vm15237_vm2 = vcmp.lt.s32.totalorder %v13109_v53, 8  ;;  %vm15235_vm14 = vcmp.lt.s32.totalorder %v13116_v21, 8  ;;  %v1954_v35 = vld [vmem:[#allocation2 + $0x87] sm:$0xff] }
 0x238   :  { %v13123_v59 = vadd.s32 1, %v15368_v61  ;;  %v1782_v44 = vsel %vm1022_vm4, %v1734_v1, 0.0  ;;  %v1785_v31 = vsel %vm15237_vm2, %v1737_v34, 0.0  ;;  %v15370_v58 = vand.u32 7, %v12919_v39 }
 0x239   :  { %v1783_v56 = vsel %vm15235_vm14, %v1735_v23, 0.0  ;;  %v1997_v42 = vsel %vm846_vm12, %v12961_v55, 0.0  ;;  %v2000_v29 = vsel %vm849_vm15, %v13011_v27, 0.0  ;;  %v15372_v14 = vand.u32 7, %v12936_v41  ;;  %v1739_v41 = vld [vmem:[#allocation2 + $0x81] sm:$0xff] }
 0x23a   :  { %15369 = vst [vmem:[#allocation72_spill] sm:$0xff] %v13123_v59  ;;  %vm15236_vm0 = vcmp.lt.s32.totalorder %v13123_v59, 8  ;;  %v13142_v19 = vadd.s32 1, %v15370_v58  ;;  %v1793_v4 = vpack.c.bf16 %v1783_v56, %v1782_v44  ;;  %v1998_v36 = vsel %vm847_vm13, %v12979_v46, 0.0 }
 0x23b   :  { %v1784_v25 = vsel %vm15236_vm0, %v1736_v51, 0.0  ;;  %v13156_v39 = vadd.s32 1, %v15372_v14  ;;  %v2008_v55 = vpack.c.bf16 %v1998_v36, %v1997_v42  ;;  %vm15374_vm14 = vcmp.ge.s32.totalorder %v12933_v57, 0 }
 0x23c   :  { %11188 = vmatmul.mubr.msk.bf16.gmra.mxu0 %vm1092_vm3, %v1791_v6  ;;  %15371 = vst [vmem:[#allocation73_spill] sm:$0xff] %v13142_v19  ;;  %v1794_v6 = vpack.c.bf16 %v1785_v31, %v1784_v25  ;;  %v1999_v16 = vsel %vm15374_vm14, %v12988_v63, 0.0  ;;  %vm15284_vm0 = vcmp.lt.s32.totalorder %v13142_v19, 8  ;;  %v2001_v61 = vsel %vm15288_vm1, %v13013_v37, 0.0  ;;  %v15376_v37 = vld [vmem:[#allocation57_spill] sm:$0xff] }
 0x23d   :  { %11191 = vmatprep.mubr.msk.bf16.mxu0 %vm1092_vm3, %v1792_v13  ;;  %15373 = vst [vmem:[#allocation74_spill] sm:$0xff] %v13156_v39  ;;  %v1738_v13 = vld [vmem:[#allocation2 + $0x79] sm:$0xff]  ;;  %v2009_v27 = vpack.c.bf16 %v2000_v29, %v1999_v16  ;;  %vm15282_vm2 = vcmp.lt.s32.totalorder %v13156_v39, 8  ;;  %vm15375_vm14 = vcmp.ge.s32.totalorder %v12992_v30, 0 }
 0x23e   :  { %11206 = vmatmul.mubr.msk.bf16.gmra.mxu1 %vm1092_vm3, %v2006_v43  ;;  %v1786_v46 = vsel %vm15284_vm0, %v1738_v13, 0.0  ;;  %v1787_v63 = vsel %vm15282_vm2, %v1739_v41, 0.0  ;;  %v2002_v52 = vsel %vm15375_vm14, %v1954_v35, 0.0  ;;  %vm15402_vm14 = vcmask 261120  }
 0x23f   :  { %11209 = vmatprep.mubr.msk.bf16.mxu1 %vm1092_vm3, %v2007_v50  ;;  %v1795_v43 = vpack.c.bf16 %v1787_v63, %v1786_v46  ;;  %v2010_v1 = vpack.c.bf16 %v2002_v52, %v2001_v61  ;;  %v12094_v50 = vld [vmem:[#allocation12] sm:$0xff]   ;;  %vm15403_vm2 = vmmov %vm15402_vm14 }
 0x240   :  { %11235 = vmatprep.subr.bf16.mxu1 %v12094_v50 }
 0x241   :  { %11236 = vmatpush3.bf16.msra.mxu1 %v12094_v50 }
 0x244   :  { %11192 = vmatmul.mubr.msk.bf16.gmra.mxu0 %vm1092_vm3, %v1793_v4 }
 0x245   :  { %11195 = vmatprep.mubr.msk.bf16.mxu0 %vm1092_vm3, %v1794_v6 }
 0x246   :  { %11210 = vmatmul.mubr.msk.bf16.gmra.mxu1 %vm1092_vm3, %v2008_v55 }
 0x247   :  { %11213 = vmatprep.mubr.msk.bf16.mxu1 %vm1092_vm3, %v2009_v27 }
 0x24c   :  { %11196 = vmatmul.mubr.msk.bf16.gmra.mxu0 %vm1092_vm3, %v1795_v43 }
 0x24d   :  { %11219 = vmatprep.mubr.msk.bf16.mxu0 %vm1092_vm3, %v12778_v10  ;;  %v15377_v10 = vld [vmem:[#allocation55_spill] sm:$0xff] }
 0x24e   :  { %11214 = vmatmul.mubr.msk.bf16.gmra.mxu1 %vm1092_vm3, %v2010_v1 }
 0x254   :  { %11220 = vmatmul.mubr.msk.bf16.vlgmr.msra.gmra.mxu0 %vm1092_vm3, %v12768_v3  ;;  %v12095_v3 = vld [vmem:[%s15164_s3 + $0x18] sm:$0xff]  }
 0x255   :  { %11223 = vmatprep.mubr.msk.bf16.mxu0 %vm1092_vm3, %v12842_v62  ;;  %11253 = vmatprep.subr.bf16.mxu0 %v12095_v3 }
 0x256   :  { %11254 = vmatpush3.bf16.msra.mxu0 %v12095_v3 }
 0x25c   :  { %11224 = vmatmul.mubr.msk.bf16.gmra.mxu0 %vm1092_vm3, %v12823_v15 }
 0x25d   :  { %11227 = vmatprep.mubr.msk.bf16.mxu0 %vm1092_vm3, %v12907_v5 }
 0x264   :  { %11228 = vmatmul.mubr.msk.bf16.gmra.mxu0 %vm1092_vm3, %v12891_v24 }
 0x265   :  { %11231 = vmatprep.mubr.msk.bf16.mxu0 %vm1092_vm3, %v15376_v37 }
 0x26c   :  { %11232 = vmatmul.mubr.msk.bf16.gmra.mxu0 %vm1092_vm3, %v15377_v10 }
 0x2d4   :  { %v11149_v15 = vpop.f32.mrf.mxu0 }
 0x2d5   :  { %v11167_v62 = vpop.f32.mrf.mxu1 }
 0x2d6   :  { %v1534_v5 = vpop.f32.mrf.mxu0  ;;  %v1670_v9 = vadd.f32 %v11167_v62, %v11149_v15 }
 0x2d7   :  { %v1661_v34 = vpop.f32.mrf.mxu1 }
 0x2d8   :  { %v11150_v24 = vpop.f32.mrf.mxu0  ;;  %v1662_v20 = vadd.f32 %v1661_v34, %v1534_v5 }
 0x2d9   :  { %v11168_v23 = vpop.f32.mrf.mxu1 }
 0x2da   :  { %v1537_v44 = vpop.f32.mrf.mxu0  ;;  %v1673_v17 = vadd.f32 %v11168_v23, %v11150_v24 }
 0x2db   :  { %v1664_v51 = vpop.f32.mrf.mxu1 }
 0x2dc   :  { %v11153_v31 = vpop.f32.mrf.mxu0  ;;  %v1665_v47 = vadd.f32 %v1664_v51, %v1537_v44 }
 0x2dd   :  { %v11171_v58 = vpop.f32.mrf.mxu1 }
 0x2de   :  { %v13200_v56 = vpop.f32.mrf.mxu0  ;;  %v1686_v62 = vadd.f32 %v11171_v58, %v11153_v31  ;;  %v15384_v58 = vld [vmem:[#allocation42_spill] sm:$0xff] }
 0x2df   :  { %v13202_v42 = vpop.f32.mrf.mxu1 }
 0x2e0   :  { %v13204_v4 = vpop.f32.mrf.mxu0 }
 0x2e1   :  { %v13206_v25 = vpop.f32.mrf.mxu1 }
 0x2e2   :  { %v13208_v29 = vpop.f32.mrf.mxu0 }
 0x2e3   :  { %v13210_v14 = vpop.f32.mrf.mxu1 }
 0x2e4   :  { %v13212_v6 = vpop.f32.mrf.mxu0 }
 0x2e5   :  { %v13214_v36 = vpop.f32.mrf.mxu1 }
 0x2e6   :  { %v13216_v55 = vpop.f32.mrf.mxu0 }
 0x2e7   :  { %v13218_v16 = vpop.f32.mrf.mxu1 }
 0x2e8   :  { %v13220_v13 = vpop.f32.mrf.mxu0 }
 0x2e9   :  { %v13222_v27 = vpop.f32.mrf.mxu1 }
 0x2ea   :  { %v13224_v41 = vpop.f32.mrf.mxu0 }
 0x2eb   :  { %v13226_v46 = vpop.f32.mrf.mxu1 }
 0x2ec   :  { %v13228_v35 = vpop.f32.mrf.mxu0 }
 0x2ed   :  { %v13230_v63 = vpop.f32.mrf.mxu1 }
 0x2ee   :  { %v13232_v61 = vpop.f32.mrf.mxu0 }
 0x2ef   :  { %v13234_v43 = vpop.f32.mrf.mxu1 }
 0x2f0   :  { %v13236_v52 = vpop.f32.mrf.mxu0 }
 0x2f1   :  { %15378 = vst [vmem:[#allocation57_spill] sm:$0xff] %v13236_v52  ;;  %v13238_v1 = vpop.f32.mrf.mxu1 }
 0x2f2   :  { %15379 = vst [vmem:[#allocation55_spill] sm:$0xff] %v13238_v1  ;;  %v13240_v37 = vpop.f32.mrf.mxu0 }
 0x2f3   :  { %15380 = vst [vmem:[#allocation75_spill] sm:$0xff] %v13240_v37  ;;  %v13242_v10 = vpop.f32.mrf.mxu1 }
 0x2f4   :  { %15381 = vst [vmem:[#allocation76_spill] sm:$0xff] %v13242_v10  ;;  %v11185_v50 = vpop.f32.mrf.mxu0  ;;  %v1096_v10 = vld [vmem:[#allocation10] sm:$0x3] }
 0x2f5   :  { %v1925_v2 = vadd.f32 %v11185_v50, %v1670_v9  ;;  %v15383_v9 = vld [vmem:[#allocation41_spill] sm:$0xff] }
 0x2f6   :  { %v11203_v3 = vpop.f32.mrf.mxu1  ;;  %v1860_v39 = vpop.f32.mrf.mxu0  ;;  %v13265_v34 = vrot.slane %v1096_v10, %v15383_v9 }
 0x2f7   :  { %v1923_v49 = vadd.f32 %v1860_v39, %v1662_v20  ;;  %v2140_v37 = vadd.f32 %v11203_v3, %v1925_v2  ;;  %v1678_v20 = vadd.f32 %v13202_v42, %v13200_v56  ;;  %v13276_v56 = vrot.slane %v1096_v10, %v15384_v58 }
 0x2f8   :  { %v2075_v19 = vpop.f32.mrf.mxu1  ;;  %v11186_v59 = vpop.f32.mrf.mxu0  ;;  %v1697_v3 = vadd.f32 %v13226_v46, %v13224_v41  ;;  %v1718_v46 = vadd.f32 %v13230_v63, %v13228_v35 }
 0x2f9   :  { %v1926_v48 = vadd.f32 %v11186_v59, %v1673_v17  ;;  %v2138_v52 = vadd.f32 %v2075_v19, %v1923_v49  ;;  %v1681_v19 = vadd.f32 %v13210_v14, %v13208_v29  ;;  %v1702_v14 = vadd.f32 %v13214_v36, %v13212_v6 }
 0x2fa   :  { %v11204_v21 = vpop.f32.mrf.mxu1  ;;  %v1863_v53 = vpop.f32.mrf.mxu0 }
 0x2fb   :  { %v2141_v39 = vadd.f32 %v11204_v21, %v1926_v48 }
 0x2fc   :  { %v11189_v32 = vpop.f32.mrf.mxu0  ;;  %v2078_v8 = vpop.f32.mrf.mxu1 }
 0x2fd   :  { %v1929_v44 = vadd.f32 %v11189_v32, %v1686_v62 }
 0x2fe   :  { %v1876_v54 = vpop.f32.mrf.mxu0  ;;  %v11207_v26 = vpop.f32.mrf.mxu1 }
 0x2ff   :  { %v1927_v2 = vadd.f32 %v1876_v54, %v1678_v20  ;;  %v2144_v54 = vadd.f32 %v11207_v26, %v1929_v44 }
 0x300   :  { %v11190_v60 = vpop.f32.mrf.mxu0  ;;  %v2091_v38 = vpop.f32.mrf.mxu1 }
 0x302   :  { %v1879_v33 = vpop.f32.mrf.mxu0  ;;  %v11208_v30 = vpop.f32.mrf.mxu1 }
 0x303   :  { %v1928_v21 = vadd.f32 %v1879_v33, %v1681_v19  ;;  %v1705_v33 = vadd.f32 %v13222_v27, %v13220_v13 }
 0x304   :  { %v13244_v40 = vpop.f32.mrf.mxu0  ;;  %v2094_v57 = vpop.f32.mrf.mxu1 }
 0x305   :  { %v1933_v36 = vadd.f32 %v13244_v40, %v1702_v14 }
 0x306   :  { %v13246_v12 = vpop.f32.mrf.mxu0  ;;  %v13258_v11 = vpop.f32.mrf.mxu1 }
 0x308   :  { %v13248_v7 = vpop.f32.mrf.mxu0  ;;  %v13262_v15 = vpop.f32.mrf.mxu1 }
 0x309   :  { %v1934_v13 = vadd.f32 %v13248_v7, %v1705_v33  ;;  %v1710_v7 = vadd.f32 %v13234_v43, %v13232_v61 }
 0x30a   :  { %v13250_v28 = vpop.f32.mrf.mxu0  ;;  %v11212_v51 = vpop.f32.mrf.mxu1 }
 0x30b   :  { %v1932_v40 = vadd.f32 %v13250_v28, %v1697_v3 }
 0x30c   :  { %v13252_v18 = vpop.f32.mrf.mxu0 }
 0x30d   :  { %15382 = vst [vmem:[#allocation77_spill] sm:$0xff] %v13252_v18  ;;  %v1924_v18 = vadd.f32 %v1863_v53, %v1665_v47  ;;  %v1689_v53 = vadd.f32 %v13206_v25, %v13204_v4 }
 0x30e   :  { %v13254_v0 = vpop.f32.mrf.mxu0 }
 0x30f   :  { %v2139_v59 = vadd.f32 %v2078_v8, %v1924_v18  ;;  %v1930_v8 = vadd.f32 %v11190_v60, %v1689_v53 }
 0x310   :  { %v13256_v22 = vpop.f32.mrf.mxu0 }
 0x311   :  { %v2145_v62 = vadd.f32 %v11208_v30, %v1930_v8 }
 0x312   :  { %v13260_v45 = vpop.f32.mrf.mxu0 }
 0x314   :  { %v11221_v1 = vpop.f32.mrf.mxu0  ;;  %v15385_v35 = vld [vmem:[#allocation77_spill] sm:$0xff] }
 0x315   :  { %v2291_v5 = vadd.f32 %v11221_v1, %v2140_v37  ;;  %v2110_v1 = vpop.f32.mrf.mxu1  ;;  %v1694_v37 = vadd.f32 %v13218_v16, %v13216_v55  ;;  %v1937_v63 = vadd.f32 %v15385_v35, %v1718_v46 }
 0x316   :  { %v2226_v24 = vpop.f32.mrf.mxu0 }
 0x317   :  { %v2289_v23 = vadd.f32 %v2226_v24, %v2138_v52  ;;  %v2311_v31 = vmul.f32 %v13265_v34, %v2291_v5  ;;  %v2142_v52 = vadd.f32 %v2091_v38, %v1927_v2  ;;  %v2143_v5 = vadd.f32 %v2094_v57, %v1928_v21  ;;  %v11215_v16 = vpop.f32.mrf.mxu1 }
 0x318   :  { %v11222_v17 = vpop.f32.mrf.mxu0  ;;  %v1931_v55 = vadd.f32 %v13246_v12, %v1694_v37  ;;  %v15388_v37 = vld [vmem:[#allocation75_spill] sm:$0xff]  ;;  %v2152_v33 = vadd.f32 %v11215_v16, %v1937_v63 }
 0x319   :  { %v2309_v47 = vmul.f32 %v13265_v34, %v2289_v23  ;;  %v2292_v49 = vadd.f32 %v11222_v17, %v2141_v39  ;;  %v2331_v10 = vadd.f32 %v13276_v56, %v2311_v31  ;;  %v2123_v53 = vpop.f32.mrf.mxu1  ;;  %v2149_v31 = vadd.f32 %v11212_v51, %v1934_v13 }
 0x31a   :  { %v2229_v48 = vpop.f32.mrf.mxu0 }
 0x31b   :  { %v2312_v32 = vmul.f32 %v13265_v34, %v2292_v49  ;;  %v2290_v18 = vadd.f32 %v2229_v48, %v2139_v59  ;;  %v2329_v4 = vadd.f32 %v13276_v56, %v2309_v47  ;;  %v2347_v27 = vmax.f32 %v2331_v10, 0.0  ;;  %v11216_v51 = vpop.f32.mrf.mxu1  ;;  %v15389_v10 = vld [vmem:[#allocation76_spill] sm:$0xff] }
 0x31c   :  { %v11225_v42 = vpop.f32.mrf.mxu0  ;;  %v2148_v47 = vadd.f32 %v13258_v11, %v1933_v36  ;;  %v2146_v49 = vadd.f32 %v13262_v15, %v1931_v55 }
 0x31d   :  { %v2332_v25 = vadd.f32 %v13276_v56, %v2312_v32  ;;  %v2310_v29 = vmul.f32 %v13265_v34, %v2290_v18  ;;  %v2295_v60 = vadd.f32 %v11225_v42, %v2144_v54  ;;  %v2345_v20 = vmax.f32 %v2329_v4, 0.0  ;;  %v2126_v55 = vpop.f32.mrf.mxu1 }
 0x31e   :  { %v2242_v26 = vpop.f32.mrf.mxu0  ;;  %v2147_v18 = vadd.f32 %v2110_v1, %v1932_v40  ;;  %v1935_v54 = vadd.f32 %v13254_v0, %v1710_v7 }
 0x31f   :  { %v2330_v38 = vadd.f32 %v13276_v56, %v2310_v29  ;;  %v2293_v50 = vadd.f32 %v2242_v26, %v2142_v52  ;;  %v2348_v24 = vmax.f32 %v2332_v25, 0.0  ;;  %v2315_v41 = vmul.f32 %v13265_v34, %v2295_v60  ;;  %v15386_v25 = vld [vmem:[#allocation57_spill] sm:$0xff]  ;;  %v15387_v29 = vld [vmem:[#allocation55_spill] sm:$0xff] }
 0x320   :  { %v11226_v6 = vpop.f32.mrf.mxu0  ;;  %v1721_v14 = vadd.f32 %v15387_v29, %v15386_v25  ;;  %v1713_v26 = vadd.f32 %v15389_v10, %v15388_v37 }
 0x321   :  { %v2346_v39 = vmax.f32 %v2330_v38, 0.0  ;;  %v2313_v23 = vmul.f32 %v13265_v34, %v2293_v50  ;;  %v2296_v44 = vadd.f32 %v11226_v6, %v2145_v62  ;;  %v2362_v12 = vpack.c.bf16 %v2348_v24, %v2347_v27 }
 0x322   :  { %v2245_v17 = vpop.f32.mrf.mxu0  ;;  %v2335_v61 = vadd.f32 %v13276_v56, %v2315_v41  ;;  %v2150_v62 = vadd.f32 %v2123_v53, %v1935_v54  ;;  %v1936_v24 = vadd.f32 %v13260_v45, %v1713_v26 }
 0x323   :  { %v2294_v30 = vadd.f32 %v2245_v17, %v2143_v5  ;;  %v2361_v57 = vpack.c.bf16 %v2346_v39, %v2345_v20  ;;  %v2316_v59 = vmul.f32 %v13265_v34, %v2296_v44  ;;  %v2333_v28 = vadd.f32 %v13276_v56, %v2313_v23 }
 0x324   :  { %v11229_v2 = vpop.f32.mrf.mxu0  ;;  %v2351_v50 = vmax.f32 %v2335_v61, 0.0  ;;  %v1938_v5 = vadd.f32 %v13256_v22, %v1721_v14  ;;  %v2151_v41 = vadd.f32 %v2126_v55, %v1936_v24 }
 0x325   :  { %v2314_v19 = vmul.f32 %v13265_v34, %v2294_v30  ;;  %11237 = vmatprep.mubr.msk.bf16.mxu1 %vm1092_vm3, %v2361_v57  ;;  %v2336_v48 = vadd.f32 %v13276_v56, %v2316_v59  ;;  %v2299_v43 = vadd.f32 %v11229_v2, %v2148_v47  ;;  %v2349_v38 = vmax.f32 %v2333_v28, 0.0 }
 0x326   :  { %v2258_v32 = vpop.f32.mrf.mxu0  ;;  %11238 = vmatmul.mubr.msk.bf16.vlgmr.msra.gmra.mxu1 %vm1092_vm3, %v2362_v12  ;;  %v2153_v45 = vadd.f32 %v11216_v51, %v1938_v5 }
 0x327   :  { %v2334_v11 = vadd.f32 %v13276_v56, %v2314_v19  ;;  %v2297_v15 = vadd.f32 %v2258_v32, %v2146_v49  ;;  %v2352_v21 = vmax.f32 %v2336_v48, 0.0  ;;  %v2319_v1 = vmul.f32 %v13265_v34, %v2299_v43 }
 0x328   :  { %v11230_v8 = vpop.f32.mrf.mxu0 }
 0x329   :  { %v2350_v42 = vmax.f32 %v2334_v11, 0.0  ;;  %v2317_v52 = vmul.f32 %v13265_v34, %v2297_v15  ;;  %v2300_v4 = vadd.f32 %v11230_v8, %v2149_v31  ;;  %v2364_v20 = vpack.c.bf16 %v2352_v21, %v2351_v50  ;;  %v12097_v8 = vld [vmem:[#allocation9 + $0x30] sm:$0xff]  }
 0x32a   :  { %v2261_v60 = vpop.f32.mrf.mxu0  ;;  %v2339_v23 = vadd.f32 %v13276_v56, %v2319_v1  ;;  %11273 = vmatprep.subr.bf16.mxu1 %v12097_v8 }
 0x32b   :  { %v2320_v0 = vmul.f32 %v13265_v34, %v2300_v4  ;;  %v2298_v3 = vadd.f32 %v2261_v60, %v2147_v18  ;;  %v2363_v36 = vpack.c.bf16 %v2350_v42, %v2349_v38  ;;  %v2337_v39 = vadd.f32 %v13276_v56, %v2317_v52  ;;  %11274 = vmatpush3.bf16.msra.mxu1 %v12097_v8 }
 0x32c   :  { %v11233_v6 = vpop.f32.mrf.mxu0  ;;  %v2355_v7 = vmax.f32 %v2339_v23, 0.0 }
 0x32d   :  { %v2340_v16 = vadd.f32 %v13276_v56, %v2320_v0  ;;  %v2318_v13 = vmul.f32 %v13265_v34, %v2298_v3  ;;  %11241 = vmatprep.mubr.msk.bf16.mxu1 %vm1092_vm3, %v2363_v36  ;;  %v2303_v22 = vadd.f32 %v11233_v6, %v2152_v33  ;;  %v2353_v57 = vmax.f32 %v2337_v39, 0.0  ;;  %v15390_v6 = vld [vmem:[#allocation26_spill] sm:$0xff]  ;;  %v15393_v39 = vld [vmem:[#allocation25_spill] sm:$0xff] }
 0x32e   :  { %v2274_v27 = vpop.f32.mrf.mxu0  ;;  %11242 = vmatmul.mubr.msk.bf16.gmra.mxu1 %vm1092_vm3, %v2364_v20  ;;  %v15391_v36 = vmax.f32 %v15390_v6, 0.0 }
 0x32f   :  { %v2338_v44 = vadd.f32 %v13276_v56, %v2318_v13  ;;  %v2301_v17 = vadd.f32 %v2274_v27, %v2150_v62  ;;  %v2356_v46 = vmax.f32 %v2340_v16, 0.0  ;;  %v2323_v47 = vmul.f32 %v13265_v34, %v2303_v22  ;;  %v15396_v27 = vld [vmem:[#allocation28_spill] sm:$0xff] }
 0x330   :  { %v11234_v30 = vpop.f32.mrf.mxu0  ;;  %v15394_v16 = vmax.f32 %v15393_v39, 0.0  ;;  %v15397_v23 = vmax.f32 %v15396_v27, 0.0  ;;  %v15420_v27 = vld [vmem:[#allocation30_spill] sm:$0xff] }
 0x331   :  { %v2354_v40 = vmax.f32 %v2338_v44, 0.0  ;;  %v2321_v12 = vmul.f32 %v13265_v34, %v2301_v17  ;;  %v2304_v59 = vadd.f32 %v11234_v30, %v2153_v45  ;;  %v2366_v31 = vpack.c.bf16 %v2356_v46, %v2355_v7  ;;  %v15399_v17 = vld [vmem:[#allocation27_spill] sm:$0xff] }
 0x332   :  { %v2277_v2 = vpop.f32.mrf.mxu0  ;;  %v2343_v48 = vadd.f32 %v13276_v56, %v2323_v47  ;;  %v15400_v45 = vmax.f32 %v15399_v17, 0.0 }
 0x333   :  { %v2302_v49 = vadd.f32 %v2277_v2, %v2151_v41  ;;  %v2365_v53 = vpack.c.bf16 %v2354_v40, %v2353_v57  ;;  %v2324_v19 = vmul.f32 %v13265_v34, %v2304_v59  ;;  %v2341_v35 = vadd.f32 %v13276_v56, %v2321_v12 }
 0x334   :  { %v2359_v15 = vmax.f32 %v2343_v48, 0.0 }
 0x335   :  { %v2322_v63 = vmul.f32 %v13265_v34, %v2302_v49  ;;  %11245 = vmatprep.mubr.msk.bf16.mxu1 %vm1092_vm3, %v2365_v53  ;;  %v2344_v28 = vadd.f32 %v13276_v56, %v2324_v19  ;;  %v2357_v61 = vmax.f32 %v2341_v35, 0.0  ;;  %v12096_v34 = vld [vmem:[%s15164_s3 + $0x10] sm:$0xff]  }
 0x336   :  { %11246 = vmatmul.mubr.msk.bf16.gmra.mxu1 %vm1092_vm3, %v2366_v31  ;;  %11255 = vmatprep.subr.bf16.mxu0 %v12096_v34 }
 0x337   :  { %v2342_v32 = vadd.f32 %v13276_v56, %v2322_v63  ;;  %v2360_v11 = vmax.f32 %v2344_v28, 0.0  ;;  %11256 = vmatpush3.bf16.msra.mxu0 %v12096_v34  ;;  %v1097_v56 = vld [vmem:[#allocation13] sm:$0x3] }
 0x338   :  { %v13346_v51 = vrot.slane %v1097_v56, %v15383_v9  ;;  %v13350_v52 = vrot.slane %v1097_v56, %v15384_v58  ;;  %v15410_v34 = vld [vmem:[#allocation34_spill] sm:$0xff] }
 0x339   :  { %v2358_v43 = vmax.f32 %v2342_v32, 0.0  ;;  %v2368_v54 = vpack.c.bf16 %v2360_v11, %v2359_v15  ;;  %v15404_v32 = vld [vmem:[#allocation32_spill] sm:$0xff]  ;;  %v15407_v15 = vld [vmem:[#allocation31_spill] sm:$0xff]  ;;  %v15411_v8 = vmax.f32 %v15410_v34, 0.0 }
 0x33a   :  { %v15436_v34 = vld [vmem:[#allocation36_spill] sm:$0xff] }
 0x33b   :  { %v2367_v18 = vpack.c.bf16 %v2358_v43, %v2357_v61  ;;  %v15405_v61 = vmax.f32 %v15404_v32, 0.0  ;;  %v15430_v32 = vld [vmem:[#allocation35_spill] sm:$0xff] }
 0x33d   :  { %11249 = vmatprep.mubr.msk.bf16.mxu1 %vm1092_vm3, %v2367_v18  ;;  %v15408_v18 = vmax.f32 %v15407_v15, 0.0 }
 0x33e   :  { %11250 = vmatmul.mubr.msk.bf16.gmra.mxu1 %vm1092_vm3, %v2368_v54 }
 0x3e6   :  { %v11239_v21 = vpop.f32.mrf.mxu1 }
 0x3e7   :  { %v2504_v42 = vmul.f32 %v11239_v21, %v13346_v51  ;;  %v15413_v21 = vld [vmem:[#allocation33_spill] sm:$0xff] }
 0x3e8   :  { %v2435_v4 = vpop.f32.mrf.mxu1 }
 0x3e9   :  { %v2502_v25 = vmul.f32 %v13346_v51, %v2435_v4  ;;  %v2524_v10 = vadd.f32 %v13350_v52, %v2504_v42  ;;  %v15414_v42 = vmax.f32 %v15413_v21, 0.0 }
 0x3ea   :  { %v11240_v29 = vpop.f32.mrf.mxu1 }
 0x3eb   :  { %v2522_v14 = vadd.f32 %v13350_v52, %v2502_v25  ;;  %v2505_v37 = vmul.f32 %v11240_v29, %v13346_v51  ;;  %v2540_v3 = vmax.f32 %v2524_v10, 0.0 }
 0x3ec   :  { %v2438_v26 = vpop.f32.mrf.mxu1 }
 0x3ed   :  { %v2525_v33 = vadd.f32 %v13350_v52, %v2505_v37  ;;  %v2503_v38 = vmul.f32 %v13346_v51, %v2438_v26  ;;  %v2538_v60 = vmax.f32 %v2522_v14, 0.0  ;;  %v13375_v41 = vadd.f32 %v2540_v3, %v15400_v45 }
 0x3ee   :  { %v11243_v0 = vpop.f32.mrf.mxu1 }
 0x3ef   :  { %v2541_v50 = vmax.f32 %v2525_v33, 0.0  ;;  %v2523_v1 = vadd.f32 %v13350_v52, %v2503_v38  ;;  %v2508_v5 = vmul.f32 %v11243_v0, %v13346_v51  ;;  %v13367_v13 = vadd.f32 %v2538_v60, %v15394_v16  ;;  %15401 = vst [vmem:[#allocation57_spill] sm:$0xff] %v13375_v41 }
 0x3f0   :  { %v2451_v24 = vpop.f32.mrf.mxu1 }
 0x3f1   :  { %v2539_v62 = vmax.f32 %v2523_v1, 0.0  ;;  %v13362_v55 = vadd.f32 %v2541_v50, %v15391_v36  ;;  %v2506_v20 = vmul.f32 %v13346_v51, %v2451_v24  ;;  %15395 = vst [vmem:[#allocation42_spill] sm:$0xff] %v13367_v13  ;;  %v2528_v46 = vadd.f32 %v13350_v52, %v2508_v5 }
 0x3f2   :  { %v11244_v22 = vpop.f32.mrf.mxu1 }
 0x3f3   :  { %15392 = vst [vmem:[#allocation41_spill] sm:$0xff] %v13362_v55  ;;  %v13371_v44 = vadd.f32 %v2539_v62, %v15397_v23  ;;  %v2526_v30 = vadd.f32 %v13350_v52, %v2506_v20  ;;  %v2509_v57 = vmul.f32 %v11244_v22, %v13346_v51  ;;  %v2588_v59 = vpack.c.bf16 %v13362_v55, %v13375_v41  ;;  %v15417_v20 = vld [vmem:[#allocation38_spill] sm:$0xff] }
 0x3f4   :  { %v2454_v40 = vpop.f32.mrf.mxu1  ;;  %v2544_v31 = vmax.f32 %v2528_v46, 0.0  ;;  %v15418_v39 = vmax.f32 %v15417_v20, 0.0  ;;  %v15421_v23 = vmax.f32 %v15420_v27, 0.0 }
 0x3f5   :  { %15398 = vst [vmem:[#allocation77_spill] sm:$0xff] %v13371_v44  ;;  %v2587_v12 = vpack.c.bf16 %v13371_v44, %v13367_v13  ;;  %v2529_v2 = vadd.f32 %v13350_v52, %v2509_v57  ;;  %v2507_v7 = vmul.f32 %v13346_v51, %v2454_v40  ;;  %v2542_v49 = vmax.f32 %v2526_v30, 0.0  ;;  %v15423_v30 = vld [vmem:[#allocation29_spill] sm:$0xff] }
 0x3f6   :  { %v11247_v47 = vpop.f32.mrf.mxu1  ;;  %v13405_v4 = vadd.f32 %v2544_v31, %v15414_v42  ;;  %v15424_v57 = vmax.f32 %v15423_v30, 0.0  ;;  %v15439_v42 = vld [vmem:[#allocation39_spill] sm:$0xff] }
 0x3f7   :  { %11257 = vmatprep.mubr.msk.bf16.mxu0 %vm15402_vm14, %v2587_v12  ;;  %v2545_v53 = vmax.f32 %v2529_v2, 0.0  ;;  %v2527_v19 = vadd.f32 %v13350_v52, %v2507_v7  ;;  %v2512_v28 = vmul.f32 %v11247_v47, %v13346_v51  ;;  %v13397_v54 = vadd.f32 %v2542_v49, %v15408_v18  ;;  %vm15416_vm14 = vmmov %vm15403_vm2  ;;  %v15426_v12 = vld [vmem:[#allocation37_spill] sm:$0xff] }
 0x3f8   :  { %11258 = vmatmul.mubr.msk.bf16.vlgmr.msra.gmra.mxu0 %vm15403_vm2, %v2588_v59  ;;  %v2467_v35 = vpop.f32.mrf.mxu1  ;;  %15415 = vst [vmem:[#allocation26_spill] sm:$0xff] %v13405_v4  ;;  %v15427_v59 = vmax.f32 %v15426_v12, 0.0 }
 0x3f9   :  { %v2543_v63 = vmax.f32 %v2527_v19, 0.0  ;;  %v2510_v48 = vmul.f32 %v13346_v51, %v2467_v35  ;;  %v13393_v11 = vadd.f32 %v2545_v53, %v15405_v61  ;;  %15409 = vst [vmem:[#allocation75_spill] sm:$0xff] %v13397_v54  ;;  %v2532_v37 = vadd.f32 %v13350_v52, %v2512_v28 }
 0x3fa   :  { %v11248_v43 = vpop.f32.mrf.mxu1  ;;  %v15431_v61 = vmax.f32 %v15430_v32, 0.0 }
 0x3fb   :  { %15406 = vst [vmem:[#allocation55_spill] sm:$0xff] %v13393_v11  ;;  %v13401_v56 = vadd.f32 %v2543_v63, %v15411_v8  ;;  %v2530_v25 = vadd.f32 %v13350_v52, %v2510_v48  ;;  %v2513_v29 = vmul.f32 %v11248_v43, %v13346_v51  ;;  %v2590_v33 = vpack.c.bf16 %v13393_v11, %v13405_v4 }
 0x3fc   :  { %v2470_v14 = vpop.f32.mrf.mxu1  ;;  %v2548_v62 = vmax.f32 %v2532_v37, 0.0  ;;  %v15437_v8 = vmax.f32 %v15436_v34, 0.0  ;;  %v12098_v37 = vld [vmem:[#allocation9 + $0x28] sm:$0xff]  }
 0x3fd   :  { %15412 = vst [vmem:[#allocation76_spill] sm:$0xff] %v13401_v56  ;;  %v2511_v10 = vmul.f32 %v13346_v51, %v2470_v14  ;;  %v2589_v26 = vpack.c.bf16 %v13401_v56, %v13397_v54  ;;  %v2533_v38 = vadd.f32 %v13350_v52, %v2513_v29  ;;  %v2546_v1 = vmax.f32 %v2530_v25, 0.0  ;;  %11291 = vmatprep.subr.bf16.mxu0 %v12098_v37 }
 0x3fe   :  { %v11251_v60 = vpop.f32.mrf.mxu1  ;;  %v13437_v2 = vadd.f32 %v2548_v62, %v15427_v59  ;;  %11292 = vmatpush3.bf16.msra.mxu0 %v12098_v37 }
 0x3ff   :  { %v2531_v50 = vadd.f32 %v13350_v52, %v2511_v10  ;;  %11261 = vmatprep.mubr.msk.bf16.mxu0 %vm15403_vm2, %v2589_v26  ;;  %v2549_v0 = vmax.f32 %v2533_v38, 0.0  ;;  %v2516_v24 = vmul.f32 %v11251_v60, %v13346_v51  ;;  %v13433_v46 = vadd.f32 %v2546_v1, %v15424_v57  ;;  %v13471_v10 = vld [vmem:[#allocation9 + $0x38] sm:$0xff]   ;;  %v13474_v26 = vld [vmem:[#allocation9 + $0x40] sm:$0xff]  }
 0x400   :  { %v2483_v3 = vpop.f32.mrf.mxu1  ;;  %11262 = vmatmul.mubr.msk.bf16.gmra.mxu0 %vm15416_vm14, %v2590_v33  ;;  %15428 = vst [vmem:[#allocation32_spill] sm:$0xff] %v13437_v2  ;;  %vm15429_vm14 = vmmov %vm15403_vm2  ;;  %11309 = vmatprep.subr.bf16.mxu1 %v13471_v10  ;;  %v2571_v33 = vld [vmem:[#allocation7 + $0x2] sm:$0x3] }
 0x401   :  { %v2547_v5 = vmax.f32 %v2531_v50, 0.0  ;;  %v2514_v6 = vmul.f32 %v13346_v51, %v2483_v3  ;;  %v13423_v16 = vadd.f32 %v2549_v0, %v15418_v39  ;;  %15425 = vst [vmem:[#allocation27_spill] sm:$0xff] %v13433_v46  ;;  %v2536_v7 = vadd.f32 %v13350_v52, %v2516_v24  ;;  %11327 = vmatprep.subr.bf16.mxu0 %v13474_v26 }
 0x402   :  { %v11252_v36 = vpop.f32.mrf.mxu1  ;;  %v13478_v38 = vrot.slane %v2571_v33, %v15383_v9  ;;  %v13481_v60 = vrot.slane %v2571_v33, %v15384_v58 }
 0x403   :  { %15419 = vst [vmem:[#allocation25_spill] sm:$0xff] %v13423_v16  ;;  %v13427_v22 = vadd.f32 %v2547_v5, %v15421_v23  ;;  %v2534_v17 = vadd.f32 %v13350_v52, %v2514_v6  ;;  %v2517_v45 = vmul.f32 %v11252_v36, %v13346_v51  ;;  %v2592_v19 = vpack.c.bf16 %v13423_v16, %v13437_v2 }
 0x404   :  { %v2486_v40 = vpop.f32.mrf.mxu1  ;;  %v2552_v28 = vmax.f32 %v2536_v7, 0.0 }
 0x405   :  { %15422 = vst [vmem:[#allocation28_spill] sm:$0xff] %v13427_v22  ;;  %v2537_v47 = vadd.f32 %v13350_v52, %v2517_v45  ;;  %v2515_v49 = vmul.f32 %v13346_v51, %v2486_v40  ;;  %v2591_v53 = vpack.c.bf16 %v13427_v22, %v13433_v46  ;;  %v2550_v31 = vmax.f32 %v2534_v17, 0.0  ;;  %v15433_v51 = vld [vmem:[#allocation40_spill] sm:$0xff] }
 0x406   :  { %v15434_v15 = vmax.f32 %v15433_v51, 0.0 }
 0x407   :  { %v2553_v35 = vmax.f32 %v2537_v47, 0.0  ;;  %v2535_v63 = vadd.f32 %v13350_v52, %v2515_v49  ;;  %11265 = vmatprep.mubr.msk.bf16.mxu0 %vm15403_vm2, %v2591_v53  ;;  %v13451_v43 = vadd.f32 %v2550_v31, %v15431_v61  ;;  %v15440_v52 = vmax.f32 %v15439_v42, 0.0 }
 0x408   :  { %11266 = vmatmul.mubr.msk.bf16.gmra.mxu0 %vm15429_vm14, %v2592_v19  ;;  %vm15442_vm14 = vmmov %vm15403_vm2 }
 0x409   :  { %v2551_v48 = vmax.f32 %v2535_v63, 0.0  ;;  %15432 = vst [vmem:[#allocation31_spill] sm:$0xff] %v13451_v43  ;;  %v13455_v18 = vadd.f32 %v2553_v35, %v15434_v15  ;;  %v13463_v25 = vadd.f32 %v2552_v28, %v15440_v52  ;;  %v15443_v15 = vmov 0.0  }
 0x40b   :  { %15435 = vst [vmem:[#allocation34_spill] sm:$0xff] %v13455_v18  ;;  %v13459_v21 = vadd.f32 %v2551_v48, %v15437_v8  ;;  %15441 = vst [vmem:[#allocation38_spill] sm:$0xff] %v13463_v25  ;;  %v2594_v14 = vpack.c.bf16 %v13455_v18, %v13463_v25  ;;  %v15444_v8 = vld [vmem:[#allocation43_spill] sm:$0xff]  ;;  %v15466_v18 = vld [vmem:[#allocation61_spill] sm:$0xff] }
 0x40c   :  { %v15464_v25 = vld [vmem:[#allocation59_spill] sm:$0xff] }
 0x40d   :  { %15438 = vst [vmem:[#allocation33_spill] sm:$0xff] %v13459_v21  ;;  %v2593_v29 = vpack.c.bf16 %v13459_v21, %v13451_v43 }
 0x40f   :  { %11269 = vmatprep.mubr.msk.bf16.mxu0 %vm15403_vm2, %v2593_v29  ;;  %vm15445_vm2 = vcmp.ge.s32.totalorder %v15444_v8, 0 }
 0x410   :  { %11270 = vmatmul.mubr.msk.bf16.gmra.mxu0 %vm15442_vm14, %v2594_v14 }
 0x4b8   :  { %v11259_v50 = vpop.f32.mrf.mxu0 }
 0x4b9   :  { %v2739_v1 = vmul.f32 %v11259_v50, %v13478_v38 }
 0x4ba   :  { %v2670_v0 = vpop.f32.mrf.mxu0 }
 0x4bb   :  { %v2759_v3 = vadd.f32 %v13481_v60, %v2739_v1  ;;  %v2737_v62 = vmul.f32 %v13478_v38, %v2670_v0 }
 0x4bc   :  { %v11260_v5 = vpop.f32.mrf.mxu0 }
 0x4bd   :  { %v2775_v24 = vmax.f32 %v2759_v3, 0.0  ;;  %v2757_v6 = vadd.f32 %v13481_v60, %v2737_v62  ;;  %v2740_v36 = vmul.f32 %v11260_v5, %v13478_v38 }
 0x4be   :  { %v2673_v20 = vpop.f32.mrf.mxu0 }
 0x4bf   :  { %2791 = vst.msk [vmem:[#allocation2 + $0x20] sm:$0xff] %vm1092_vm3, %v2775_v24  ;;  %v2773_v39 = vmax.f32 %v2757_v6, 0.0  ;;  %v2760_v27 = vadd.f32 %v13481_v60, %v2740_v36  ;;  %v2738_v23 = vmul.f32 %v13478_v38, %v2673_v20 }
 0x4c0   :  { %v11263_v30 = vpop.f32.mrf.mxu0 }
 0x4c1   :  { %2789 = vst.msk [vmem:[#allocation2 + $0x10] sm:$0xff] %vm1092_vm3, %v2773_v39  ;;  %v2776_v17 = vmax.f32 %v2760_v27, 0.0  ;;  %v2758_v45 = vadd.f32 %v13481_v60, %v2738_v23  ;;  %v2743_v57 = vmul.f32 %v11263_v30, %v13478_v38  ;;  %v13531_v23 = vld [vmem:[#allocation9 + $0x48] sm:$0xff]   ;;  %v15474_v30 = vld [vmem:[#allocation65_spill] sm:$0xff] }
 0x4c2   :  { %v2686_v59 = vpop.f32.mrf.mxu0 }
 0x4c3   :  { %v13494_v40 = vpack.c.bf16 %v2776_v17, %v2775_v24  ;;  %2792 = vst.msk [vmem:[#allocation2 + $0x28] sm:$0xff] %vm1092_vm3, %v2776_v17  ;;  %v2774_v12 = vmax.f32 %v2758_v45, 0.0  ;;  %v2763_v7 = vadd.f32 %v13481_v60, %v2743_v57  ;;  %v2741_v47 = vmul.f32 %v13478_v38, %v2686_v59 }
 0x4c4   :  { %v11264_v53 = vpop.f32.mrf.mxu0 }
 0x4c5   :  { %v13499_v49 = vpack.c.bf16 %v2774_v12, %v2773_v39  ;;  %2790 = vst.msk [vmem:[#allocation2 + $0x18] sm:$0xff] %vm1092_vm3, %v2774_v12  ;;  %v2779_v19 = vmax.f32 %v2763_v7, 0.0  ;;  %v2761_v31 = vadd.f32 %v13481_v60, %v2741_v47  ;;  %v2744_v35 = vmul.f32 %v11264_v53, %v13478_v38 }
 0x4c6   :  { %v2689_v63 = vpop.f32.mrf.mxu0  ;;  %v2848_v50 = vld [vmem:[#allocation2 + $0x20] sm:$0xff] }
 0x4c7   :  { %2795 = vst.msk [vmem:[#allocation2 + $0x40] sm:$0xff] %vm1092_vm3, %v2779_v19  ;;  %v2777_v28 = vmax.f32 %v2761_v31, 0.0  ;;  %v2764_v48 = vadd.f32 %v13481_v60, %v2744_v35  ;;  %v2742_v32 = vmul.f32 %v13478_v38, %v2689_v63 }
 0x4c8   :  { %v2846_v61 = vld [vmem:[#allocation2 + $0x10] sm:$0xff]  ;;  %v11267_v14 = vpop.f32.mrf.mxu0 }
 0x4c9   :  { %v13507_v51 = vld [vmem:[#allocation2 + $0xf] sm:$0xff]  ;;  %v2877_v34 = vpack.c.bf16 %v2846_v61, %v15443_v15  ;;  %2793 = vst.msk [vmem:[#allocation2 + $0x30] sm:$0xff] %vm1092_vm3, %v2777_v28  ;;  %v2780_v52 = vmax.f32 %v2764_v48, 0.0  ;;  %v2762_v29 = vadd.f32 %v13481_v60, %v2742_v32  ;;  %v2747_v33 = vmul.f32 %v11267_v14, %v13478_v38 }
 0x4ca   :  { %v2822_v42 = vsel %vm15445_vm2, %v13507_v51, 0.0  ;;  %v2702_v3 = vpop.f32.mrf.mxu0  ;;  %v13542_v53 = vld [vmem:[#allocation2 + $0x27] sm:$0xff] }
 0x4cb   :  { %v2837_v37 = vpack.c.bf16 %v2822_v42, %v15443_v15  ;;  %11275 = vmatprep.mubr.msk.bf16.mxu1 %vm1092_vm3, %v2877_v34  ;;  %2796 = vst.msk [vmem:[#allocation2 + $0x48] sm:$0xff] %vm1092_vm3, %v2780_v52  ;;  %v13519_v1 = vpack.c.bf16 %v2780_v52, %v2779_v19  ;;  %v2778_v0 = vmax.f32 %v2762_v29, 0.0  ;;  %v2767_v6 = vadd.f32 %v13481_v60, %v2747_v33 }
 0x4cc   :  { %v2847_v62 = vld [vmem:[#allocation2 + $0x18] sm:$0xff]  ;;  %v2745_v36 = vmul.f32 %v13478_v38, %v2702_v3  ;;  %v11268_v45 = vpop.f32.mrf.mxu0 }
 0x4cd   :  { %11293 = vmatprep.mubr.msk.bf16.mxu0 %vm1092_vm3, %v2837_v37  ;;  %v13522_v5 = vld [vmem:[#allocation2 + $0x17] sm:$0xff]  ;;  %v13524_v24 = vld [vmem:[#allocation2 + $0x1f] sm:$0xff]  ;;  %v2878_v20 = vpack.c.bf16 %v2848_v50, %v2847_v62  ;;  %v13533_v17 = vpack.c.bf16 %v2778_v0, %v2777_v28  ;;  %2794 = vst.msk [vmem:[#allocation2 + $0x38] sm:$0xff] %vm1092_vm3, %v2778_v0  ;;  %v2783_v12 = vmax.f32 %v2767_v6, 0.0  ;;  %v2748_v7 = vmul.f32 %v11268_v45, %v13478_v38  ;;  %v2849_v28 = vld [vmem:[#allocation2 + $0x28] sm:$0xff] }
 0x4ce   :  { %v2823_v27 = vsel %vm838_vm6, %v13522_v5, 0.0  ;;  %v2824_v57 = vsel %vm839_vm5, %v13524_v24, 0.0  ;;  %v2765_v59 = vadd.f32 %v13481_v60, %v2745_v36  ;;  %v2705_v19 = vpop.f32.mrf.mxu0  ;;  %v2852_v3 = vld [vmem:[#allocation2 + $0x40] sm:$0xff] }
 0x4cf   :  { %11276 = vmatmul.mubr.msk.bf16.vlgmr.msra.gmra.mxu1 %vm1092_vm3, %v2878_v20  ;;  %v2838_v47 = vpack.c.bf16 %v2824_v57, %v2823_v27  ;;  %2799 = vst.msk [vmem:[#allocation2 + $0x60] sm:$0xff] %vm1092_vm3, %v2783_v12  ;;  %v2768_v35 = vadd.f32 %v13481_v60, %v2748_v7  ;;  %v2746_v63 = vmul.f32 %v13478_v38, %v2705_v19 }
 0x4d0   :  { %11310 = vmatpush3.bf16.msra.mxu1 %v13471_v10  ;;  %v2781_v31 = vmax.f32 %v2765_v59, 0.0  ;;  %v2850_v48 = vld [vmem:[#allocation2 + $0x30] sm:$0xff]  ;;  %v11271_v61 = vpop.f32.mrf.mxu0  ;;  %v2825_v10 = vsel %vm840_vm7, %v13542_v53, 0.0 }
 0x4d1   :  { %11294 = vmatmul.mubr.msk.bf16.vlgmr.msra.gmra.mxu0 %vm1092_vm3, %v2838_v47  ;;  %v13549_v32 = vld [vmem:[#allocation2 + $0x2f] sm:$0xff]  ;;  %11345 = vmatprep.subr.bf16.mxu1 %v13531_v23  ;;  %v2879_v34 = vpack.c.bf16 %v2850_v48, %v2849_v28  ;;  %v2784_v14 = vmax.f32 %v2768_v35, 0.0  ;;  %v2766_v37 = vadd.f32 %v13481_v60, %v2746_v63  ;;  %v2751_v33 = vmul.f32 %v11271_v61, %v13478_v38 }
 0x4d2   :  { %v2826_v29 = vsel %vm841_vm8, %v13549_v32, 0.0  ;;  %11328 = vmatpush3.bf16.msra.mxu0 %v13474_v26  ;;  %2797 = vst.msk [vmem:[#allocation2 + $0x50] sm:$0xff] %vm1092_vm3, %v2781_v31  ;;  %v2718_v0 = vpop.f32.mrf.mxu0  ;;  %v3329_v42 = vld [vmem:[#allocation2 + $0x47] sm:$0xff] }
 0x4d3   :  { %v2839_v50 = vpack.c.bf16 %v2826_v29, %v2825_v10  ;;  %11279 = vmatprep.mubr.msk.bf16.mxu1 %vm1092_vm3, %v2879_v34  ;;  %v13563_v62 = vpack.c.bf16 %v2784_v14, %v2783_v12  ;;  %2800 = vst.msk [vmem:[#allocation2 + $0x68] sm:$0xff] %vm1092_vm3, %v2784_v14  ;;  %v2782_v6 = vmax.f32 %v2766_v37, 0.0  ;;  %v2771_v36 = vadd.f32 %v13481_v60, %v2751_v33 }
 0x4d4   :  { %v2749_v26 = vmul.f32 %v13478_v38, %v2718_v0  ;;  %v2851_v20 = vld [vmem:[#allocation2 + $0x38] sm:$0xff]  ;;  %v11272_v57 = vpop.f32.mrf.mxu0 }
 0x4d5   :  { %11297 = vmatprep.mubr.msk.bf16.mxu0 %vm1092_vm3, %v2839_v50  ;;  %v13569_v27 = vld [vmem:[#allocation2 + $0x37] sm:$0xff]  ;;  %v13571_v45 = vld [vmem:[#allocation2 + $0x3f] sm:$0xff]  ;;  %v2880_v59 = vpack.c.bf16 %v2852_v3, %v2851_v20  ;;  %v13579_v35 = vpack.c.bf16 %v2782_v6, %v2781_v31  ;;  %2798 = vst.msk [vmem:[#allocation2 + $0x58] sm:$0xff] %vm1092_vm3, %v2782_v6  ;;  %v2787_v63 = vmax.f32 %v2771_v36, 0.0  ;;  %v2752_v48 = vmul.f32 %v11272_v57, %v13478_v38 }
 0x4d6   :  { %v2827_v12 = vsel %vm842_vm9, %v13569_v27, 0.0  ;;  %v2828_v19 = vsel %vm843_vm10, %v13571_v45, 0.0  ;;  %v2769_v28 = vadd.f32 %v13481_v60, %v2749_v26  ;;  %v2721_v61 = vpop.f32.mrf.mxu0  ;;  %v2856_v20 = vld [vmem:[#allocation2 + $0x60] sm:$0xff] }
 0x4d7   :  { %11280 = vmatmul.mubr.msk.bf16.gmra.mxu1 %vm1092_vm3, %v2880_v59  ;;  %v2840_v34 = vpack.c.bf16 %v2828_v19, %v2827_v12  ;;  %2803 = vst.msk [vmem:[#allocation2 + $0x80] sm:$0xff] %vm1092_vm3, %v2787_v63  ;;  %v2772_v29 = vadd.f32 %v13481_v60, %v2752_v48  ;;  %v2750_v14 = vmul.f32 %v13478_v38, %v2721_v61  ;;  %v3145_v39 = vld [vmem:[#allocation2 + $0x39] sm:$0xff] }
 0x4d8   :  { %v2785_v10 = vmax.f32 %v2769_v28, 0.0 }
 0x4d9   :  { %11298 = vmatmul.mubr.msk.bf16.gmra.mxu0 %vm1092_vm3, %v2840_v34  ;;  %v2854_v31 = vld [vmem:[#allocation2 + $0x50] sm:$0xff]  ;;  %v2788_v33 = vmax.f32 %v2772_v29, 0.0  ;;  %v2770_v50 = vadd.f32 %v13481_v60, %v2750_v14 }
 0x4da   :  { %v13589_v37 = vld [vmem:[#allocation2 + $0x4f] sm:$0xff]  ;;  %2801 = vst.msk [vmem:[#allocation2 + $0x70] sm:$0xff] %vm1092_vm3, %v2785_v10  ;;  %v2881_v0 = vpack.c.bf16 %v2854_v31, %v15443_v15  ;;  %v13616_v29 = vld [vmem:[#allocation2 + $0x67] sm:$0xff] }
 0x4db   :  { %v2830_v6 = vsel %vm845_vm11, %v13589_v37, 0.0  ;;  %2804 = vst.msk [vmem:[#allocation2 + $0x88] sm:$0xff] %vm1092_vm3, %v2788_v33  ;;  %v13599_v38 = vpack.c.bf16 %v2788_v33, %v2787_v63  ;;  %v2786_v26 = vmax.f32 %v2770_v50, 0.0  ;;  %v3140_v14 = vld [vmem:[#allocation2 + $0x11] sm:$0xff]  ;;  %v3150_v3 = vld [vmem:[#allocation2 + $0x61] sm:$0xff] }
 0x4dc   :  { %v2841_v36 = vpack.c.bf16 %v2830_v6, %v15443_v15  ;;  %11283 = vmatprep.mubr.msk.bf16.mxu1 %vm1092_vm3, %v2881_v0  ;;  %v2855_v57 = vld [vmem:[#allocation2 + $0x58] sm:$0xff]  ;;  %v15455_v0 = vld [vmem:[#allocation53_spill] sm:$0xff] }
 0x4dd   :  { %v13603_v60 = vld [vmem:[#allocation2 + $0x57] sm:$0xff]  ;;  %v13605_v59 = vld [vmem:[#allocation2 + $0x5f] sm:$0xff]  ;;  %v13607_v12 = vpack.c.bf16 %v2786_v26, %v2785_v10  ;;  %2802 = vst.msk [vmem:[#allocation2 + $0x78] sm:$0xff] %vm1092_vm3, %v2786_v26  ;;  %v2882_v19 = vpack.c.bf16 %v2856_v20, %v2855_v57  ;;  %v2857_v10 = vld [vmem:[#allocation2 + $0x68] sm:$0xff]  ;;  %vm15456_vm14 = vcmp.ge.s32.totalorder %v15455_v0, 0 }
 0x4de   :  { %11301 = vmatprep.mubr.msk.bf16.mxu0 %vm1092_vm3, %v2841_v36  ;;  %v2831_v63 = vsel %vm846_vm12, %v13603_v60, 0.0  ;;  %v2832_v61 = vsel %vm847_vm13, %v13605_v59, 0.0  ;;  %v2833_v6 = vsel %vm15456_vm14, %v13616_v29, 0.0  ;;  %v2860_v57 = vld [vmem:[#allocation2 + $0x80] sm:$0xff]  ;;  %vm15460_vm14 = vcmp.ge.s32.totalorder %v15444_v8, 0  ;;  %v3148_v52 = vld [vmem:[#allocation2 + $0x51] sm:$0xff] }
 0x4df   :  { %v2842_v34 = vpack.c.bf16 %v2832_v61, %v2831_v63  ;;  %11284 = vmatmul.mubr.msk.bf16.gmra.mxu1 %vm1092_vm3, %v2882_v19  ;;  %v15458_v19 = vld [vmem:[#allocation56_spill] sm:$0xff] }
 0x4e0   :  { %vm15459_vm2 = vcmp.lt.s32.totalorder %v15458_v19, 8 }
 0x4e1   :  { %11302 = vmatmul.mubr.msk.bf16.gmra.mxu0 %vm1092_vm3, %v2842_v34  ;;  %v2858_v31 = vld [vmem:[#allocation2 + $0x70] sm:$0xff]  ;;  %v3156_v63 = vsel %vm15459_vm2, %v3140_v14, 0.0  ;;  %vm15465_vm2 = vcmp.ge.s32.totalorder %v15464_v25, 0 }
 0x4e2   :  { %v13620_v33 = vld [vmem:[#allocation2 + $0x6f] sm:$0xff]  ;;  %v2883_v50 = vpack.c.bf16 %v2858_v31, %v2857_v10  ;;  %v3339_v31 = vsel %vm15460_vm14, %v13522_v5, 0.0  ;;  %v3338_v43 = vsel %vm15465_vm2, %v13507_v51, 0.0  ;;  %v3141_v5 = vld [vmem:[#allocation2 + $0x19] sm:$0xff]  ;;  %v3154_v36 = vld [vmem:[#allocation2 + $0x81] sm:$0xff] }
 0x4e3   :  { %v2834_v26 = vsel %vm849_vm15, %v13620_v33, 0.0  ;;  %v3354_v8 = vpack.c.bf16 %v3339_v31, %v3338_v43  ;;  %v15470_v51 = vld [vmem:[#allocation63_spill] sm:$0xff]  ;;  %v3340_v43 = vsel %vm838_vm6, %v13524_v24, 0.0  ;;  %v3342_v24 = vsel %vm840_vm7, %v13549_v32, 0.0 }
 0x4e4   :  { %v2843_v20 = vpack.c.bf16 %v2834_v26, %v2833_v6  ;;  %11287 = vmatprep.mubr.msk.bf16.mxu1 %vm1092_vm3, %v2883_v50  ;;  %v2859_v61 = vld [vmem:[#allocation2 + $0x78] sm:$0xff]  ;;  %v15462_v26 = vld [vmem:[#allocation60_spill] sm:$0xff]  ;;  %vm15471_vm2 = vcmp.lt.s32.totalorder %v15470_v51, 8  ;;  %v3347_v51 = vsel %vm845_vm11, %v13603_v60, 0.0 }
 0x4e5   :  { %v13632_v34 = vld [vmem:[#allocation2 + $0x77] sm:$0xff]  ;;  %v13634_v10 = vld [vmem:[#allocation2 + $0x7f] sm:$0xff]  ;;  %v2884_v21 = vpack.c.bf16 %v2860_v57, %v2859_v61  ;;  %vm15463_vm0 = vcmp.ge.s32.totalorder %v15462_v26, 0  ;;  %v3151_v60 = vld [vmem:[#allocation2 + $0x69] sm:$0xff] }
 0x4e6   :  { %11305 = vmatprep.mubr.msk.bf16.mxu0 %vm1092_vm3, %v2843_v20  ;;  %v15461_v6 = vld [vmem:[#allocation58_spill] sm:$0xff]  ;;  %v2835_v50 = vsel %vm15288_vm1, %v13632_v34, 0.0  ;;  %v2836_v14 = vsel %vm15463_vm0, %v13634_v10, 0.0  ;;  %v3171_v20 = vpack.c.bf16 %v3156_v63, %v15443_v15  ;;  %v3142_v61 = vld [vmem:[#allocation2 + $0x21] sm:$0xff]  ;;  %vm15467_vm0 = vcmp.lt.s32.totalorder %v15466_v18, 8  ;;  %v3143_v63 = vld [vmem:[#allocation2 + $0x29] sm:$0xff] }
 0x4e7   :  { %v2844_v19 = vpack.c.bf16 %v2836_v14, %v2835_v50  ;;  %11288 = vmatmul.mubr.msk.bf16.gmra.mxu1 %vm1092_vm3, %v2884_v21  ;;  %v3144_v57 = vld [vmem:[#allocation2 + $0x31] sm:$0xff]  ;;  %v3157_v50 = vsel %vm15467_vm0, %v3141_v5, 0.0  ;;  %v3158_v21 = vsel %vm15471_vm2, %v3142_v61, 0.0  ;;  %v3343_v18 = vsel %vm841_vm8, %v13569_v27, 0.0  ;;  %v3146_v27 = vld [vmem:[#allocation2 + $0x41] sm:$0xff]  ;;  %v3153_v28 = vld [vmem:[#allocation2 + $0x79] sm:$0xff] }
 0x4e8   :  { %11311 = vmatprep.mubr.msk.bf16.mxu1 %vm1092_vm3, %v3171_v20  ;;  %v15468_v14 = vld [vmem:[#allocation62_spill] sm:$0xff]  ;;  %v3172_v31 = vpack.c.bf16 %v3158_v21, %v3157_v50  ;;  %v3341_v5 = vsel %vm839_vm5, %v13542_v53, 0.0  ;;  %v3356_v61 = vpack.c.bf16 %v3343_v18, %v3342_v24  ;;  %vm15475_vm5 = vcmp.lt.s32.totalorder %v15474_v30, 8  ;;  %v15478_v32 = vld [vmem:[#allocation67_spill] sm:$0xff] }
 0x4e9   :  { %11306 = vmatmul.mubr.msk.bf16.gmra.mxu0 %vm1092_vm3, %v2844_v19  ;;  %vm15469_vm14 = vcmp.lt.s32.totalorder %v15468_v14, 8  ;;  %v15472_v19 = vld [vmem:[#allocation64_spill] sm:$0xff]  ;;  %v3161_v53 = vsel %vm15475_vm5, %v3145_v39, 0.0  ;;  %v15476_v50 = vld [vmem:[#allocation66_spill] sm:$0xff]  ;;  %vm15479_vm7 = vcmp.lt.s32.totalorder %v15478_v32, 8  ;;  %v3348_v24 = vsel %vm846_vm12, %v13605_v59, 0.0 }
 0x4ea   :  { %11329 = vmatprep.mubr.msk.bf16.mxu0 %vm1092_vm3, %v3354_v8  ;;  %v3160_v25 = vsel %vm15469_vm14, %v3144_v57, 0.0  ;;  %vm15473_vm1 = vcmp.lt.s32.totalorder %v15472_v19, 8  ;;  %v3355_v57 = vpack.c.bf16 %v3341_v5, %v3340_v43  ;;  %vm15477_vm6 = vcmp.lt.s32.totalorder %v15476_v50, 8  ;;  %v15480_v19 = vld [vmem:[#allocation68_spill] sm:$0xff]  ;;  %v3149_v18 = vld [vmem:[#allocation2 + $0x59] sm:$0xff]  ;;  %v3152_v7 = vld [vmem:[#allocation2 + $0x71] sm:$0xff] }
 0x4eb   :  { %v3159_v20 = vsel %vm15473_vm1, %v3143_v63, 0.0  ;;  %v3164_v63 = vsel %vm15477_vm6, %v3148_v52, 0.0  ;;  %v3162_v14 = vsel %vm15479_vm7, %v3146_v27, 0.0  ;;  %v3345_v43 = vsel %vm843_vm10, %v3329_v42, 0.0  ;;  %v15492_v42 = vld [vmem:[#allocation74_spill] sm:$0xff] }
 0x4ec   :  { %v3173_v8 = vpack.c.bf16 %v3160_v25, %v3159_v20  ;;  %v3174_v25 = vpack.c.bf16 %v3162_v14, %v3161_v53  ;;  %v3175_v21 = vpack.c.bf16 %v3164_v63, %v15443_v15  ;;  %vm15481_vm8 = vcmp.ge.s32.totalorder %v15480_v19, 0 }
 0x4ed   :  { %v3346_v20 = vsel %vm15481_vm8, %v13589_v37, 0.0  ;;  %v3165_v47 = vsel %vm1022_vm4, %v3149_v18, 0.0  ;;  %v3351_v27 = vsel %vm849_vm15, %v13632_v34, 0.0  ;;  %v3349_v53 = vsel %vm847_vm13, %v13616_v29, 0.0  ;;  %v15490_v34 = vld [vmem:[#allocation73_spill] sm:$0xff] }
 0x4ee   :  { %v3359_v50 = vpack.c.bf16 %v3349_v53, %v3348_v24  ;;  %vm15489_vm4 = vcmp.ge.s32.totalorder %v15455_v0, 0  ;;  %vm15491_vm12 = vcmp.lt.s32.totalorder %v15490_v34, 8  ;;  %v3337_v29 = vld [vmem:[#allocation2 + $0x87] sm:$0xff]  ;;  %vm15493_vm13 = vcmp.lt.s32.totalorder %v15492_v42, 8 }
 0x4ef   :  { %11312 = vmatmul.mubr.msk.bf16.vlgmr.msra.gmra.mxu1 %vm1092_vm3, %v3172_v31  ;;  %v3350_v59 = vsel %vm15489_vm4, %v13620_v33, 0.0  ;;  %v3169_v48 = vsel %vm15491_vm12, %v3153_v28, 0.0  ;;  %v3170_v32 = vsel %vm15493_vm13, %v3154_v36, 0.0  ;;  %vm15494_vm15 = vcmp.ge.s32.totalorder %v15461_v6, 0 }
 0x4f0   :  { %11346 = vmatpush3.bf16.msra.mxu1 %v13531_v23  ;;  %11315 = vmatprep.mubr.msk.bf16.mxu1 %vm1092_vm3, %v3173_v8  ;;  %v3344_v23 = vsel %vm842_vm9, %v13571_v45, 0.0  ;;  %v3358_v45 = vpack.c.bf16 %v3347_v51, %v3346_v20  ;;  %v15483_v8 = vld [vmem:[#allocation70_spill] sm:$0xff]  ;;  %v3360_v63 = vpack.c.bf16 %v3351_v27, %v3350_v59  ;;  %v3352_v33 = vsel %vm15494_vm15, %v13634_v10, 0.0 }
 0x4f1   :  { %11330 = vmatmul.mubr.msk.bf16.vlgmr.msra.gmra.mxu0 %vm1092_vm3, %v3355_v57  ;;  %v3357_v31 = vpack.c.bf16 %v3345_v43, %v3344_v23  ;;  %vm15484_vm9 = vcmp.lt.s32.totalorder %v15483_v8, 8  ;;  %v15485_v57 = vld [vmem:[#allocation71_spill] sm:$0xff]  ;;  %v3178_v0 = vpack.c.bf16 %v3170_v32, %v3169_v48  ;;  %vm15495_vm1 = vcmp.ge.s32.totalorder %v15462_v26, 0 }
 0x4f2   :  { %11333 = vmatprep.mubr.msk.bf16.mxu0 %vm1092_vm3, %v3356_v61  ;;  %v3168_v5 = vsel %vm15484_vm9, %v3152_v7, 0.0  ;;  %vm15486_vm10 = vcmp.lt.s32.totalorder %v15485_v57, 8  ;;  %v15487_v61 = vld [vmem:[#allocation72_spill] sm:$0xff]  ;;  %v3353_v14 = vsel %vm15495_vm1, %v3337_v29, 0.0 }
 0x4f3   :  { %v3166_v37 = vsel %vm15486_vm10, %v3150_v3, 0.0  ;;  %vm15488_vm11 = vcmp.lt.s32.totalorder %v15487_v61, 8  ;;  %v3361_v23 = vpack.c.bf16 %v3353_v14, %v3352_v33 }
 0x4f4   :  { %v3176_v39 = vpack.c.bf16 %v3166_v37, %v3165_v47  ;;  %v3167_v52 = vsel %vm15488_vm11, %v3151_v60, 0.0 }
 0x4f5   :  { %v3177_v30 = vpack.c.bf16 %v3168_v5, %v3167_v52 }
 0x4f7   :  { %11316 = vmatmul.mubr.msk.bf16.gmra.mxu1 %vm1092_vm3, %v3174_v25 }
 0x4f8   :  { %11319 = vmatprep.mubr.msk.bf16.mxu1 %vm1092_vm3, %v3175_v21 }
 0x4f9   :  { %11334 = vmatmul.mubr.msk.bf16.gmra.mxu0 %vm1092_vm3, %v3357_v31 }
 0x4fa   :  { %11337 = vmatprep.mubr.msk.bf16.mxu0 %vm1092_vm3, %v3358_v45 }
 0x4ff   :  { %11320 = vmatmul.mubr.msk.bf16.gmra.mxu1 %vm1092_vm3, %v3176_v39 }
 0x500   :  { %11323 = vmatprep.mubr.msk.bf16.mxu1 %vm1092_vm3, %v3177_v30 }
 0x501   :  { %11338 = vmatmul.mubr.msk.bf16.gmra.mxu0 %vm1092_vm3, %v3359_v50 }
 0x502   :  { %11341 = vmatprep.mubr.msk.bf16.mxu0 %vm1092_vm3, %v3360_v63 }
 0x507   :  { %11324 = vmatmul.mubr.msk.bf16.gmra.mxu1 %vm1092_vm3, %v3178_v0 }
 0x508   :  { %11347 = vmatprep.mubr.msk.bf16.mxu1 %vm1092_vm3, %v13499_v49  ;;  %v12102_v49 = vld [vmem:[#allocation12 + $0x8] sm:$0xff]  }
 0x509   :  { %11342 = vmatmul.mubr.msk.bf16.gmra.mxu0 %vm1092_vm3, %v3361_v23  ;;  %11363 = vmatprep.subr.bf16.mxu0 %v12102_v49 }
 0x50a   :  { %11364 = vmatpush3.bf16.msra.mxu0 %v12102_v49 }
 0x50f   :  { %11348 = vmatmul.mubr.msk.bf16.vlgmr.msra.gmra.mxu1 %vm1092_vm3, %v13494_v40  ;;  %v3948_v40 = vld [vmem:[%s15170_s9 + $0x40] sm:$0xf] }
 0x510   :  { %11351 = vmatprep.mubr.msk.bf16.mxu1 %vm1092_vm3, %v13533_v17  ;;  %v4223_v17 = vld [vmem:[%s15170_s9 + $0x44] sm:$0xf] }
 0x517   :  { %11352 = vmatmul.mubr.msk.bf16.gmra.mxu1 %vm1092_vm3, %v13519_v1  ;;  %v3949_v1 = vld [vmem:[%s15170_s9 + $0x60] sm:$0xf] }
 0x518   :  { %11355 = vmatprep.mubr.msk.bf16.mxu1 %vm1092_vm3, %v13579_v35  ;;  %v4224_v35 = vld [vmem:[%s15170_s9 + $0x64] sm:$0xf] }
 0x51f   :  { %11356 = vmatmul.mubr.msk.bf16.gmra.mxu1 %vm1092_vm3, %v13563_v62  ;;  %v10022_v62 = vcombine.low %v3948_v40, %v3949_v1 }
 0x520   :  { %11359 = vmatprep.mubr.msk.bf16.mxu1 %vm1092_vm3, %v13607_v12 }
 0x521   :  { %11381 = vmatprep.subr.bf16.mxu1 %v10022_v62 }
 0x522   :  { %11382 = vmatpush3.bf16.msra.mxu1 %v10022_v62 }
 0x527   :  { %11360 = vmatmul.mubr.msk.bf16.gmra.mxu1 %vm1092_vm3, %v13599_v38  ;;  %v13763_v38 = vcombine.low %v4223_v17, %v4224_v35 }
 0x529   :  { %15496 = vst [vmem:[#allocation30_spill] sm:$0xff] %v13763_v38  ;;  %11401 = vmatprep.subr.bf16.mxu0 %v13763_v38 }
 0x58f   :  { %v11277_v12 = vpop.f32.mrf.mxu1 }
 0x591   :  { %v11295_v10 = vpop.f32.mrf.mxu0  ;;  %v2949_v6 = vpop.f32.mrf.mxu1 }
 0x592   :  { %v3085_v56 = vadd.f32 %v11295_v10, %v11277_v12 }
 0x593   :  { %v3076_v26 = vpop.f32.mrf.mxu0  ;;  %v11278_v25 = vpop.f32.mrf.mxu1 }
 0x594   :  { %v3077_v11 = vadd.f32 %v3076_v26, %v2949_v6 }
 0x595   :  { %v11296_v51 = vpop.f32.mrf.mxu0  ;;  %v2952_v21 = vpop.f32.mrf.mxu1 }
 0x596   :  { %v3088_v41 = vadd.f32 %v11296_v51, %v11278_v25 }
 0x597   :  { %v3079_v43 = vpop.f32.mrf.mxu0  ;;  %v11281_v31 = vpop.f32.mrf.mxu1 }
 0x599   :  { %v11299_v19 = vpop.f32.mrf.mxu0  ;;  %v13766_v20 = vpop.f32.mrf.mxu1 }
 0x59a   :  { %v3101_v10 = vadd.f32 %v11299_v19, %v11281_v31 }
 0x59b   :  { %v13768_v18 = vpop.f32.mrf.mxu0  ;;  %v13770_v45 = vpop.f32.mrf.mxu1 }
 0x59d   :  { %v13772_v7 = vpop.f32.mrf.mxu0  ;;  %v13774_v3 = vpop.f32.mrf.mxu1 }
 0x59f   :  { %v13776_v15 = vpop.f32.mrf.mxu0  ;;  %v13778_v47 = vpop.f32.mrf.mxu1 }
 0x5a0   :  { %v3096_v31 = vadd.f32 %v13776_v15, %v13774_v3 }
 0x5a1   :  { %v13780_v60 = vpop.f32.mrf.mxu0  ;;  %v13782_v8 = vpop.f32.mrf.mxu1 }
 0x5a2   :  { %v3117_v15 = vadd.f32 %v13780_v60, %v13778_v47 }
 0x5a3   :  { %v13784_v5 = vpop.f32.mrf.mxu0  ;;  %v13786_v57 = vpop.f32.mrf.mxu1 }
 0x5a5   :  { %v13788_v37 = vpop.f32.mrf.mxu0  ;;  %v13790_v24 = vpop.f32.mrf.mxu1 }
 0x5a7   :  { %v13792_v39 = vpop.f32.mrf.mxu0  ;;  %v13794_v61 = vpop.f32.mrf.mxu1 }
 0x5a9   :  { %v13796_v52 = vpop.f32.mrf.mxu0  ;;  %v13798_v27 = vpop.f32.mrf.mxu1 }
 0x5aa   :  { %15497 = vst [vmem:[#allocation29_spill] sm:$0xff] %v13798_v27 }
 0x5ab   :  { %v13800_v30 = vpop.f32.mrf.mxu0  ;;  %v13802_v53 = vpop.f32.mrf.mxu1 }
 0x5ac   :  { %15498 = vst [vmem:[#allocation37_spill] sm:$0xff] %v13800_v30  ;;  %15499 = vst [vmem:[#allocation35_spill] sm:$0xff] %v13802_v53  ;;  %v2573_v53 = vld [vmem:[#allocation10 + $0x2] sm:$0x3] }
 0x5ad   :  { %v13804_v50 = vpop.f32.mrf.mxu0  ;;  %v13806_v59 = vpop.f32.mrf.mxu1 }
 0x5ae   :  { %15500 = vst [vmem:[#allocation40_spill] sm:$0xff] %v13804_v50  ;;  %15501 = vst [vmem:[#allocation36_spill] sm:$0xff] %v13806_v59  ;;  %v3080_v59 = vadd.f32 %v3079_v43, %v2952_v21 }
 0x5af   :  { %v13808_v28 = vpop.f32.mrf.mxu0  ;;  %v11313_v63 = vpop.f32.mrf.mxu1 }
 0x5b0   :  { %15502 = vst [vmem:[#allocation39_spill] sm:$0xff] %v13808_v28  ;;  %v3308_v54 = vadd.f32 %v11313_v63, %v3085_v56  ;;  %v13831_v56 = vrot.slane %v2573_v53, %v15383_v9 }
 0x5b1   :  { %v11331_v36 = vpop.f32.mrf.mxu0  ;;  %v3243_v34 = vpop.f32.mrf.mxu1 }
 0x5b2   :  { %v3306_v55 = vadd.f32 %v3243_v34, %v3077_v11  ;;  %v3491_v38 = vadd.f32 %v11331_v36, %v3308_v54  ;;  %v3093_v11 = vadd.f32 %v13768_v18, %v13766_v20  ;;  %v13842_v20 = vrot.slane %v2573_v53, %v15384_v58 }
 0x5b3   :  { %v3426_v48 = vpop.f32.mrf.mxu0  ;;  %v11314_v29 = vpop.f32.mrf.mxu1  ;;  %v3109_v53 = vadd.f32 %v13784_v5, %v13782_v8 }
 0x5b4   :  { %v3309_v50 = vadd.f32 %v11314_v29, %v3088_v41 }
 0x5b5   :  { %v11332_v42 = vpop.f32.mrf.mxu0  ;;  %v3246_v32 = vpop.f32.mrf.mxu1 }
 0x5b6   :  { %v3307_v27 = vadd.f32 %v3246_v32, %v3080_v59  ;;  %v3492_v25 = vadd.f32 %v11332_v42, %v3309_v50 }
 0x5b7   :  { %v11317_v33 = vpop.f32.mrf.mxu1  ;;  %v3429_v0 = vpop.f32.mrf.mxu0 }
 0x5b8   :  { %v3312_v21 = vadd.f32 %v11317_v33, %v3101_v10  ;;  %v3490_v43 = vadd.f32 %v3429_v0, %v3307_v27  ;;  %v3120_v33 = vadd.f32 %v13788_v37, %v13786_v57 }
 0x5b9   :  { %v3259_v14 = vpop.f32.mrf.mxu1  ;;  %v11335_v49 = vpop.f32.mrf.mxu0 }
 0x5ba   :  { %v3310_v54 = vadd.f32 %v3259_v14, %v3093_v11 }
 0x5bb   :  { %v11318_v23 = vpop.f32.mrf.mxu1  ;;  %v3442_v17 = vpop.f32.mrf.mxu0 }
 0x5bd   :  { %v3262_v40 = vpop.f32.mrf.mxu1  ;;  %v11336_v22 = vpop.f32.mrf.mxu0 }
 0x5be   :  { %v3311_v36 = vadd.f32 %v3262_v40, %v3096_v31 }
 0x5bf   :  { %v13810_v1 = vpop.f32.mrf.mxu1  ;;  %v3445_v16 = vpop.f32.mrf.mxu0 }
 0x5c0   :  { %v3316_v60 = vadd.f32 %v13810_v1, %v3117_v15 }
 0x5c1   :  { %v13812_v62 = vpop.f32.mrf.mxu1  ;;  %v13824_v13 = vpop.f32.mrf.mxu0 }
 0x5c2   :  { %v3314_v8 = vadd.f32 %v13812_v62, %v3109_v53  ;;  %v15508_v53 = vld [vmem:[#allocation35_spill] sm:$0xff] }
 0x5c3   :  { %v13814_v35 = vpop.f32.mrf.mxu1  ;;  %v13828_v12 = vpop.f32.mrf.mxu0 }
 0x5c4   :  { %v3317_v57 = vadd.f32 %v13814_v35, %v3120_v33  ;;  %v15505_v35 = vld [vmem:[#allocation37_spill] sm:$0xff]  ;;  %v15510_v33 = vld [vmem:[#allocation36_spill] sm:$0xff] }
 0x5c5   :  { %v13816_v2 = vpop.f32.mrf.mxu1  ;;  %v11340_v63 = vpop.f32.mrf.mxu0 }
 0x5c7   :  { %v13818_v46 = vpop.f32.mrf.mxu1  ;;  %v3461_v29 = vpop.f32.mrf.mxu0 }
 0x5c8   :  { %15503 = vst [vmem:[#allocation43_spill] sm:$0xff] %v13818_v46  ;;  %v3489_v46 = vadd.f32 %v3426_v48, %v3306_v55  ;;  %v3493_v48 = vadd.f32 %v3442_v17, %v3310_v54  ;;  %v3494_v17 = vadd.f32 %v3445_v16, %v3311_v36 }
 0x5c9   :  { %v13820_v4 = vpop.f32.mrf.mxu1  ;;  %v11343_v5 = vpop.f32.mrf.mxu0 }
 0x5cb   :  { %v13822_v44 = vpop.f32.mrf.mxu1 }
 0x5cd   :  { %v13826_v28 = vpop.f32.mrf.mxu1 }
 0x5cf   :  { %v11349_v30 = vpop.f32.mrf.mxu1 }
 0x5d0   :  { %v3642_v6 = vadd.f32 %v11349_v30, %v3491_v38  ;;  %v3104_v38 = vadd.f32 %v13772_v7, %v13770_v45  ;;  %v3495_v30 = vadd.f32 %v11335_v49, %v3312_v21  ;;  %v3112_v49 = vadd.f32 %v13792_v39, %v13790_v24 }
 0x5d1   :  { %v3577_v26 = vpop.f32.mrf.mxu1  ;;  %v3133_v39 = vadd.f32 %v13796_v52, %v13794_v61  ;;  %v15506_v61 = vld [vmem:[#allocation43_spill] sm:$0xff] }
 0x5d2   :  { %v3640_v51 = vadd.f32 %v3577_v26, %v3489_v46  ;;  %v3662_v19 = vmul.f32 %v13831_v56, %v3642_v6  ;;  %v3313_v50 = vadd.f32 %v11318_v23, %v3104_v38  ;;  %v3315_v1 = vadd.f32 %v13816_v2, %v3112_v49  ;;  %v3474_v38 = vpop.f32.mrf.mxu0 }
 0x5d3   :  { %v11350_v41 = vpop.f32.mrf.mxu1  ;;  %v3320_v52 = vadd.f32 %v15506_v61, %v3133_v39 }
 0x5d4   :  { %v3660_v55 = vmul.f32 %v13831_v56, %v3640_v51  ;;  %v3643_v59 = vadd.f32 %v11350_v41, %v3492_v25  ;;  %v3682_v42 = vadd.f32 %v13842_v20, %v3662_v19  ;;  %v3496_v40 = vadd.f32 %v11336_v22, %v3313_v50  ;;  %v15507_v50 = vld [vmem:[#allocation30_spill] sm:$0xff] }
 0x5d5   :  { %v3580_v46 = vpop.f32.mrf.mxu1  ;;  %v3500_v19 = vadd.f32 %v11340_v63, %v3317_v57  ;;  %v3498_v36 = vadd.f32 %v3461_v29, %v3315_v1 }
 0x5d6   :  { %v3663_v18 = vmul.f32 %v13831_v56, %v3643_v59  ;;  %v3641_v27 = vadd.f32 %v3580_v46, %v3490_v43  ;;  %v3680_v45 = vadd.f32 %v13842_v20, %v3660_v55  ;;  %v3698_v37 = vmax.f32 %v3682_v42, 0.0  ;;  %v15504_v43 = vld [vmem:[#allocation29_spill] sm:$0xff]  ;;  %v15509_v42 = vld [vmem:[#allocation40_spill] sm:$0xff] }
 0x5d7   :  { %v11353_v34 = vpop.f32.mrf.mxu1  ;;  %v3125_v54 = vadd.f32 %v15505_v35, %v15504_v43  ;;  %v3499_v55 = vadd.f32 %v13824_v13, %v3316_v60  ;;  %v3497_v59 = vadd.f32 %v13828_v12, %v3314_v8 }
 0x5d8   :  { %v3683_v7 = vadd.f32 %v13842_v20, %v3663_v18  ;;  %v3661_v3 = vmul.f32 %v13831_v56, %v3641_v27  ;;  %v3646_v14 = vadd.f32 %v11353_v34, %v3495_v30  ;;  %v3696_v6 = vmax.f32 %v3680_v45, 0.0 }
 0x5d9   :  { %v3593_v32 = vpop.f32.mrf.mxu1  ;;  %v3318_v63 = vadd.f32 %v13820_v4, %v3125_v54 }
 0x5da   :  { %v3681_v0 = vadd.f32 %v13842_v20, %v3661_v3  ;;  %v3644_v23 = vadd.f32 %v3593_v32, %v3493_v48  ;;  %v3699_v10 = vmax.f32 %v3683_v7, 0.0  ;;  %v3666_v24 = vmul.f32 %v13831_v56, %v3646_v14  ;;  %v11344_v48 = vpop.f32.mrf.mxu0 }
 0x5db   :  { %v11354_v47 = vpop.f32.mrf.mxu1  ;;  %v3136_v32 = vadd.f32 %v15509_v42, %v15508_v53  ;;  %v4725_v42 = vld [vmem:[%s15170_s9 + $0x4c] sm:$0xf] }
 0x5dc   :  { %v3697_v26 = vmax.f32 %v3681_v0, 0.0  ;;  %v3664_v11 = vmul.f32 %v13831_v56, %v3644_v23  ;;  %v3647_v25 = vadd.f32 %v11354_v47, %v3496_v40  ;;  %v3713_v62 = vpack.c.bf16 %v3699_v10, %v3698_v37  ;;  %v15511_v0 = vld [vmem:[#allocation39_spill] sm:$0xff]  ;;  %v3477_v57 = vpop.f32.mrf.mxu0 }
 0x5dd   :  { %v3596_v51 = vpop.f32.mrf.mxu1  ;;  %v3686_v27 = vadd.f32 %v13842_v20, %v3666_v24  ;;  %v3128_v14 = vadd.f32 %v15511_v0, %v15510_v33  ;;  %v3503_v23 = vadd.f32 %v11343_v5, %v3320_v52  ;;  %v3501_v47 = vadd.f32 %v3474_v38, %v3318_v63  ;;  %v2575_v0 = vld [vmem:[#allocation13 + $0x2] sm:$0x3] }
 0x5de   :  { %v3645_v22 = vadd.f32 %v3596_v51, %v3494_v17  ;;  %v3712_v16 = vpack.c.bf16 %v3697_v26, %v3696_v6  ;;  %v3667_v21 = vmul.f32 %v13831_v56, %v3647_v25  ;;  %v3684_v2 = vadd.f32 %v13842_v20, %v3664_v11 }
 0x5df   :  { %v11357_v41 = vpop.f32.mrf.mxu1  ;;  %v3702_v17 = vmax.f32 %v3686_v27, 0.0  ;;  %v3321_v60 = vadd.f32 %v13822_v44, %v3136_v32  ;;  %v3319_v8 = vadd.f32 %v13826_v28, %v3128_v14  ;;  %v4726_v32 = vld [vmem:[%s15170_s9 + $0x6c] sm:$0xf]  ;;  %v13940_v14 = vrot.slane %v2575_v0, %v15383_v9 }
 0x5e0   :  { %v3665_v31 = vmul.f32 %v13831_v56, %v3645_v22  ;;  %11365 = vmatprep.mubr.msk.bf16.mxu0 %vm1092_vm3, %v3712_v16  ;;  %v3687_v46 = vadd.f32 %v13842_v20, %v3667_v21  ;;  %v3650_v12 = vadd.f32 %v11357_v41, %v3499_v55  ;;  %v3700_v49 = vmax.f32 %v3684_v2, 0.0 }
 0x5e1   :  { %v3609_v18 = vpop.f32.mrf.mxu1  ;;  %11366 = vmatmul.mubr.msk.bf16.vlgmr.msra.gmra.mxu0 %vm1092_vm3, %v3713_v62  ;;  %v3504_v28 = vadd.f32 %v11344_v48, %v3321_v60  ;;  %v3502_v39 = vadd.f32 %v3477_v57, %v3319_v8  ;;  %v13936_v33 = vcombine.low %v4725_v42, %v4726_v32 }
 0x5e2   :  { %v3685_v13 = vadd.f32 %v13842_v20, %v3665_v31  ;;  %v3648_v30 = vadd.f32 %v3609_v18, %v3497_v59  ;;  %11402 = vmatpush3.bf16.msra.mxu0 %v15507_v50  ;;  %v3703_v45 = vmax.f32 %v3687_v46, 0.0  ;;  %v3670_v29 = vmul.f32 %v13831_v56, %v3650_v12 }
 0x5e3   :  { %v11358_v34 = vpop.f32.mrf.mxu1 }
 0x5e4   :  { %v3701_v7 = vmax.f32 %v3685_v13, 0.0  ;;  %v3668_v3 = vmul.f32 %v13831_v56, %v3648_v30  ;;  %v3651_v15 = vadd.f32 %v11358_v34, %v3500_v19  ;;  %v3715_v37 = vpack.c.bf16 %v3703_v45, %v3702_v17  ;;  %v4221_v34 = vld [vmem:[%s15170_s9 + $0x4] sm:$0xf] }
 0x5e5   :  { %v3612_v40 = vpop.f32.mrf.mxu1  ;;  %v3690_v24 = vadd.f32 %v13842_v20, %v3670_v29  ;;  %v4222_v45 = vld [vmem:[%s15170_s9 + $0x24] sm:$0xf] }
 0x5e6   :  { %v3671_v4 = vmul.f32 %v13831_v56, %v3651_v15  ;;  %v3649_v10 = vadd.f32 %v3612_v40, %v3498_v36  ;;  %v3714_v26 = vpack.c.bf16 %v3701_v7, %v3700_v49  ;;  %v3688_v11 = vadd.f32 %v13842_v20, %v3668_v3  ;;  %v4474_v3 = vld [vmem:[%s15170_s9 + $0x48] sm:$0xf] }
 0x5e7   :  { %v11361_v6 = vpop.f32.mrf.mxu1  ;;  %v3706_v55 = vmax.f32 %v3690_v24, 0.0  ;;  %v10049_v7 = vcombine.low %v4221_v34, %v4222_v45  ;;  %v4475_v15 = vld [vmem:[%s15170_s9 + $0x68] sm:$0xf]  ;;  %v13943_v49 = vrot.slane %v2575_v0, %v15384_v58  ;;  %v15513_v24 = vld [vmem:[#allocation41_spill] sm:$0xff]  ;;  %v15518_v0 = vld [vmem:[#allocation75_spill] sm:$0xff] }
 0x5e8   :  { %v3691_v5 = vadd.f32 %v13842_v20, %v3671_v4  ;;  %v3669_v25 = vmul.f32 %v13831_v56, %v3649_v10  ;;  %11369 = vmatprep.mubr.msk.bf16.mxu0 %vm1092_vm3, %v3714_v26  ;;  %v3654_v44 = vadd.f32 %v11361_v6, %v3503_v23  ;;  %v3704_v62 = vmax.f32 %v3688_v11, 0.0 }
 0x5e9   :  { %v3625_v51 = vpop.f32.mrf.mxu1  ;;  %11370 = vmatmul.mubr.msk.bf16.gmra.mxu0 %vm1092_vm3, %v3715_v37  ;;  %11403 = vmatprep.subr.bf16.mxu0 %v10049_v7  ;;  %v13927_v53 = vcombine.low %v4474_v3, %v4475_v15  ;;  %v5228_v3 = vld [vmem:[%s15170_s9 + $0x74] sm:$0xf] }
 0x5ea   :  { %v3689_v22 = vadd.f32 %v13842_v20, %v3669_v25  ;;  %v3652_v16 = vadd.f32 %v3625_v51, %v3501_v47  ;;  %v3707_v21 = vmax.f32 %v3691_v5, 0.0  ;;  %v3674_v59 = vmul.f32 %v13831_v56, %v3654_v44  ;;  %11404 = vmatpush3.bf16.msra.mxu0 %v10049_v7  ;;  %v15512_v25 = vld [vmem:[#allocation42_spill] sm:$0xff] }
 0x5eb   :  { %v11362_v1 = vpop.f32.mrf.mxu1  ;;  %11441 = vmatprep.subr.bf16.mxu0 %v13936_v33  ;;  %v5227_v7 = vld [vmem:[%s15170_s9 + $0x54] sm:$0xf] }
 0x5ec   :  { %v3705_v41 = vmax.f32 %v3689_v22, 0.0  ;;  %v3672_v43 = vmul.f32 %v13831_v56, %v3652_v16  ;;  %v3655_v35 = vadd.f32 %v11362_v1, %v3504_v28  ;;  %v3717_v61 = vpack.c.bf16 %v3707_v21, %v3706_v55  ;;  %v15514_v28 = vld [vmem:[#allocation57_spill] sm:$0xff] }
 0x5ed   :  { %v3628_v54 = vpop.f32.mrf.mxu1  ;;  %v3694_v18 = vadd.f32 %v13842_v20, %v3674_v59  ;;  %v4472_v59 = vld [vmem:[%s15170_s9 + $0x8] sm:$0xf] }
 0x5ee   :  { %v3653_v38 = vadd.f32 %v3628_v54, %v3502_v39  ;;  %v3716_v31 = vpack.c.bf16 %v3705_v41, %v3704_v62  ;;  %v3675_v19 = vmul.f32 %v13831_v56, %v3655_v35  ;;  %v3692_v52 = vadd.f32 %v13842_v20, %v3672_v43  ;;  %v15515_v62 = vld [vmem:[#allocation77_spill] sm:$0xff] }
 0x5ef   :  { %v3710_v50 = vmax.f32 %v3694_v18, 0.0 }
 0x5f0   :  { %v3673_v2 = vmul.f32 %v13831_v56, %v3653_v38  ;;  %11373 = vmatprep.mubr.msk.bf16.mxu0 %vm1092_vm3, %v3716_v31  ;;  %v3695_v46 = vadd.f32 %v13842_v20, %v3675_v19  ;;  %v3708_v13 = vmax.f32 %v3692_v52, 0.0  ;;  %v3946_v56 = vld [vmem:[%s15170_s9] sm:$0xf]  ;;  %v4473_v38 = vld [vmem:[%s15170_s9 + $0x28] sm:$0xf] }
 0x5f1   :  { %11374 = vmatmul.mubr.msk.bf16.gmra.mxu0 %vm1092_vm3, %v3717_v61  ;;  %v4723_v52 = vld [vmem:[%s15170_s9 + $0xc] sm:$0xf] }
 0x5f2   :  { %v3693_v27 = vadd.f32 %v13842_v20, %v3673_v2  ;;  %v3711_v12 = vmax.f32 %v3695_v46, 0.0  ;;  %v3947_v20 = vld [vmem:[%s15170_s9 + $0x20] sm:$0xf]  ;;  %v4724_v2 = vld [vmem:[%s15170_s9 + $0x2c] sm:$0xf] }
 0x5f3   :  { %v10021_v48 = vcombine.low %v3946_v56, %v3947_v20  ;;  %v10077_v56 = vcombine.low %v4472_v59, %v4473_v38  ;;  %v10105_v45 = vcombine.low %v4723_v52, %v4724_v2 }
 0x5f4   :  { %v3709_v30 = vmax.f32 %v3693_v27, 0.0  ;;  %v3719_v63 = vpack.c.bf16 %v3711_v12, %v3710_v50  ;;  %v4976_v12 = vld [vmem:[%s15170_s9 + $0x50] sm:$0xf] }
 0x5f5   :  { %11383 = vmatprep.subr.bf16.mxu1 %v10021_v48 }
 0x5f6   :  { %v3718_v36 = vpack.c.bf16 %v3709_v30, %v3708_v13  ;;  %11384 = vmatpush3.bf16.msra.mxu1 %v10021_v48  ;;  %v4977_v30 = vld [vmem:[%s15170_s9 + $0x70] sm:$0xf] }
 0x5f7   :  { %11421 = vmatprep.subr.bf16.mxu1 %v13927_v53  ;;  %v13998_v32 = vcombine.low %v4976_v12, %v4977_v30 }
 0x5f8   :  { %11377 = vmatprep.mubr.msk.bf16.mxu0 %vm1092_vm3, %v3718_v36 }
 0x5f9   :  { %11378 = vmatmul.mubr.msk.bf16.gmra.mxu0 %vm1092_vm3, %v3719_v63  ;;  %vm15516_vm3 = vcmask 261120  }
 0x5fa   :  { %vm15517_vm0 = vmmov %vm15516_vm3 }
 0x5fb   :  { %vm15520_vm14 = vmmov %vm15517_vm0 }
 0x5fc   :  { %vm15521_vm2 = vmmov %vm15517_vm0 }
 0x5fd   :  { %vm15525_vm5 = vmmov %vm15517_vm0 }
 0x5fe   :  { %vm15526_vm6 = vmmov %vm15517_vm0 }
 0x5ff   :  { %vm15528_vm7 = vmmov %vm15517_vm0 }
 0x600   :  { %vm15529_vm8 = vmmov %vm15517_vm0 }
 0x601   :  { %vm15534_vm9 = vmmov %vm15517_vm0 }
 0x602   :  { %vm15535_vm10 = vmmov %vm15517_vm0 }
 0x603   :  { %vm15537_vm11 = vmmov %vm15517_vm0 }
 0x604   :  { %vm15538_vm4 = vmmov %vm15517_vm0 }
 0x605   :  { %vm15540_vm12 = vmmov %vm15517_vm0 }
 0x606   :  { %vm15541_vm13 = vmmov %vm15517_vm0 }
 0x607   :  { %vm15542_vm15 = vmmov %vm15517_vm0 }
 0x608   :  { %vm15543_vm1 = vmmov %vm15517_vm0 }
 0x6a1   :  { %v11367_v23 = vpop.f32.mrf.mxu0 }
 0x6a2   :  { %v3856_v40 = vmul.f32 %v11367_v23, %v13940_v14 }
 0x6a3   :  { %v3787_v17 = vpop.f32.mrf.mxu0 }
 0x6a4   :  { %v3854_v29 = vmul.f32 %v13940_v14, %v3787_v17  ;;  %v3876_v4 = vadd.f32 %v13943_v49, %v3856_v40  ;;  %v15519_v40 = vld [vmem:[#allocation55_spill] sm:$0xff] }
 0x6a5   :  { %v11368_v10 = vpop.f32.mrf.mxu0 }
 0x6a6   :  { %v3874_v47 = vadd.f32 %v13943_v49, %v3854_v29  ;;  %v3857_v60 = vmul.f32 %v11368_v10, %v13940_v14  ;;  %v3892_v58 = vmax.f32 %v3876_v4, 0.0  ;;  %v15522_v10 = vld [vmem:[#allocation26_spill] sm:$0xff] }
 0x6a7   :  { %v3790_v8 = vpop.f32.mrf.mxu0 }
 0x6a8   :  { %v3890_v6 = vmax.f32 %v3874_v47, 0.0  ;;  %v3877_v9 = vadd.f32 %v13943_v49, %v3857_v60  ;;  %v3855_v26 = vmul.f32 %v13940_v14, %v3790_v8  ;;  %v3908_v39 = vadd.f32 %v3892_v58, %v15514_v28 }
 0x6a9   :  { %v11371_v11 = vpop.f32.mrf.mxu0 }
 0x6aa   :  { %v3893_v57 = vmax.f32 %v3877_v9, 0.0  ;;  %v3875_v37 = vadd.f32 %v13943_v49, %v3855_v26  ;;  %v3860_v5 = vmul.f32 %v11371_v11, %v13940_v14  ;;  %v3906_v51 = vadd.f32 %v3890_v6, %v15512_v25  ;;  %v15523_v9 = vld [vmem:[#allocation76_spill] sm:$0xff] }
 0x6ab   :  { %v3803_v16 = vpop.f32.mrf.mxu0  ;;  %v3924_v46 = vmax.f32 %v3908_v39, 0.0  ;;  %v14011_v6 = vcombine.low %v5227_v7, %v5228_v3 }
 0x6ac   :  { %v3909_v22 = vadd.f32 %v3893_v57, %v15513_v24  ;;  %v3891_v44 = vmax.f32 %v3875_v37, 0.0  ;;  %v3858_v1 = vmul.f32 %v13940_v14, %v3803_v16  ;;  %v3880_v41 = vadd.f32 %v13943_v49, %v3860_v5 }
 0x6ad   :  { %v11372_v43 = vpop.f32.mrf.mxu0  ;;  %v3922_v31 = vmax.f32 %v3906_v51, 0.0 }
 0x6ae   :  { %v3907_v21 = vadd.f32 %v3891_v44, %v15515_v62  ;;  %v3925_v35 = vmax.f32 %v3909_v22, 0.0  ;;  %v3878_v54 = vadd.f32 %v13943_v49, %v3858_v1  ;;  %v3861_v55 = vmul.f32 %v11372_v43, %v13940_v14 }
 0x6af   :  { %v3806_v61 = vpop.f32.mrf.mxu0  ;;  %v3896_v36 = vmax.f32 %v3880_v41, 0.0  ;;  %v15524_v41 = vld [vmem:[#allocation25_spill] sm:$0xff] }
 0x6b0   :  { %v3923_v19 = vmax.f32 %v3907_v21, 0.0  ;;  %v3894_v18 = vmax.f32 %v3878_v54, 0.0  ;;  %v3881_v27 = vadd.f32 %v13943_v49, %v3861_v55  ;;  %v3859_v13 = vmul.f32 %v13940_v14, %v3806_v61  ;;  %v15527_v54 = vld [vmem:[#allocation27_spill] sm:$0xff] }
 0x6b1   :  { %v11375_v63 = vpop.f32.mrf.mxu0  ;;  %v13984_v20 = vpack.c.bf16 %v3925_v35, %v3924_v46  ;;  %v3912_v47 = vadd.f32 %v3896_v36, %v15522_v10  ;;  %v15531_v46 = vld [vmem:[#allocation28_spill] sm:$0xff] }
 0x6b2   :  { %v13982_v50 = vpack.c.bf16 %v3923_v19, %v3922_v31  ;;  %v3897_v34 = vmax.f32 %v3881_v27, 0.0  ;;  %v3879_v48 = vadd.f32 %v13943_v49, %v3859_v13  ;;  %v3864_v15 = vmul.f32 %v11375_v63, %v13940_v14  ;;  %v15530_v31 = vld [vmem:[#allocation32_spill] sm:$0xff] }
 0x6b3   :  { %v3819_v42 = vpop.f32.mrf.mxu0  ;;  %v3910_v23 = vadd.f32 %v3894_v18, %v15518_v0  ;;  %v3928_v24 = vmax.f32 %v3912_v47, 0.0 }
 0x6b4   :  { %11385 = vmatprep.mubr.msk.bf16.mxu1 %vm15516_vm3, %v13982_v50  ;;  %11405 = vmatprep.mubr.msk.bf16.mxu0 %vm15517_vm0, %v13982_v50  ;;  %v3913_v17 = vadd.f32 %v3897_v34, %v15519_v40  ;;  %v3895_v29 = vmax.f32 %v3879_v48, 0.0  ;;  %v3862_v4 = vmul.f32 %v13940_v14, %v3819_v42  ;;  %v3884_v60 = vadd.f32 %v13943_v49, %v3864_v15  ;;  %v15532_v42 = vld [vmem:[#allocation34_spill] sm:$0xff]  ;;  %vm15544_vm3 = vmmov %vm15517_vm0 }
 0x6b5   :  { %11386 = vmatmul.mubr.msk.bf16.vlgmr.msra.gmra.mxu1 %vm15520_vm14, %v13984_v20  ;;  %11406 = vmatmul.mubr.msk.bf16.vlgmr.msra.gmra.mxu0 %vm15521_vm2, %v13984_v20  ;;  %v11376_v8 = vpop.f32.mrf.mxu0  ;;  %v3926_v5 = vmax.f32 %v3910_v23, 0.0  ;;  %v15533_v23 = vld [vmem:[#allocation31_spill] sm:$0xff]  ;;  %vm15545_vm14 = vmmov %vm15517_vm0 }
 0x6b6   :  { %11422 = vmatpush3.bf16.msra.mxu1 %v13927_v53  ;;  %11442 = vmatpush3.bf16.msra.mxu0 %v13936_v33  ;;  %v3911_v26 = vadd.f32 %v3895_v29, %v15523_v9  ;;  %v3882_v58 = vadd.f32 %v13943_v49, %v3862_v4  ;;  %v3865_v57 = vmul.f32 %v11376_v8, %v13940_v14  ;;  %v3929_v37 = vmax.f32 %v3913_v17, 0.0  ;;  %vm15546_vm2 = vmmov %vm15517_vm0 }
 0x6b7   :  { %11423 = vmatprep.subr.bf16.mxu1 %v10077_v56  ;;  %11443 = vmatprep.subr.bf16.mxu0 %v10105_v45  ;;  %v3822_v11 = vpop.f32.mrf.mxu0  ;;  %v3900_v16 = vmax.f32 %v3884_v60, 0.0 }
 0x6b8   :  { %v3927_v25 = vmax.f32 %v3911_v26, 0.0  ;;  %v3885_v51 = vadd.f32 %v13943_v49, %v3865_v57  ;;  %v3898_v53 = vmax.f32 %v3882_v58, 0.0  ;;  %v3863_v33 = vmul.f32 %v13940_v14, %v3822_v11  ;;  %v4974_v58 = vld [vmem:[%s15170_s9 + $0x10] sm:$0xf]  ;;  %v5226_v11 = vld [vmem:[%s15170_s9 + $0x34] sm:$0xf] }
 0x6b9   :  { %v11379_v22 = vpop.f32.mrf.mxu0  ;;  %v14023_v1 = vpack.c.bf16 %v3929_v37, %v3928_v24  ;;  %v3916_v19 = vadd.f32 %v3900_v16, %v15530_v31  ;;  %v4975_v57 = vld [vmem:[%s15170_s9 + $0x30] sm:$0xf]  ;;  %v5225_v37 = vld [vmem:[%s15170_s9 + $0x14] sm:$0xf]  ;;  %v5479_v24 = vld [vmem:[%s15170_s9 + $0x78] sm:$0xf] }
 0x6ba   :  { %11424 = vmatpush3.bf16.msra.mxu1 %v10077_v56  ;;  %11444 = vmatpush3.bf16.msra.mxu0 %v10105_v45  ;;  %v14018_v44 = vpack.c.bf16 %v3927_v25, %v3926_v5  ;;  %v3901_v28 = vmax.f32 %v3885_v51, 0.0  ;;  %v3868_v39 = vmul.f32 %v11379_v22, %v13940_v14  ;;  %v3883_v62 = vadd.f32 %v13943_v49, %v3863_v33  ;;  %v5478_v51 = vld [vmem:[%s15170_s9 + $0x58] sm:$0xf]  ;;  %v5730_v33 = vld [vmem:[%s15170_s9 + $0x7c] sm:$0xf] }
 0x6bb   :  { %11461 = vmatprep.subr.bf16.mxu1 %v13998_v32  ;;  %11481 = vmatprep.subr.bf16.mxu0 %v14011_v6  ;;  %v3835_v21 = vpop.f32.mrf.mxu0  ;;  %v3914_v55 = vadd.f32 %v3898_v53, %v15527_v54  ;;  %v3932_v34 = vmax.f32 %v3916_v19, 0.0  ;;  %v10133_v5 = vcombine.low %v4974_v58, %v4975_v57  ;;  %v10161_v25 = vcombine.low %v5225_v37, %v5226_v11  ;;  %v5729_v53 = vld [vmem:[%s15170_s9 + $0x5c] sm:$0xf]  ;;  %v12106_v54 = vld [vmem:[#allocation16 + $0x60] ss:$8 sps:$4 sm:$0xff]  }
 0x6bc   :  { %v3917_v43 = vadd.f32 %v3901_v28, %v15524_v41  ;;  %v3866_v35 = vmul.f32 %v13940_v14, %v3835_v21  ;;  %11389 = vmatprep.mubr.msk.bf16.mxu1 %vm15525_vm5, %v14018_v44  ;;  %11409 = vmatprep.mubr.msk.bf16.mxu0 %vm15526_vm6, %v14018_v44  ;;  %v3899_v59 = vmax.f32 %v3883_v62, 0.0  ;;  %v3888_v61 = vadd.f32 %v13943_v49, %v3868_v39  ;;  %vm15547_vm5 = vmmov %vm15517_vm0  ;;  %v5727_v28 = vld [vmem:[%s15170_s9 + $0x1c] sm:$0xf]  ;;  %v12113_v31 = vld [vmem:[#allocation16 + $0xa0] ss:$8 sps:$4 sm:$0xff]  }
 0x6bd   :  { %v11380_v38 = vpop.f32.mrf.mxu0  ;;  %11390 = vmatmul.mubr.msk.bf16.gmra.mxu1 %vm15528_vm7, %v14023_v1  ;;  %11410 = vmatmul.mubr.msk.bf16.gmra.mxu0 %vm15529_vm8, %v14023_v1  ;;  %v3930_v30 = vmax.f32 %v3914_v55, 0.0  ;;  %vm15548_vm6 = vmmov %vm15517_vm0  ;;  %v10190_v22 = vcombine.low %v5478_v51, %v5479_v24  ;;  %v10218_v16 = vcombine.low %v5729_v53, %v5730_v33  ;;  %v5728_v39 = vld [vmem:[%s15170_s9 + $0x3c] sm:$0xf]  ;;  %v12114_v19 = vld [vmem:[#allocation16 + $0x20] ss:$8 sps:$4 sm:$0xff]  }
 0x6be   :  { %v3886_v52 = vadd.f32 %v13943_v49, %v3866_v35  ;;  %v3869_v2 = vmul.f32 %v11380_v38, %v13940_v14  ;;  %v3915_v18 = vadd.f32 %v3899_v59, %v15531_v46  ;;  %v3933_v13 = vmax.f32 %v3917_v43, 0.0  ;;  %vm15549_vm7 = vmmov %vm15517_vm0  ;;  %v12103_v41 = vld [vmem:[#allocation16 + $0xf0] ss:$8 sps:$4 sm:$0xff]   ;;  %v12105_v35 = vld [vmem:[#allocation16 + $0xe0] ss:$8 sps:$4 sm:$0xff]  }
 0x6bf   :  { %v3838_v27 = vpop.f32.mrf.mxu0  ;;  %v3904_v48 = vmax.f32 %v3888_v61, 0.0  ;;  %vm15550_vm8 = vmmov %vm15517_vm0  ;;  %v10217_v21 = vcombine.low %v5727_v28, %v5728_v39  ;;  %v12104_v43 = vld [vmem:[#allocation16 + $0x70] ss:$8 sps:$4 sm:$0xff]   ;;  %v12109_v59 = vld [vmem:[#allocation16 + $0xc0] ss:$8 sps:$4 sm:$0xff]  }
 0x6c0   :  { %v3889_v12 = vadd.f32 %v13943_v49, %v3869_v2  ;;  %v3931_v36 = vmax.f32 %v3915_v18, 0.0  ;;  %v3902_v63 = vmax.f32 %v3886_v52, 0.0  ;;  %v3867_v56 = vmul.f32 %v13940_v14, %v3838_v27  ;;  %v15536_v14 = vld [vmem:[#allocation38_spill] sm:$0xff]  ;;  %v12107_v55 = vld [vmem:[#allocation16 + $0xd0] ss:$8 sps:$4 sm:$0xff]  }
 0x6c1   :  { %v14047_v15 = vpack.c.bf16 %v3933_v13, %v3932_v34  ;;  %v3920_v29 = vadd.f32 %v3904_v48, %v15536_v14  ;;  %v12110_v38 = vld [vmem:[#allocation16 + $0x40] ss:$8 sps:$4 sm:$0xff]   ;;  %v12116_v61 = vld [vmem:[#allocation16 + $0x10] ss:$8 sps:$4 sm:$0xff]  }
 0x6c2   :  { %v3905_v45 = vmax.f32 %v3889_v12, 0.0  ;;  %v14044_v7 = vpack.c.bf16 %v3931_v36, %v3930_v30  ;;  %v3887_v3 = vadd.f32 %v13943_v49, %v3867_v56  ;;  %v3918_v40 = vadd.f32 %v3902_v63, %v15533_v23  ;;  %v15539_v49 = vld [vmem:[#allocation33_spill] sm:$0xff]  ;;  %v14207_v46 = vld [vmem:[#allocation16 + $0x170] ss:$8 sps:$4 sm:$0xff]  }
 0x6c3   :  { %v3936_v8 = vmax.f32 %v3920_v29, 0.0  ;;  %v12117_v52 = vld [vmem:[#allocation16 + $0x80] ss:$8 sps:$4 sm:$0xff]   ;;  %v14209_v18 = vld [vmem:[#allocation16 + $0x1f0] ss:$8 sps:$4 sm:$0xff]  }
 0x6c4   :  { %v3921_v0 = vadd.f32 %v3905_v45, %v15532_v42  ;;  %v3903_v17 = vmax.f32 %v3887_v3, 0.0  ;;  %11393 = vmatprep.mubr.msk.bf16.mxu1 %vm15534_vm9, %v14044_v7  ;;  %11413 = vmatprep.mubr.msk.bf16.mxu0 %vm15535_vm10, %v14044_v7  ;;  %v3934_v47 = vmax.f32 %v3918_v40, 0.0  ;;  %vm15551_vm9 = vmmov %vm15517_vm0  ;;  %v12118_v2 = vld [vmem:[#allocation16] ss:$8 sps:$4 sm:$0xff]   ;;  %v14213_v27 = vld [vmem:[#allocation15] ss:$0 sm:$0xff] }
 0x6c5   :  { %11394 = vmatmul.mubr.msk.bf16.gmra.mxu1 %vm15537_vm11, %v14047_v15  ;;  %11414 = vmatmul.mubr.msk.bf16.gmra.mxu0 %vm15538_vm4, %v14047_v15  ;;  %vm15552_vm10 = vmmov %vm15517_vm0  ;;  %v14215_v13 = vld [vmem:[#allocation15 + $0x2] ss:$0 sm:$0xff]  ;;  %v14217_v30 = vld [vmem:[#allocation15 + $0x1] ss:$0 sm:$0xff] }
 0x6c6   :  { %v3919_v4 = vadd.f32 %v3903_v17, %v15539_v49  ;;  %v3937_v10 = vmax.f32 %v3921_v0, 0.0  ;;  %vm15553_vm11 = vmmov %vm15517_vm0  ;;  %v14219_v63 = vld [vmem:[#allocation15 + $0x3] ss:$0 sm:$0xff] }
 0x6c7   :  { %vm15554_vm4 = vmmov %vm15517_vm0 }
 0x6c8   :  { %v3935_v60 = vmax.f32 %v3919_v4, 0.0  ;;  %v14063_v26 = vpack.c.bf16 %v3937_v10, %v3936_v8 }
 0x6ca   :  { %v14061_v9 = vpack.c.bf16 %v3935_v60, %v3934_v47 }
 0x6cc   :  { %11397 = vmatprep.mubr.msk.bf16.mxu1 %vm15540_vm12, %v14061_v9  ;;  %11417 = vmatprep.mubr.msk.bf16.mxu0 %vm15541_vm13, %v14061_v9  ;;  %vm15555_vm12 = vmmov %vm15517_vm0 }
 0x6cd   :  { %11398 = vmatmul.mubr.msk.bf16.gmra.mxu1 %vm15542_vm15, %v14063_v26  ;;  %11418 = vmatmul.mubr.msk.bf16.gmra.mxu0 %vm15543_vm1, %v14063_v26  ;;  %vm15556_vm13 = vmmov %vm15517_vm0 }
 0x6ce   :  { %11425 = vmatprep.mubr.msk.bf16.mxu1 %vm15544_vm3, %v13982_v50  ;;  %11445 = vmatprep.mubr.msk.bf16.mxu0 %vm15517_vm0, %v13982_v50  ;;  %vm15557_vm15 = vmmov %vm15517_vm0 }
 0x6cf   :  { %vm15558_vm1 = vmmov %vm15517_vm0 }
 0x6d0   :  { %vm15559_vm3 = vmmov %vm15517_vm0 }
 0x6d5   :  { %11426 = vmatmul.mubr.msk.bf16.vlgmr.msra.gmra.mxu1 %vm15545_vm14, %v13984_v20  ;;  %11446 = vmatmul.mubr.msk.bf16.vlgmr.msra.gmra.mxu0 %vm15546_vm2, %v13984_v20  ;;  %vm15560_vm14 = vmmov %vm15517_vm0 }
 0x6d6   :  { %11462 = vmatpush3.bf16.msra.mxu1 %v13998_v32  ;;  %11429 = vmatprep.mubr.msk.bf16.mxu1 %vm15547_vm5, %v14018_v44  ;;  %v5476_v32 = vld [vmem:[%s15170_s9 + $0x18] sm:$0xf]  ;;  %vm15561_vm2 = vmmov %vm15517_vm0 }
 0x6d7   :  { %11449 = vmatprep.mubr.msk.bf16.mxu0 %vm15548_vm6, %v14018_v44  ;;  %11482 = vmatpush3.bf16.msra.mxu0 %v14011_v6  ;;  %v5477_v6 = vld [vmem:[%s15170_s9 + $0x38] sm:$0xf]  ;;  %vm15562_vm5 = vmmov %vm15517_vm0 }
 0x6d8   :  { %11463 = vmatprep.subr.bf16.mxu1 %v10133_v5  ;;  %11483 = vmatprep.subr.bf16.mxu0 %v10161_v25  ;;  %v10189_v62 = vcombine.low %v5476_v32, %v5477_v6  ;;  %vm15563_vm6 = vmmov %vm15517_vm0 }
 0x6da   :  { %11464 = vmatpush3.bf16.msra.mxu1 %v10133_v5 }
 0x6db   :  { %11484 = vmatpush3.bf16.msra.mxu0 %v10161_v25  ;;  %11501 = vmatprep.subr.bf16.mxu1 %v10190_v22 }
 0x6dc   :  { %11521 = vmatprep.subr.bf16.mxu0 %v10218_v16 }
 0x6dd   :  { %11430 = vmatmul.mubr.msk.bf16.gmra.mxu1 %vm15549_vm7, %v14023_v1  ;;  %11450 = vmatmul.mubr.msk.bf16.gmra.mxu0 %vm15550_vm8, %v14023_v1  ;;  %vm15564_vm7 = vmmov %vm15517_vm0 }
 0x6de   :  { %11433 = vmatprep.mubr.msk.bf16.mxu1 %vm15551_vm9, %v14044_v7  ;;  %11453 = vmatprep.mubr.msk.bf16.mxu0 %vm15552_vm10, %v14044_v7  ;;  %vm15565_vm8 = vmmov %vm15517_vm0 }
 0x6df   :  { %vm15566_vm9 = vmmov %vm15517_vm0 }
 0x6e0   :  { %vm15567_vm10 = vmmov %vm15517_vm0 }
 0x6e5   :  { %11434 = vmatmul.mubr.msk.bf16.gmra.mxu1 %vm15553_vm11, %v14047_v15  ;;  %11454 = vmatmul.mubr.msk.bf16.gmra.mxu0 %vm15554_vm4, %v14047_v15  ;;  %vm15568_vm11 = vmmov %vm15517_vm0 }
 0x6e6   :  { %11437 = vmatprep.mubr.msk.bf16.mxu1 %vm15555_vm12, %v14061_v9  ;;  %11457 = vmatprep.mubr.msk.bf16.mxu0 %vm15556_vm13, %v14061_v9  ;;  %vm15569_vm4 = vmmov %vm15517_vm0 }
 0x6e7   :  { %vm15570_vm12 = vmmov %vm15517_vm0 }
 0x6e8   :  { %vm15571_vm13 = vmmov %vm15517_vm0 }
 0x6ed   :  { %11438 = vmatmul.mubr.msk.bf16.gmra.mxu1 %vm15557_vm15, %v14063_v26  ;;  %11458 = vmatmul.mubr.msk.bf16.gmra.mxu0 %vm15558_vm1, %v14063_v26  ;;  %vm15572_vm15 = vmmov %vm15517_vm0 }
 0x6ee   :  { %11465 = vmatprep.mubr.msk.bf16.mxu1 %vm15559_vm3, %v13982_v50  ;;  %11485 = vmatprep.mubr.msk.bf16.mxu0 %vm15517_vm0, %v13982_v50  ;;  %vm15573_vm1 = vmmov %vm15517_vm0 }
 0x6ef   :  { %vm15574_vm3 = vmmov %vm15517_vm0 }
 0x6f5   :  { %11466 = vmatmul.mubr.msk.bf16.vlgmr.msra.gmra.mxu1 %vm15560_vm14, %v13984_v20  ;;  %11486 = vmatmul.mubr.msk.bf16.vlgmr.msra.gmra.mxu0 %vm15561_vm2, %v13984_v20  ;;  %vm15575_vm14 = vmmov %vm15517_vm0 }
 0x6f6   :  { %11502 = vmatpush3.bf16.msra.mxu1 %v10190_v22  ;;  %11469 = vmatprep.mubr.msk.bf16.mxu1 %vm15562_vm5, %v14018_v44  ;;  %vm15576_vm2 = vmmov %vm15517_vm0 }
 0x6f7   :  { %11489 = vmatprep.mubr.msk.bf16.mxu0 %vm15563_vm6, %v14018_v44  ;;  %11522 = vmatpush3.bf16.msra.mxu0 %v10218_v16  ;;  %vm15577_vm5 = vmmov %vm15517_vm0 }
 0x6f8   :  { %11503 = vmatprep.subr.bf16.mxu1 %v10189_v62  ;;  %11523 = vmatprep.subr.bf16.mxu0 %v10217_v21  ;;  %vm15578_vm6 = vmmov %vm15517_vm0 }
 0x6fa   :  { %11504 = vmatpush3.bf16.msra.mxu1 %v10189_v62 }
 0x6fb   :  { %11524 = vmatpush3.bf16.msra.mxu0 %v10217_v21  ;;  %11541 = vmatprep.subr.bf16.mxu1 %v12103_v41 }
 0x6fc   :  { %11573 = vmatprep.subr.bf16.mxu0 %v12104_v43 }
 0x6fd   :  { %11470 = vmatmul.mubr.msk.bf16.gmra.mxu1 %vm15564_vm7, %v14023_v1  ;;  %11490 = vmatmul.mubr.msk.bf16.gmra.mxu0 %vm15565_vm8, %v14023_v1  ;;  %vm15579_vm7 = vmmov %vm15517_vm0 }
 0x6fe   :  { %11473 = vmatprep.mubr.msk.bf16.mxu1 %vm15566_vm9, %v14044_v7  ;;  %11493 = vmatprep.mubr.msk.bf16.mxu0 %vm15567_vm10, %v14044_v7  ;;  %vm15580_vm8 = vmmov %vm15517_vm0 }
 0x6ff   :  { %vm15581_vm9 = vmmov %vm15517_vm0 }
 0x700   :  { %vm15582_vm10 = vmmov %vm15517_vm0 }
 0x705   :  { %11474 = vmatmul.mubr.msk.bf16.gmra.mxu1 %vm15568_vm11, %v14047_v15  ;;  %11494 = vmatmul.mubr.msk.bf16.gmra.mxu0 %vm15569_vm4, %v14047_v15  ;;  %vm15583_vm11 = vmmov %vm15517_vm0 }
 0x706   :  { %11477 = vmatprep.mubr.msk.bf16.mxu1 %vm15570_vm12, %v14061_v9  ;;  %11497 = vmatprep.mubr.msk.bf16.mxu0 %vm15571_vm13, %v14061_v9  ;;  %vm15584_vm4 = vmmov %vm15517_vm0 }
 0x707   :  { %vm15585_vm12 = vmmov %vm15517_vm0 }
 0x708   :  { %vm15586_vm13 = vmmov %vm15517_vm0 }
 0x70d   :  { %11478 = vmatmul.mubr.msk.bf16.gmra.mxu1 %vm15572_vm15, %v14063_v26  ;;  %11498 = vmatmul.mubr.msk.bf16.gmra.mxu0 %vm15573_vm1, %v14063_v26  ;;  %vm15587_vm15 = vmmov %vm15517_vm0 }
 0x70e   :  { %11505 = vmatprep.mubr.msk.bf16.mxu1 %vm15574_vm3, %v13982_v50  ;;  %11525 = vmatprep.mubr.msk.bf16.mxu0 %vm15517_vm0, %v13982_v50  ;;  %v12108_v50 = vld [vmem:[#allocation16 + $0x50] ss:$8 sps:$4 sm:$0xff]   ;;  %vm15588_vm1 = vmmov %vm15517_vm0 }
 0x715   :  { %11506 = vmatmul.mubr.msk.bf16.vlgmr.msra.gmra.mxu1 %vm15575_vm14, %v13984_v20  ;;  %11526 = vmatmul.mubr.msk.bf16.vlgmr.msra.gmra.mxu0 %vm15576_vm2, %v13984_v20  ;;  %v12111_v20 = vld [vmem:[#allocation16 + $0xb0] ss:$8 sps:$4 sm:$0xff]  }
 0x716   :  { %11509 = vmatprep.mubr.msk.bf16.mxu1 %vm15577_vm5, %v14018_v44  ;;  %11529 = vmatprep.mubr.msk.bf16.mxu0 %vm15578_vm6, %v14018_v44  ;;  %v12112_v44 = vld [vmem:[#allocation16 + $0x30] ss:$8 sps:$4 sm:$0xff]  }
 0x717   :  { %11542 = vmatpush3.bf16.msra.mxu1 %v12103_v41  ;;  %11574 = vmatpush3.bf16.msra.mxu0 %v12104_v43 }
 0x718   :  { %11543 = vmatprep.subr.bf16.mxu1 %v12105_v35  ;;  %11575 = vmatprep.subr.bf16.mxu0 %v12106_v54 }
 0x71b   :  { %11544 = vmatpush3.bf16.msra.mxu1 %v12105_v35  ;;  %11576 = vmatpush3.bf16.msra.mxu0 %v12106_v54 }
 0x71c   :  { %11545 = vmatprep.subr.bf16.mxu1 %v12107_v55  ;;  %11577 = vmatprep.subr.bf16.mxu0 %v12108_v50 }
 0x71d   :  { %11510 = vmatmul.mubr.msk.bf16.gmra.mxu1 %vm15579_vm7, %v14023_v1  ;;  %11530 = vmatmul.mubr.msk.bf16.gmra.mxu0 %vm15580_vm8, %v14023_v1  ;;  %v12115_v1 = vld [vmem:[#allocation16 + $0x90] ss:$8 sps:$4 sm:$0xff]  }
 0x71e   :  { %11513 = vmatprep.mubr.msk.bf16.mxu1 %vm15581_vm9, %v14044_v7  ;;  %11533 = vmatprep.mubr.msk.bf16.mxu0 %vm15582_vm10, %v14044_v7 }
 0x71f   :  { %11546 = vmatpush3.bf16.msra.mxu1 %v12107_v55  ;;  %11578 = vmatpush3.bf16.msra.mxu0 %v12108_v50 }
 0x720   :  { %11547 = vmatprep.subr.bf16.mxu1 %v12109_v59  ;;  %11579 = vmatprep.subr.bf16.mxu0 %v12110_v38 }
 0x723   :  { %11548 = vmatpush3.bf16.msra.mxu1 %v12109_v59  ;;  %11580 = vmatpush3.bf16.msra.mxu0 %v12110_v38 }
 0x724   :  { %11549 = vmatprep.subr.bf16.mxu1 %v12111_v20  ;;  %11581 = vmatprep.subr.bf16.mxu0 %v12112_v44 }
 0x725   :  { %11514 = vmatmul.mubr.msk.bf16.gmra.mxu1 %vm15583_vm11, %v14047_v15  ;;  %11534 = vmatmul.mubr.msk.bf16.gmra.mxu0 %vm15584_vm4, %v14047_v15 }
 0x726   :  { %11517 = vmatprep.mubr.msk.bf16.mxu1 %vm15585_vm12, %v14061_v9  ;;  %11537 = vmatprep.mubr.msk.bf16.mxu0 %vm15586_vm13, %v14061_v9 }
 0x727   :  { %11550 = vmatpush3.bf16.msra.mxu1 %v12111_v20  ;;  %11582 = vmatpush3.bf16.msra.mxu0 %v12112_v44 }
 0x728   :  { %11551 = vmatprep.subr.bf16.mxu1 %v12113_v31  ;;  %11583 = vmatprep.subr.bf16.mxu0 %v12114_v19 }
 0x72b   :  { %11552 = vmatpush3.bf16.msra.mxu1 %v12113_v31  ;;  %11584 = vmatpush3.bf16.msra.mxu0 %v12114_v19 }
 0x72c   :  { %11553 = vmatprep.subr.bf16.mxu1 %v12115_v1  ;;  %11585 = vmatprep.subr.bf16.mxu0 %v12116_v61 }
 0x72d   :  { %11518 = vmatmul.mubr.msk.bf16.gmra.mxu1 %vm15587_vm15, %v14063_v26  ;;  %11538 = vmatmul.mubr.msk.bf16.gmra.mxu0 %vm15588_vm1, %v14063_v26 }
 0x72f   :  { %11554 = vmatpush3.bf16.msra.mxu1 %v12115_v1  ;;  %11586 = vmatpush3.bf16.msra.mxu0 %v12116_v61 }
 0x730   :  { %11555 = vmatprep.subr.bf16.mxu1 %v12117_v52  ;;  %11587 = vmatprep.subr.bf16.mxu0 %v12118_v2 }
 0x733   :  { %11556 = vmatpush3.bf16.msra.mxu1 %v12117_v52  ;;  %11588 = vmatpush3.bf16.msra.mxu0 %v12118_v2 }
 0x734   :  { %11605 = vmatprep.subr.bf16.mxu1 %v14207_v46  ;;  %11637 = vmatprep.subr.bf16.mxu0 %v14209_v18 }
 0x775   :  { %v11387_v12 = vpop.f32.mrf.mxu1  ;;  %v11407_v36 = vpop.f32.mrf.mxu0 }
 0x776   :  { %v4090_v56 = vmul.f32 %v11387_v12, %v14213_v27  ;;  %v4341_v34 = vmul.f32 %v11407_v36, %v14215_v13 }
 0x777   :  { %v4020_v48 = vpop.f32.mrf.mxu1  ;;  %v4271_v45 = vpop.f32.mrf.mxu0 }
 0x778   :  { %v4111_v7 = vadd.f32 %v14217_v30, %v4090_v56  ;;  %v4362_v3 = vadd.f32 %v14219_v63, %v4341_v34  ;;  %v4088_v15 = vmul.f32 %v14213_v27, %v4020_v48  ;;  %v4339_v42 = vmul.f32 %v14215_v13, %v4271_v45 }
 0x779   :  { %v11388_v0 = vpop.f32.mrf.mxu1  ;;  %v11408_v23 = vpop.f32.mrf.mxu0 }
 0x77a   :  { %v4127_v40 = vmax.f32 %v4111_v7, 0.0  ;;  %v4378_v17 = vmax.f32 %v4362_v3, 0.0  ;;  %v4109_v14 = vadd.f32 %v14217_v30, %v4088_v15  ;;  %v4360_v29 = vadd.f32 %v14219_v63, %v4339_v42 }
 0x77b   :  { %v4091_v49 = vmul.f32 %v11388_v0, %v14213_v27  ;;  %v4342_v4 = vmul.f32 %v11408_v23, %v14215_v13  ;;  %v4023_v10 = vpop.f32.mrf.mxu1  ;;  %v4274_v47 = vpop.f32.mrf.mxu0 }
 0x77c   :  { %v10505_v60 = vpack.c.bf16 %v4127_v40, %v4127_v40  ;;  %v10521_v8 = vpack.c.bf16 %v4378_v17, %v4378_v17  ;;  %v4125_v9 = vmax.f32 %v4109_v14, 0.0  ;;  %v4376_v26 = vmax.f32 %v4360_v29, 0.0 }
 0x77d   :  { %v4112_v58 = vadd.f32 %v14217_v30, %v4091_v49  ;;  %v4363_v57 = vadd.f32 %v14219_v63, %v4342_v4  ;;  %v4089_v37 = vmul.f32 %v14213_v27, %v4023_v10  ;;  %v4340_v11 = vmul.f32 %v14215_v13, %v4274_v47  ;;  %v11391_v51 = vpop.f32.mrf.mxu1  ;;  %v11411_v24 = vpop.f32.mrf.mxu0 }
 0x77e   :  { %4207 = vst [vmem:[#allocation3 + $0x40] sm:$0xf] %v10505_v60  ;;  %4458 = vst [vmem:[#allocation3 + $0x44] sm:$0xf] %v10521_v8  ;;  %v10503_v5 = vpack.c.bf16 %v4125_v9, %v4125_v9  ;;  %v10519_v25 = vpack.c.bf16 %v4376_v26, %v4376_v26  ;;  %v4094_v32 = vmul.f32 %v11391_v51, %v14213_v27 }
 0x77f   :  { %v4128_v53 = vmax.f32 %v4112_v58, 0.0  ;;  %v4379_v33 = vmax.f32 %v4363_v57, 0.0  ;;  %v4110_v22 = vadd.f32 %v14217_v30, %v4089_v37  ;;  %v4361_v16 = vadd.f32 %v14219_v63, %v4340_v11  ;;  %v4036_v28 = vpop.f32.mrf.mxu1  ;;  %v4287_v39 = vpop.f32.mrf.mxu0 }
 0x780   :  { %4205 = vst [vmem:[#allocation3] sm:$0xf] %v10503_v5  ;;  %4456 = vst [vmem:[#allocation3 + $0x4] sm:$0xf] %v10519_v25  ;;  %v4345_v6 = vmul.f32 %v11411_v24, %v14215_v13  ;;  %v4115_v35 = vadd.f32 %v14217_v30, %v4094_v32  ;;  %v4092_v55 = vmul.f32 %v14213_v27, %v4036_v28 }
 0x781   :  { %v10506_v62 = vpack.c.bf16 %v4128_v53, %v4128_v53  ;;  %v10522_v21 = vpack.c.bf16 %v4379_v33, %v4379_v33  ;;  %v4126_v41 = vmax.f32 %v4110_v22, 0.0  ;;  %v4377_v43 = vmax.f32 %v4361_v16, 0.0  ;;  %v11392_v59 = vpop.f32.mrf.mxu1  ;;  %v11412_v38 = vpop.f32.mrf.mxu0 }
 0x782   :  { %v4366_v54 = vadd.f32 %v14219_v63, %v4345_v6  ;;  %v4343_v50 = vmul.f32 %v14215_v13, %v4287_v39  ;;  %v4095_v31 = vmul.f32 %v11392_v59, %v14213_v27  ;;  %v4346_v19 = vmul.f32 %v11412_v38, %v14215_v13 }
 0x783   :  { %4208 = vst [vmem:[#allocation3 + $0x60] sm:$0xf] %v10506_v62  ;;  %4459 = vst [vmem:[#allocation3 + $0x64] sm:$0xf] %v10522_v21  ;;  %v10504_v20 = vpack.c.bf16 %v4126_v41, %v4126_v41  ;;  %v10520_v44 = vpack.c.bf16 %v4377_v43, %v4377_v43  ;;  %v4131_v1 = vmax.f32 %v4115_v35, 0.0  ;;  %v4113_v52 = vadd.f32 %v14217_v30, %v4092_v55  ;;  %v4039_v12 = vpop.f32.mrf.mxu1  ;;  %v4290_v36 = vpop.f32.mrf.mxu0 }
 0x784   :  { %v4382_v61 = vmax.f32 %v4366_v54, 0.0  ;;  %v4364_v2 = vadd.f32 %v14219_v63, %v4343_v50  ;;  %v4116_v56 = vadd.f32 %v14217_v30, %v4095_v31  ;;  %v4367_v34 = vadd.f32 %v14219_v63, %v4346_v19 }
 0x785   :  { %4206 = vst [vmem:[#allocation3 + $0x20] sm:$0xf] %v10504_v20  ;;  %4457 = vst [vmem:[#allocation3 + $0x24] sm:$0xf] %v10520_v44  ;;  %v4093_v48 = vmul.f32 %v14213_v27, %v4039_v12  ;;  %v4344_v45 = vmul.f32 %v14215_v13, %v4290_v36  ;;  %v10509_v7 = vpack.c.bf16 %v4131_v1, %v4131_v1  ;;  %v4129_v15 = vmax.f32 %v4113_v52, 0.0  ;;  %v11395_v14 = vpop.f32.mrf.mxu1  ;;  %v11415_v29 = vpop.f32.mrf.mxu0 }
 0x786   :  { %v10525_v3 = vpack.c.bf16 %v4382_v61, %v4382_v61  ;;  %v4380_v42 = vmax.f32 %v4364_v2, 0.0  ;;  %v4132_v0 = vmax.f32 %v4116_v56, 0.0  ;;  %v4383_v23 = vmax.f32 %v4367_v34, 0.0  ;;  %v6012_v37 = vld [vmem:[#allocation3 + $0x44] sm:$0xf] }
 0x787   :  { %v4114_v40 = vadd.f32 %v14217_v30, %v4093_v48  ;;  %v4365_v17 = vadd.f32 %v14219_v63, %v4344_v45  ;;  %4211 = vst [vmem:[#allocation3 + $0xc0] sm:$0xf] %v10509_v7  ;;  %v10507_v49 = vpack.c.bf16 %v4129_v15, %v4129_v15  ;;  %v4098_v10 = vmul.f32 %v11395_v14, %v14213_v27  ;;  %v4052_v58 = vpop.f32.mrf.mxu1  ;;  %v4303_v57 = vpop.f32.mrf.mxu0  ;;  %v5980_v53 = vld [vmem:[#allocation3 + $0x40] sm:$0xf]  ;;  %v6010_v28 = vld [vmem:[#allocation3 + $0x4] sm:$0xf] }
 0x788   :  { %4462 = vst [vmem:[#allocation3 + $0xc4] sm:$0xf] %v10525_v3  ;;  %v10523_v4 = vpack.c.bf16 %v4380_v42, %v4380_v42  ;;  %v4349_v47 = vmul.f32 %v11415_v29, %v14215_v13  ;;  %v10510_v60 = vpack.c.bf16 %v4132_v0, %v4132_v0  ;;  %v10526_v8 = vpack.c.bf16 %v4383_v23, %v4383_v23  ;;  %v5978_v39 = vld [vmem:[#allocation3] sm:$0xf] }
 0x789   :  { %v4130_v9 = vmax.f32 %v4114_v40, 0.0  ;;  %v4381_v26 = vmax.f32 %v4365_v17, 0.0  ;;  %4209 = vst [vmem:[#allocation3 + $0x80] sm:$0xf] %v10507_v49  ;;  %v4119_v11 = vadd.f32 %v14217_v30, %v4098_v10  ;;  %v4096_v25 = vmul.f32 %v14213_v27, %v4052_v58  ;;  %v11396_v32 = vpop.f32.mrf.mxu1  ;;  %v11416_v6 = vpop.f32.mrf.mxu0  ;;  %v12121_v7 = vld [vmem:[#allocation16 + $0x160] ss:$8 sps:$4 sm:$0xff]  }
 0x78a   :  { %4460 = vst [vmem:[#allocation3 + $0x84] sm:$0xf] %v10523_v4  ;;  %v4370_v5 = vadd.f32 %v14219_v63, %v4349_v47  ;;  %v4347_v51 = vmul.f32 %v14215_v13, %v4303_v57  ;;  %v6013_v24 = vld [vmem:[#allocation3 + $0x64] sm:$0xf]  ;;  %v5981_v33 = vld [vmem:[#allocation3 + $0x60] sm:$0xf]  ;;  %v4099_v59 = vmul.f32 %v11396_v32, %v14213_v27  ;;  %v4350_v38 = vmul.f32 %v11416_v6, %v14215_v13 }
 0x78b   :  { %4212 = vst [vmem:[#allocation3 + $0xe0] sm:$0xf] %v10510_v60  ;;  %4463 = vst [vmem:[#allocation3 + $0xe4] sm:$0xf] %v10526_v8  ;;  %v10508_v22 = vpack.c.bf16 %v4130_v9, %v4130_v9  ;;  %v10524_v16 = vpack.c.bf16 %v4381_v26, %v4381_v26  ;;  %v10246_v62 = vcombine.low %v6012_v37, %v6013_v24  ;;  %v4135_v41 = vmax.f32 %v4119_v11, 0.0  ;;  %v4055_v20 = vpop.f32.mrf.mxu1  ;;  %v4306_v44 = vpop.f32.mrf.mxu0 }
 0x78c   :  { %v10262_v21 = vcombine.low %v5980_v53, %v5981_v33  ;;  %v4386_v43 = vmax.f32 %v4370_v5, 0.0  ;;  %v4117_v35 = vadd.f32 %v14217_v30, %v4096_v25  ;;  %v4368_v54 = vadd.f32 %v14219_v63, %v4347_v51  ;;  %v6011_v55 = vld [vmem:[#allocation3 + $0x24] sm:$0xf]  ;;  %v5979_v50 = vld [vmem:[#allocation3 + $0x20] sm:$0xf] }
 0x78d   :  { %4210 = vst [vmem:[#allocation3 + $0xa0] sm:$0xf] %v10508_v22  ;;  %4461 = vst [vmem:[#allocation3 + $0xa4] sm:$0xf] %v10524_v16  ;;  %v10245_v31 = vcombine.low %v6010_v28, %v6011_v55  ;;  %v10261_v19 = vcombine.low %v5978_v39, %v5979_v50  ;;  %v10513_v1 = vpack.c.bf16 %v4135_v41, %v4135_v41  ;;  %v11399_v48 = vpop.f32.mrf.mxu1  ;;  %v11419_v45 = vpop.f32.mrf.mxu0  ;;  %v12122_v23 = vld [vmem:[#allocation16 + $0x1e0] ss:$8 sps:$4 sm:$0xff]  }
 0x78e   :  { %v10529_v61 = vpack.c.bf16 %v4386_v43, %v4386_v43  ;;  %v4133_v52 = vmax.f32 %v4117_v35, 0.0  ;;  %v4384_v2 = vmax.f32 %v4368_v54, 0.0  ;;  %v4120_v12 = vadd.f32 %v14217_v30, %v4099_v59  ;;  %v12123_v53 = vld [vmem:[#allocation16 + $0x150] ss:$8 sps:$4 sm:$0xff]   ;;  %v14281_v6 = vld [vmem:[#allocation15 + $0x4] ss:$0 sm:$0xff] }
 0x78f   :  { %v4371_v36 = vadd.f32 %v14219_v63, %v4350_v38  ;;  %v4097_v56 = vmul.f32 %v14213_v27, %v4055_v20  ;;  %v4348_v34 = vmul.f32 %v14215_v13, %v4306_v44  ;;  %11557 = vmatprep.mubr.bf16.mxu1 %v10245_v31  ;;  %4215 = vst [vmem:[#allocation3 + $0x140] sm:$0xf] %v10513_v1  ;;  %v4068_v49 = vpop.f32.mrf.mxu1  ;;  %v4319_v4 = vpop.f32.mrf.mxu0  ;;  %v14283_v28 = vld [vmem:[#allocation15 + $0x6] ss:$0 sm:$0xff]  ;;  %v12124_v39 = vld [vmem:[#allocation16 + $0x1d0] ss:$8 sps:$4 sm:$0xff]  }
 0x790   :  { %4466 = vst [vmem:[#allocation3 + $0x144] sm:$0xf] %v10529_v61  ;;  %v10511_v3 = vpack.c.bf16 %v4133_v52, %v4133_v52  ;;  %v10527_v15 = vpack.c.bf16 %v4384_v2, %v4384_v2  ;;  %v4102_v42 = vmul.f32 %v11399_v48, %v14213_v27  ;;  %v4353_v0 = vmul.f32 %v11419_v45, %v14215_v13  ;;  %v14285_v35 = vld [vmem:[#allocation15 + $0x5] ss:$0 sm:$0xff]  ;;  %v14287_v54 = vld [vmem:[#allocation15 + $0x7] ss:$0 sm:$0xff] }
 0x791   :  { %11589 = vmatprep.mubr.bf16.mxu0 %v10261_v19  ;;  %v4136_v40 = vmax.f32 %v4120_v12, 0.0  ;;  %v4387_v17 = vmax.f32 %v4371_v36, 0.0  ;;  %v4118_v14 = vadd.f32 %v14217_v30, %v4097_v56  ;;  %v4369_v29 = vadd.f32 %v14219_v63, %v4348_v34  ;;  %11558 = vmatmul.mubr.bf16.vlgmr.msra.gmra.mxu1 %v10246_v62  ;;  %v11400_v37 = vpop.f32.mrf.mxu1  ;;  %v11420_v11 = vpop.f32.mrf.mxu0  ;;  %v12125_v1 = vld [vmem:[#allocation16 + $0x140] ss:$8 sps:$4 sm:$0xff]  }
 0x792   :  { %11590 = vmatmul.mubr.bf16.vlgmr.msra.gmra.mxu0 %v10262_v21  ;;  %4213 = vst [vmem:[#allocation3 + $0x100] sm:$0xf] %v10511_v3  ;;  %4464 = vst [vmem:[#allocation3 + $0x104] sm:$0xf] %v10527_v15  ;;  %v4123_v10 = vadd.f32 %v14217_v30, %v4102_v42  ;;  %v4374_v47 = vadd.f32 %v14219_v63, %v4353_v0  ;;  %v4100_v60 = vmul.f32 %v14213_v27, %v4068_v49  ;;  %v14295_v36 = vld [vmem:[#allocation16 + $0x1c0] ss:$8 sps:$4 sm:$0xff]  }
 0x793   :  { %v4351_v8 = vmul.f32 %v14215_v13, %v4319_v4  ;;  %11606 = vmatpush3.bf16.msra.mxu1 %v14207_v46  ;;  %v10514_v9 = vpack.c.bf16 %v4136_v40, %v4136_v40  ;;  %v10530_v26 = vpack.c.bf16 %v4387_v17, %v4387_v17  ;;  %v4134_v58 = vmax.f32 %v4118_v14, 0.0  ;;  %11638 = vmatpush3.bf16.msra.mxu0 %v14209_v18  ;;  %v4071_v18 = vpop.f32.mrf.mxu1  ;;  %v4322_v32 = vpop.f32.mrf.mxu0  ;;  %v6014_v48 = vld [vmem:[#allocation3 + $0x84] sm:$0xf]  ;;  %v5982_v45 = vld [vmem:[#allocation3 + $0x80] sm:$0xf] }
 0x794   :  { %v4385_v57 = vmax.f32 %v4369_v29, 0.0  ;;  %11607 = vmatprep.subr.bf16.mxu1 %v12121_v7  ;;  %v4139_v5 = vmax.f32 %v4123_v10, 0.0  ;;  %v4390_v25 = vmax.f32 %v4374_v47, 0.0  ;;  %v4121_v51 = vadd.f32 %v14217_v30, %v4100_v60  ;;  %11639 = vmatprep.subr.bf16.mxu0 %v12122_v23  ;;  %v6015_v31 = vld [vmem:[#allocation3 + $0xa4] sm:$0xf] }
 0x795   :  { %v4372_v24 = vadd.f32 %v14219_v63, %v4351_v8  ;;  %4216 = vst [vmem:[#allocation3 + $0x160] sm:$0xf] %v10514_v9  ;;  %4467 = vst [vmem:[#allocation3 + $0x164] sm:$0xf] %v10530_v26  ;;  %v10512_v46 = vpack.c.bf16 %v4134_v58, %v4134_v58  ;;  %v4103_v22 = vmul.f32 %v11400_v37, %v14213_v27  ;;  %v11427_v20 = vpop.f32.mrf.mxu1  ;;  %v11447_v44 = vpop.f32.mrf.mxu0  ;;  %v5983_v19 = vld [vmem:[#allocation3 + $0xa0] sm:$0xf] }
 0x796   :  { %v10528_v33 = vpack.c.bf16 %v4385_v57, %v4385_v57  ;;  %v4354_v16 = vmul.f32 %v11420_v11, %v14215_v13  ;;  %v10517_v62 = vpack.c.bf16 %v4139_v5, %v4139_v5  ;;  %v10533_v21 = vpack.c.bf16 %v4390_v25, %v4390_v25  ;;  %v6017_v40 = vld [vmem:[#allocation3 + $0xe4] sm:$0xf]  ;;  %v5985_v17 = vld [vmem:[#allocation3 + $0xe0] sm:$0xf]  ;;  %v12127_v10 = vld [vmem:[#allocation16 + $0x130] ss:$8 sps:$4 sm:$0xff]  }
 0x797   :  { %v4137_v41 = vmax.f32 %v4121_v51, 0.0  ;;  %v4388_v43 = vmax.f32 %v4372_v24, 0.0  ;;  %11608 = vmatpush3.bf16.msra.mxu1 %v12121_v7  ;;  %4214 = vst [vmem:[#allocation3 + $0x120] sm:$0xf] %v10512_v46  ;;  %v4124_v55 = vadd.f32 %v14217_v30, %v4103_v22  ;;  %v4101_v59 = vmul.f32 %v14213_v27, %v4071_v18  ;;  %11640 = vmatpush3.bf16.msra.mxu0 %v12122_v23  ;;  %v4522_v7 = vpop.f32.mrf.mxu1  ;;  %v4773_v3 = vpop.f32.mrf.mxu0  ;;  %v6016_v26 = vld [vmem:[#allocation3 + $0xc4] sm:$0xf] }
 0x798   :  { %4465 = vst [vmem:[#allocation3 + $0x124] sm:$0xf] %v10528_v33  ;;  %v4375_v50 = vadd.f32 %v14219_v63, %v4354_v16  ;;  %v4352_v38 = vmul.f32 %v14215_v13, %v4322_v32  ;;  %4219 = vst [vmem:[#allocation3 + $0x1c0] sm:$0xf] %v10517_v62  ;;  %v4592_v2 = vmul.f32 %v11427_v20, %v14281_v6  ;;  %11609 = vmatprep.subr.bf16.mxu1 %v12123_v53  ;;  %v5984_v58 = vld [vmem:[#allocation3 + $0xc0] sm:$0xf] }
 0x799   :  { %4470 = vst [vmem:[#allocation3 + $0x1c4] sm:$0xf] %v10533_v21  ;;  %v10515_v61 = vpack.c.bf16 %v4137_v41, %v4137_v41  ;;  %v10531_v52 = vpack.c.bf16 %v4388_v43, %v4388_v43  ;;  %v4843_v12 = vmul.f32 %v11447_v44, %v14283_v28  ;;  %v4140_v27 = vmax.f32 %v4124_v55, 0.0  ;;  %11641 = vmatprep.subr.bf16.mxu0 %v12124_v39  ;;  %v11428_v49 = vpop.f32.mrf.mxu1  ;;  %v11448_v4 = vpop.f32.mrf.mxu0  ;;  %v12128_v24 = vld [vmem:[#allocation16 + $0x1b0] ss:$8 sps:$4 sm:$0xff]  }
 0x79a   :  { %v4391_v56 = vmax.f32 %v4375_v50, 0.0  ;;  %v4122_v13 = vadd.f32 %v14217_v30, %v4101_v59  ;;  %v4373_v34 = vadd.f32 %v14219_v63, %v4352_v38  ;;  %v4613_v15 = vadd.f32 %v14285_v35, %v4592_v2  ;;  %v14309_v21 = vld [vmem:[#allocation16 + $0x120] ss:$8 sps:$4 sm:$0xff]  }
 0x79b   :  { %4217 = vst [vmem:[#allocation3 + $0x180] sm:$0xf] %v10515_v61  ;;  %4468 = vst [vmem:[#allocation3 + $0x184] sm:$0xf] %v10531_v52  ;;  %v4864_v42 = vadd.f32 %v14287_v54, %v4843_v12  ;;  %v10247_v0 = vcombine.low %v6014_v48, %v6015_v31  ;;  %v10263_v23 = vcombine.low %v5982_v45, %v5983_v19  ;;  %11610 = vmatpush3.bf16.msra.mxu1 %v12123_v53  ;;  %v4525_v25 = vpop.f32.mrf.mxu1  ;;  %v4776_v51 = vpop.f32.mrf.mxu0  ;;  %v12130_v52 = vld [vmem:[#allocation16 + $0x1a0] ss:$8 sps:$4 sm:$0xff]  }
 0x79c   :  { %v10518_v14 = vpack.c.bf16 %v4140_v27, %v4140_v27  ;;  %v10534_v30 = vpack.c.bf16 %v4391_v56, %v4391_v56  ;;  %v4138_v29 = vmax.f32 %v4122_v13, 0.0  ;;  %v4389_v63 = vmax.f32 %v4373_v34, 0.0  ;;  %11642 = vmatpush3.bf16.msra.mxu0 %v12124_v39  ;;  %11611 = vmatprep.subr.bf16.mxu1 %v12125_v1  ;;  %v6018_v56 = vld [vmem:[#allocation3 + $0x104] sm:$0xf] }
 0x79d   :  { %v4629_v47 = vmax.f32 %v4613_v15, 0.0  ;;  %v4880_v60 = vmax.f32 %v4864_v42, 0.0  ;;  %11561 = vmatprep.mubr.bf16.mxu1 %v10247_v0  ;;  %11593 = vmatprep.mubr.bf16.mxu0 %v10263_v23  ;;  %v4590_v8 = vmul.f32 %v14281_v6, %v4522_v7  ;;  %v4841_v9 = vmul.f32 %v14283_v28, %v4773_v3  ;;  %v11431_v39 = vpop.f32.mrf.mxu1  ;;  %v11451_v62 = vpop.f32.mrf.mxu0  ;;  %v5986_v7 = vld [vmem:[#allocation3 + $0x100] sm:$0xf] }
 0x79e   :  { %4220 = vst [vmem:[#allocation3 + $0x1e0] sm:$0xf] %v10518_v14  ;;  %4471 = vst [vmem:[#allocation3 + $0x1e4] sm:$0xf] %v10534_v30  ;;  %v10516_v57 = vpack.c.bf16 %v4138_v29, %v4138_v29  ;;  %v10532_v37 = vpack.c.bf16 %v4389_v63, %v4389_v63  ;;  %v10248_v11 = vcombine.low %v6016_v26, %v6017_v40  ;;  %11643 = vmatprep.subr.bf16.mxu0 %v14295_v36  ;;  %v5987_v19 = vld [vmem:[#allocation3 + $0x120] sm:$0xf] }
 0x79f   :  { %v10264_v5 = vcombine.low %v5984_v58, %v5985_v17  ;;  %v10537_v53 = vpack.c.bf16 %v4629_v47, %v4629_v47  ;;  %v10553_v46 = vpack.c.bf16 %v4880_v60, %v4880_v60  ;;  %v4611_v33 = vadd.f32 %v14285_v35, %v4590_v8  ;;  %11612 = vmatpush3.bf16.msra.mxu1 %v12125_v1  ;;  %v6019_v31 = vld [vmem:[#allocation3 + $0x124] sm:$0xf]  ;;  %v4538_v1 = vpop.f32.mrf.mxu1  ;;  %v4789_v61 = vpop.f32.mrf.mxu0  ;;  %v5989_v14 = vld [vmem:[#allocation3 + $0x160] sm:$0xf]  ;;  %v12131_v47 = vld [vmem:[#allocation16 + $0x110] ss:$8 sps:$4 sm:$0xff]  }
 0x7a0   :  { %v4862_v22 = vadd.f32 %v14287_v54, %v4841_v9  ;;  %4218 = vst [vmem:[#allocation3 + $0x1a0] sm:$0xf] %v10516_v57  ;;  %4469 = vst [vmem:[#allocation3 + $0x1a4] sm:$0xf] %v10532_v37  ;;  %11562 = vmatmul.mubr.bf16.gmra.mxu1 %v10248_v11  ;;  %v4593_v16 = vmul.f32 %v11428_v49, %v14281_v6  ;;  %v4844_v18 = vmul.f32 %v11448_v4, %v14283_v28  ;;  %v6021_v17 = vld [vmem:[#allocation3 + $0x164] sm:$0xf] }
 0x7a1   :  { %11594 = vmatmul.mubr.bf16.gmra.mxu0 %v10264_v5  ;;  %v4591_v32 = vmul.f32 %v14281_v6, %v4525_v25  ;;  %4709 = vst [vmem:[#allocation3 + $0x48] sm:$0xf] %v10537_v53  ;;  %4960 = vst [vmem:[#allocation3 + $0x4c] sm:$0xf] %v10553_v46  ;;  %v4627_v41 = vmax.f32 %v4611_v33, 0.0  ;;  %v4842_v55 = vmul.f32 %v14283_v28, %v4776_v51  ;;  %11613 = vmatprep.subr.bf16.mxu1 %v12127_v10  ;;  %v11432_v3 = vpop.f32.mrf.mxu1  ;;  %v11452_v15 = vpop.f32.mrf.mxu0 }
 0x7a2   :  { %v4878_v43 = vmax.f32 %v4862_v22, 0.0  ;;  %11644 = vmatpush3.bf16.msra.mxu0 %v14295_v36  ;;  %v4596_v50 = vmul.f32 %v11431_v39, %v14281_v6  ;;  %v4614_v59 = vadd.f32 %v14285_v35, %v4593_v16  ;;  %v4865_v38 = vadd.f32 %v14287_v54, %v4844_v18  ;;  %v6020_v26 = vld [vmem:[#allocation3 + $0x144] sm:$0xf]  ;;  %v5988_v58 = vld [vmem:[#allocation3 + $0x140] sm:$0xf] }
 0x7a3   :  { %v4612_v20 = vadd.f32 %v14285_v35, %v4591_v32  ;;  %v4847_v44 = vmul.f32 %v11451_v62, %v14283_v28  ;;  %11645 = vmatprep.subr.bf16.mxu0 %v12128_v24  ;;  %v10535_v2 = vpack.c.bf16 %v4627_v41, %v4627_v41  ;;  %v4863_v36 = vadd.f32 %v14287_v54, %v4842_v55  ;;  %v4541_v4 = vpop.f32.mrf.mxu1  ;;  %v12132_v57 = vld [vmem:[#allocation16 + $0x190] ss:$8 sps:$4 sm:$0xff]   ;;  %v12133_v16 = vld [vmem:[#allocation16 + $0x100] ss:$8 sps:$4 sm:$0xff]  }
 0x7a4   :  { %v10551_v12 = vpack.c.bf16 %v4878_v43, %v4878_v43  ;;  %v4617_v27 = vadd.f32 %v14285_v35, %v4596_v50  ;;  %11614 = vmatpush3.bf16.msra.mxu1 %v12127_v10  ;;  %v4630_v13 = vmax.f32 %v4614_v59, 0.0  ;;  %v4881_v34 = vmax.f32 %v4865_v38, 0.0  ;;  %v4792_v10 = vpop.f32.mrf.mxu0  ;;  %v14332_v41 = vld [vmem:[#allocation16 + $0x180] ss:$8 sps:$4 sm:$0xff]  }
 0x7a5   :  { %v4628_v48 = vmax.f32 %v4612_v20, 0.0  ;;  %v4868_v45 = vadd.f32 %v14287_v54, %v4847_v44  ;;  %11615 = vmatprep.subr.bf16.mxu1 %v14309_v21  ;;  %4707 = vst [vmem:[#allocation3 + $0x8] sm:$0xf] %v10535_v2  ;;  %v4879_v42 = vmax.f32 %v4863_v36, 0.0  ;;  %v10249_v23 = vcombine.low %v6018_v56, %v6019_v31  ;;  %v11435_v51 = vpop.f32.mrf.mxu1 }
 0x7a6   :  { %4958 = vst [vmem:[#allocation3 + $0xc] sm:$0xf] %v10551_v12  ;;  %v4633_v0 = vmax.f32 %v4617_v27, 0.0  ;;  %v10265_v40 = vcombine.low %v5986_v7, %v5987_v19  ;;  %11646 = vmatpush3.bf16.msra.mxu0 %v12128_v24  ;;  %v10538_v30 = vpack.c.bf16 %v4630_v13, %v4630_v13  ;;  %v10554_v29 = vpack.c.bf16 %v4881_v34, %v4881_v34  ;;  %v11455_v24 = vpop.f32.mrf.mxu0  ;;  %v6022_v19 = vld [vmem:[#allocation3 + $0x184] sm:$0xf] }
 0x7a7   :  { %v10536_v63 = vpack.c.bf16 %v4628_v48, %v4628_v48  ;;  %v4884_v49 = vmax.f32 %v4868_v45, 0.0  ;;  %11647 = vmatprep.subr.bf16.mxu0 %v12130_v52  ;;  %v10552_v60 = vpack.c.bf16 %v4879_v42, %v4879_v42  ;;  %11565 = vmatprep.mubr.bf16.mxu1 %v10249_v23  ;;  %v4594_v9 = vmul.f32 %v14281_v6, %v4538_v1  ;;  %v4554_v62 = vpop.f32.mrf.mxu1  ;;  %v6023_v1 = vld [vmem:[#allocation3 + $0x1a4] sm:$0xf]  ;;  %v5991_v56 = vld [vmem:[#allocation3 + $0x1a0] sm:$0xf] }
 0x7a8   :  { %v10541_v8 = vpack.c.bf16 %v4633_v0, %v4633_v0  ;;  %11597 = vmatprep.mubr.bf16.mxu0 %v10265_v40  ;;  %4710 = vst [vmem:[#allocation3 + $0x68] sm:$0xf] %v10538_v30  ;;  %4961 = vst [vmem:[#allocation3 + $0x6c] sm:$0xf] %v10554_v29  ;;  %v4845_v11 = vmul.f32 %v14283_v28, %v4789_v61  ;;  %v10250_v5 = vcombine.low %v6020_v26, %v6021_v17  ;;  %v6025_v7 = vld [vmem:[#allocation3 + $0x1e4] sm:$0xf] }
 0x7a9   :  { %4708 = vst [vmem:[#allocation3 + $0x28] sm:$0xf] %v10536_v63  ;;  %v10557_v37 = vpack.c.bf16 %v4884_v49, %v4884_v49  ;;  %v10266_v25 = vcombine.low %v5988_v58, %v5989_v14  ;;  %11616 = vmatpush3.bf16.msra.mxu1 %v14309_v21  ;;  %4959 = vst [vmem:[#allocation3 + $0x2c] sm:$0xf] %v10552_v60  ;;  %v4615_v53 = vadd.f32 %v14285_v35, %v4594_v9  ;;  %v4805_v21 = vpop.f32.mrf.mxu0  ;;  %v11436_v61 = vpop.f32.mrf.mxu1  ;;  %v5990_v14 = vld [vmem:[#allocation3 + $0x180] sm:$0xf] }
 0x7aa   :  { %4713 = vst [vmem:[#allocation3 + $0xc8] sm:$0xf] %v10541_v8  ;;  %v4597_v46 = vmul.f32 %v11432_v3, %v14281_v6  ;;  %v4848_v33 = vmul.f32 %v11452_v15, %v14283_v28  ;;  %v4595_v22 = vmul.f32 %v14281_v6, %v4541_v4  ;;  %11648 = vmatpush3.bf16.msra.mxu0 %v12130_v52  ;;  %v5993_v3 = vld [vmem:[#allocation3 + $0x1e0] sm:$0xf]  ;;  %v6024_v4 = vld [vmem:[#allocation3 + $0x1c4] sm:$0xf] }
 0x7ab   :  { %4964 = vst [vmem:[#allocation3 + $0xcc] sm:$0xf] %v10557_v37  ;;  %v4866_v18 = vadd.f32 %v14287_v54, %v4845_v11  ;;  %11566 = vmatmul.mubr.bf16.gmra.mxu1 %v10250_v5  ;;  %11598 = vmatmul.mubr.bf16.gmra.mxu0 %v10266_v25  ;;  %v4846_v32 = vmul.f32 %v14283_v28, %v4792_v10  ;;  %v4631_v43 = vmax.f32 %v4615_v53, 0.0  ;;  %v11456_v52 = vpop.f32.mrf.mxu0  ;;  %v4557_v15 = vpop.f32.mrf.mxu1  ;;  %v5992_v10 = vld [vmem:[#allocation3 + $0x1c0] sm:$0xf] }
 0x7ac   :  { %v4600_v39 = vmul.f32 %v11435_v51, %v14281_v6  ;;  %v4618_v55 = vadd.f32 %v14285_v35, %v4597_v46  ;;  %v4869_v50 = vadd.f32 %v14287_v54, %v4848_v33  ;;  %v4616_v59 = vadd.f32 %v14285_v35, %v4595_v22  ;;  %11617 = vmatprep.subr.bf16.mxu1 %v12131_v47  ;;  %v14346_v37 = vld [vmem:[#allocation16 + $0x2f0] ss:$8 sps:$4 sm:$0xff]  }
 0x7ad   :  { %11649 = vmatprep.subr.bf16.mxu0 %v12132_v57  ;;  %v4882_v38 = vmax.f32 %v4866_v18, 0.0  ;;  %v4867_v20 = vadd.f32 %v14287_v54, %v4846_v32  ;;  %v4851_v31 = vmul.f32 %v11455_v24, %v14283_v28  ;;  %11618 = vmatpush3.bf16.msra.mxu1 %v12131_v47  ;;  %v10539_v2 = vpack.c.bf16 %v4631_v43, %v4631_v43  ;;  %v4808_v42 = vpop.f32.mrf.mxu0  ;;  %v11439_v47 = vpop.f32.mrf.mxu1 }
 0x7ae   :  { %v4621_v44 = vadd.f32 %v14285_v35, %v4600_v39  ;;  %v4634_v12 = vmax.f32 %v4618_v55, 0.0  ;;  %v4885_v36 = vmax.f32 %v4869_v50, 0.0  ;;  %v4632_v27 = vmax.f32 %v4616_v59, 0.0  ;;  %11650 = vmatpush3.bf16.msra.mxu0 %v12132_v57  ;;  %11619 = vmatprep.subr.bf16.mxu1 %v12133_v16  ;;  %v14344_v57 = vld [vmem:[#allocation16 + $0x270] ss:$8 sps:$4 sm:$0xff]  }
 0x7af   :  { %v10555_v13 = vpack.c.bf16 %v4882_v38, %v4882_v38  ;;  %v4883_v34 = vmax.f32 %v4867_v20, 0.0  ;;  %v4872_v45 = vadd.f32 %v14287_v54, %v4851_v31  ;;  %11651 = vmatprep.subr.bf16.mxu0 %v14332_v41  ;;  %4711 = vst [vmem:[#allocation3 + $0x88] sm:$0xf] %v10539_v2  ;;  %v10251_v17 = vcombine.low %v6022_v19, %v6023_v1  ;;  %v11459_v60 = vpop.f32.mrf.mxu0  ;;  %v4570_v24 = vpop.f32.mrf.mxu1 }
 0x7b0   :  { %v4637_v48 = vmax.f32 %v4621_v44, 0.0  ;;  %v10542_v0 = vpack.c.bf16 %v4634_v12, %v4634_v12  ;;  %v10558_v23 = vpack.c.bf16 %v4885_v36, %v4885_v36  ;;  %v10540_v40 = vpack.c.bf16 %v4632_v27, %v4632_v27  ;;  %v6429_v38 = vld [vmem:[#allocation3 + $0x28] sm:$0xf]  ;;  %v6670_v19 = vld [vmem:[#allocation3 + $0x2c] sm:$0xf] }
 0x7b1   :  { %4962 = vst [vmem:[#allocation3 + $0x8c] sm:$0xf] %v10555_v13  ;;  %v10556_v30 = vpack.c.bf16 %v4883_v34, %v4883_v34  ;;  %v4888_v63 = vmax.f32 %v4872_v45, 0.0  ;;  %v10267_v49 = vcombine.low %v5990_v14, %v5991_v56  ;;  %11620 = vmatpush3.bf16.msra.mxu1 %v12133_v16  ;;  %11569 = vmatprep.mubr.bf16.mxu1 %v10251_v17  ;;  %v4821_v53 = vpop.f32.mrf.mxu0  ;;  %v6428_v27 = vld [vmem:[#allocation3 + $0x8] sm:$0xf] }
 0x7b2   :  { %v10545_v29 = vpack.c.bf16 %v4637_v48, %v4637_v48  ;;  %4714 = vst [vmem:[#allocation3 + $0xe8] sm:$0xf] %v10542_v0  ;;  %4965 = vst [vmem:[#allocation3 + $0xec] sm:$0xf] %v10558_v23  ;;  %v4598_v8 = vmul.f32 %v14281_v6, %v4554_v62  ;;  %v4849_v9 = vmul.f32 %v14283_v28, %v4805_v21  ;;  %11652 = vmatpush3.bf16.msra.mxu0 %v14332_v41  ;;  %v11440_v62 = vpop.f32.mrf.mxu1  ;;  %v6431_v56 = vld [vmem:[#allocation3 + $0x68] sm:$0xf] }
 0x7b3   :  { %4712 = vst [vmem:[#allocation3 + $0xa8] sm:$0xf] %v10540_v40  ;;  %v10252_v26 = vcombine.low %v6024_v4, %v6025_v7  ;;  %v10268_v58 = vcombine.low %v5992_v10, %v5993_v3  ;;  %4963 = vst [vmem:[#allocation3 + $0xac] sm:$0xf] %v10556_v30  ;;  %v10561_v11 = vpack.c.bf16 %v4888_v63, %v4888_v63  ;;  %11601 = vmatprep.mubr.bf16.mxu0 %v10267_v49  ;;  %v11460_v21 = vpop.f32.mrf.mxu0  ;;  %v6669_v7 = vld [vmem:[#allocation3 + $0xc] sm:$0xf] }
 0x7b4   :  { %4717 = vst [vmem:[#allocation3 + $0x148] sm:$0xf] %v10545_v29  ;;  %v4601_v5 = vmul.f32 %v11436_v61, %v14281_v6  ;;  %v4852_v25 = vmul.f32 %v11456_v52, %v14283_v28  ;;  %v4599_v51 = vmul.f32 %v14281_v6, %v4557_v15  ;;  %v4619_v46 = vadd.f32 %v14285_v35, %v4598_v8  ;;  %v4573_v1 = vpop.f32.mrf.mxu1  ;;  %v6672_v3 = vld [vmem:[#allocation3 + $0x6c] sm:$0xf]  ;;  %v6430_v14 = vld [vmem:[#allocation3 + $0x48] sm:$0xf] }
 0x7b5   :  { %v4870_v33 = vadd.f32 %v14287_v54, %v4849_v9  ;;  %11570 = vmatmul.mubr.bf16.gmra.mxu1 %v10252_v26  ;;  %11602 = vmatmul.mubr.bf16.gmra.mxu0 %v10268_v58  ;;  %v4850_v22 = vmul.f32 %v14283_v28, %v4808_v42  ;;  %4968 = vst [vmem:[#allocation3 + $0x14c] sm:$0xf] %v10561_v11  ;;  %v4824_v61 = vpop.f32.mrf.mxu0  ;;  %v6671_v4 = vld [vmem:[#allocation3 + $0x4c] sm:$0xf]  ;;  %v12137_v10 = vld [vmem:[#allocation16 + $0x260] ss:$8 sps:$4 sm:$0xff]  }
 0x7b6   :  { %v4622_v16 = vadd.f32 %v14285_v35, %v4601_v5  ;;  %v4873_v18 = vadd.f32 %v14287_v54, %v4852_v25  ;;  %v4620_v32 = vadd.f32 %v14285_v35, %v4599_v51  ;;  %v4604_v39 = vmul.f32 %v11439_v47, %v14281_v6  ;;  %11669 = vmatprep.subr.bf16.mxu1 %v14344_v57  ;;  %v11467_v15 = vpop.f32.mrf.mxu1  ;;  %v14367_v47 = vld [vmem:[#allocation15 + $0x8] ss:$0 sm:$0xff]  ;;  %v12138_v11 = vld [vmem:[#allocation16 + $0x2e0] ss:$8 sps:$4 sm:$0xff]  }
 0x7b7   :  { %v4635_v43 = vmax.f32 %v4619_v46, 0.0  ;;  %v4886_v55 = vmax.f32 %v4870_v33, 0.0  ;;  %v4871_v50 = vadd.f32 %v14287_v54, %v4850_v22  ;;  %v4855_v59 = vmul.f32 %v11459_v60, %v14283_v28  ;;  %11701 = vmatprep.subr.bf16.mxu0 %v14346_v37  ;;  %v11487_v42 = vpop.f32.mrf.mxu0  ;;  %v14380_v46 = vld [vmem:[#allocation15 + $0xa] ss:$0 sm:$0xff] }
 0x7b8   :  { %v4638_v20 = vmax.f32 %v4622_v16, 0.0  ;;  %v4889_v44 = vmax.f32 %v4873_v18, 0.0  ;;  %v4636_v31 = vmax.f32 %v4620_v32, 0.0  ;;  %v4625_v41 = vadd.f32 %v14285_v35, %v4604_v39  ;;  %v14369_v60 = vpop.f32.mrf.mxu1  ;;  %v14390_v39 = vld [vmem:[#allocation15 + $0xb] ss:$0 sm:$0xff] }
 0x7b9   :  { %v10543_v52 = vpack.c.bf16 %v4635_v43, %v4635_v43  ;;  %v10559_v2 = vpack.c.bf16 %v4886_v55, %v4886_v55  ;;  %v4887_v12 = vmax.f32 %v4871_v50, 0.0  ;;  %v4876_v36 = vadd.f32 %v14287_v54, %v4855_v59  ;;  %v14371_v8 = vpop.f32.mrf.mxu0  ;;  %v12139_v55 = vld [vmem:[#allocation16 + $0x250] ss:$8 sps:$4 sm:$0xff]  }
 0x7ba   :  { %v10546_v13 = vpack.c.bf16 %v4638_v20, %v4638_v20  ;;  %v10562_v34 = vpack.c.bf16 %v4889_v44, %v4889_v44  ;;  %v10544_v48 = vpack.c.bf16 %v4636_v31, %v4636_v31  ;;  %v4641_v45 = vmax.f32 %v4625_v41, 0.0  ;;  %v14382_v33 = vpop.f32.mrf.mxu1  ;;  %v14395_v50 = vld [vmem:[#allocation16 + $0x2d0] ss:$8 sps:$4 sm:$0xff]   ;;  %v6433_v44 = vld [vmem:[#allocation3 + $0xa8] sm:$0xf] }
 0x7bb   :  { %4715 = vst [vmem:[#allocation3 + $0x108] sm:$0xf] %v10543_v52  ;;  %4966 = vst [vmem:[#allocation3 + $0x10c] sm:$0xf] %v10559_v2  ;;  %v10560_v0 = vpack.c.bf16 %v4887_v12, %v4887_v12  ;;  %v4892_v23 = vmax.f32 %v4876_v36, 0.0  ;;  %v10277_v40 = vcombine.low %v6428_v27, %v6429_v38  ;;  %v10293_v17 = vcombine.low %v6669_v7, %v6670_v19  ;;  %v14384_v22 = vpop.f32.mrf.mxu0 }
 0x7bc   :  { %4718 = vst [vmem:[#allocation3 + $0x168] sm:$0xf] %v10546_v13  ;;  %4969 = vst [vmem:[#allocation3 + $0x16c] sm:$0xf] %v10562_v34  ;;  %v10549_v30 = vpack.c.bf16 %v4641_v45, %v4641_v45  ;;  %v4602_v29 = vmul.f32 %v14281_v6, %v4570_v24  ;;  %v4853_v63 = vmul.f32 %v14283_v28, %v4821_v53  ;;  %v14378_v53 = vld [vmem:[#allocation15 + $0x9] ss:$0 sm:$0xff] }
 0x7bd   :  { %4716 = vst [vmem:[#allocation3 + $0x128] sm:$0xf] %v10544_v48  ;;  %v10278_v49 = vcombine.low %v6430_v14, %v6431_v56  ;;  %4967 = vst [vmem:[#allocation3 + $0x12c] sm:$0xf] %v10560_v0  ;;  %v10565_v9 = vpack.c.bf16 %v4892_v23, %v4892_v23  ;;  %11621 = vmatprep.mubr.bf16.mxu1 %v10277_v40  ;;  %11653 = vmatprep.mubr.bf16.mxu0 %v10293_v17  ;;  %v14399_v59 = vpop.f32.mrf.mxu0  ;;  %v6674_v31 = vld [vmem:[#allocation3 + $0xac] sm:$0xf] }
 0x7be   :  { %v10294_v26 = vcombine.low %v6671_v4, %v6672_v3  ;;  %v4605_v58 = vmul.f32 %v11440_v62, %v14281_v6  ;;  %4721 = vst [vmem:[#allocation3 + $0x1c8] sm:$0xf] %v10549_v30  ;;  %v4623_v5 = vadd.f32 %v14285_v35, %v4602_v29  ;;  %v4874_v25 = vadd.f32 %v14287_v54, %v4853_v63  ;;  %v6673_v52 = vld [vmem:[#allocation3 + $0x8c] sm:$0xf]  ;;  %v6435_v13 = vld [vmem:[#allocation3 + $0xe8] sm:$0xf] }
 0x7bf   :  { %11622 = vmatmul.mubr.bf16.vlgmr.msra.gmra.mxu1 %v10278_v49  ;;  %v4856_v51 = vmul.f32 %v11460_v21, %v14283_v28  ;;  %v4603_v24 = vmul.f32 %v14281_v6, %v4573_v1  ;;  %4972 = vst [vmem:[#allocation3 + $0x1cc] sm:$0xf] %v10565_v9  ;;  %v4854_v18 = vmul.f32 %v14283_v28, %v4824_v61  ;;  %v6432_v61 = vld [vmem:[#allocation3 + $0x88] sm:$0xf]  ;;  %v14404_v12 = vpop.f32.mrf.mxu0  ;;  %v6676_v34 = vld [vmem:[#allocation3 + $0xec] sm:$0xf] }
 0x7c0   :  { %11654 = vmatmul.mubr.bf16.vlgmr.msra.gmra.mxu0 %v10294_v26  ;;  %11670 = vmatpush3.bf16.msra.mxu1 %v14344_v57  ;;  %v4626_v16 = vadd.f32 %v14285_v35, %v4605_v58  ;;  %v5094_v32 = vmul.f32 %v11467_v15, %v14367_v47  ;;  %v4639_v6 = vmax.f32 %v4623_v5, 0.0  ;;  %v4890_v62 = vmax.f32 %v4874_v25, 0.0  ;;  %v14397_v57 = vpop.f32.mrf.mxu1  ;;  %v12141_v15 = vld [vmem:[#allocation16 + $0x240] ss:$8 sps:$4 sm:$0xff]   ;;  %v6675_v29 = vld [vmem:[#allocation3 + $0xcc] sm:$0xf] }
 0x7c1   :  { %11702 = vmatpush3.bf16.msra.mxu0 %v14346_v37  ;;  %v4877_v21 = vadd.f32 %v14287_v54, %v4856_v51  ;;  %11671 = vmatprep.subr.bf16.mxu1 %v12137_v10  ;;  %v4624_v43 = vadd.f32 %v14285_v35, %v4603_v24  ;;  %v4875_v38 = vadd.f32 %v14287_v54, %v4854_v18  ;;  %v14409_v0 = vpop.f32.mrf.mxu0  ;;  %v6434_v30 = vld [vmem:[#allocation3 + $0xc8] sm:$0xf]  ;;  %v14430_v24 = vld [vmem:[#allocation16 + $0x230] ss:$8 sps:$4 sm:$0xff]  }
 0x7c2   :  { %v4642_v28 = vmax.f32 %v4626_v16, 0.0  ;;  %11703 = vmatprep.subr.bf16.mxu0 %v12138_v11  ;;  %v5115_v20 = vadd.f32 %v14378_v53, %v5094_v32  ;;  %v5345_v37 = vmul.f32 %v11487_v42, %v14380_v46  ;;  %v10547_v41 = vpack.c.bf16 %v4639_v6, %v4639_v6  ;;  %v11471_v2 = vpop.f32.mrf.mxu1 }
 0x7c3   :  { %v10563_v19 = vpack.c.bf16 %v4890_v62, %v4890_v62  ;;  %v4893_v35 = vmax.f32 %v4877_v21, 0.0  ;;  %v4640_v1 = vmax.f32 %v4624_v43, 0.0  ;;  %v4891_v27 = vmax.f32 %v4875_v38, 0.0  ;;  %v14418_v26 = vpop.f32.mrf.mxu0 }
 0x7c4   :  { %v10550_v36 = vpack.c.bf16 %v4642_v28, %v4642_v28  ;;  %11672 = vmatpush3.bf16.msra.mxu1 %v12137_v10  ;;  %v5131_v54 = vmax.f32 %v5115_v20, 0.0  ;;  %v5366_v56 = vadd.f32 %v14390_v39, %v5345_v37  ;;  %4719 = vst [vmem:[#allocation3 + $0x188] sm:$0xf] %v10547_v41  ;;  %v10279_v7 = vcombine.low %v6432_v61, %v6433_v44  ;;  %v14407_v42 = vpop.f32.mrf.mxu1  ;;  %v12142_v10 = vld [vmem:[#allocation16 + $0x2c0] ss:$8 sps:$4 sm:$0xff]  }
 0x7c5   :  { %4970 = vst [vmem:[#allocation3 + $0x18c] sm:$0xf] %v10563_v19  ;;  %v10566_v48 = vpack.c.bf16 %v4893_v35, %v4893_v35  ;;  %v10548_v45 = vpack.c.bf16 %v4640_v1, %v4640_v1  ;;  %11704 = vmatpush3.bf16.msra.mxu0 %v12138_v11  ;;  %v10295_v3 = vcombine.low %v6673_v52, %v6674_v31  ;;  %v14434_v18 = vpop.f32.mrf.mxu0  ;;  %v6678_v31 = vld [vmem:[#allocation3 + $0x12c] sm:$0xf]  ;;  %v6436_v61 = vld [vmem:[#allocation3 + $0x108] sm:$0xf] }
 0x7c6   :  { %4722 = vst [vmem:[#allocation3 + $0x1e8] sm:$0xf] %v10550_v36  ;;  %v10564_v23 = vpack.c.bf16 %v4891_v27, %v4891_v27  ;;  %v10569_v40 = vpack.c.bf16 %v5131_v54, %v5131_v54  ;;  %v5382_v17 = vmax.f32 %v5366_v56, 0.0  ;;  %11673 = vmatprep.subr.bf16.mxu1 %v12139_v55  ;;  %v5092_v14 = vmul.f32 %v14367_v47, %v14369_v60  ;;  %v14416_v9 = vpop.f32.mrf.mxu1  ;;  %v6439_v52 = vld [vmem:[#allocation3 + $0x168] sm:$0xf] }
 0x7c7   :  { %11705 = vmatprep.subr.bf16.mxu0 %v14395_v50  ;;  %4973 = vst [vmem:[#allocation3 + $0x1ec] sm:$0xf] %v10566_v48  ;;  %4720 = vst [vmem:[#allocation3 + $0x1a8] sm:$0xf] %v10548_v45  ;;  %11625 = vmatprep.mubr.bf16.mxu1 %v10279_v7  ;;  %v5343_v63 = vmul.f32 %v14380_v46, %v14371_v8  ;;  %v10280_v49 = vcombine.low %v6434_v30, %v6435_v13  ;;  %v6677_v13 = vld [vmem:[#allocation3 + $0x10c] sm:$0xf] }
 0x7c8   :  { %11657 = vmatprep.mubr.bf16.mxu0 %v10295_v3  ;;  %v10296_v4 = vcombine.low %v6675_v29, %v6676_v34  ;;  %4971 = vst [vmem:[#allocation3 + $0x1ac] sm:$0xf] %v10564_v23  ;;  %5211 = vst [vmem:[#allocation3 + $0x50] sm:$0xf] %v10569_v40  ;;  %v10585_v60 = vpack.c.bf16 %v5382_v17, %v5382_v17  ;;  %v5113_v58 = vadd.f32 %v14378_v53, %v5092_v14  ;;  %v14432_v16 = vpop.f32.mrf.mxu1  ;;  %v6680_v34 = vld [vmem:[#allocation3 + $0x16c] sm:$0xf] }
 0x7c9   :  { %11674 = vmatpush3.bf16.msra.mxu1 %v12139_v55  ;;  %v5095_v11 = vmul.f32 %v14382_v33, %v14367_v47  ;;  %v5346_v5 = vmul.f32 %v14384_v22, %v14380_v46  ;;  %v5364_v8 = vadd.f32 %v14390_v39, %v5343_v63  ;;  %v5093_v25 = vmul.f32 %v14367_v47, %v14397_v57  ;;  %v6437_v57 = vld [vmem:[#allocation3 + $0x128] sm:$0xf] }
 0x7ca   :  { %11626 = vmatmul.mubr.bf16.gmra.mxu1 %v10280_v49  ;;  %11658 = vmatmul.mubr.bf16.gmra.mxu0 %v10296_v4  ;;  %v5344_v51 = vmul.f32 %v14380_v46, %v14399_v59  ;;  %5462 = vst [vmem:[#allocation3 + $0x54] sm:$0xf] %v10585_v60  ;;  %v5129_v33 = vmax.f32 %v5113_v58, 0.0  ;;  %v5098_v6 = vmul.f32 %v11471_v2, %v14367_v47  ;;  %v12144_v59 = vld [vmem:[#allocation16 + $0x2b0] ss:$8 sps:$4 sm:$0xff]   ;;  %v14444_v28 = vpop.f32.mrf.mxu1 }
 0x7cb   :  { %11706 = vmatpush3.bf16.msra.mxu0 %v14395_v50  ;;  %v5116_v22 = vadd.f32 %v14378_v53, %v5095_v11  ;;  %v5367_v32 = vadd.f32 %v14390_v39, %v5346_v5  ;;  %11675 = vmatprep.subr.bf16.mxu1 %v12141_v15  ;;  %v5380_v62 = vmax.f32 %v5364_v8, 0.0  ;;  %v5114_v21 = vadd.f32 %v14378_v53, %v5093_v25  ;;  %v14446_v50 = vpop.f32.mrf.mxu0  ;;  %v12145_v23 = vld [vmem:[#allocation16 + $0x220] ss:$8 sps:$4 sm:$0xff]   ;;  %v6679_v49 = vld [vmem:[#allocation3 + $0x14c] sm:$0xf] }
 0x7cc   :  { %v5365_v43 = vadd.f32 %v14390_v39, %v5344_v51  ;;  %11707 = vmatprep.subr.bf16.mxu0 %v12142_v10  ;;  %v5349_v55 = vmul.f32 %v14404_v12, %v14380_v46  ;;  %v10567_v38 = vpack.c.bf16 %v5129_v33, %v5129_v33  ;;  %v5119_v44 = vadd.f32 %v14378_v53, %v5098_v6  ;;  %v14451_v2 = vpop.f32.mrf.mxu1  ;;  %v12146_v4 = vld [vmem:[#allocation16 + $0x2a0] ss:$8 sps:$4 sm:$0xff]   ;;  %v12147_v25 = vld [vmem:[#allocation16 + $0x210] ss:$8 sps:$4 sm:$0xff]  }
 0x7cd   :  { %v5132_v20 = vmax.f32 %v5116_v22, 0.0  ;;  %v5383_v37 = vmax.f32 %v5367_v32, 0.0  ;;  %11676 = vmatpush3.bf16.msra.mxu1 %v12141_v15  ;;  %v10583_v41 = vpack.c.bf16 %v5380_v62, %v5380_v62  ;;  %v5130_v19 = vmax.f32 %v5114_v21, 0.0  ;;  %v14453_v12 = vpop.f32.mrf.mxu0  ;;  %v6438_v15 = vld [vmem:[#allocation3 + $0x148] sm:$0xf] }
 0x7ce   :  { %v5381_v35 = vmax.f32 %v5365_v43, 0.0  ;;  %v5370_v1 = vadd.f32 %v14390_v39, %v5349_v55  ;;  %11677 = vmatprep.subr.bf16.mxu1 %v14430_v24  ;;  %5209 = vst [vmem:[#allocation3 + $0x10] sm:$0xf] %v10567_v38  ;;  %v5135_v54 = vmax.f32 %v5119_v44, 0.0  ;;  %v10281_v56 = vcombine.low %v6436_v61, %v6437_v57  ;;  %v14455_v40 = vpop.f32.mrf.mxu1  ;;  %v14479_v33 = vld [vmem:[#allocation16 + $0x290] ss:$8 sps:$4 sm:$0xff]  }
 0x7cf   :  { %v10570_v36 = vpack.c.bf16 %v5132_v20, %v5132_v20  ;;  %v10586_v27 = vpack.c.bf16 %v5383_v37, %v5383_v37  ;;  %11708 = vmatpush3.bf16.msra.mxu0 %v12142_v10  ;;  %5460 = vst [vmem:[#allocation3 + $0x14] sm:$0xf] %v10583_v41  ;;  %v10568_v48 = vpack.c.bf16 %v5130_v19, %v5130_v19  ;;  %v14457_v17 = vpop.f32.mrf.mxu0  ;;  %v6441_v57 = vld [vmem:[#allocation3 + $0x1a8] sm:$0xf] }
 0x7d0   :  { %v10584_v45 = vpack.c.bf16 %v5381_v35, %v5381_v35  ;;  %v5386_v7 = vmax.f32 %v5370_v1, 0.0  ;;  %v10297_v3 = vcombine.low %v6677_v13, %v6678_v31  ;;  %11709 = vmatprep.subr.bf16.mxu0 %v12144_v59  ;;  %v10573_v14 = vpack.c.bf16 %v5135_v54, %v5135_v54  ;;  %11629 = vmatprep.mubr.bf16.mxu1 %v10281_v56  ;;  %v14466_v11 = vpop.f32.mrf.mxu1  ;;  %v6440_v41 = vld [vmem:[#allocation3 + $0x188] sm:$0xf] }
 0x7d1   :  { %5212 = vst [vmem:[#allocation3 + $0x70] sm:$0xf] %v10570_v36  ;;  %5463 = vst [vmem:[#allocation3 + $0x74] sm:$0xf] %v10586_v27  ;;  %v5096_v30 = vmul.f32 %v14367_v47, %v14407_v42  ;;  %v5347_v29 = vmul.f32 %v14380_v46, %v14409_v0  ;;  %v10282_v63 = vcombine.low %v6438_v15, %v6439_v52  ;;  %11678 = vmatpush3.bf16.msra.mxu1 %v14430_v24  ;;  %v14468_v5 = vpop.f32.mrf.mxu0  ;;  %v6443_v52 = vld [vmem:[#allocation3 + $0x1e8] sm:$0xf] }
 0x7d2   :  { %5210 = vst [vmem:[#allocation3 + $0x30] sm:$0xf] %v10568_v48  ;;  %5461 = vst [vmem:[#allocation3 + $0x34] sm:$0xf] %v10584_v45  ;;  %v10589_v10 = vpack.c.bf16 %v5386_v7, %v5386_v7  ;;  %11661 = vmatprep.mubr.bf16.mxu0 %v10297_v3  ;;  %v10298_v60 = vcombine.low %v6679_v49, %v6680_v34  ;;  %v5099_v58 = vmul.f32 %v14416_v9, %v14367_v47  ;;  %v14481_v22 = vpop.f32.mrf.mxu1  ;;  %v6684_v48 = vld [vmem:[#allocation3 + $0x1ec] sm:$0xf] }
 0x7d3   :  { %5215 = vst [vmem:[#allocation3 + $0xd0] sm:$0xf] %v10573_v14  ;;  %v5117_v42 = vadd.f32 %v14378_v53, %v5096_v30  ;;  %v5368_v0 = vadd.f32 %v14390_v39, %v5347_v29  ;;  %11630 = vmatmul.mubr.bf16.gmra.mxu1 %v10282_v63  ;;  %11710 = vmatpush3.bf16.msra.mxu0 %v12144_v59  ;;  %v14483_v32 = vpop.f32.mrf.mxu0  ;;  %v6682_v59 = vld [vmem:[#allocation3 + $0x1ac] sm:$0xf]  ;;  %v12149_v45 = vld [vmem:[#allocation16 + $0x200] ss:$8 sps:$4 sm:$0xff]  }
 0x7d4   :  { %v5350_v8 = vmul.f32 %v14418_v26, %v14380_v46  ;;  %5466 = vst [vmem:[#allocation3 + $0xd4] sm:$0xf] %v10589_v10  ;;  %11662 = vmatmul.mubr.bf16.gmra.mxu0 %v10298_v60  ;;  %v5120_v51 = vadd.f32 %v14378_v53, %v5099_v58  ;;  %11679 = vmatprep.subr.bf16.mxu1 %v12145_v23  ;;  %v14492_v38 = vpop.f32.mrf.mxu1  ;;  %v6442_v14 = vld [vmem:[#allocation3 + $0x1c8] sm:$0xf]  ;;  %v6683_v10 = vld [vmem:[#allocation3 + $0x1cc] sm:$0xf] }
 0x7d5   :  { %v5097_v9 = vmul.f32 %v14367_v47, %v14432_v16  ;;  %v5348_v24 = vmul.f32 %v14380_v46, %v14434_v18  ;;  %v5133_v6 = vmax.f32 %v5117_v42, 0.0  ;;  %v5384_v26 = vmax.f32 %v5368_v0, 0.0  ;;  %11711 = vmatprep.subr.bf16.mxu0 %v12146_v4  ;;  %11680 = vmatpush3.bf16.msra.mxu1 %v12145_v23  ;;  %v14494_v20 = vpop.f32.mrf.mxu0  ;;  %v12150_v60 = vld [vmem:[#allocation16 + $0x280] ss:$8 sps:$4 sm:$0xff]   ;;  %v14511_v58 = vld [vmem:[#allocation16 + $0x370] ss:$8 sps:$4 sm:$0xff]  }
 0x7d6   :  { %v5371_v62 = vadd.f32 %v14390_v39, %v5350_v8  ;;  %v5102_v21 = vmul.f32 %v14444_v28, %v14367_v47  ;;  %v5136_v43 = vmax.f32 %v5120_v51, 0.0  ;;  %v5353_v18 = vmul.f32 %v14446_v50, %v14380_v46  ;;  %11681 = vmatprep.subr.bf16.mxu1 %v12147_v25  ;;  %v6681_v50 = vld [vmem:[#allocation3 + $0x18c] sm:$0xf]  ;;  %v14499_v36 = vpop.f32.mrf.mxu1 }
 0x7d7   :  { %v5118_v16 = vadd.f32 %v14378_v53, %v5097_v9  ;;  %v5369_v55 = vadd.f32 %v14390_v39, %v5348_v24  ;;  %v10571_v37 = vpack.c.bf16 %v5133_v6, %v5133_v6  ;;  %v10587_v44 = vpack.c.bf16 %v5384_v26, %v5384_v26  ;;  %11712 = vmatpush3.bf16.msra.mxu0 %v12146_v4  ;;  %v14501_v27 = vpop.f32.mrf.mxu0  ;;  %v14526_v6 = vld [vmem:[#allocation16 + $0x3f0] ss:$8 sps:$4 sm:$0xff]  }
 0x7d8   :  { %v5387_v31 = vmax.f32 %v5371_v62, 0.0  ;;  %v5123_v28 = vadd.f32 %v14378_v53, %v5102_v21  ;;  %v10574_v19 = vpack.c.bf16 %v5136_v43, %v5136_v43  ;;  %v5374_v61 = vadd.f32 %v14390_v39, %v5353_v18  ;;  %11713 = vmatprep.subr.bf16.mxu0 %v14479_v33  ;;  %v14505_v30 = vpop.f32.mrf.mxu1 }
 0x7d9   :  { %v5134_v35 = vmax.f32 %v5118_v16, 0.0  ;;  %v5385_v1 = vmax.f32 %v5369_v55, 0.0  ;;  %5213 = vst [vmem:[#allocation3 + $0x90] sm:$0xf] %v10571_v37  ;;  %5464 = vst [vmem:[#allocation3 + $0x94] sm:$0xf] %v10587_v44  ;;  %v10283_v13 = vcombine.low %v6440_v41, %v6441_v57  ;;  %v10299_v34 = vcombine.low %v6681_v50, %v6682_v59  ;;  %11682 = vmatpush3.bf16.msra.mxu1 %v12147_v25  ;;  %v14507_v29 = vpop.f32.mrf.mxu0 }
 0x7da   :  { %v10590_v54 = vpack.c.bf16 %v5387_v31, %v5387_v31  ;;  %v5139_v56 = vmax.f32 %v5123_v28, 0.0  ;;  %5216 = vst [vmem:[#allocation3 + $0xf0] sm:$0xf] %v10574_v19  ;;  %v5390_v15 = vmax.f32 %v5374_v61, 0.0  ;;  %v5100_v23 = vmul.f32 %v14367_v47, %v14451_v2  ;;  %v14517_v25 = vpop.f32.mrf.mxu1  ;;  %11683 = vmatprep.subr.bf16.mxu1 %v12149_v45  ;;  %v6911_v18 = vld [vmem:[#allocation3 + $0x30] sm:$0xf] }
 0x7db   :  { %v10572_v7 = vpack.c.bf16 %v5134_v35, %v5134_v35  ;;  %v10588_v3 = vpack.c.bf16 %v5385_v1, %v5385_v1  ;;  %11633 = vmatprep.mubr.bf16.mxu1 %v10283_v13  ;;  %11665 = vmatprep.mubr.bf16.mxu0 %v10299_v34  ;;  %v5351_v49 = vmul.f32 %v14380_v46, %v14453_v12  ;;  %v14519_v51 = vpop.f32.mrf.mxu0  ;;  %v7152_v37 = vld [vmem:[#allocation3 + $0x34] sm:$0xf]  ;;  %v6910_v35 = vld [vmem:[#allocation3 + $0x10] sm:$0xf] }
 0x7dc   :  { %5467 = vst [vmem:[#allocation3 + $0xf4] sm:$0xf] %v10590_v54  ;;  %v10577_v63 = vpack.c.bf16 %v5139_v56, %v5139_v56  ;;  %v10284_v4 = vcombine.low %v6442_v14, %v6443_v52  ;;  %v10593_v2 = vpack.c.bf16 %v5390_v15, %v5390_v15  ;;  %v5121_v42 = vadd.f32 %v14378_v53, %v5100_v23  ;;  %v14533_v21 = vpop.f32.mrf.mxu1  ;;  %v7151_v1 = vld [vmem:[#allocation3 + $0x14] sm:$0xf]  ;;  %v6913_v56 = vld [vmem:[#allocation3 + $0x70] sm:$0xf] }
 0x7dd   :  { %5214 = vst [vmem:[#allocation3 + $0xb0] sm:$0xf] %v10572_v7  ;;  %5465 = vst [vmem:[#allocation3 + $0xb4] sm:$0xf] %v10588_v3  ;;  %v10300_v0 = vcombine.low %v6683_v10, %v6684_v48  ;;  %11714 = vmatpush3.bf16.msra.mxu0 %v14479_v33  ;;  %v5103_v8 = vmul.f32 %v14455_v40, %v14367_v47  ;;  %v5372_v12 = vadd.f32 %v14390_v39, %v5351_v49  ;;  %v7154_v13 = vld [vmem:[#allocation3 + $0x74] sm:$0xf] }
 0x7de   :  { %5219 = vst [vmem:[#allocation3 + $0x150] sm:$0xf] %v10577_v63  ;;  %11634 = vmatmul.mubr.bf16.gmra.mxu1 %v10284_v4  ;;  %v5354_v9 = vmul.f32 %v14457_v17, %v14380_v46  ;;  %v5101_v24 = vmul.f32 %v14367_v47, %v14466_v11  ;;  %5470 = vst [vmem:[#allocation3 + $0x154] sm:$0xf] %v10593_v2  ;;  %v5137_v33 = vmax.f32 %v5121_v42, 0.0  ;;  %v14535_v17 = vpop.f32.mrf.mxu0  ;;  %11715 = vmatprep.subr.bf16.mxu0 %v12150_v60  ;;  %v14544_v44 = vpop.f32.mrf.mxu1 }
 0x7df   :  { %11666 = vmatmul.mubr.bf16.gmra.mxu0 %v10300_v0  ;;  %v5124_v40 = vadd.f32 %v14378_v53, %v5103_v8  ;;  %v5352_v26 = vmul.f32 %v14380_v46, %v14468_v5  ;;  %11684 = vmatpush3.bf16.msra.mxu1 %v12149_v45  ;;  %v5106_v62 = vmul.f32 %v14481_v22, %v14367_v47  ;;  %v5388_v43 = vmax.f32 %v5372_v12, 0.0  ;;  %v6912_v4 = vld [vmem:[#allocation3 + $0x50] sm:$0xf]  ;;  %v7153_v10 = vld [vmem:[#allocation3 + $0x54] sm:$0xf] }
 0x7e0   :  { %v5375_v11 = vadd.f32 %v14390_v39, %v5354_v9  ;;  %v5122_v16 = vadd.f32 %v14378_v53, %v5101_v24  ;;  %v5357_v55 = vmul.f32 %v14483_v32, %v14380_v46  ;;  %11733 = vmatprep.subr.bf16.mxu1 %v14511_v58  ;;  %v10575_v5 = vpack.c.bf16 %v5137_v33, %v5137_v33  ;;  %v14546_v31 = vpop.f32.mrf.mxu0  ;;  %v14550_v34 = vpop.f32.mrf.mxu1  ;;  %v12153_v9 = vld [vmem:[#allocation16 + $0x360] ss:$8 sps:$4 sm:$0xff]  }
 0x7e1   :  { %v5140_v57 = vmax.f32 %v5124_v40, 0.0  ;;  %v5373_v22 = vadd.f32 %v14390_v39, %v5352_v26  ;;  %11716 = vmatpush3.bf16.msra.mxu0 %v12150_v60  ;;  %v5127_v59 = vadd.f32 %v14378_v53, %v5106_v62  ;;  %v10591_v28 = vpack.c.bf16 %v5388_v43, %v5388_v43  ;;  %v14558_v60 = vld [vmem:[#allocation15 + $0xc] ss:$0 sm:$0xff]  ;;  %v12154_v24 = vld [vmem:[#allocation16 + $0x3e0] ss:$8 sps:$4 sm:$0xff]  }
 0x7e2   :  { %v5391_v41 = vmax.f32 %v5375_v11, 0.0  ;;  %v5138_v19 = vmax.f32 %v5122_v16, 0.0  ;;  %v5378_v32 = vadd.f32 %v14390_v39, %v5357_v55  ;;  %11765 = vmatprep.subr.bf16.mxu0 %v14526_v6  ;;  %5217 = vst [vmem:[#allocation3 + $0x110] sm:$0xf] %v10575_v5  ;;  %v10309_v54 = vcombine.low %v6910_v35, %v6911_v18  ;;  %v14552_v48 = vpop.f32.mrf.mxu0  ;;  %v14560_v2 = vpop.f32.mrf.mxu1  ;;  %v14572_v62 = vld [vmem:[#allocation15 + $0xd] ss:$0 sm:$0xff] }
 0x7e3   :  { %v10578_v61 = vpack.c.bf16 %v5140_v57, %v5140_v57  ;;  %v5389_v50 = vmax.f32 %v5373_v22, 0.0  ;;  %v5143_v52 = vmax.f32 %v5127_v59, 0.0  ;;  %5468 = vst [vmem:[#allocation3 + $0x114] sm:$0xf] %v10591_v28  ;;  %v10325_v15 = vcombine.low %v7151_v1, %v7152_v37  ;;  %v14574_v43 = vld [vmem:[#allocation15 + $0xe] ss:$0 sm:$0xff] }
 0x7e4   :  { %v10594_v45 = vpack.c.bf16 %v5391_v41, %v5391_v41  ;;  %v10576_v7 = vpack.c.bf16 %v5138_v19, %v5138_v19  ;;  %v5394_v3 = vmax.f32 %v5378_v32, 0.0  ;;  %11685 = vmatprep.mubr.bf16.mxu1 %v10309_v54  ;;  %v5104_v63 = vmul.f32 %v14367_v47, %v14492_v38  ;;  %v14562_v42 = vpop.f32.mrf.mxu0  ;;  %v14576_v11 = vpop.f32.mrf.mxu1  ;;  %v14589_v57 = vld [vmem:[#allocation15 + $0xf] ss:$0 sm:$0xff]  ;;  %v14591_v22 = vld [vmem:[#allocation16 + $0x350] ss:$8 sps:$4 sm:$0xff]  }
 0x7e5   :  { %5220 = vst [vmem:[#allocation3 + $0x170] sm:$0xf] %v10578_v61  ;;  %v10592_v23 = vpack.c.bf16 %v5389_v50, %v5389_v50  ;;  %v10581_v14 = vpack.c.bf16 %v5143_v52, %v5143_v52  ;;  %v5355_v49 = vmul.f32 %v14380_v46, %v14494_v20  ;;  %11717 = vmatprep.mubr.bf16.mxu0 %v10325_v15  ;;  %v6915_v37 = vld [vmem:[#allocation3 + $0xb0] sm:$0xf]  ;;  %v7156_v1 = vld [vmem:[#allocation3 + $0xb4] sm:$0xf] }
 0x7e6   :  { %5471 = vst [vmem:[#allocation3 + $0x174] sm:$0xf] %v10594_v45  ;;  %5218 = vst [vmem:[#allocation3 + $0x130] sm:$0xf] %v10576_v7  ;;  %v10597_v0 = vpack.c.bf16 %v5394_v3, %v5394_v3  ;;  %v10310_v8 = vcombine.low %v6912_v4, %v6913_v56  ;;  %v10326_v12 = vcombine.low %v7153_v10, %v7154_v13  ;;  %v14593_v59 = vpop.f32.mrf.mxu1  ;;  %v6914_v35 = vld [vmem:[#allocation3 + $0x90] sm:$0xf] }
 0x7e7   :  { %v5107_v38 = vmul.f32 %v14499_v36, %v14367_v47  ;;  %5469 = vst [vmem:[#allocation3 + $0x134] sm:$0xf] %v10592_v23  ;;  %5223 = vst [vmem:[#allocation3 + $0x1d0] sm:$0xf] %v10581_v14  ;;  %v5125_v20 = vadd.f32 %v14378_v53, %v5104_v63  ;;  %v5376_v33 = vadd.f32 %v14390_v39, %v5355_v49  ;;  %v14578_v36 = vpop.f32.mrf.mxu0  ;;  %v6917_v13 = vld [vmem:[#allocation3 + $0xf0] sm:$0xf] }
 0x7e8   :  { %v5358_v40 = vmul.f32 %v14501_v27, %v14380_v46  ;;  %v5105_v26 = vmul.f32 %v14367_v47, %v14505_v30  ;;  %5474 = vst [vmem:[#allocation3 + $0x1d4] sm:$0xf] %v10597_v0  ;;  %11686 = vmatmul.mubr.bf16.vlgmr.msra.gmra.mxu1 %v10310_v8  ;;  %11718 = vmatmul.mubr.bf16.vlgmr.msra.gmra.mxu0 %v10326_v12  ;;  %v14601_v61 = vpop.f32.mrf.mxu1  ;;  %v7158_v45 = vld [vmem:[#allocation3 + $0xf4] sm:$0xf]  ;;  %v6916_v4 = vld [vmem:[#allocation3 + $0xd0] sm:$0xf] }
 0x7e9   :  { %v5128_v16 = vadd.f32 %v14378_v53, %v5107_v38  ;;  %v5356_v55 = vmul.f32 %v14380_v46, %v14507_v29  ;;  %v5596_v27 = vmul.f32 %v14517_v25, %v14558_v60  ;;  %v5141_v47 = vmax.f32 %v5125_v20, 0.0  ;;  %11734 = vmatpush3.bf16.msra.mxu1 %v14511_v58  ;;  %11766 = vmatpush3.bf16.msra.mxu0 %v14526_v6  ;;  %v14595_v46 = vpop.f32.mrf.mxu0  ;;  %v7155_v15 = vld [vmem:[#allocation3 + $0x94] sm:$0xf]  ;;  %v12158_v20 = vld [vmem:[#allocation16 + $0x3c0] ss:$8 sps:$4 sm:$0xff]  }
 0x7ea   :  { %v5392_v30 = vmax.f32 %v5376_v33, 0.0  ;;  %v5379_v18 = vadd.f32 %v14390_v39, %v5358_v40  ;;  %v5126_v5 = vadd.f32 %v14378_v53, %v5105_v26  ;;  %11735 = vmatprep.subr.bf16.mxu1 %v12153_v9  ;;  %11767 = vmatprep.subr.bf16.mxu0 %v12154_v24  ;;  %v5847_v6 = vmul.f32 %v14519_v51, %v14574_v43  ;;  %v12156_v53 = vld [vmem:[#allocation16 + $0x3d0] ss:$8 sps:$4 sm:$0xff]   ;;  %v14607_v0 = vpop.f32.mrf.mxu1 }
 0x7eb   :  { %v5144_v29 = vmax.f32 %v5128_v16, 0.0  ;;  %v5377_v25 = vadd.f32 %v14390_v39, %v5356_v55  ;;  %v5617_v58 = vadd.f32 %v14572_v62, %v5596_v27  ;;  %v10579_v28 = vpack.c.bf16 %v5141_v47, %v5141_v47  ;;  %v14603_v50 = vpop.f32.mrf.mxu0  ;;  %v7157_v10 = vld [vmem:[#allocation3 + $0xd4] sm:$0xf] }
 0x7ec   :  { %v10595_v41 = vpack.c.bf16 %v5392_v30, %v5392_v30  ;;  %v5395_v19 = vmax.f32 %v5379_v18, 0.0  ;;  %v5142_v32 = vmax.f32 %v5126_v5, 0.0  ;;  %v5868_v56 = vadd.f32 %v14589_v57, %v5847_v6 }
 0x7ed   :  { %v10582_v52 = vpack.c.bf16 %v5144_v29, %v5144_v29  ;;  %v5393_v39 = vmax.f32 %v5377_v25, 0.0  ;;  %v5633_v54 = vmax.f32 %v5617_v58, 0.0  ;;  %5221 = vst [vmem:[#allocation3 + $0x190] sm:$0xf] %v10579_v28  ;;  %11736 = vmatpush3.bf16.msra.mxu1 %v12153_v9  ;;  %11768 = vmatpush3.bf16.msra.mxu0 %v12154_v24  ;;  %v10311_v3 = vcombine.low %v6914_v35, %v6915_v37  ;;  %v12157_v24 = vld [vmem:[#allocation16 + $0x340] ss:$8 sps:$4 sm:$0xff]   ;;  %v14613_v33 = vpop.f32.mrf.mxu0 }
 0x7ee   :  { %5472 = vst [vmem:[#allocation3 + $0x194] sm:$0xf] %v10595_v41  ;;  %v10598_v51 = vpack.c.bf16 %v5395_v19, %v5395_v19  ;;  %v10580_v7 = vpack.c.bf16 %v5142_v32, %v5142_v32  ;;  %v5884_v63 = vmax.f32 %v5868_v56, 0.0  ;;  %v10327_v49 = vcombine.low %v7155_v15, %v7156_v1  ;;  %11737 = vmatprep.subr.bf16.mxu1 %v14591_v22  ;;  %v12159_v29 = vld [vmem:[#allocation16 + $0x330] ss:$8 sps:$4 sm:$0xff]  }
 0x7ef   :  { %5224 = vst [vmem:[#allocation3 + $0x1f0] sm:$0xf] %v10582_v52  ;;  %v10596_v23 = vpack.c.bf16 %v5393_v39, %v5393_v39  ;;  %v10601_v14 = vpack.c.bf16 %v5633_v54, %v5633_v54  ;;  %11769 = vmatprep.subr.bf16.mxu0 %v12156_v53  ;;  %11689 = vmatprep.mubr.bf16.mxu1 %v10311_v3  ;;  %v14634_v25 = vpop.f32.mrf.mxu0  ;;  %v6919_v28 = vld [vmem:[#allocation3 + $0x130] sm:$0xf]  ;;  %v7160_v1 = vld [vmem:[#allocation3 + $0x134] sm:$0xf] }
 0x7f0   :  { %5475 = vst [vmem:[#allocation3 + $0x1f4] sm:$0xf] %v10598_v51  ;;  %5222 = vst [vmem:[#allocation3 + $0x1b0] sm:$0xf] %v10580_v7  ;;  %v5594_v8 = vmul.f32 %v14558_v60, %v14533_v21  ;;  %v5845_v12 = vmul.f32 %v14574_v43, %v14535_v17  ;;  %v10312_v38 = vcombine.low %v6916_v4, %v6917_v13  ;;  %11721 = vmatprep.mubr.bf16.mxu0 %v10327_v49  ;;  %v6921_v52 = vld [vmem:[#allocation3 + $0x170] sm:$0xf] }
 0x7f1   :  { %v10328_v9 = vcombine.low %v7157_v10, %v7158_v45  ;;  %5473 = vst [vmem:[#allocation3 + $0x1b4] sm:$0xf] %v10596_v23  ;;  %5713 = vst [vmem:[#allocation3 + $0x58] sm:$0xf] %v10601_v14  ;;  %v10617_v40 = vpack.c.bf16 %v5884_v63, %v5884_v63  ;;  %v5597_v26 = vmul.f32 %v14544_v44, %v14558_v60  ;;  %11738 = vmatpush3.bf16.msra.mxu1 %v14591_v22  ;;  %v12160_v22 = vld [vmem:[#allocation16 + $0x3b0] ss:$8 sps:$4 sm:$0xff]   ;;  %v14642_v14 = vpop.f32.mrf.mxu0 }
 0x7f2   :  { %v5848_v16 = vmul.f32 %v14546_v31, %v14574_v43  ;;  %v5595_v21 = vmul.f32 %v14558_v60, %v14550_v34  ;;  %v5615_v17 = vadd.f32 %v14572_v62, %v5594_v8  ;;  %v5866_v55 = vadd.f32 %v14589_v57, %v5845_v12  ;;  %11690 = vmatmul.mubr.bf16.gmra.mxu1 %v10312_v38  ;;  %v14629_v34 = vpop.f32.mrf.mxu1  ;;  %v6918_v56 = vld [vmem:[#allocation3 + $0x110] sm:$0xf]  ;;  %v7162_v13 = vld [vmem:[#allocation3 + $0x174] sm:$0xf]  ;;  %v12161_v12 = vld [vmem:[#allocation16 + $0x320] ss:$8 sps:$4 sm:$0xff]  }
 0x7f3   :  { %11722 = vmatmul.mubr.bf16.gmra.mxu0 %v10328_v9  ;;  %v5846_v27 = vmul.f32 %v14574_v43, %v14552_v48  ;;  %5964 = vst [vmem:[#allocation3 + $0x5c] sm:$0xf] %v10617_v40  ;;  %v5618_v44 = vadd.f32 %v14572_v62, %v5597_v26  ;;  %11739 = vmatprep.subr.bf16.mxu1 %v12157_v24  ;;  %v7159_v15 = vld [vmem:[#allocation3 + $0x114] sm:$0xf]  ;;  %v6920_v23 = vld [vmem:[#allocation3 + $0x150] sm:$0xf] }
 0x7f4   :  { %11770 = vmatpush3.bf16.msra.mxu0 %v12156_v53  ;;  %v5869_v31 = vadd.f32 %v14589_v57, %v5848_v16  ;;  %v5616_v47 = vadd.f32 %v14572_v62, %v5595_v21  ;;  %v5631_v30 = vmax.f32 %v5615_v17, 0.0  ;;  %v5882_v18 = vmax.f32 %v5866_v55, 0.0  ;;  %v14639_v45 = vpop.f32.mrf.mxu1  ;;  %v7161_v8 = vld [vmem:[#allocation3 + $0x154] sm:$0xf]  ;;  %v12162_v40 = vld [vmem:[#allocation16 + $0x3a0] ss:$8 sps:$4 sm:$0xff]   ;;  %v14659_v55 = vpop.f32.mrf.mxu0 }
 0x7f5   :  { %v5867_v5 = vadd.f32 %v14589_v57, %v5846_v27  ;;  %11771 = vmatprep.subr.bf16.mxu0 %v12158_v20  ;;  %v5600_v48 = vmul.f32 %v14560_v2, %v14558_v60  ;;  %v5634_v58 = vmax.f32 %v5618_v44, 0.0  ;;  %v5851_v53 = vmul.f32 %v14562_v42, %v14574_v43  ;;  %11740 = vmatpush3.bf16.msra.mxu1 %v12157_v24 }
 0x7f6   :  { %v5885_v6 = vmax.f32 %v5869_v31, 0.0  ;;  %v5632_v37 = vmax.f32 %v5616_v47, 0.0  ;;  %v10599_v41 = vpack.c.bf16 %v5631_v30, %v5631_v30  ;;  %v10615_v19 = vpack.c.bf16 %v5882_v18, %v5882_v18  ;;  %11741 = vmatprep.subr.bf16.mxu1 %v12159_v29  ;;  %v14654_v16 = vpop.f32.mrf.mxu1  ;;  %v12163_v47 = vld [vmem:[#allocation16 + $0x310] ss:$8 sps:$4 sm:$0xff]  }
 0x7f7   :  { %v5883_v32 = vmax.f32 %v5867_v5, 0.0  ;;  %v5621_v35 = vadd.f32 %v14572_v62, %v5600_v48  ;;  %v10602_v39 = vpack.c.bf16 %v5634_v58, %v5634_v58  ;;  %v5872_v7 = vadd.f32 %v14589_v57, %v5851_v53  ;;  %v12164_v30 = vld [vmem:[#allocation16 + $0x390] ss:$8 sps:$4 sm:$0xff]  }
 0x7f8   :  { %v10618_v2 = vpack.c.bf16 %v5885_v6, %v5885_v6  ;;  %v10600_v54 = vpack.c.bf16 %v5632_v37, %v5632_v37  ;;  %11772 = vmatpush3.bf16.msra.mxu0 %v12158_v20  ;;  %5711 = vst [vmem:[#allocation3 + $0x18] sm:$0xf] %v10599_v41  ;;  %5962 = vst [vmem:[#allocation3 + $0x1c] sm:$0xf] %v10615_v19  ;;  %v10313_v3 = vcombine.low %v6918_v56, %v6919_v28  ;;  %v6922_v53 = vld [vmem:[#allocation3 + $0x190] sm:$0xf]  ;;  %v11519_v28 = vpop.f32.mrf.mxu1 }
 0x7f9   :  { %v10616_v42 = vpack.c.bf16 %v5883_v32, %v5883_v32  ;;  %v5637_v51 = vmax.f32 %v5621_v35, 0.0  ;;  %11773 = vmatprep.subr.bf16.mxu0 %v12160_v22  ;;  %5714 = vst [vmem:[#allocation3 + $0x78] sm:$0xf] %v10602_v39  ;;  %v10329_v63 = vcombine.low %v7159_v15, %v7160_v1  ;;  %v5598_v49 = vmul.f32 %v14558_v60, %v14576_v11  ;;  %v6925_v1 = vld [vmem:[#allocation3 + $0x1f0] sm:$0xf] }
 0x7fa   :  { %5965 = vst [vmem:[#allocation3 + $0x7c] sm:$0xf] %v10618_v2  ;;  %5712 = vst [vmem:[#allocation3 + $0x38] sm:$0xf] %v10600_v54  ;;  %v5849_v4 = vmul.f32 %v14574_v43, %v14578_v36  ;;  %v10314_v10 = vcombine.low %v6920_v23, %v6921_v52  ;;  %v5888_v9 = vmax.f32 %v5872_v7, 0.0  ;;  %11693 = vmatprep.mubr.bf16.mxu1 %v10313_v3  ;;  %11742 = vmatpush3.bf16.msra.mxu1 %v12159_v29  ;;  %v11539_v52 = vpop.f32.mrf.mxu0 }
 0x7fb   :  { %5963 = vst [vmem:[#allocation3 + $0x3c] sm:$0xf] %v10616_v42  ;;  %v10605_v38 = vpack.c.bf16 %v5637_v51, %v5637_v51  ;;  %v10330_v24 = vcombine.low %v7161_v8, %v7162_v13  ;;  %v5601_v20 = vmul.f32 %v14593_v59, %v14558_v60  ;;  %11725 = vmatprep.mubr.bf16.mxu0 %v10329_v63  ;;  %v6923_v29 = vld [vmem:[#allocation3 + $0x1b0] sm:$0xf]  ;;  %v7166_v56 = vld [vmem:[#allocation3 + $0x1f4] sm:$0xf]  ;;  %v14676_v8 = vpop.f32.mrf.mxu1 }
 0x7fc   :  { %v5619_v26 = vadd.f32 %v14572_v62, %v5598_v49  ;;  %v5870_v11 = vadd.f32 %v14589_v57, %v5849_v4  ;;  %11694 = vmatmul.mubr.bf16.gmra.mxu1 %v10314_v10  ;;  %v5852_v36 = vmul.f32 %v14595_v46, %v14574_v43  ;;  %v10621_v21 = vpack.c.bf16 %v5888_v9, %v5888_v9  ;;  %v6924_v3 = vld [vmem:[#allocation3 + $0x1d0] sm:$0xf]  ;;  %v12165_v15 = vld [vmem:[#allocation16 + $0x300] ss:$8 sps:$4 sm:$0xff]   ;;  %v7165_v4 = vld [vmem:[#allocation3 + $0x1d4] sm:$0xf] }
 0x7fd   :  { %5717 = vst [vmem:[#allocation3 + $0xd8] sm:$0xf] %v10605_v38  ;;  %11726 = vmatmul.mubr.bf16.gmra.mxu0 %v10330_v24  ;;  %v5622_v17 = vadd.f32 %v14572_v62, %v5601_v20  ;;  %v5599_v59 = vmul.f32 %v14558_v60, %v14601_v61  ;;  %11743 = vmatprep.subr.bf16.mxu1 %v12161_v12  ;;  %v12166_v10 = vld [vmem:[#allocation16 + $0x380] ss:$8 sps:$4 sm:$0xff]   ;;  %v14679_v24 = vpop.f32.mrf.mxu0 }
 0x7fe   :  { %v5635_v27 = vmax.f32 %v5619_v26, 0.0  ;;  %v5886_v44 = vmax.f32 %v5870_v11, 0.0  ;;  %11774 = vmatpush3.bf16.msra.mxu0 %v12160_v22  ;;  %v5873_v31 = vadd.f32 %v14589_v57, %v5852_v36  ;;  %v5850_v46 = vmul.f32 %v14574_v43, %v14603_v50  ;;  %5968 = vst [vmem:[#allocation3 + $0xdc] sm:$0xf] %v10621_v21  ;;  %v7164_v22 = vld [vmem:[#allocation3 + $0x1b4] sm:$0xf]  ;;  %11744 = vmatpush3.bf16.msra.mxu1 %v12161_v12 }
 0x7ff   :  { %v5638_v18 = vmax.f32 %v5622_v17, 0.0  ;;  %v5620_v5 = vadd.f32 %v14572_v62, %v5599_v59  ;;  %11775 = vmatprep.subr.bf16.mxu0 %v12162_v40  ;;  %v5604_v61 = vmul.f32 %v14607_v0, %v14558_v60  ;;  %v5855_v48 = vmul.f32 %v14613_v33, %v14574_v43  ;;  %v7163_v0 = vld [vmem:[#allocation3 + $0x194] sm:$0xf]  ;;  %11745 = vmatprep.subr.bf16.mxu1 %v12163_v47 }
 0x800   :  { %v10603_v58 = vpack.c.bf16 %v5635_v27, %v5635_v27  ;;  %v10619_v6 = vpack.c.bf16 %v5886_v44, %v5886_v44  ;;  %v5889_v37 = vmax.f32 %v5873_v31, 0.0  ;;  %v5871_v50 = vadd.f32 %v14589_v57, %v5850_v46  ;;  %v14686_v26 = vld [vmem:[#allocation16 + $0xf4] ss:$8 sps:$4 sm:$0xff]   ;;  %v11520_v46 = vpop.f32.mrf.mxu1 }
 0x801   :  { %v10606_v41 = vpack.c.bf16 %v5638_v18, %v5638_v18  ;;  %v5636_v19 = vmax.f32 %v5620_v5, 0.0  ;;  %v5625_v32 = vadd.f32 %v14572_v62, %v5604_v61  ;;  %v5876_v35 = vadd.f32 %v14589_v57, %v5855_v48  ;;  %v14693_v59 = vld [vmem:[#allocation16 + $0x74] ss:$8 sps:$4 sm:$0xff]   ;;  %v11540_v61 = vpop.f32.mrf.mxu0 }
 0x802   :  { %5715 = vst [vmem:[#allocation3 + $0x98] sm:$0xf] %v10603_v58  ;;  %5966 = vst [vmem:[#allocation3 + $0x9c] sm:$0xf] %v10619_v6  ;;  %v10622_v33 = vpack.c.bf16 %v5889_v37, %v5889_v37  ;;  %v5887_v39 = vmax.f32 %v5871_v50, 0.0  ;;  %11776 = vmatpush3.bf16.msra.mxu0 %v12162_v40  ;;  %v10315_v2 = vcombine.low %v6922_v53, %v6923_v29  ;;  %11746 = vmatpush3.bf16.msra.mxu1 %v12163_v47 }
 0x803   :  { %v10331_v54 = vcombine.low %v7163_v0, %v7164_v22  ;;  %5718 = vst [vmem:[#allocation3 + $0xf8] sm:$0xf] %v10606_v41  ;;  %v10604_v13 = vpack.c.bf16 %v5636_v19, %v5636_v19  ;;  %v5641_v42 = vmax.f32 %v5625_v32, 0.0  ;;  %v5892_v51 = vmax.f32 %v5876_v35, 0.0  ;;  %11777 = vmatprep.subr.bf16.mxu0 %v12164_v30  ;;  %11747 = vmatprep.subr.bf16.mxu1 %v12165_v15  ;;  %v7393_v31 = vld [vmem:[#allocation3 + $0x38] sm:$0xf] }
 0x804   :  { %v5602_v7 = vmul.f32 %v14558_v60, %v14629_v34  ;;  %5969 = vst [vmem:[#allocation3 + $0xfc] sm:$0xf] %v10622_v33  ;;  %v10620_v23 = vpack.c.bf16 %v5887_v39, %v5887_v39  ;;  %11697 = vmatprep.mubr.bf16.mxu1 %v10315_v2  ;;  %v5853_v63 = vmul.f32 %v14574_v43, %v14634_v25  ;;  %v7392_v18 = vld [vmem:[#allocation3 + $0x18] sm:$0xf]  ;;  %v7634_v5 = vld [vmem:[#allocation3 + $0x3c] sm:$0xf] }
 0x805   :  { %11729 = vmatprep.mubr.bf16.mxu0 %v10331_v54  ;;  %v10316_v49 = vcombine.low %v6924_v3, %v6925_v1  ;;  %5716 = vst [vmem:[#allocation3 + $0xb8] sm:$0xf] %v10604_v13  ;;  %v10609_v12 = vpack.c.bf16 %v5641_v42, %v5641_v42  ;;  %v10625_v38 = vpack.c.bf16 %v5892_v51, %v5892_v51  ;;  %v7633_v6 = vld [vmem:[#allocation3 + $0x1c] sm:$0xf]  ;;  %v7395_v37 = vld [vmem:[#allocation3 + $0x78] sm:$0xf]  ;;  %v5828_v42 = vpop.f32.mrf.mxu0 }
 0x806   :  { %v5623_v34 = vadd.f32 %v14572_v62, %v5602_v7  ;;  %v10332_v9 = vcombine.low %v7165_v4, %v7166_v56  ;;  %5967 = vst [vmem:[#allocation3 + $0xbc] sm:$0xf] %v10620_v23  ;;  %v5874_v20 = vadd.f32 %v14589_v57, %v5853_v63  ;;  %11778 = vmatpush3.bf16.msra.mxu0 %v12164_v30  ;;  %v7636_v19 = vld [vmem:[#allocation3 + $0x7c] sm:$0xf]  ;;  %v7394_v56 = vld [vmem:[#allocation3 + $0x58] sm:$0xf] }
 0x807   :  { %11698 = vmatmul.mubr.bf16.gmra.mxu1 %v10316_v49  ;;  %v5605_v25 = vmul.f32 %v14639_v45, %v14558_v60  ;;  %v5856_v40 = vmul.f32 %v14642_v14, %v14574_v43  ;;  %5721 = vst [vmem:[#allocation3 + $0x158] sm:$0xf] %v10609_v12  ;;  %5972 = vst [vmem:[#allocation3 + $0x15c] sm:$0xf] %v10625_v38  ;;  %v5603_v36 = vmul.f32 %v14558_v60, %v14654_v16  ;;  %v7635_v13 = vld [vmem:[#allocation3 + $0x5c] sm:$0xf] }
 0x808   :  { %v5639_v11 = vmax.f32 %v5623_v34, 0.0  ;;  %11730 = vmatmul.mubr.bf16.gmra.mxu0 %v10332_v9  ;;  %v5854_v21 = vmul.f32 %v14574_v43, %v14659_v55  ;;  %v5608_v17 = vmul.f32 %v11519_v28, %v14558_v60  ;;  %v5890_v45 = vmax.f32 %v5874_v20, 0.0  ;;  %11779 = vmatprep.subr.bf16.mxu0 %v12166_v10  ;;  %v12169_v63 = vld [vmem:[#allocation16 + $0xe4] ss:$8 sps:$4 sm:$0xff]  }
 0x809   :  { %v5626_v14 = vadd.f32 %v14572_v62, %v5605_v25  ;;  %v5877_v27 = vadd.f32 %v14589_v57, %v5856_v40  ;;  %v5859_v44 = vmul.f32 %v11539_v52, %v14574_v43  ;;  %v5624_v16 = vadd.f32 %v14572_v62, %v5603_v36  ;;  %11748 = vmatpush3.bf16.msra.mxu1 %v12165_v15  ;;  %v5577_v52 = vpop.f32.mrf.mxu1  ;;  %v12170_v49 = vld [vmem:[#allocation16 + $0x64] ss:$8 sps:$4 sm:$0xff]   ;;  %v7396_v38 = vld [vmem:[#allocation3 + $0x98] sm:$0xf]  ;;  %v7637_v36 = vld [vmem:[#allocation3 + $0x9c] sm:$0xf] }
 0x80a   :  { %v10607_v47 = vpack.c.bf16 %v5639_v11, %v5639_v11  ;;  %v5875_v30 = vadd.f32 %v14589_v57, %v5854_v21  ;;  %v5629_v55 = vadd.f32 %v14572_v62, %v5608_v17  ;;  %v10623_v48 = vpack.c.bf16 %v5890_v45, %v5890_v45  ;;  %11780 = vmatpush3.bf16.msra.mxu0 %v12166_v10  ;;  %v12171_v21 = vld [vmem:[#allocation16 + $0xd4] ss:$8 sps:$4 sm:$0xff]  }
 0x80b   :  { %v5642_v29 = vmax.f32 %v5626_v14, 0.0  ;;  %v5893_v22 = vmax.f32 %v5877_v27, 0.0  ;;  %v5880_v58 = vadd.f32 %v14589_v57, %v5859_v44  ;;  %11797 = vmatprep.subr.bf16.mxu1 %v14686_v26  ;;  %v5640_v50 = vmax.f32 %v5624_v16, 0.0  ;;  %11829 = vmatprep.subr.bf16.mxu0 %v14693_v59  ;;  %v7399_v14 = vld [vmem:[#allocation3 + $0xf8] sm:$0xf] }
 0x80c   :  { %5719 = vst [vmem:[#allocation3 + $0x118] sm:$0xf] %v10607_v47  ;;  %v5891_v53 = vmax.f32 %v5875_v30, 0.0  ;;  %v5645_v28 = vmax.f32 %v5629_v55, 0.0  ;;  %v10341_v41 = vcombine.low %v7392_v18, %v7393_v31  ;;  %5970 = vst [vmem:[#allocation3 + $0x11c] sm:$0xf] %v10623_v48  ;;  %v10357_v1 = vcombine.low %v7633_v6, %v7634_v5 }
 0x80d   :  { %v10610_v32 = vpack.c.bf16 %v5642_v29, %v5642_v29  ;;  %v10626_v35 = vpack.c.bf16 %v5893_v22, %v5893_v22  ;;  %v5896_v0 = vmax.f32 %v5880_v58, 0.0  ;;  %v10608_v33 = vpack.c.bf16 %v5640_v50, %v5640_v50  ;;  %v7397_v51 = vld [vmem:[#allocation3 + $0xb8] sm:$0xf]  ;;  %v7638_v34 = vld [vmem:[#allocation3 + $0xbc] sm:$0xf] }
 0x80e   :  { %v10624_v39 = vpack.c.bf16 %v5891_v53, %v5891_v53  ;;  %v10613_v2 = vpack.c.bf16 %v5645_v28, %v5645_v28  ;;  %11749 = vmatprep.mubr.bf16.mxu1 %v10341_v41  ;;  %v5606_v54 = vmul.f32 %v14558_v60, %v14676_v8  ;;  %11781 = vmatprep.mubr.bf16.mxu0 %v10357_v1  ;;  %v12172_v27 = vld [vmem:[#allocation16 + $0x54] ss:$8 sps:$4 sm:$0xff]   ;;  %v12174_v30 = vld [vmem:[#allocation16 + $0x44] ss:$8 sps:$4 sm:$0xff]  }
 0x80f   :  { %5722 = vst [vmem:[#allocation3 + $0x178] sm:$0xf] %v10610_v32  ;;  %5973 = vst [vmem:[#allocation3 + $0x17c] sm:$0xf] %v10626_v35  ;;  %v10629_v7 = vpack.c.bf16 %v5896_v0, %v5896_v0  ;;  %v5857_v3 = vmul.f32 %v14574_v43, %v14679_v24  ;;  %v10342_v15 = vcombine.low %v7394_v56, %v7395_v37  ;;  %v12175_v41 = vld [vmem:[#allocation16 + $0xb4] ss:$8 sps:$4 sm:$0xff]  }
 0x810   :  { %v10358_v23 = vcombine.low %v7635_v13, %v7636_v19  ;;  %5720 = vst [vmem:[#allocation3 + $0x138] sm:$0xf] %v10608_v33  ;;  %5971 = vst [vmem:[#allocation3 + $0x13c] sm:$0xf] %v10624_v39  ;;  %v5627_v4 = vadd.f32 %v14572_v62, %v5606_v54  ;;  %v5609_v10 = vmul.f32 %v11520_v46, %v14558_v60  ;;  %v7640_v46 = vld [vmem:[#allocation3 + $0xfc] sm:$0xf] }
 0x811   :  { %5725 = vst [vmem:[#allocation3 + $0x1d8] sm:$0xf] %v10613_v2  ;;  %v5860_v8 = vmul.f32 %v11540_v61, %v14574_v43  ;;  %v5607_v12 = vmul.f32 %v14558_v60, %v5577_v52  ;;  %5976 = vst [vmem:[#allocation3 + $0x1dc] sm:$0xf] %v10629_v7  ;;  %v5878_v9 = vadd.f32 %v14589_v57, %v5857_v3  ;;  %11750 = vmatmul.mubr.bf16.vlgmr.msra.gmra.mxu1 %v10342_v15  ;;  %v7639_v61 = vld [vmem:[#allocation3 + $0xdc] sm:$0xf] }
 0x812   :  { %11782 = vmatmul.mubr.bf16.vlgmr.msra.gmra.mxu0 %v10358_v23  ;;  %v5858_v24 = vmul.f32 %v14574_v43, %v5828_v42  ;;  %v10343_v20 = vcombine.low %v7396_v38, %v7397_v51  ;;  %v5643_v25 = vmax.f32 %v5627_v4, 0.0  ;;  %11798 = vmatpush3.bf16.msra.mxu1 %v14686_v26  ;;  %v5630_v40 = vadd.f32 %v14572_v62, %v5609_v10  ;;  %v12176_v19 = vld [vmem:[#allocation16 + $0x34] ss:$8 sps:$4 sm:$0xff]   ;;  %v12177_v52 = vld [vmem:[#allocation16 + $0xa4] ss:$8 sps:$4 sm:$0xff]  }
 0x813   :  { %11830 = vmatpush3.bf16.msra.mxu0 %v14693_v59  ;;  %v5881_v11 = vadd.f32 %v14589_v57, %v5860_v8  ;;  %v5628_v60 = vadd.f32 %v14572_v62, %v5607_v12  ;;  %v5894_v17 = vmax.f32 %v5878_v9, 0.0  ;;  %11799 = vmatprep.subr.bf16.mxu1 %v12169_v63  ;;  %v10359_v43 = vcombine.low %v7637_v36, %v7638_v34  ;;  %v12173_v62 = vld [vmem:[#allocation16 + $0xc4] ss:$8 sps:$4 sm:$0xff]   ;;  %v7400_v48 = vld [vmem:[#allocation3 + $0x118] sm:$0xf] }
 0x814   :  { %v5879_v45 = vadd.f32 %v14589_v57, %v5858_v24  ;;  %11831 = vmatprep.subr.bf16.mxu0 %v12170_v49  ;;  %v10611_v44 = vpack.c.bf16 %v5643_v25, %v5643_v25  ;;  %v5646_v26 = vmax.f32 %v5630_v40, 0.0  ;;  %11753 = vmatprep.mubr.bf16.mxu1 %v10343_v20  ;;  %v7398_v57 = vld [vmem:[#allocation3 + $0xd8] sm:$0xf]  ;;  %v10360_v58 = vcombine.low %v7639_v61, %v7640_v46  ;;  %v7641_v37 = vld [vmem:[#allocation3 + $0x11c] sm:$0xf] }
 0x815   :  { %v5897_v31 = vmax.f32 %v5881_v11, 0.0  ;;  %v5644_v59 = vmax.f32 %v5628_v60, 0.0  ;;  %v10627_v47 = vpack.c.bf16 %v5894_v17, %v5894_v17  ;;  %11785 = vmatprep.mubr.bf16.mxu0 %v10359_v43  ;;  %v10344_v22 = vcombine.low %v7398_v57, %v7399_v14  ;;  %v7402_v0 = vld [vmem:[#allocation3 + $0x158] sm:$0xf]  ;;  %v7643_v1 = vld [vmem:[#allocation3 + $0x15c] sm:$0xf] }
 0x816   :  { %v5895_v16 = vmax.f32 %v5879_v45, 0.0  ;;  %5723 = vst [vmem:[#allocation3 + $0x198] sm:$0xf] %v10611_v44  ;;  %v10614_v55 = vpack.c.bf16 %v5646_v26, %v5646_v26  ;;  %11800 = vmatpush3.bf16.msra.mxu1 %v12169_v63  ;;  %v7403_v32 = vld [vmem:[#allocation3 + $0x178] sm:$0xf] }
 0x817   :  { %v10630_v18 = vpack.c.bf16 %v5897_v31, %v5897_v31  ;;  %v10612_v5 = vpack.c.bf16 %v5644_v59, %v5644_v59  ;;  %11832 = vmatpush3.bf16.msra.mxu0 %v12170_v49  ;;  %5974 = vst [vmem:[#allocation3 + $0x19c] sm:$0xf] %v10627_v47  ;;  %11801 = vmatprep.subr.bf16.mxu1 %v12171_v21  ;;  %v7401_v6 = vld [vmem:[#allocation3 + $0x138] sm:$0xf]  ;;  %v7642_v50 = vld [vmem:[#allocation3 + $0x13c] sm:$0xf] }
 0x818   :  { %v10628_v29 = vpack.c.bf16 %v5895_v16, %v5895_v16  ;;  %11833 = vmatprep.subr.bf16.mxu0 %v12172_v27  ;;  %5726 = vst [vmem:[#allocation3 + $0x1f8] sm:$0xf] %v10614_v55  ;;  %v10345_v53 = vcombine.low %v7400_v48, %v7401_v6  ;;  %v10361_v28 = vcombine.low %v7641_v37, %v7642_v50  ;;  %v7644_v35 = vld [vmem:[#allocation3 + $0x17c] sm:$0xf]  ;;  %v12178_v2 = vld [vmem:[#allocation16 + $0x24] ss:$8 sps:$4 sm:$0xff]  }
 0x819   :  { %5977 = vst [vmem:[#allocation3 + $0x1fc] sm:$0xf] %v10630_v18  ;;  %5724 = vst [vmem:[#allocation3 + $0x1b8] sm:$0xf] %v10612_v5  ;;  %11754 = vmatmul.mubr.bf16.gmra.mxu1 %v10344_v22  ;;  %v10346_v33 = vcombine.low %v7402_v0, %v7403_v32  ;;  %v10362_v39 = vcombine.low %v7643_v1, %v7644_v35  ;;  %v12179_v3 = vld [vmem:[#allocation16 + $0x94] ss:$8 sps:$4 sm:$0xff]  }
 0x81a   :  { %5975 = vst [vmem:[#allocation3 + $0x1bc] sm:$0xf] %v10628_v29  ;;  %11786 = vmatmul.mubr.bf16.gmra.mxu0 %v10360_v58  ;;  %11802 = vmatpush3.bf16.msra.mxu1 %v12171_v21  ;;  %v12180_v15 = vld [vmem:[#allocation16 + $0x14] ss:$8 sps:$4 sm:$0xff]   ;;  %v7946_v49 = vld [vmem:[#allocation3 + $0x24] sm:$0xf] }
 0x81b   :  { %11834 = vmatpush3.bf16.msra.mxu0 %v12172_v27  ;;  %11803 = vmatprep.subr.bf16.mxu1 %v12173_v62  ;;  %v7406_v4 = vld [vmem:[#allocation3 + $0x1d8] sm:$0xf]  ;;  %v7647_v10 = vld [vmem:[#allocation3 + $0x1dc] sm:$0xf]  ;;  %v7914_v8 = vld [vmem:[#allocation3 + $0x20] sm:$0xf] }
 0x81c   :  { %11835 = vmatprep.subr.bf16.mxu0 %v12174_v30  ;;  %11757 = vmatprep.mubr.bf16.mxu1 %v10345_v53  ;;  %v7945_v34 = vld [vmem:[#allocation3 + $0x4] sm:$0xf]  ;;  %v7913_v24 = vld [vmem:[#allocation3] sm:$0xf]  ;;  %v12183_v11 = vld [vmem:[#allocation16 + $0x174] ss:$8 sps:$4 sm:$0xff]  }
 0x81d   :  { %11789 = vmatprep.mubr.bf16.mxu0 %v10361_v28  ;;  %v7404_v54 = vld [vmem:[#allocation3 + $0x198] sm:$0xf]  ;;  %v10374_v9 = vcombine.low %v7945_v34, %v7946_v49  ;;  %v12181_v20 = vld [vmem:[#allocation16 + $0x84] ss:$8 sps:$4 sm:$0xff]   ;;  %v10390_v40 = vcombine.low %v7913_v24, %v7914_v8 }
 0x81e   :  { %11804 = vmatpush3.bf16.msra.mxu1 %v12173_v62  ;;  %v7645_v42 = vld [vmem:[#allocation3 + $0x19c] sm:$0xf]  ;;  %v12182_v25 = vld [vmem:[#allocation16 + $0x4] ss:$8 sps:$4 sm:$0xff]  }
 0x81f   :  { %11836 = vmatpush3.bf16.msra.mxu0 %v12174_v30  ;;  %11805 = vmatprep.subr.bf16.mxu1 %v12175_v41  ;;  %v7407_v23 = vld [vmem:[#allocation3 + $0x1f8] sm:$0xf]  ;;  %v7948_v60 = vld [vmem:[#allocation3 + $0x64] sm:$0xf]  ;;  %v7916_v21 = vld [vmem:[#allocation3 + $0x60] sm:$0xf] }
 0x820   :  { %11837 = vmatprep.subr.bf16.mxu0 %v12176_v19  ;;  %v7405_v56 = vld [vmem:[#allocation3 + $0x1b8] sm:$0xf]  ;;  %v7648_v63 = vld [vmem:[#allocation3 + $0x1fc] sm:$0xf]  ;;  %v10348_v12 = vcombine.low %v7406_v4, %v7407_v23  ;;  %v7947_v17 = vld [vmem:[#allocation3 + $0x44] sm:$0xf] }
 0x821   :  { %v10347_v13 = vcombine.low %v7404_v54, %v7405_v56  ;;  %v7646_v51 = vld [vmem:[#allocation3 + $0x1bc] sm:$0xf]  ;;  %11758 = vmatmul.mubr.bf16.gmra.mxu1 %v10346_v33  ;;  %v10364_v38 = vcombine.low %v7647_v10, %v7648_v63  ;;  %v7950_v45 = vld [vmem:[#allocation3 + $0xa4] sm:$0xf]  ;;  %v7918_v43 = vld [vmem:[#allocation3 + $0xa0] sm:$0xf]  ;;  %v10375_v14 = vcombine.low %v7947_v17, %v7948_v60 }
 0x822   :  { %11790 = vmatmul.mubr.bf16.gmra.mxu0 %v10362_v39  ;;  %v10363_v7 = vcombine.low %v7645_v42, %v7646_v51  ;;  %11806 = vmatpush3.bf16.msra.mxu1 %v12175_v41  ;;  %v12184_v36 = vld [vmem:[#allocation16 + $0x1f4] ss:$8 sps:$4 sm:$0xff]   ;;  %v7915_v27 = vld [vmem:[#allocation3 + $0x40] sm:$0xf]  ;;  %v7949_v26 = vld [vmem:[#allocation3 + $0x84] sm:$0xf] }
 0x823   :  { %11838 = vmatpush3.bf16.msra.mxu0 %v12176_v19  ;;  %11807 = vmatprep.subr.bf16.mxu1 %v12177_v52  ;;  %v10391_v44 = vcombine.low %v7915_v27, %v7916_v21  ;;  %v7917_v31 = vld [vmem:[#allocation3 + $0x80] sm:$0xf]  ;;  %v10376_v46 = vcombine.low %v7949_v26, %v7950_v45  ;;  %v12187_v62 = vld [vmem:[#allocation16 + $0x154] ss:$8 sps:$4 sm:$0xff]   ;;  %v7952_v30 = vld [vmem:[#allocation3 + $0xe4] sm:$0xf] }
 0x824   :  { %11839 = vmatprep.subr.bf16.mxu0 %v12178_v2  ;;  %11761 = vmatprep.mubr.bf16.mxu1 %v10347_v13  ;;  %v12185_v59 = vld [vmem:[#allocation16 + $0x164] ss:$8 sps:$4 sm:$0xff]   ;;  %v10392_v47 = vcombine.low %v7917_v31, %v7918_v43  ;;  %v12188_v18 = vld [vmem:[#allocation16 + $0x1d4] ss:$8 sps:$4 sm:$0xff]  }
 0x825   :  { %11793 = vmatprep.mubr.bf16.mxu0 %v10363_v7  ;;  %v12186_v16 = vld [vmem:[#allocation16 + $0x1e4] ss:$8 sps:$4 sm:$0xff]   ;;  %v12191_v41 = vld [vmem:[#allocation16 + $0x134] ss:$8 sps:$4 sm:$0xff]  }
 0x826   :  { %11808 = vmatpush3.bf16.msra.mxu1 %v12177_v52  ;;  %v7920_v55 = vld [vmem:[#allocation3 + $0xe0] sm:$0xf]  ;;  %v7951_v5 = vld [vmem:[#allocation3 + $0xc4] sm:$0xf]  ;;  %v12192_v35 = vld [vmem:[#allocation16 + $0x1b4] ss:$8 sps:$4 sm:$0xff]  }
 0x827   :  { %11840 = vmatpush3.bf16.msra.mxu0 %v12178_v2  ;;  %11809 = vmatprep.subr.bf16.mxu1 %v12179_v3  ;;  %v7954_v57 = vld [vmem:[#allocation3 + $0x124] sm:$0xf]  ;;  %v7922_v61 = vld [vmem:[#allocation3 + $0x120] sm:$0xf]  ;;  %v10377_v48 = vcombine.low %v7951_v5, %v7952_v30  ;;  %v12196_v63 = vld [vmem:[#allocation16 + $0x194] ss:$8 sps:$4 sm:$0xff]  }
 0x828   :  { %11841 = vmatprep.subr.bf16.mxu0 %v12180_v15  ;;  %v7919_v29 = vld [vmem:[#allocation3 + $0xc0] sm:$0xf]  ;;  %v7953_v58 = vld [vmem:[#allocation3 + $0x104] sm:$0xf]  ;;  %v8364_v4 = vld [vmem:[#allocation3 + $0x28] sm:$0xf] }
 0x829   :  { %11762 = vmatmul.mubr.bf16.gmra.mxu1 %v10348_v12  ;;  %v10393_v22 = vcombine.low %v7919_v29, %v7920_v55  ;;  %v7921_v6 = vld [vmem:[#allocation3 + $0x100] sm:$0xf]  ;;  %v10378_v50 = vcombine.low %v7953_v58, %v7954_v57  ;;  %v7956_v19 = vld [vmem:[#allocation3 + $0x164] sm:$0xf]  ;;  %v8605_v10 = vld [vmem:[#allocation3 + $0x2c] sm:$0xf] }
 0x82a   :  { %11794 = vmatmul.mubr.bf16.gmra.mxu0 %v10364_v38  ;;  %11810 = vmatpush3.bf16.msra.mxu1 %v12179_v3  ;;  %v12189_v37 = vld [vmem:[#allocation16 + $0x144] ss:$8 sps:$4 sm:$0xff]   ;;  %v10394_v53 = vcombine.low %v7921_v6, %v7922_v61  ;;  %v12195_v3 = vld [vmem:[#allocation16 + $0x114] ss:$8 sps:$4 sm:$0xff]  }
 0x82b   :  { %11813 = vmatprep.mubr.bf16.mxu1 %v10374_v9  ;;  %11842 = vmatpush3.bf16.msra.mxu0 %v12180_v15  ;;  %v12190_v28 = vld [vmem:[#allocation16 + $0x1c4] ss:$8 sps:$4 sm:$0xff]   ;;  %v12204_v55 = vld [vmem:[#allocation16 + $0x2d4] ss:$8 sps:$4 sm:$0xff]  }
 0x82c   :  { %11845 = vmatprep.mubr.bf16.mxu0 %v10390_v40  ;;  %11811 = vmatprep.subr.bf16.mxu1 %v12181_v20  ;;  %v7924_v32 = vld [vmem:[#allocation3 + $0x160] sm:$0xf]  ;;  %v7955_v0 = vld [vmem:[#allocation3 + $0x144] sm:$0xf]  ;;  %v8363_v34 = vld [vmem:[#allocation3 + $0x8] sm:$0xf] }
 0x82d   :  { %11843 = vmatprep.subr.bf16.mxu0 %v12182_v25  ;;  %v7958_v1 = vld [vmem:[#allocation3 + $0x1a4] sm:$0xf]  ;;  %v7926_v52 = vld [vmem:[#allocation3 + $0x1a0] sm:$0xf]  ;;  %v10379_v33 = vcombine.low %v7955_v0, %v7956_v19  ;;  %v8604_v9 = vld [vmem:[#allocation3 + $0xc] sm:$0xf] }
 0x82e   :  { %11812 = vmatpush3.bf16.msra.mxu1 %v12181_v20  ;;  %v7923_v39 = vld [vmem:[#allocation3 + $0x140] sm:$0xf]  ;;  %v7957_v54 = vld [vmem:[#allocation3 + $0x184] sm:$0xf]  ;;  %v10406_v20 = vcombine.low %v8363_v34, %v8364_v4  ;;  %v8366_v60 = vld [vmem:[#allocation3 + $0x68] sm:$0xf] }
 0x82f   :  { %11844 = vmatpush3.bf16.msra.mxu0 %v12182_v25  ;;  %11861 = vmatprep.subr.bf16.mxu1 %v12183_v11  ;;  %v10395_v2 = vcombine.low %v7923_v39, %v7924_v32  ;;  %v7925_v56 = vld [vmem:[#allocation3 + $0x180] sm:$0xf]  ;;  %v10380_v42 = vcombine.low %v7957_v54, %v7958_v1  ;;  %v7960_v15 = vld [vmem:[#allocation3 + $0x1e4] sm:$0xf]  ;;  %v10422_v25 = vcombine.low %v8604_v9, %v8605_v10  ;;  %v8368_v21 = vld [vmem:[#allocation3 + $0xa8] sm:$0xf] }
 0x830   :  { %11893 = vmatprep.subr.bf16.mxu0 %v12184_v36  ;;  %v12193_v13 = vld [vmem:[#allocation16 + $0x124] ss:$8 sps:$4 sm:$0xff]   ;;  %v10396_v51 = vcombine.low %v7925_v56, %v7926_v52  ;;  %v12207_v32 = vld [vmem:[#allocation16 + $0x234] ss:$8 sps:$4 sm:$0xff]  }
 0x831   :  { %11814 = vmatmul.mubr.bf16.vlgmr.msra.gmra.mxu1 %v10375_v14  ;;  %v12194_v7 = vld [vmem:[#allocation16 + $0x1a4] ss:$8 sps:$4 sm:$0xff]  }
 0x832   :  { %11846 = vmatmul.mubr.bf16.vlgmr.msra.gmra.mxu0 %v10391_v44  ;;  %11862 = vmatpush3.bf16.msra.mxu1 %v12183_v11  ;;  %v7928_v23 = vld [vmem:[#allocation3 + $0x1e0] sm:$0xf]  ;;  %v7959_v49 = vld [vmem:[#allocation3 + $0x1c4] sm:$0xf]  ;;  %v12199_v11 = vld [vmem:[#allocation16 + $0x274] ss:$8 sps:$4 sm:$0xff]  }
 0x833   :  { %11817 = vmatprep.mubr.bf16.mxu1 %v10376_v46  ;;  %11849 = vmatprep.mubr.bf16.mxu0 %v10392_v47  ;;  %v10381_v8 = vcombine.low %v7959_v49, %v7960_v15  ;;  %v7927_v12 = vld [vmem:[#allocation3 + $0x1c0] sm:$0xf]  ;;  %v8365_v17 = vld [vmem:[#allocation3 + $0x48] sm:$0xf]  ;;  %v8607_v45 = vld [vmem:[#allocation3 + $0x6c] sm:$0xf] }
 0x834   :  { %11894 = vmatpush3.bf16.msra.mxu0 %v12184_v36  ;;  %11863 = vmatprep.subr.bf16.mxu1 %v12185_v59  ;;  %v10397_v38 = vcombine.low %v7927_v12, %v7928_v23  ;;  %v12197_v24 = vld [vmem:[#allocation16 + $0x104] ss:$8 sps:$4 sm:$0xff]   ;;  %v12200_v36 = vld [vmem:[#allocation16 + $0x2f4] ss:$8 sps:$4 sm:$0xff]   ;;  %v10407_v43 = vcombine.low %v8365_v17, %v8366_v60 }
 0x835   :  { %11895 = vmatprep.subr.bf16.mxu0 %v12186_v16  ;;  %v12198_v40 = vld [vmem:[#allocation16 + $0x184] ss:$8 sps:$4 sm:$0xff]   ;;  %v9087_v17 = vld [vmem:[#allocation3 + $0x34] sm:$0xf] }
 0x836   :  { %11864 = vmatpush3.bf16.msra.mxu1 %v12185_v59  ;;  %v8367_v14 = vld [vmem:[#allocation3 + $0x88] sm:$0xf]  ;;  %v8609_v27 = vld [vmem:[#allocation3 + $0xac] sm:$0xf] }
 0x837   :  { %11865 = vmatprep.subr.bf16.mxu1 %v12187_v62  ;;  %v12201_v44 = vld [vmem:[#allocation16 + $0x264] ss:$8 sps:$4 sm:$0xff]   ;;  %v10408_v31 = vcombine.low %v8367_v14, %v8368_v21  ;;  %v8845_v21 = vld [vmem:[#allocation3 + $0x10] sm:$0xf] }
 0x838   :  { %11896 = vmatpush3.bf16.msra.mxu0 %v12186_v16  ;;  %v8606_v26 = vld [vmem:[#allocation3 + $0x4c] sm:$0xf]  ;;  %v8370_v30 = vld [vmem:[#allocation3 + $0xe8] sm:$0xf] }
 0x839   :  { %11818 = vmatmul.mubr.bf16.gmra.mxu1 %v10377_v48  ;;  %11897 = vmatprep.subr.bf16.mxu0 %v12188_v18  ;;  %v10423_v59 = vcombine.low %v8606_v26, %v8607_v45  ;;  %v8608_v46 = vld [vmem:[#allocation3 + $0x8c] sm:$0xf]  ;;  %v8369_v5 = vld [vmem:[#allocation3 + $0xc8] sm:$0xf] }
 0x83a   :  { %11850 = vmatmul.mubr.bf16.gmra.mxu0 %v10393_v22  ;;  %11866 = vmatpush3.bf16.msra.mxu1 %v12187_v62  ;;  %v12202_v47 = vld [vmem:[#allocation16 + $0x2e4] ss:$8 sps:$4 sm:$0xff]   ;;  %v10424_v16 = vcombine.low %v8608_v46, %v8609_v27  ;;  %v12203_v62 = vld [vmem:[#allocation16 + $0x254] ss:$8 sps:$4 sm:$0xff]   ;;  %v10409_v61 = vcombine.low %v8369_v5, %v8370_v30 }
 0x83b   :  { %11821 = vmatprep.mubr.bf16.mxu1 %v10378_v50  ;;  %11853 = vmatprep.mubr.bf16.mxu0 %v10394_v53  ;;  %v8611_v57 = vld [vmem:[#allocation3 + $0xec] sm:$0xf]  ;;  %v8371_v48 = vld [vmem:[#allocation3 + $0x108] sm:$0xf]  ;;  %v12215_v30 = vld [vmem:[#allocation16 + $0x374] ss:$8 sps:$4 sm:$0xff]  }
 0x83c   :  { %11898 = vmatpush3.bf16.msra.mxu0 %v12188_v18  ;;  %11867 = vmatprep.subr.bf16.mxu1 %v12189_v37  ;;  %v8372_v18 = vld [vmem:[#allocation3 + $0x128] sm:$0xf]  ;;  %v8613_v29 = vld [vmem:[#allocation3 + $0x12c] sm:$0xf] }
 0x83d   :  { %11899 = vmatprep.subr.bf16.mxu0 %v12190_v28  ;;  %v12205_v22 = vld [vmem:[#allocation16 + $0x244] ss:$8 sps:$4 sm:$0xff]   ;;  %v10410_v6 = vcombine.low %v8371_v48, %v8372_v18  ;;  %v8848_v18 = vld [vmem:[#allocation3 + $0x70] sm:$0xf] }
 0x83e   :  { %11868 = vmatpush3.bf16.msra.mxu1 %v12189_v37  ;;  %v8610_v58 = vld [vmem:[#allocation3 + $0xcc] sm:$0xf]  ;;  %v8374_v0 = vld [vmem:[#allocation3 + $0x168] sm:$0xf]  ;;  %v8850_v48 = vld [vmem:[#allocation3 + $0xb0] sm:$0xf] }
 0x83f   :  { %11869 = vmatprep.subr.bf16.mxu1 %v12191_v41  ;;  %v10425_v37 = vcombine.low %v8610_v58, %v8611_v57  ;;  %v8612_v50 = vld [vmem:[#allocation3 + $0x10c] sm:$0xf]  ;;  %v8376_v39 = vld [vmem:[#allocation3 + $0x1a8] sm:$0xf]  ;;  %v9089_v58 = vld [vmem:[#allocation3 + $0x74] sm:$0xf] }
 0x840   :  { %11900 = vmatpush3.bf16.msra.mxu0 %v12190_v28  ;;  %v12206_v53 = vld [vmem:[#allocation16 + $0x2c4] ss:$8 sps:$4 sm:$0xff]   ;;  %v10426_v28 = vcombine.low %v8612_v50, %v8613_v29 }
 0x841   :  { %11822 = vmatmul.mubr.bf16.gmra.mxu1 %v10379_v33  ;;  %11901 = vmatprep.subr.bf16.mxu0 %v12192_v35  ;;  %v12208_v33 = vld [vmem:[#allocation16 + $0x2b4] ss:$8 sps:$4 sm:$0xff]   ;;  %v8373_v54 = vld [vmem:[#allocation3 + $0x148] sm:$0xf]  ;;  %v8615_v56 = vld [vmem:[#allocation3 + $0x16c] sm:$0xf] }
 0x842   :  { %11854 = vmatmul.mubr.bf16.gmra.mxu0 %v10395_v2  ;;  %11870 = vmatpush3.bf16.msra.mxu1 %v12191_v41  ;;  %v12209_v15 = vld [vmem:[#allocation16 + $0x224] ss:$8 sps:$4 sm:$0xff]  }
 0x843   :  { %11825 = vmatprep.mubr.bf16.mxu1 %v10380_v42  ;;  %11857 = vmatprep.mubr.bf16.mxu0 %v10396_v51  ;;  %v10411_v51 = vcombine.low %v8373_v54, %v8374_v0  ;;  %v8616_v12 = vld [vmem:[#allocation3 + $0x18c] sm:$0xf] }
 0x844   :  { %11902 = vmatpush3.bf16.msra.mxu0 %v12192_v35  ;;  %11871 = vmatprep.subr.bf16.mxu1 %v12193_v13  ;;  %v8619_v60 = vld [vmem:[#allocation3 + $0x1ec] sm:$0xf] }
 0x845   :  { %11903 = vmatprep.subr.bf16.mxu0 %v12194_v7  ;;  %v12213_v45 = vld [vmem:[#allocation16 + $0x204] ss:$8 sps:$4 sm:$0xff]  }
 0x846   :  { %11872 = vmatpush3.bf16.msra.mxu1 %v12193_v13 }
 0x847   :  { %11873 = vmatprep.subr.bf16.mxu1 %v12195_v3 }
 0x848   :  { %11904 = vmatpush3.bf16.msra.mxu0 %v12194_v7  ;;  %v8375_v7 = vld [vmem:[#allocation3 + $0x188] sm:$0xf] }
 0x849   :  { %11826 = vmatmul.mubr.bf16.gmra.mxu1 %v10381_v8  ;;  %11905 = vmatprep.subr.bf16.mxu0 %v12196_v63  ;;  %v10412_v49 = vcombine.low %v8375_v7, %v8376_v39 }
 0x84a   :  { %11858 = vmatmul.mubr.bf16.gmra.mxu0 %v10397_v38  ;;  %11874 = vmatpush3.bf16.msra.mxu1 %v12195_v3  ;;  %v8617_v3 = vld [vmem:[#allocation3 + $0x1ac] sm:$0xf] }
 0x84b   :  { %11877 = vmatprep.mubr.bf16.mxu1 %v10406_v20  ;;  %11909 = vmatprep.mubr.bf16.mxu0 %v10422_v25  ;;  %v12210_v38 = vld [vmem:[#allocation16 + $0x2a4] ss:$8 sps:$4 sm:$0xff]   ;;  %v10428_v9 = vcombine.low %v8616_v12, %v8617_v3  ;;  %v12212_v25 = vld [vmem:[#allocation16 + $0x294] ss:$8 sps:$4 sm:$0xff]  }
 0x84c   :  { %11906 = vmatpush3.bf16.msra.mxu0 %v12196_v63  ;;  %11875 = vmatprep.subr.bf16.mxu1 %v12197_v24  ;;  %v8614_v63 = vld [vmem:[#allocation3 + $0x14c] sm:$0xf]  ;;  %v8378_v20 = vld [vmem:[#allocation3 + $0x1e8] sm:$0xf] }
 0x84d   :  { %11907 = vmatprep.subr.bf16.mxu0 %v12198_v40  ;;  %v10427_v8 = vcombine.low %v8614_v63, %v8615_v56  ;;  %v8854_v63 = vld [vmem:[#allocation3 + $0x130] sm:$0xf] }
 0x84e   :  { %11876 = vmatpush3.bf16.msra.mxu1 %v12197_v24  ;;  %v12211_v24 = vld [vmem:[#allocation16 + $0x214] ss:$8 sps:$4 sm:$0xff]  }
 0x84f   :  { %11925 = vmatprep.subr.bf16.mxu1 %v12199_v11 }
 0x850   :  { %11908 = vmatpush3.bf16.msra.mxu0 %v12198_v40  ;;  %v8846_v40 = vld [vmem:[#allocation3 + $0x30] sm:$0xf] }
 0x851   :  { %11878 = vmatmul.mubr.bf16.vlgmr.msra.gmra.mxu1 %v10407_v43  ;;  %11957 = vmatprep.subr.bf16.mxu0 %v12200_v36  ;;  %v11559_v41 = vpop.f32.mrf.mxu1  ;;  %v8618_v43 = vld [vmem:[#allocation3 + $0x1cc] sm:$0xf]  ;;  %v10438_v14 = vcombine.low %v8845_v21, %v8846_v40  ;;  %v9092_v40 = vld [vmem:[#allocation3 + $0xd4] sm:$0xf] }
 0x852   :  { %11926 = vmatpush3.bf16.msra.mxu1 %v12199_v11  ;;  %11881 = vmatprep.mubr.bf16.mxu1 %v10408_v31  ;;  %v11591_v19 = vpop.f32.mrf.mxu0  ;;  %v8377_v11 = vld [vmem:[#allocation3 + $0x1c8] sm:$0xf]  ;;  %v10429_v26 = vcombine.low %v8618_v43, %v8619_v60  ;;  %v9086_v31 = vld [vmem:[#allocation3 + $0x14] sm:$0xf] }
 0x853   :  { %11910 = vmatmul.mubr.bf16.vlgmr.msra.gmra.mxu0 %v10423_v59  ;;  %11927 = vmatprep.subr.bf16.mxu1 %v12201_v44  ;;  %v14720_v35 = vadd.f32 %v11591_v19, %v11559_v41  ;;  %v6172_v1 = vpop.f32.mrf.mxu1  ;;  %v12214_v59 = vld [vmem:[#allocation16 + $0x284] ss:$8 sps:$4 sm:$0xff]  }
 0x854   :  { %11913 = vmatprep.mubr.bf16.mxu0 %v10424_v16  ;;  %11958 = vmatpush3.bf16.msra.mxu0 %v12200_v36  ;;  %v6365_v52 = vpop.f32.mrf.mxu0  ;;  %v10413_v36 = vcombine.low %v8377_v11, %v8378_v20  ;;  %v12217_v41 = vld [vmem:[#allocation16 + $0x364] ss:$8 sps:$4 sm:$0xff]  }
 0x855   :  { %11959 = vmatprep.subr.bf16.mxu0 %v12202_v47  ;;  %v14722_v2 = vadd.f32 %v6365_v52, %v6172_v1  ;;  %v11560_v13 = vpop.f32.mrf.mxu1  ;;  %v9090_v52 = vld [vmem:[#allocation3 + $0x94] sm:$0xf]  ;;  %v12221_v20 = vld [vmem:[#allocation16 + $0x344] ss:$8 sps:$4 sm:$0xff]  }
 0x856   :  { %11928 = vmatpush3.bf16.msra.mxu1 %v12201_v44  ;;  %v11592_v42 = vpop.f32.mrf.mxu0 }
 0x857   :  { %11929 = vmatprep.subr.bf16.mxu1 %v12203_v62  ;;  %v14724_v23 = vadd.f32 %v11592_v42, %v11560_v13  ;;  %v6175_v4 = vpop.f32.mrf.mxu1  ;;  %v12219_v13 = vld [vmem:[#allocation16 + $0x354] ss:$8 sps:$4 sm:$0xff]  }
 0x858   :  { %11960 = vmatpush3.bf16.msra.mxu0 %v12202_v47  ;;  %v6368_v10 = vpop.f32.mrf.mxu0  ;;  %v10454_v47 = vcombine.low %v9086_v31, %v9087_v17  ;;  %v9094_v17 = vld [vmem:[#allocation3 + $0x114] sm:$0xf]  ;;  %v8856_v31 = vld [vmem:[#allocation3 + $0x170] sm:$0xf] }
 0x859   :  { %11882 = vmatmul.mubr.bf16.gmra.mxu1 %v10409_v61  ;;  %11961 = vmatprep.subr.bf16.mxu0 %v12204_v55  ;;  %v14726_v34 = vadd.f32 %v6368_v10, %v6175_v4  ;;  %v12216_v61 = vld [vmem:[#allocation16 + $0x3f4] ss:$8 sps:$4 sm:$0xff]  }
 0x85a   :  { %11930 = vmatpush3.bf16.msra.mxu1 %v12203_v62  ;;  %11885 = vmatprep.mubr.bf16.mxu1 %v10410_v6  ;;  %v8851_v4 = vld [vmem:[#allocation3 + $0xd0] sm:$0xf]  ;;  %v9093_v10 = vld [vmem:[#allocation3 + $0xf4] sm:$0xf] }
 0x85b   :  { %11914 = vmatmul.mubr.bf16.gmra.mxu0 %v10425_v37  ;;  %11931 = vmatprep.subr.bf16.mxu1 %v12205_v22  ;;  %v10457_v21 = vcombine.low %v9092_v40, %v9093_v10 }
 0x85c   :  { %11917 = vmatprep.mubr.bf16.mxu0 %v10426_v28  ;;  %11962 = vmatpush3.bf16.msra.mxu0 %v12204_v55  ;;  %v9091_v28 = vld [vmem:[#allocation3 + $0xb4] sm:$0xf] }
 0x85d   :  { %11963 = vmatprep.subr.bf16.mxu0 %v12206_v53  ;;  %v10456_v39 = vcombine.low %v9090_v52, %v9091_v28 }
 0x85e   :  { %11932 = vmatpush3.bf16.msra.mxu1 %v12205_v22  ;;  %v8847_v22 = vld [vmem:[#allocation3 + $0x50] sm:$0xf] }
 0x85f   :  { %11933 = vmatprep.subr.bf16.mxu1 %v12207_v32  ;;  %v10439_v50 = vcombine.low %v8847_v22, %v8848_v18  ;;  %v8855_v18 = vld [vmem:[#allocation3 + $0x150] sm:$0xf]  ;;  %v9099_v22 = vld [vmem:[#allocation3 + $0x1b4] sm:$0xf] }
 0x860   :  { %11964 = vmatpush3.bf16.msra.mxu0 %v12206_v53  ;;  %v11563_v27 = vpop.f32.mrf.mxu1  ;;  %v8849_v53 = vld [vmem:[#allocation3 + $0x90] sm:$0xf] }
 0x861   :  { %11886 = vmatmul.mubr.bf16.gmra.mxu1 %v10411_v51  ;;  %11965 = vmatprep.subr.bf16.mxu0 %v12208_v33  ;;  %v11595_v44 = vpop.f32.mrf.mxu0  ;;  %v10440_v0 = vcombine.low %v8849_v53, %v8850_v48  ;;  %v8852_v51 = vld [vmem:[#allocation3 + $0xf0] sm:$0xf] }
 0x862   :  { %11934 = vmatpush3.bf16.msra.mxu1 %v12207_v32  ;;  %11889 = vmatprep.mubr.bf16.mxu1 %v10412_v49  ;;  %v14728_v46 = vadd.f32 %v11595_v44, %v11563_v27  ;;  %v6188_v16 = vpop.f32.mrf.mxu1  ;;  %v9088_v32 = vld [vmem:[#allocation3 + $0x54] sm:$0xf]  ;;  %v8857_v48 = vld [vmem:[#allocation3 + $0x190] sm:$0xf] }
 0x863   :  { %11918 = vmatmul.mubr.bf16.gmra.mxu0 %v10427_v8  ;;  %11935 = vmatprep.subr.bf16.mxu1 %v12209_v15  ;;  %v6381_v62 = vpop.f32.mrf.mxu0  ;;  %v10455_v1 = vcombine.low %v9088_v32, %v9089_v58  ;;  %v12223_v27 = vld [vmem:[#allocation16 + $0x334] ss:$8 sps:$4 sm:$0xff]   ;;  %v12225_v58 = vld [vmem:[#allocation16 + $0x324] ss:$8 sps:$4 sm:$0xff]  }
 0x864   :  { %11921 = vmatprep.mubr.bf16.mxu0 %v10428_v9  ;;  %11966 = vmatpush3.bf16.msra.mxu0 %v12208_v33  ;;  %v14730_v55 = vadd.f32 %v6381_v62, %v6188_v16  ;;  %v11564_v5 = vpop.f32.mrf.mxu1  ;;  %v12218_v33 = vld [vmem:[#allocation16 + $0x3e4] ss:$8 sps:$4 sm:$0xff]   ;;  %v8853_v9 = vld [vmem:[#allocation3 + $0x110] sm:$0xf]  ;;  %v9098_v32 = vld [vmem:[#allocation3 + $0x194] sm:$0xf] }
 0x865   :  { %11967 = vmatprep.subr.bf16.mxu0 %v12210_v38  ;;  %v11596_v57 = vpop.f32.mrf.mxu0  ;;  %v10442_v11 = vcombine.low %v8853_v9, %v8854_v63  ;;  %v8858_v16 = vld [vmem:[#allocation3 + $0x1b0] sm:$0xf]  ;;  %v9101_v63 = vld [vmem:[#allocation3 + $0x1f4] sm:$0xf] }
 0x866   :  { %11936 = vmatpush3.bf16.msra.mxu1 %v12209_v15  ;;  %v14732_v29 = vadd.f32 %v11596_v57, %v11564_v5  ;;  %v6191_v6 = vpop.f32.mrf.mxu1  ;;  %v12220_v15 = vld [vmem:[#allocation16 + $0x3d4] ss:$8 sps:$4 sm:$0xff]   ;;  %v10444_v53 = vcombine.low %v8857_v48, %v8858_v16 }
 0x867   :  { %11937 = vmatprep.subr.bf16.mxu1 %v12211_v24  ;;  %v6384_v37 = vpop.f32.mrf.mxu0  ;;  %v9097_v5 = vld [vmem:[#allocation3 + $0x174] sm:$0xf] }
 0x868   :  { %11968 = vmatpush3.bf16.msra.mxu0 %v12210_v38  ;;  %v14734_v19 = vadd.f32 %v6384_v37, %v6191_v6  ;;  %v10441_v38 = vcombine.low %v8851_v4, %v8852_v51  ;;  %v12228_v51 = vld [vmem:[#allocation16 + $0x394] ss:$8 sps:$4 sm:$0xff]  }
 0x869   :  { %11890 = vmatmul.mubr.bf16.gmra.mxu1 %v10413_v36  ;;  %11969 = vmatprep.subr.bf16.mxu0 %v12212_v25 }
 0x86a   :  { %11938 = vmatpush3.bf16.msra.mxu1 %v12211_v24  ;;  %11941 = vmatprep.mubr.bf16.mxu1 %v10438_v14  ;;  %v9095_v24 = vld [vmem:[#allocation3 + $0x134] sm:$0xf] }
 0x86b   :  { %11922 = vmatmul.mubr.bf16.gmra.mxu0 %v10429_v26  ;;  %11939 = vmatprep.subr.bf16.mxu1 %v12213_v45  ;;  %v11567_v54 = vpop.f32.mrf.mxu1  ;;  %v11599_v56 = vpop.f32.mrf.mxu0  ;;  %v10458_v14 = vcombine.low %v9094_v17, %v9095_v24  ;;  %v9100_v24 = vld [vmem:[#allocation3 + $0x1d4] sm:$0xf] }
 0x86c   :  { %11970 = vmatpush3.bf16.msra.mxu0 %v12212_v25  ;;  %11973 = vmatprep.mubr.bf16.mxu0 %v10454_v47  ;;  %v14736_v42 = vadd.f32 %v11599_v56, %v11567_v54  ;;  %v12224_v47 = vld [vmem:[#allocation16 + $0x3b4] ss:$8 sps:$4 sm:$0xff]  }
 0x86d   :  { %11971 = vmatprep.subr.bf16.mxu0 %v12214_v59  ;;  %v6204_v7 = vpop.f32.mrf.mxu1  ;;  %v6397_v3 = vpop.f32.mrf.mxu0  ;;  %v12227_v54 = vld [vmem:[#allocation16 + $0x314] ss:$8 sps:$4 sm:$0xff]  }
 0x86e   :  { %11940 = vmatpush3.bf16.msra.mxu1 %v12213_v45  ;;  %v14738_v49 = vadd.f32 %v6397_v3, %v6204_v7  ;;  %v12222_v45 = vld [vmem:[#allocation16 + $0x3c4] ss:$8 sps:$4 sm:$0xff]   ;;  %v8860_v56 = vld [vmem:[#allocation3 + $0x1f0] sm:$0xf]  ;;  %v9328_v7 = vld [vmem:[#allocation3 + $0x38] sm:$0xf] }
 0x86f   :  { %11989 = vmatprep.subr.bf16.mxu1 %v12215_v30  ;;  %v11568_v8 = vpop.f32.mrf.mxu1  ;;  %v11600_v12 = vpop.f32.mrf.mxu0 }
 0x870   :  { %11972 = vmatpush3.bf16.msra.mxu0 %v12214_v59  ;;  %v14740_v25 = vadd.f32 %v11600_v12, %v11568_v8  ;;  %v9327_v8 = vld [vmem:[#allocation3 + $0x18] sm:$0xf]  ;;  %v9569_v12 = vld [vmem:[#allocation3 + $0x3c] sm:$0xf] }
 0x871   :  { %11942 = vmatmul.mubr.bf16.vlgmr.msra.gmra.mxu1 %v10439_v50  ;;  %12021 = vmatprep.subr.bf16.mxu0 %v12216_v61  ;;  %v6207_v60 = vpop.f32.mrf.mxu1  ;;  %v6400_v36 = vpop.f32.mrf.mxu0  ;;  %v9096_v50 = vld [vmem:[#allocation3 + $0x154] sm:$0xf] }
 0x872   :  { %11990 = vmatpush3.bf16.msra.mxu1 %v12215_v30  ;;  %11945 = vmatprep.mubr.bf16.mxu1 %v10440_v0  ;;  %v14742_v43 = vadd.f32 %v6400_v36, %v6207_v60  ;;  %v12226_v0 = vld [vmem:[#allocation16 + $0x3a4] ss:$8 sps:$4 sm:$0xff]   ;;  %v9568_v60 = vld [vmem:[#allocation3 + $0x1c] sm:$0xf] }
 0x873   :  { %11974 = vmatmul.mubr.bf16.vlgmr.msra.gmra.mxu0 %v10455_v1  ;;  %11991 = vmatprep.subr.bf16.mxu1 %v12217_v41  ;;  %v12230_v36 = vld [vmem:[#allocation16 + $0x384] ss:$8 sps:$4 sm:$0xff]   ;;  %v10486_v17 = vcombine.low %v9568_v60, %v9569_v12  ;;  %v9576_v12 = vld [vmem:[#allocation3 + $0x11c] sm:$0xf]  ;;  %v9338_v60 = vld [vmem:[#allocation3 + $0x178] sm:$0xf] }
 0x874   :  { %11977 = vmatprep.mubr.bf16.mxu0 %v10456_v39  ;;  %12022 = vmatpush3.bf16.msra.mxu0 %v12216_v61  ;;  %v10443_v61 = vcombine.low %v8855_v18, %v8856_v31  ;;  %v9571_v31 = vld [vmem:[#allocation3 + $0x7c] sm:$0xf] }
 0x875   :  { %12023 = vmatprep.subr.bf16.mxu0 %v12218_v33  ;;  %v11571_v44 = vpop.f32.mrf.mxu1  ;;  %v11603_v26 = vpop.f32.mrf.mxu0  ;;  %v9573_v18 = vld [vmem:[#allocation3 + $0xbc] sm:$0xf] }
 0x876   :  { %11992 = vmatpush3.bf16.msra.mxu1 %v12217_v41  ;;  %v14744_v59 = vadd.f32 %v11603_v26, %v11571_v44  ;;  %v10459_v41 = vcombine.low %v9096_v50, %v9097_v5  ;;  %v9332_v44 = vld [vmem:[#allocation3 + $0xb8] sm:$0xf]  ;;  %v9570_v5 = vld [vmem:[#allocation3 + $0x5c] sm:$0xf] }
 0x877   :  { %11993 = vmatprep.subr.bf16.mxu1 %v12219_v13  ;;  %v6220_v62 = vpop.f32.mrf.mxu1  ;;  %v6413_v30 = vpop.f32.mrf.mxu0  ;;  %v9329_v26 = vld [vmem:[#allocation3 + $0x58] sm:$0xf] }
 0x878   :  { %12024 = vmatpush3.bf16.msra.mxu0 %v12218_v33  ;;  %v14746_v57 = vadd.f32 %v6413_v30, %v6220_v62  ;;  %v10460_v33 = vcombine.low %v9098_v32, %v9099_v22  ;;  %v9331_v30 = vld [vmem:[#allocation3 + $0x98] sm:$0xf] }
 0x879   :  { %11946 = vmatmul.mubr.bf16.gmra.mxu1 %v10441_v38  ;;  %12025 = vmatprep.subr.bf16.mxu0 %v12220_v15  ;;  %v11572_v6 = vpop.f32.mrf.mxu1  ;;  %v11604_v37 = vpop.f32.mrf.mxu0  ;;  %v12229_v38 = vld [vmem:[#allocation16 + $0x304] ss:$8 sps:$4 sm:$0xff]  }
 0x87a   :  { %11994 = vmatpush3.bf16.msra.mxu1 %v12219_v13  ;;  %11949 = vmatprep.mubr.bf16.mxu1 %v10442_v11  ;;  %15589 = vst [vmem:[#allocation45_spill] sm:$0xff] %v14746_v57  ;;  %v14748_v28 = vadd.f32 %v11604_v37, %v11572_v6  ;;  %v10461_v11 = vcombine.low %v9100_v24, %v9101_v63  ;;  %v9572_v6 = vld [vmem:[#allocation3 + $0x9c] sm:$0xf] }
 0x87b   :  { %11978 = vmatmul.mubr.bf16.gmra.mxu0 %v10457_v21  ;;  %11995 = vmatprep.subr.bf16.mxu1 %v12221_v20  ;;  %v6223_v1 = vpop.f32.mrf.mxu1  ;;  %v6416_v52 = vpop.f32.mrf.mxu0  ;;  %v10488_v37 = vcombine.low %v9572_v6, %v9573_v18  ;;  %v9581_v18 = vld [vmem:[#allocation3 + $0x1bc] sm:$0xf] }
 0x87c   :  { %11981 = vmatprep.mubr.bf16.mxu0 %v10458_v14  ;;  %12026 = vmatpush3.bf16.msra.mxu0 %v12220_v15  ;;  %15590 = vst [vmem:[#allocation44_spill] sm:$0xff] %v14748_v28  ;;  %v14750_v39 = vadd.f32 %v6416_v52, %v6223_v1  ;;  %v8859_v15 = vld [vmem:[#allocation3 + $0x1d0] sm:$0xf]  ;;  %v9336_v1 = vld [vmem:[#allocation3 + $0x138] sm:$0xf] }
 0x87d   :  { %12027 = vmatprep.subr.bf16.mxu0 %v12222_v45  ;;  %v10445_v10 = vcombine.low %v8859_v15, %v8860_v56  ;;  %v9333_v52 = vld [vmem:[#allocation3 + $0xd8] sm:$0xf]  ;;  %v9574_v15 = vld [vmem:[#allocation3 + $0xdc] sm:$0xf] }
 0x87e   :  { %11996 = vmatpush3.bf16.msra.mxu1 %v12221_v20  ;;  %15591 = vst [vmem:[#allocation46_spill] sm:$0xff] %v14750_v39  ;;  %v10470_v20 = vcombine.low %v9327_v8, %v9328_v7  ;;  %v9335_v56 = vld [vmem:[#allocation3 + $0x118] sm:$0xf]  ;;  %v9580_v6 = vld [vmem:[#allocation3 + $0x19c] sm:$0xf] }
 0x87f   :  { %11997 = vmatprep.subr.bf16.mxu1 %v12223_v27  ;;  %v14752_v13 = vpop.f32.mrf.mxu1  ;;  %v10474_v63 = vcombine.low %v9335_v56, %v9336_v1 }
 0x880   :  { %12028 = vmatpush3.bf16.msra.mxu0 %v12222_v45  ;;  %v14754_v3 = vpop.f32.mrf.mxu0 }
 0x881   :  { %11950 = vmatmul.mubr.bf16.gmra.mxu1 %v10443_v61  ;;  %12029 = vmatprep.subr.bf16.mxu0 %v12224_v47  ;;  %v14756_v4 = vpop.f32.mrf.mxu1  ;;  %v10472_v61 = vcombine.low %v9331_v30, %v9332_v44  ;;  %v9337_v44 = vld [vmem:[#allocation3 + $0x158] sm:$0xf] }
 0x882   :  { %11998 = vmatpush3.bf16.msra.mxu1 %v12223_v27  ;;  %11953 = vmatprep.mubr.bf16.mxu1 %v10444_v53  ;;  %v14758_v9 = vpop.f32.mrf.mxu0  ;;  %v9330_v27 = vld [vmem:[#allocation3 + $0x78] sm:$0xf] }
 0x883   :  { %11982 = vmatmul.mubr.bf16.gmra.mxu0 %v10459_v41  ;;  %11999 = vmatprep.subr.bf16.mxu1 %v12225_v58  ;;  %v14760_v40 = vpop.f32.mrf.mxu1  ;;  %v10471_v62 = vcombine.low %v9329_v26, %v9330_v27  ;;  %v9334_v41 = vld [vmem:[#allocation3 + $0xf8] sm:$0xf]  ;;  %v9579_v26 = vld [vmem:[#allocation3 + $0x17c] sm:$0xf] }
 0x884   :  { %11985 = vmatprep.mubr.bf16.mxu0 %v10460_v33  ;;  %12030 = vmatpush3.bf16.msra.mxu0 %v12224_v47  ;;  %v14762_v21 = vpop.f32.mrf.mxu0  ;;  %v9575_v33 = vld [vmem:[#allocation3 + $0xfc] sm:$0xf]  ;;  %v9339_v30 = vld [vmem:[#allocation3 + $0x198] sm:$0xf] }
 0x885   :  { %12031 = vmatprep.subr.bf16.mxu0 %v12226_v0  ;;  %v14764_v45 = vpop.f32.mrf.mxu1  ;;  %v10489_v8 = vcombine.low %v9574_v15, %v9575_v33  ;;  %v9342_v33 = vld [vmem:[#allocation3 + $0x1f8] sm:$0xf]  ;;  %v9583_v15 = vld [vmem:[#allocation3 + $0x1fc] sm:$0xf] }
 0x886   :  { %12000 = vmatpush3.bf16.msra.mxu1 %v12225_v58  ;;  %v14766_v14 = vpop.f32.mrf.mxu0  ;;  %v10487_v58 = vcombine.low %v9570_v5, %v9571_v31  ;;  %v9578_v5 = vld [vmem:[#allocation3 + $0x15c] sm:$0xf] }
 0x887   :  { %12001 = vmatprep.subr.bf16.mxu1 %v12227_v54 }
 0x888   :  { %12032 = vmatpush3.bf16.msra.mxu0 %v12226_v0 }
 0x889   :  { %11954 = vmatmul.mubr.bf16.gmra.mxu1 %v10445_v10  ;;  %12033 = vmatprep.subr.bf16.mxu0 %v12228_v51 }
 0x88a   :  { %12002 = vmatpush3.bf16.msra.mxu1 %v12227_v54  ;;  %12005 = vmatprep.mubr.bf16.mxu1 %v10470_v20  ;;  %v14768_v47 = vpop.f32.mrf.mxu1  ;;  %v14770_v16 = vpop.f32.mrf.mxu0  ;;  %v10473_v54 = vcombine.low %v9333_v52, %v9334_v41  ;;  %v10492_v41 = vcombine.low %v9580_v6, %v9581_v18 }
 0x88b   :  { %11986 = vmatmul.mubr.bf16.gmra.mxu0 %v10461_v11  ;;  %12003 = vmatprep.subr.bf16.mxu1 %v12229_v38 }
 0x88c   :  { %12034 = vmatpush3.bf16.msra.mxu0 %v12228_v51  ;;  %12037 = vmatprep.mubr.bf16.mxu0 %v10486_v17  ;;  %v14772_v48 = vpop.f32.mrf.mxu1  ;;  %v14774_v22 = vpop.f32.mrf.mxu0  ;;  %v9577_v51 = vld [vmem:[#allocation3 + $0x13c] sm:$0xf]  ;;  %v9340_v17 = vld [vmem:[#allocation3 + $0x1b8] sm:$0xf] }
 0x88d   :  { %12035 = vmatprep.subr.bf16.mxu0 %v12230_v36  ;;  %v10490_v24 = vcombine.low %v9576_v12, %v9577_v51  ;;  %v9341_v51 = vld [vmem:[#allocation3 + $0x1d8] sm:$0xf] }
 0x88e   :  { %12004 = vmatpush3.bf16.msra.mxu1 %v12229_v38  ;;  %v14776_v50 = vpop.f32.mrf.mxu1  ;;  %v14778_v53 = vpop.f32.mrf.mxu0 }
 0x890   :  { %12036 = vmatpush3.bf16.msra.mxu0 %v12230_v36  ;;  %v14780_v32 = vpop.f32.mrf.mxu1  ;;  %v14782_v0 = vpop.f32.mrf.mxu0 }
 0x891   :  { %12006 = vmatmul.mubr.bf16.vlgmr.msra.gmra.mxu1 %v10471_v62  ;;  %v10475_v62 = vcombine.low %v9337_v44, %v9338_v60 }
 0x892   :  { %12009 = vmatprep.mubr.bf16.mxu1 %v10472_v61  ;;  %v10476_v61 = vcombine.low %v9339_v30, %v9340_v17 }
 0x893   :  { %12038 = vmatmul.mubr.bf16.vlgmr.msra.gmra.mxu0 %v10487_v58  ;;  %v14784_v7 = vpop.f32.mrf.mxu1  ;;  %v10491_v58 = vcombine.low %v9578_v5, %v9579_v26 }
 0x894   :  { %12041 = vmatprep.mubr.bf16.mxu0 %v10488_v37  ;;  %v14786_v10 = vpop.f32.mrf.mxu0 }
 0x895   :  { %v14788_v38 = vpop.f32.mrf.mxu1 }
 0x896   :  { %v14790_v20 = vpop.f32.mrf.mxu0 }
 0x897   :  { %v14792_v11 = vpop.f32.mrf.mxu1 }
 0x898   :  { %v14794_v36 = vpop.f32.mrf.mxu0 }
 0x899   :  { %12010 = vmatmul.mubr.bf16.gmra.mxu1 %v10473_v54  ;;  %v14796_v27 = vpop.f32.mrf.mxu1 }
 0x89a   :  { %12013 = vmatprep.mubr.bf16.mxu1 %v10474_v63  ;;  %v14798_v31 = vpop.f32.mrf.mxu0 }
 0x89b   :  { %12042 = vmatmul.mubr.bf16.gmra.mxu0 %v10489_v8  ;;  %15592 = vst [vmem:[#allocation47_spill] sm:$0xff] %v14798_v31  ;;  %v10477_v8 = vcombine.low %v9341_v51, %v9342_v33 }
 0x89c   :  { %12045 = vmatprep.mubr.bf16.mxu0 %v10490_v24  ;;  %v9582_v24 = vld [vmem:[#allocation3 + $0x1dc] sm:$0xf] }
 0x89d   :  { %v10493_v17 = vcombine.low %v9582_v24, %v9583_v15 }
 0x89e   :  { %v14800_v37 = vpop.f32.mrf.mxu1 }
 0x89f   :  { %v14802_v1 = vpop.f32.mrf.mxu0 }
 0x8a0   :  { %15593 = vst [vmem:[#allocation48_spill] sm:$0xff] %v14802_v1  ;;  %v14804_v52 = vpop.f32.mrf.mxu1 }
 0x8a1   :  { %12014 = vmatmul.mubr.bf16.gmra.mxu1 %v10475_v62  ;;  %15594 = vst [vmem:[#allocation49_spill] sm:$0xff] %v14804_v52  ;;  %v14806_v54 = vpop.f32.mrf.mxu0  ;;  %v6655_v52 = vadd.f32 %v14752_v13, %v14720_v35  ;;  %v6654_v13 = vadd.f32 %v14764_v45, %v14726_v34  ;;  %v6660_v45 = vadd.f32 %v14776_v50, %v14732_v29 }
 0x8a2   :  { %12017 = vmatprep.mubr.bf16.mxu1 %v10476_v61  ;;  %15595 = vst [vmem:[#allocation50_spill] sm:$0xff] %v14806_v54  ;;  %v14808_v56 = vpop.f32.mrf.mxu1 }
 0x8a3   :  { %12046 = vmatmul.mubr.bf16.gmra.mxu0 %v10491_v58  ;;  %15596 = vst [vmem:[#allocation51_spill] sm:$0xff] %v14808_v56  ;;  %v14810_v63 = vpop.f32.mrf.mxu0 }
 0x8a4   :  { %12049 = vmatprep.mubr.bf16.mxu0 %v10492_v41  ;;  %15597 = vst [vmem:[#allocation52_spill] sm:$0xff] %v14810_v63  ;;  %v14812_v12 = vpop.f32.mrf.mxu1 }
 0x8a5   :  { %15598 = vst [vmem:[#allocation53_spill] sm:$0xff] %v14812_v12  ;;  %v14814_v60 = vpop.f32.mrf.mxu0 }
 0x8a6   :  { %15599 = vst [vmem:[#allocation54_spill] sm:$0xff] %v14814_v60 }
 0x8a8   :  { %v11687_v44 = vpop.f32.mrf.mxu1  ;;  %v11719_v26 = vpop.f32.mrf.mxu0 }
 0x8a9   :  { %12018 = vmatmul.mubr.bf16.gmra.mxu1 %v10477_v8 }
 0x8aa   :  { %v7072_v62 = vpop.f32.mrf.mxu1  ;;  %v7313_v30 = vpop.f32.mrf.mxu0 }
 0x8ab   :  { %12050 = vmatmul.mubr.bf16.gmra.mxu0 %v10493_v17 }
 0x8ac   :  { %v11688_v18 = vpop.f32.mrf.mxu1  ;;  %v11720_v5 = vpop.f32.mrf.mxu0 }
 0x8ae   :  { %v7075_v61 = vpop.f32.mrf.mxu1  ;;  %v7316_v58 = vpop.f32.mrf.mxu0 }
 0x8b2   :  { %v11691_v6 = vpop.f32.mrf.mxu1 }
 0x8b3   :  { %v14816_v41 = vpop.f32.mrf.mxu0 }
 0x8b4   :  { %v7088_v33 = vpop.f32.mrf.mxu1 }
 0x8b5   :  { %v14818_v51 = vpop.f32.mrf.mxu0 }
 0x8b6   :  { %v14820_v63 = vpop.f32.mrf.mxu1 }
 0x8b7   :  { %v14822_v60 = vpop.f32.mrf.mxu0 }
 0x8b8   :  { %v14824_v15 = vpop.f32.mrf.mxu1 }
 0x8b9   :  { %v14826_v8 = vpop.f32.mrf.mxu0 }
 0x8ba   :  { %15600 = vst [vmem:[#allocation56_spill] sm:$0xff] %v14826_v8 }
 0x8bc   :  { %v14828_v24 = vpop.f32.mrf.mxu1 }
 0x8bd   :  { %v14830_v17 = vpop.f32.mrf.mxu0 }
 0x8be   :  { %15601 = vst [vmem:[#allocation58_spill] sm:$0xff] %v14830_v17  ;;  %v14832_v12 = vpop.f32.mrf.mxu1  ;;  %v6653_v17 = vadd.f32 %v14756_v4, %v14722_v2  ;;  %v6659_v4 = vadd.f32 %v14768_v47, %v14728_v46 }
 0x8bf   :  { %v14834_v39 = vpop.f32.mrf.mxu0 }
 0x8c0   :  { %15602 = vst [vmem:[#allocation60_spill] sm:$0xff] %v14834_v39  ;;  %v14836_v54 = vpop.f32.mrf.mxu1  ;;  %v6896_v39 = vadd.f32 %v14754_v3, %v6655_v52  ;;  %v6894_v35 = vadd.f32 %v14758_v9, %v6653_v17  ;;  %v6657_v52 = vadd.f32 %v14772_v48, %v14730_v55  ;;  %v6895_v9 = vadd.f32 %v14766_v14, %v6654_v13 }
 0x8c1   :  { %v14838_v56 = vpop.f32.mrf.mxu0 }
 0x8c2   :  { %15603 = vst [vmem:[#allocation59_spill] sm:$0xff] %v14838_v56  ;;  %v14840_v28 = vpop.f32.mrf.mxu1  ;;  %v6656_v56 = vadd.f32 %v14760_v40, %v14724_v23  ;;  %v7135_v23 = vadd.f32 %v7072_v62, %v6894_v35  ;;  %v6658_v62 = vadd.f32 %v14780_v32, %v14734_v19 }
 0x8c3   :  { %15604 = vst [vmem:[#allocation61_spill] sm:$0xff] %v14840_v28  ;;  %v14842_v1 = vpop.f32.mrf.mxu0 }
 0x8c4   :  { %15605 = vst [vmem:[#allocation62_spill] sm:$0xff] %v14842_v1  ;;  %v6897_v3 = vadd.f32 %v14762_v21, %v6656_v56  ;;  %v6898_v56 = vadd.f32 %v14774_v22, %v6657_v52  ;;  %v6899_v13 = vadd.f32 %v14782_v0, %v6658_v62  ;;  %v15610_v62 = vld [vmem:[#allocation47_spill] sm:$0xff] }
 0x8c6   :  { %v7138_v34 = vadd.f32 %v11688_v18, %v6897_v3  ;;  %v7139_v22 = vadd.f32 %v7088_v33, %v6898_v56 }
 0x8c7   :  { %v14846_v57 = vpop.f32.mrf.mxu1 }
 0x8c8   :  { %15606 = vst [vmem:[#allocation63_spill] sm:$0xff] %v14846_v57  ;;  %v14850_v31 = vpop.f32.mrf.mxu0  ;;  %v7137_v57 = vadd.f32 %v11687_v44, %v6896_v39  ;;  %v6900_v39 = vadd.f32 %v14770_v16, %v6659_v4  ;;  %v7376_v44 = vadd.f32 %v7313_v30, %v7135_v23  ;;  %v7379_v48 = vadd.f32 %v11720_v5, %v7138_v34 }
 0x8c9   :  { %15607 = vst [vmem:[#allocation64_spill] sm:$0xff] %v14850_v31  ;;  %v14852_v8 = vpop.f32.mrf.mxu1  ;;  %v6663_v30 = vadd.f32 %v14784_v7, %v14736_v42  ;;  %v6661_v5 = vadd.f32 %v14788_v38, %v14738_v49  ;;  %v7380_v0 = vadd.f32 %v14818_v51, %v7139_v22  ;;  %v7140_v38 = vadd.f32 %v14824_v15, %v6899_v13  ;;  %v15614_v22 = vld [vmem:[#allocation48_spill] sm:$0xff] }
 0x8ca   :  { %v14857_v28 = vpop.f32.mrf.mxu0  ;;  %v7378_v17 = vadd.f32 %v11719_v26, %v7137_v57  ;;  %v7141_v55 = vadd.f32 %v11691_v6, %v6900_v39  ;;  %v14885_v57 = vld [vmem:[%s15173_s12] ss:$0 sm:$0xff]  ;;  %v6901_v26 = vadd.f32 %v14778_v53, %v6660_v45  ;;  %v6662_v34 = vadd.f32 %v14796_v27, %v14742_v43  ;;  %v15609_v27 = vld [vmem:[#allocation56_spill] sm:$0xff] }
 0x8cb   :  { %v14859_v1 = vpop.f32.mrf.mxu1  ;;  %v6904_v33 = vadd.f32 %v14786_v10, %v6663_v30 }
 0x8cc   :  { %v14864_v2 = vpop.f32.mrf.mxu0  ;;  %v7382_v4 = vadd.f32 %v14816_v41, %v7141_v55  ;;  %v7142_v23 = vadd.f32 %v14820_v63, %v6901_v26  ;;  %v6903_v55 = vadd.f32 %v15610_v62, %v6662_v34 }
 0x8cd   :  { %15608 = vst [vmem:[#allocation65_spill] sm:$0xff] %v14864_v2  ;;  %v14868_v31 = vpop.f32.mrf.mxu1  ;;  %v7136_v2 = vadd.f32 %v7075_v61, %v6895_v9  ;;  %v7145_v10 = vadd.f32 %v14828_v24, %v6904_v33  ;;  %v7381_v24 = vadd.f32 %v15609_v27, %v7140_v38  ;;  %v15621_v33 = vld [vmem:[#allocation53_spill] sm:$0xff] }
 0x8ce   :  { %v14871_v40 = vpop.f32.mrf.mxu0 }
 0x8cf   :  { %v7377_v19 = vadd.f32 %v7316_v58, %v7136_v2  ;;  %v6664_v2 = vadd.f32 %v14792_v11, %v14740_v25  ;;  %v7383_v11 = vadd.f32 %v14822_v60, %v7142_v23 }
 0x8d0   :  { %v15627_v27 = vld [vmem:[#allocation64_spill] sm:$0xff] }
 0x8d1   :  { %v11751_v46 = vpop.f32.mrf.mxu1 }
 0x8d2   :  { %v11783_v47 = vpop.f32.mrf.mxu0  ;;  %v7619_v21 = vadd.f32 %v11751_v46, %v7378_v17  ;;  %v6902_v17 = vadd.f32 %v14790_v20, %v6661_v5  ;;  %v6905_v46 = vadd.f32 %v14794_v36, %v6664_v2  ;;  %v15613_v36 = vld [vmem:[#allocation58_spill] sm:$0xff] }
 0x8d3   :  { %v7554_v14 = vpop.f32.mrf.mxu1 }
 0x8d4   :  { %v7795_v16 = vpop.f32.mrf.mxu0  ;;  %v7860_v29 = vadd.f32 %v11783_v47, %v7619_v21  ;;  %v7617_v50 = vadd.f32 %v7554_v14, %v7376_v44  ;;  %v6667_v47 = vadd.f32 %v14800_v37, %v14744_v59  ;;  %v7143_v20 = vadd.f32 %v14832_v12, %v6902_v17  ;;  %v15611_v14 = vld [vmem:[#allocation45_spill] sm:$0xff] }
 0x8d5   :  { %v11752_v18 = vpop.f32.mrf.mxu1  ;;  %v7146_v37 = vadd.f32 %v14836_v54, %v6905_v46 }
 0x8d6   :  { %v11784_v61 = vpop.f32.mrf.mxu0  ;;  %v7883_v32 = vadd.f32 %v14885_v57, %v7860_v29  ;;  %v7858_v6 = vadd.f32 %v7795_v16, %v7617_v50  ;;  %v7620_v35 = vadd.f32 %v11752_v18, %v7379_v48  ;;  %v15612_v16 = vld [vmem:[#allocation49_spill] sm:$0xff]  ;;  %v7386_v29 = vadd.f32 %v15613_v36, %v7145_v10  ;;  %v15624_v10 = vld [vmem:[#allocation52_spill] sm:$0xff] }
 0x8d7   :  { %v7557_v3 = vpop.f32.mrf.mxu1  ;;  %v6665_v48 = vadd.f32 %v15612_v16, %v15611_v14  ;;  %v6908_v18 = vadd.f32 %v15614_v22, %v6667_v47 }
 0x8d8   :  { %v7798_v53 = vpop.f32.mrf.mxu0  ;;  %7899 = vst [vmem:[#allocation18 + $0x20] sm:$0xff] %v7883_v32  ;;  %v7881_v42 = vadd.f32 %v14885_v57, %v7858_v6  ;;  %v7861_v7 = vadd.f32 %v11784_v61, %v7620_v35  ;;  %v7618_v58 = vadd.f32 %v7557_v3, %v7377_v19  ;;  %v15615_v61 = vld [vmem:[#allocation44_spill] sm:$0xff]  ;;  %v15616_v19 = vld [vmem:[#allocation51_spill] sm:$0xff] }
 0x8d9   :  { %v11755_v52 = vpop.f32.mrf.mxu1  ;;  %v6668_v32 = vadd.f32 %v15616_v19, %v15615_v61  ;;  %v15617_v6 = vld [vmem:[#allocation60_spill] sm:$0xff] }
 0x8da   :  { %v11787_v49 = vpop.f32.mrf.mxu0  ;;  %7897 = vst [vmem:[#allocation18] sm:$0xff] %v7881_v42  ;;  %v7884_v41 = vadd.f32 %v14885_v57, %v7861_v7  ;;  %v7859_v63 = vadd.f32 %v7798_v53, %v7618_v58  ;;  %v7623_v9 = vadd.f32 %v11755_v52, %v7382_v4  ;;  %v7384_v35 = vadd.f32 %v15617_v6, %v7143_v20  ;;  %v15618_v4 = vld [vmem:[#allocation61_spill] sm:$0xff]  ;;  %v15619_v42 = vld [vmem:[#allocation50_spill] sm:$0xff] }
 0x8db   :  { %v7570_v39 = vpop.f32.mrf.mxu1  ;;  %v7144_v3 = vadd.f32 %v15618_v4, %v6903_v55  ;;  %v6906_v7 = vadd.f32 %v15619_v42, %v6665_v48  ;;  %v15620_v58 = vld [vmem:[#allocation46_spill] sm:$0xff] }
 0x8dc   :  { %v7811_v25 = vpop.f32.mrf.mxu0  ;;  %7900 = vst [vmem:[#allocation18 + $0x30] sm:$0xff] %v7884_v41  ;;  %v7882_v51 = vadd.f32 %v14885_v57, %v7859_v63  ;;  %v7864_v15 = vadd.f32 %v11787_v49, %v7623_v9  ;;  %v7621_v45 = vadd.f32 %v7570_v39, %v7380_v0  ;;  %v6666_v2 = vadd.f32 %v15621_v33, %v15620_v58  ;;  %v15622_v0 = vld [vmem:[#allocation63_spill] sm:$0xff] }
 0x8dd   :  { %v11756_v44 = vpop.f32.mrf.mxu1  ;;  %v7149_v52 = vadd.f32 %v15622_v0, %v6908_v18  ;;  %v15623_v41 = vld [vmem:[#allocation59_spill] sm:$0xff]  ;;  %v6909_v39 = vadd.f32 %v15624_v10, %v6668_v32 }
 0x8de   :  { %v11788_v43 = vpop.f32.mrf.mxu0  ;;  %7898 = vst [vmem:[#allocation18 + $0x10] sm:$0xff] %v7882_v51  ;;  %v7887_v21 = vadd.f32 %v14885_v57, %v7864_v15  ;;  %v7862_v60 = vadd.f32 %v7811_v25, %v7621_v45  ;;  %v7624_v56 = vadd.f32 %v11756_v44, %v7383_v11  ;;  %v7387_v63 = vadd.f32 %v15623_v41, %v7146_v37  ;;  %v15625_v15 = vld [vmem:[#allocation62_spill] sm:$0xff] }
 0x8df   :  { %v7573_v50 = vpop.f32.mrf.mxu1  ;;  %v7147_v25 = vadd.f32 %v14852_v8, %v6906_v7  ;;  %v7385_v45 = vadd.f32 %v15625_v15, %v7144_v3  ;;  %v15626_v44 = vld [vmem:[#allocation54_spill] sm:$0xff] }
 0x8e0   :  { %v7814_v59 = vpop.f32.mrf.mxu0  ;;  %7903 = vst [vmem:[#allocation18 + $0x60] sm:$0xff] %v7887_v21  ;;  %v7885_v12 = vadd.f32 %v14885_v57, %v7862_v60  ;;  %v7865_v26 = vadd.f32 %v11788_v43, %v7624_v56  ;;  %v7622_v30 = vadd.f32 %v7573_v50, %v7381_v24  ;;  %v6907_v43 = vadd.f32 %v15626_v44, %v6666_v2 }
 0x8e1   :  { %v11759_v13 = vpop.f32.mrf.mxu1  ;;  %v7390_v24 = vadd.f32 %v15627_v27, %v7149_v52  ;;  %v7150_v56 = vadd.f32 %v14859_v1, %v6909_v39  ;;  %v7388_v14 = vadd.f32 %v14857_v28, %v7147_v25 }
 0x8e2   :  { %v11791_v5 = vpop.f32.mrf.mxu0  ;;  %7901 = vst [vmem:[#allocation18 + $0x40] sm:$0xff] %v7885_v12  ;;  %v7888_v53 = vadd.f32 %v14885_v57, %v7865_v26  ;;  %v7863_v54 = vadd.f32 %v7814_v59, %v7622_v30  ;;  %v7627_v23 = vadd.f32 %v11759_v13, %v7386_v29  ;;  %v7148_v36 = vadd.f32 %v14868_v31, %v6907_v43  ;;  %v15628_v26 = vld [vmem:[#allocation65_spill] sm:$0xff] }
 0x8e3   :  { %v7586_v49 = vpop.f32.mrf.mxu1  ;;  %v7391_v1 = vadd.f32 %v15628_v26, %v7150_v56 }
 0x8e4   :  { %v7827_v38 = vpop.f32.mrf.mxu0  ;;  %7904 = vst [vmem:[#allocation18 + $0x70] sm:$0xff] %v7888_v53  ;;  %v7886_v9 = vadd.f32 %v14885_v57, %v7863_v54  ;;  %v7868_v17 = vadd.f32 %v11791_v5, %v7627_v23  ;;  %v7625_v34 = vadd.f32 %v7586_v49, %v7384_v35  ;;  %v7389_v19 = vadd.f32 %v14871_v40, %v7148_v36 }
 0x8e5   :  { %v11760_v11 = vpop.f32.mrf.mxu1 }
 0x8e6   :  { %v11792_v51 = vpop.f32.mrf.mxu0  ;;  %7902 = vst [vmem:[#allocation18 + $0x50] sm:$0xff] %v7886_v9  ;;  %v7891_v46 = vadd.f32 %v14885_v57, %v7868_v17  ;;  %v7866_v47 = vadd.f32 %v7827_v38, %v7625_v34  ;;  %v7628_v20 = vadd.f32 %v11760_v11, %v7387_v63 }
 0x8e7   :  { %v7589_v21 = vpop.f32.mrf.mxu1 }
 0x8e8   :  { %v7830_v60 = vpop.f32.mrf.mxu0  ;;  %7907 = vst [vmem:[#allocation18 + $0xa0] sm:$0xff] %v7891_v46  ;;  %v7889_v8 = vadd.f32 %v14885_v57, %v7866_v47  ;;  %v7869_v62 = vadd.f32 %v11792_v51, %v7628_v20  ;;  %v7626_v55 = vadd.f32 %v7589_v21, %v7385_v45 }
 0x8e9   :  { %v11763_v16 = vpop.f32.mrf.mxu1 }
 0x8ea   :  { %v11795_v48 = vpop.f32.mrf.mxu0  ;;  %7905 = vst [vmem:[#allocation18 + $0x80] sm:$0xff] %v7889_v8  ;;  %v7892_v29 = vadd.f32 %v14885_v57, %v7869_v62  ;;  %v7867_v50 = vadd.f32 %v7830_v60, %v7626_v55  ;;  %v7631_v59 = vadd.f32 %v11763_v16, %v7390_v24 }
 0x8eb   :  { %v7602_v37 = vpop.f32.mrf.mxu1 }
 0x8ec   :  { %v7843_v12 = vpop.f32.mrf.mxu0  ;;  %7908 = vst [vmem:[#allocation18 + $0xb0] sm:$0xff] %v7892_v29  ;;  %v7890_v30 = vadd.f32 %v14885_v57, %v7867_v50  ;;  %v7872_v22 = vadd.f32 %v11795_v48, %v7631_v59  ;;  %v7629_v18 = vadd.f32 %v7602_v37, %v7388_v14 }
 0x8ed   :  { %v11764_v61 = vpop.f32.mrf.mxu1 }
 0x8ee   :  { %v11796_v28 = vpop.f32.mrf.mxu0  ;;  %7906 = vst [vmem:[#allocation18 + $0x90] sm:$0xff] %v7890_v30  ;;  %v7895_v31 = vadd.f32 %v14885_v57, %v7872_v22  ;;  %v7870_v32 = vadd.f32 %v7843_v12, %v7629_v18  ;;  %v7632_v6 = vadd.f32 %v11764_v61, %v7391_v1 }
 0x8ef   :  { %v7605_v35 = vpop.f32.mrf.mxu1 }
 0x8f0   :  { %v7846_v13 = vpop.f32.mrf.mxu0  ;;  %7911 = vst [vmem:[#allocation18 + $0xe0] sm:$0xff] %v7895_v31  ;;  %v7893_v5 = vadd.f32 %v14885_v57, %v7870_v32  ;;  %v7873_v4 = vadd.f32 %v11796_v28, %v7632_v6  ;;  %v7630_v3 = vadd.f32 %v7605_v35, %v7389_v19 }
 0x8f1   :  { %v11815_v53 = vpop.f32.mrf.mxu1 }
 0x8f2   :  { %7909 = vst [vmem:[#allocation18 + $0xc0] sm:$0xff] %v7893_v5  ;;  %v7896_v54 = vadd.f32 %v14885_v57, %v7873_v4  ;;  %v7871_v23 = vadd.f32 %v7846_v13, %v7630_v3  ;;  %v11847_v42 = vpop.f32.mrf.mxu0 }
 0x8f3   :  { %v14950_v7 = vadd.f32 %v11847_v42, %v11815_v53  ;;  %v8107_v40 = vpop.f32.mrf.mxu1 }
 0x8f4   :  { %7912 = vst [vmem:[#allocation18 + $0xf0] sm:$0xff] %v7896_v54  ;;  %v7894_v58 = vadd.f32 %v14885_v57, %v7871_v23  ;;  %v8300_v33 = vpop.f32.mrf.mxu0 }
 0x8f5   :  { %v14953_v2 = vadd.f32 %v8300_v33, %v8107_v40  ;;  %v11816_v0 = vpop.f32.mrf.mxu1 }
 0x8f6   :  { %7910 = vst [vmem:[#allocation18 + $0xd0] sm:$0xff] %v7894_v58  ;;  %v11848_v52 = vpop.f32.mrf.mxu0 }
 0x8f7   :  { %v14955_v49 = vadd.f32 %v11848_v52, %v11816_v0  ;;  %v8110_v38 = vpop.f32.mrf.mxu1 }
 0x8f8   :  { %v8303_v41 = vpop.f32.mrf.mxu0 }
 0x8f9   :  { %v14957_v63 = vadd.f32 %v8303_v41, %v8110_v38  ;;  %v11819_v9 = vpop.f32.mrf.mxu1 }
 0x8fa   :  { %v11851_v17 = vpop.f32.mrf.mxu0 }
 0x8fb   :  { %v14959_v34 = vadd.f32 %v11851_v17, %v11819_v9  ;;  %v8123_v10 = vpop.f32.mrf.mxu1 }
 0x8fc   :  { %v8316_v39 = vpop.f32.mrf.mxu0 }
 0x8fd   :  { %v14961_v25 = vadd.f32 %v8316_v39, %v8123_v10  ;;  %v11820_v57 = vpop.f32.mrf.mxu1 }
 0x8fe   :  { %v11852_v11 = vpop.f32.mrf.mxu0 }
 0x8ff   :  { %v14963_v51 = vadd.f32 %v11852_v11, %v11820_v57  ;;  %v8126_v15 = vpop.f32.mrf.mxu1 }
 0x900   :  { %v8319_v45 = vpop.f32.mrf.mxu0 }
 0x901   :  { %v14965_v46 = vadd.f32 %v8319_v45, %v8126_v15  ;;  %v11823_v47 = vpop.f32.mrf.mxu1 }
 0x902   :  { %v11855_v20 = vpop.f32.mrf.mxu0 }
 0x903   :  { %v14967_v44 = vadd.f32 %v11855_v20, %v11823_v47  ;;  %v8139_v43 = vpop.f32.mrf.mxu1 }
 0x904   :  { %v8332_v27 = vpop.f32.mrf.mxu0 }
 0x905   :  { %v14969_v24 = vadd.f32 %v8332_v27, %v8139_v43  ;;  %v11824_v21 = vpop.f32.mrf.mxu1 }
 0x906   :  { %v11856_v60 = vpop.f32.mrf.mxu0 }
 0x907   :  { %v14971_v56 = vadd.f32 %v11856_v60, %v11824_v21  ;;  %v8142_v8 = vpop.f32.mrf.mxu1 }
 0x908   :  { %v8335_v62 = vpop.f32.mrf.mxu0 }
 0x909   :  { %v14973_v55 = vadd.f32 %v8335_v62, %v8142_v8  ;;  %v11827_v14 = vpop.f32.mrf.mxu1 }
 0x90a   :  { %v11859_v16 = vpop.f32.mrf.mxu0 }
 0x90b   :  { %v14975_v48 = vadd.f32 %v11859_v16, %v11827_v14  ;;  %v8155_v36 = vpop.f32.mrf.mxu1 }
 0x90c   :  { %v8348_v29 = vpop.f32.mrf.mxu0 }
 0x90d   :  { %v14977_v50 = vadd.f32 %v8348_v29, %v8155_v36  ;;  %v11828_v59 = vpop.f32.mrf.mxu1 }
 0x90e   :  { %v11860_v37 = vpop.f32.mrf.mxu0 }
 0x90f   :  { %15629 = vst [vmem:[#allocation66_spill] sm:$0xff] %v14977_v50  ;;  %v14979_v12 = vadd.f32 %v11860_v37, %v11828_v59  ;;  %v8158_v26 = vpop.f32.mrf.mxu1 }
 0x910   :  { %v8351_v1 = vpop.f32.mrf.mxu0 }
 0x911   :  { %15630 = vst [vmem:[#allocation67_spill] sm:$0xff] %v14979_v12  ;;  %v14981_v30 = vadd.f32 %v8351_v1, %v8158_v26  ;;  %v11879_v22 = vpop.f32.mrf.mxu1 }
 0x913   :  { %15631 = vst [vmem:[#allocation68_spill] sm:$0xff] %v14981_v30  ;;  %v11911_v18 = vpop.f32.mrf.mxu0  ;;  %v8525_v61 = vpop.f32.mrf.mxu1 }
 0x915   :  { %v8766_v28 = vpop.f32.mrf.mxu0  ;;  %v11880_v19 = vpop.f32.mrf.mxu1 }
 0x917   :  { %v14983_v31 = vpop.f32.mrf.mxu0  ;;  %v8528_v32 = vpop.f32.mrf.mxu1 }
 0x919   :  { %v14985_v6 = vpop.f32.mrf.mxu0  ;;  %v11883_v35 = vpop.f32.mrf.mxu1 }
 0x91b   :  { %v14987_v13 = vpop.f32.mrf.mxu0  ;;  %v8541_v5 = vpop.f32.mrf.mxu1 }
 0x91d   :  { %v14989_v4 = vpop.f32.mrf.mxu0  ;;  %v14991_v3 = vpop.f32.mrf.mxu1 }
 0x91f   :  { %v14993_v53 = vpop.f32.mrf.mxu0  ;;  %v14995_v54 = vpop.f32.mrf.mxu1 }
 0x921   :  { %v14997_v23 = vpop.f32.mrf.mxu0  ;;  %v14999_v42 = vpop.f32.mrf.mxu1 }
 0x923   :  { %v15001_v40 = vpop.f32.mrf.mxu0  ;;  %v15003_v58 = vpop.f32.mrf.mxu1 }
 0x925   :  { %v15005_v33 = vpop.f32.mrf.mxu0  ;;  %v15007_v0 = vpop.f32.mrf.mxu1 }
 0x927   :  { %v15009_v52 = vpop.f32.mrf.mxu0  ;;  %v15011_v38 = vpop.f32.mrf.mxu1 }
 0x929   :  { %v15013_v41 = vpop.f32.mrf.mxu0  ;;  %v15015_v9 = vpop.f32.mrf.mxu1 }
 0x92a   :  { %15632 = vst [vmem:[#allocation69_spill] sm:$0xff] %v15013_v41 }
 0x92b   :  { %v15017_v17 = vpop.f32.mrf.mxu0  ;;  %v15019_v10 = vpop.f32.mrf.mxu1 }
 0x92c   :  { %15633 = vst [vmem:[#allocation70_spill] sm:$0xff] %v15017_v17  ;;  %15634 = vst [vmem:[#allocation71_spill] sm:$0xff] %v15019_v10  ;;  %v8588_v10 = vadd.f32 %v8525_v61, %v14953_v2 }
 0x92d   :  { %v15021_v39 = vpop.f32.mrf.mxu0  ;;  %v15023_v57 = vpop.f32.mrf.mxu1 }
 0x92e   :  { %15635 = vst [vmem:[#allocation72_spill] sm:$0xff] %v15021_v39  ;;  %15636 = vst [vmem:[#allocation73_spill] sm:$0xff] %v15023_v57  ;;  %v8590_v57 = vadd.f32 %v11879_v22, %v14950_v7  ;;  %v8589_v7 = vadd.f32 %v8528_v32, %v14957_v63 }
 0x92f   :  { %v15025_v11 = vpop.f32.mrf.mxu0  ;;  %v15027_v15 = vpop.f32.mrf.mxu1 }
 0x930   :  { %15637 = vst [vmem:[#allocation74_spill] sm:$0xff] %v15025_v11  ;;  %15638 = vst [vmem:[#allocation29_spill] sm:$0xff] %v15027_v15 }
 0x931   :  { %v15029_v45 = vpop.f32.mrf.mxu0  ;;  %v11943_v47 = vpop.f32.mrf.mxu1 }
 0x932   :  { %15639 = vst [vmem:[#allocation37_spill] sm:$0xff] %v15029_v45 }
 0x933   :  { %v11975_v20 = vpop.f32.mrf.mxu0  ;;  %v9007_v43 = vpop.f32.mrf.mxu1 }
 0x935   :  { %v9248_v27 = vpop.f32.mrf.mxu0  ;;  %v11944_v21 = vpop.f32.mrf.mxu1 }
 0x937   :  { %v11976_v60 = vpop.f32.mrf.mxu0  ;;  %v9010_v8 = vpop.f32.mrf.mxu1 }
 0x939   :  { %v9251_v62 = vpop.f32.mrf.mxu0  ;;  %v11947_v14 = vpop.f32.mrf.mxu1 }
 0x93b   :  { %v15031_v16 = vpop.f32.mrf.mxu0  ;;  %v9023_v36 = vpop.f32.mrf.mxu1 }
 0x93d   :  { %v15033_v29 = vpop.f32.mrf.mxu0  ;;  %v15035_v59 = vpop.f32.mrf.mxu1 }
 0x93f   :  { %v15037_v37 = vpop.f32.mrf.mxu0  ;;  %v15039_v26 = vpop.f32.mrf.mxu1 }
 0x941   :  { %v15041_v1 = vpop.f32.mrf.mxu0  ;;  %v15043_v45 = vpop.f32.mrf.mxu1 }
 0x942   :  { %15640 = vst [vmem:[#allocation43_spill] sm:$0xff] %v15041_v1  ;;  %v8831_v1 = vadd.f32 %v11911_v18, %v8590_v57  ;;  %v8592_v18 = vadd.f32 %v8541_v5, %v14961_v25  ;;  %v8593_v5 = vadd.f32 %v14995_v54, %v14965_v46 }
 0x943   :  { %v15045_v11 = vpop.f32.mrf.mxu0  ;;  %v15047_v15 = vpop.f32.mrf.mxu1 }
 0x944   :  { %15641 = vst [vmem:[#allocation30_spill] sm:$0xff] %v15045_v11  ;;  %15642 = vst [vmem:[#allocation35_spill] sm:$0xff] %v15047_v15  ;;  %v8591_v11 = vadd.f32 %v11880_v19, %v14955_v49  ;;  %v9072_v22 = vadd.f32 %v11943_v47, %v8831_v1  ;;  %v8833_v25 = vadd.f32 %v14989_v4, %v8592_v18 }
 0x945   :  { %v15049_v30 = vpop.f32.mrf.mxu0  ;;  %v15051_v39 = vpop.f32.mrf.mxu1  ;;  %v8834_v1 = vadd.f32 %v14997_v23, %v8593_v5  ;;  %v8599_v18 = vadd.f32 %v15007_v0, %v14971_v56 }
 0x946   :  { %15643 = vst [vmem:[#allocation40_spill] sm:$0xff] %v15049_v30  ;;  %15644 = vst [vmem:[#allocation36_spill] sm:$0xff] %v15051_v39  ;;  %v8829_v39 = vadd.f32 %v8766_v28, %v8588_v10  ;;  %v8832_v61 = vadd.f32 %v14983_v31, %v8591_v11  ;;  %v8830_v28 = vadd.f32 %v14985_v6, %v8589_v7 }
 0x947   :  { %v15054_v12 = vpop.f32.mrf.mxu0  ;;  %v15056_v17 = vpop.f32.mrf.mxu1  ;;  %v9313_v10 = vadd.f32 %v11975_v20, %v9072_v22  ;;  %v9074_v4 = vadd.f32 %v9023_v36, %v8833_v25 }
 0x948   :  { %15645 = vst [vmem:[#allocation39_spill] sm:$0xff] %v15054_v12  ;;  %15646 = vst [vmem:[#allocation42_spill] sm:$0xff] %v15056_v17  ;;  %v8594_v12 = vadd.f32 %v11883_v35, %v14959_v34  ;;  %v9073_v63 = vadd.f32 %v11944_v21, %v8832_v61  ;;  %v8595_v34 = vadd.f32 %v14991_v3, %v14963_v51 }
 0x949   :  { %v15059_v50 = vpop.f32.mrf.mxu0  ;;  %v15061_v41 = vpop.f32.mrf.mxu1  ;;  %v9315_v23 = vadd.f32 %v15033_v29, %v9074_v4 }
 0x94a   :  { %15647 = vst [vmem:[#allocation41_spill] sm:$0xff] %v15059_v50  ;;  %v9070_v50 = vadd.f32 %v9007_v43, %v8829_v39  ;;  %v8835_v32 = vadd.f32 %v14987_v13, %v8594_v12  ;;  %v9071_v39 = vadd.f32 %v9010_v8, %v8830_v28  ;;  %v15092_v12 = vld [vmem:[%s15173_s12 + $0x1] ss:$0 sm:$0xff]  ;;  %v9314_v51 = vadd.f32 %v11976_v60, %v9073_v63  ;;  %s12438_s12 = smov [#allocation18]  }
 0x94b   :  { %v15064_v15 = vpop.f32.mrf.mxu0  ;;  %v15066_v30 = vpop.f32.mrf.mxu1  ;;  %v8598_v43 = vadd.f32 %v14999_v42, %v14967_v44  ;;  %v8596_v60 = vadd.f32 %v15003_v58, %v14969_v24  ;;  %v9075_v58 = vadd.f32 %v15039_v26, %v8834_v1  ;;  %v15657_v1 = vld [vmem:[#allocation73_spill] sm:$0xff]  ;;  %s9853_s19 = sshll.u32 %s12438_s12, 4  ;;  %s9854_s19 = int_to_ptr.vmem [resolvable:$true] %s9853_s19 }
 0x94c   :  { %v9311_v31 = vadd.f32 %v9248_v27, %v9070_v50  ;;  %v9076_v47 = vadd.f32 %v11947_v14, %v8835_v32  ;;  %v8836_v50 = vadd.f32 %v14993_v53, %v8595_v34  ;;  %v9312_v46 = vadd.f32 %v9251_v62, %v9071_v39  ;;  %s12391_s20 = scalar_lea.vmem %s9854_s19, 4096  ;;  %p12396_p13 = scmp.lt.s32.totalorder %s9854_s19, %s9854_s19 }
 0x94d   :  { %v15070_v17 = vpop.f32.mrf.mxu0  ;;  %v15072_v2 = vpop.f32.mrf.mxu1  ;;  %v8839_v36 = vadd.f32 %v15001_v40, %v8598_v43  ;;  %v8837_v63 = vadd.f32 %v15005_v33, %v8596_v60  ;;  %v8597_v32 = vadd.f32 %v15011_v38, %v14973_v55  ;;  %v8602_v39 = vadd.f32 %v15015_v9, %v14975_v48  ;;  %v15648_v33 = vld [vmem:[#allocation35_spill] sm:$0xff]  ;;  %v15654_v9 = vld [vmem:[#allocation36_spill] sm:$0xff]  ;;  %p12392_p12 = scmp.ne.s32.totalorder %s9854_s19, %s12391_s20  ;;  %p12397_p0 = scmp.lt.s32.totalorder %s12391_s20, %s12391_s20 }
 0x94e   :  { %v9317_v7 = vadd.f32 %v15031_v16, %v9076_v47  ;;  %v9077_v61 = vadd.f32 %v15035_v59, %v8836_v50  ;;  %v15649_v38 = vld [vmem:[#allocation43_spill] sm:$0xff] }
 0x94f   :  { %v15076_v49 = vpop.f32.mrf.mxu0  ;;  %v15078_v19 = vpop.f32.mrf.mxu1  ;;  %v9080_v40 = vadd.f32 %v15043_v45, %v8839_v36  ;;  %v9316_v45 = vadd.f32 %v15649_v38, %v9075_v58  ;;  %v15662_v58 = vld [vmem:[#allocation29_spill] sm:$0xff]  ;;  %p12398_p1 = por %p12397_p0, %p12396_p13 }
 0x950   :  { %v9318_v0 = vadd.f32 %v15037_v37, %v9077_v61  ;;  %v15666_v38 = vld [vmem:[#allocation37_spill] sm:$0xff] }
 0x951   :  { %v15084_v35 = vpop.f32.mrf.mxu0  ;;  %v12007_v57 = vpop.f32.mrf.mxu1  ;;  %p12399_p2 = pnand %p12398_p1, %p12392_p12 }
 0x952   :  { %v9554_v11 = vadd.f32 %v12007_v57, %v9313_v10 }
 0x953   :  { %v12039_v6 = vpop.f32.mrf.mxu0  ;;  %v9489_v13 = vpop.f32.mrf.mxu1 }
 0x954   :  { %v9795_v3 = vadd.f32 %v12039_v6, %v9554_v11  ;;  %v9552_v20 = vadd.f32 %v9489_v13, %v9311_v31  ;;  %v8840_v31 = vadd.f32 %v15009_v52, %v8599_v18  ;;  %v9078_v11 = vadd.f32 %v15648_v33, %v8837_v63  ;;  %v15650_v6 = vld [vmem:[#allocation69_spill] sm:$0xff]  ;;  %v15653_v52 = vld [vmem:[#allocation30_spill] sm:$0xff] }
 0x955   :  { %v9730_v27 = vpop.f32.mrf.mxu0  ;;  %v12008_v21 = vpop.f32.mrf.mxu1  ;;  %v8838_v13 = vadd.f32 %v15650_v6, %v8597_v32  ;;  %v9321_v50 = vadd.f32 %v15653_v52, %v9080_v40  ;;  %v15663_v32 = vld [vmem:[#allocation39_spill] sm:$0xff]  ;;  %v15665_v33 = vld [vmem:[#allocation41_spill] sm:$0xff] }
 0x956   :  { %v9818_v54 = vadd.f32 %v15092_v12, %v9795_v3  ;;  %v9793_v8 = vadd.f32 %v9730_v27, %v9552_v20  ;;  %v9555_v14 = vadd.f32 %v12008_v21, %v9314_v51  ;;  %v15651_v51 = vld [vmem:[#allocation66_spill] sm:$0xff]  ;;  %v15652_v3 = vld [vmem:[#allocation71_spill] sm:$0xff]  ;;  %v9081_v4 = vadd.f32 %v15654_v9, %v8840_v31 }
 0x957   :  { %v12040_v22 = vpop.f32.mrf.mxu0  ;;  %v9492_v53 = vpop.f32.mrf.mxu1  ;;  %v8600_v20 = vadd.f32 %v15652_v3, %v15651_v51 }
 0x958   :  { %9834 = vst [vmem:[#allocation18 + $0x28] sm:$0xff] %v9818_v54  ;;  %v9816_v44 = vadd.f32 %v15092_v12, %v9793_v8  ;;  %v9796_v42 = vadd.f32 %v12040_v22, %v9555_v14  ;;  %v9553_v62 = vadd.f32 %v9492_v53, %v9312_v46  ;;  %v15655_v54 = vld [vmem:[#allocation70_spill] sm:$0xff]  ;;  %v15656_v14 = vld [vmem:[#allocation67_spill] sm:$0xff]  ;;  %v9322_v40 = vadd.f32 %v15663_v32, %v9081_v4 }
 0x959   :  { %v9733_v28 = vpop.f32.mrf.mxu0  ;;  %v12011_v24 = vpop.f32.mrf.mxu1  ;;  %v8843_v8 = vadd.f32 %v15655_v54, %v8602_v39  ;;  %v8603_v60 = vadd.f32 %v15657_v1, %v15656_v14 }
 0x95a   :  { %9832 = vst [vmem:[#allocation18 + $0x8] sm:$0xff] %v9816_v44  ;;  %v9819_v16 = vadd.f32 %v15092_v12, %v9796_v42  ;;  %v9794_v59 = vadd.f32 %v9733_v28, %v9553_v62  ;;  %v9558_v10 = vadd.f32 %v12011_v24, %v9317_v7  ;;  %v15658_v7 = vld [vmem:[#allocation40_spill] sm:$0xff]  ;;  %v15659_v44 = vld [vmem:[#allocation42_spill] sm:$0xff] }
 0x95b   :  { %v12043_v34 = vpop.f32.mrf.mxu0  ;;  %v9505_v56 = vpop.f32.mrf.mxu1  ;;  %v9319_v22 = vadd.f32 %v15658_v7, %v9078_v11  ;;  %v9079_v42 = vadd.f32 %v15659_v44, %v8838_v13  ;;  %v15661_v24 = vld [vmem:[#allocation68_spill] sm:$0xff] }
 0x95c   :  { %9835 = vst [vmem:[#allocation18 + $0x38] sm:$0xff] %v9819_v16  ;;  %v9817_v29 = vadd.f32 %v15092_v12, %v9794_v59  ;;  %v9799_v26 = vadd.f32 %v12043_v34, %v9558_v10  ;;  %v9556_v57 = vadd.f32 %v9505_v56, %v9315_v23  ;;  %v15660_v23 = vld [vmem:[#allocation72_spill] sm:$0xff]  ;;  %v8601_v16 = vadd.f32 %v15662_v58, %v15661_v24 }
 0x95d   :  { %v9746_v25 = vpop.f32.mrf.mxu0  ;;  %v12012_v55 = vpop.f32.mrf.mxu1  ;;  %v8841_v28 = vadd.f32 %v15660_v23, %v8600_v20  ;;  %v9084_v59 = vadd.f32 %v15061_v41, %v8843_v8  ;;  %v9320_v11 = vadd.f32 %v15665_v33, %v9079_v42 }
 0x95e   :  { %9833 = vst [vmem:[#allocation18 + $0x18] sm:$0xff] %v9817_v29  ;;  %v9822_v5 = vadd.f32 %v15092_v12, %v9799_v26  ;;  %v9797_v37 = vadd.f32 %v9746_v25, %v9556_v57  ;;  %v9559_v47 = vadd.f32 %v12012_v55, %v9318_v0  ;;  %v15664_v29 = vld [vmem:[#allocation74_spill] sm:$0xff] }
 0x95f   :  { %v12044_v43 = vpop.f32.mrf.mxu0  ;;  %v9508_v48 = vpop.f32.mrf.mxu1  ;;  %v8844_v26 = vadd.f32 %v15664_v29, %v8603_v60  ;;  %v9082_v57 = vadd.f32 %v15066_v30, %v8841_v28 }
 0x960   :  { %9838 = vst [vmem:[#allocation18 + $0x68] sm:$0xff] %v9822_v5  ;;  %v9820_v27 = vadd.f32 %v15092_v12, %v9797_v37  ;;  %v9800_v21 = vadd.f32 %v12044_v43, %v9559_v47  ;;  %v9557_v46 = vadd.f32 %v9508_v48, %v9316_v45  ;;  %v8842_v45 = vadd.f32 %v15666_v38, %v8601_v16 }
 0x961   :  { %v9749_v53 = vpop.f32.mrf.mxu0  ;;  %v12015_v61 = vpop.f32.mrf.mxu1  ;;  %v9325_v5 = vadd.f32 %v15064_v15, %v9084_v59  ;;  %v9085_v6 = vadd.f32 %v15072_v2, %v8844_v26  ;;  %v9323_v3 = vadd.f32 %v15070_v17, %v9082_v57 }
 0x962   :  { %9836 = vst [vmem:[#allocation18 + $0x48] sm:$0xff] %v9820_v27  ;;  %v9823_v62 = vadd.f32 %v15092_v12, %v9800_v21  ;;  %v9798_v36 = vadd.f32 %v9749_v53, %v9557_v46  ;;  %v9562_v18 = vadd.f32 %v12015_v61, %v9321_v50  ;;  %v9083_v50 = vadd.f32 %v15078_v19, %v8842_v45 }
 0x963   :  { %v12047_v10 = vpop.f32.mrf.mxu0  ;;  %v9521_v63 = vpop.f32.mrf.mxu1  ;;  %v9326_v2 = vadd.f32 %v15076_v49, %v9085_v6 }
 0x964   :  { %9839 = vst [vmem:[#allocation18 + $0x78] sm:$0xff] %v9823_v62  ;;  %v9821_v34 = vadd.f32 %v15092_v12, %v9798_v36  ;;  %v9803_v56 = vadd.f32 %v12047_v10, %v9562_v18  ;;  %v9560_v0 = vadd.f32 %v9521_v63, %v9319_v22  ;;  %v9324_v8 = vadd.f32 %v15084_v35, %v9083_v50 }
 0x965   :  { %v9762_v31 = vpop.f32.mrf.mxu0  ;;  %v12016_v39 = vpop.f32.mrf.mxu1 }
 0x966   :  { %9837 = vst [vmem:[#allocation18 + $0x58] sm:$0xff] %v9821_v34  ;;  %v9826_v41 = vadd.f32 %v15092_v12, %v9803_v56  ;;  %v9801_v25 = vadd.f32 %v9762_v31, %v9560_v0  ;;  %v9563_v55 = vadd.f32 %v12016_v39, %v9322_v40 }
 0x967   :  { %v12048_v37 = vpop.f32.mrf.mxu0  ;;  %v9524_v47 = vpop.f32.mrf.mxu1 }
 0x968   :  { %9842 = vst [vmem:[#allocation18 + $0xa8] sm:$0xff] %v9826_v41  ;;  %v9824_v30 = vadd.f32 %v15092_v12, %v9801_v25  ;;  %v9804_v13 = vadd.f32 %v12048_v37, %v9563_v55  ;;  %v9561_v51 = vadd.f32 %v9524_v47, %v9320_v11 }
 0x969   :  { %v9765_v20 = vpop.f32.mrf.mxu0  ;;  %v12019_v52 = vpop.f32.mrf.mxu1 }
 0x96a   :  { %9840 = vst [vmem:[#allocation18 + $0x88] sm:$0xff] %v9824_v30  ;;  %v9827_v43 = vadd.f32 %v15092_v12, %v9804_v13  ;;  %v9802_v48 = vadd.f32 %v9765_v20, %v9561_v51  ;;  %v9566_v15 = vadd.f32 %v12019_v52, %v9325_v5 }
 0x96b   :  { %v12051_v9 = vpop.f32.mrf.mxu0  ;;  %v9537_v4 = vpop.f32.mrf.mxu1 }
 0x96c   :  { %9843 = vst [vmem:[#allocation18 + $0xb8] sm:$0xff] %v9827_v43  ;;  %v9825_v27 = vadd.f32 %v15092_v12, %v9802_v48  ;;  %v9807_v21 = vadd.f32 %v12051_v9, %v9566_v15  ;;  %v9564_v46 = vadd.f32 %v9537_v4, %v9323_v3 }
 0x96d   :  { %v9778_v54 = vpop.f32.mrf.mxu0  ;;  %v12020_v17 = vpop.f32.mrf.mxu1 }
 0x96e   :  { %9841 = vst [vmem:[#allocation18 + $0x98] sm:$0xff] %v9825_v27  ;;  %v9830_v19 = vadd.f32 %v15092_v12, %v9807_v21  ;;  %v9805_v14 = vadd.f32 %v9778_v54, %v9564_v46  ;;  %v9567_v1 = vadd.f32 %v12020_v17, %v9326_v2 }
 0x96f   :  { %v12052_v60 = vpop.f32.mrf.mxu0  ;;  %v9540_v7 = vpop.f32.mrf.mxu1 }
 0x970   :  { %9846 = vst [vmem:[#allocation18 + $0xe8] sm:$0xff] %v9830_v19  ;;  %v9828_v22 = vadd.f32 %v15092_v12, %v9805_v14  ;;  %v9808_v49 = vadd.f32 %v12052_v60, %v9567_v1  ;;  %v9565_v53 = vadd.f32 %v9540_v7, %v9324_v8 }
 0x971   :  { %v9781_v61 = vpop.f32.mrf.mxu0 }
 0x972   :  { %9844 = vst [vmem:[#allocation18 + $0xc8] sm:$0xff] %v9828_v22  ;;  %v9831_v44 = vadd.f32 %v15092_v12, %v9808_v49  ;;  %v9806_v42 = vadd.f32 %v9781_v61, %v9565_v53 }
 0x974   :  { %9847 = vst [vmem:[#allocation18 + $0xf8] sm:$0xff] %v9831_v44  ;;  %v9829_v35 = vadd.f32 %v15092_v12, %v9806_v42 }
 0x976   :  { %9845 = vst [vmem:[#allocation18 + $0xd8] sm:$0xff] %v9829_v35 }
 0x977   :  { %12402 = shalt.err (!%p12399_p2)
}
 0x978   :  { %s12439_s2 = smov 256   ;;  %s12440_s21 = smov 16  }
 0x979   :  { %9859 = dma.vmem_to_hbm [thread:$0]  %s9854_s19, 4096, %s15174_s13, [#allocation6], %s12439_s2, %s12439_s2, %s12440_s21  }
 0x97a   :  { %12421 = dma.done.wait [#allocation6], 4096  }
 0x97b   :  { %12422 = vsyncadd [#allocation6], 4294963200 }
 0x97c   :  { %9863 = vsyncpa [#allocation5], 1 }
 0x97d   :  { %9864 = vsyncpa [#allocation8], 1 }
 0x97e   :  { %9865 = vsyncpa [#allocation11], 1 }
 0x97f   :  { %9866 = vsyncpa [#allocation14], 1 }
 0x980   :  { %9867 = vsyncpa [#allocation17], 1 }
 0x981   :  { %9868 = vsyncpa [#allocation6], 1 }

</bundles_post_ra>
